<compile_context>
chip_gen: v5e
topology: v5e:2x2
jax: 0.10.0
libtpu: 0.0.40
codegen_flags: <defaults>
</compile_context>

<pallas_src>
import math
import jax
import jax.numpy as jnp
from jax.experimental import pallas as pl
from jax.experimental.pallas import tpu as pltpu

# ---------------- problem sizes (small, consistent with the module) ---------
N_VOX = 64            # voxels per attention window (sequence length)
C_IN = 32             # input_channels / embed_dim
C_OUT = 32            # output_channels (== input_channels, residual path)
C_FF = 64             # ff_channels
NUM_HEADS = 4
HEAD_DIM = C_IN // NUM_HEADS
EPS = 1e-5
TB_WINDOWS = 4        # windows processed per grid step (tile fits VMEM easily,
                      # well under v7x's 64 MiB; raise for bigger batches)

# MXU operand dtype.  Keep f32 here for exact agreement with the f32 reference;
# on v6e/v7x set jnp.bfloat16 for 2x MXU throughput / half the operand bytes
# (accumulation stays f32 via preferred_element_type).  On v5e keep elementwise
# math f32 regardless (no bf16 VPU/EUP there).
MXU_DTYPE = jnp.float32


def attention3d_kernel(
    feat_ref, coords_ref,
    wp_ref, bp_ref,                 # k_pos_proj Conv1d(3->C,k=1), pre-T: (3,C), (1,C)
    wq_ref, bq_ref,                 # per-head q proj (pre-scaled): (H,C,Dh), (H,1,Dh)
    wk_ref, bk_ref,                 # per-head k proj:              (H,C,Dh), (H,1,Dh)
    wv_ref, bv_ref,                 # per-head v proj:              (H,C,Dh), (H,1,Dh)
    wo_ref, bo_ref,                 # out proj split per head:      (H,Dh,C), (1,C)
    g1_ref, be1_ref,                # LayerNorm1 gamma/beta: (1,C)
    w1_ref, b1_ref,                 # linear1 pre-T: (C,F), (1,F)
    w2_ref, b2_ref,                 # linear2 pre-T: (F,C), (1,C)
    g2_ref, be2_ref,                # LayerNorm2 gamma/beta: (1,C)
    out_ref,
):
    TB = feat_ref.shape[0]
    feat = feat_ref[...].astype(jnp.float32)        # (TB, N, C)
    coords = coords_ref[...].astype(jnp.float32)    # (TB, N, 3)

    # --- key positional embedding: Conv1d(3->C,k=1) + ReLU as 3 VPU FMAs -----
    wp = wp_ref[...]                                # (3, C)
    pos = (coords[..., 0:1] * wp[0:1, :]
           + coords[..., 1:2] * wp[1:2, :]
           + coords[..., 2:3] * wp[2:3, :]
           + bp_ref[...])
    pos = jnp.maximum(pos, 0.0)                     # (TB, N, C)

    # Flatten windows for the dense projections (merge leading dims only).
    q_in = feat.reshape(TB * N_VOX, C_IN)           # query/value input
    k_in = (feat + pos).reshape(TB * N_VOX, C_IN)   # key input

    def mm(a, b):
        return jnp.dot(a.astype(MXU_DTYPE), b.astype(MXU_DTYPE),
                       preferred_element_type=jnp.float32)

    # --- multi-head attention (heads statically unrolled, no slicing/concat) -
    acc = jnp.zeros((TB * N_VOX, C_OUT), jnp.float32)
    for h in range(NUM_HEADS):
        qh = (mm(q_in, wq_ref[h]) + bq_ref[h]).reshape(TB, N_VOX, HEAD_DIM)
        kh = (mm(k_in, wk_ref[h]) + bk_ref[h]).reshape(TB, N_VOX, HEAD_DIM)
        vh = (mm(q_in, wv_ref[h]) + bv_ref[h]).reshape(TB, N_VOX, HEAD_DIM)

        s = jnp.einsum('bnd,bmd->bnm',
                       qh.astype(MXU_DTYPE), kh.astype(MXU_DTYPE),
                       preferred_element_type=jnp.float32)      # (TB, N, N)
        s = s - jnp.max(s, axis=-1, keepdims=True)
        p = jnp.exp(s)
        p = p * pl.reciprocal(jnp.sum(p, axis=-1, keepdims=True), approx=True)

        oh = jnp.einsum('bnm,bmd->bnd',
                        p.astype(MXU_DTYPE), vh.astype(MXU_DTYPE),
                        preferred_element_type=jnp.float32)     # (TB, N, Dh)
        # accumulate through this head's slice of the output projection
        acc = acc + mm(oh.reshape(TB * N_VOX, HEAD_DIM), wo_ref[h])
    attn = acc + bo_ref[...]                        # (TB*N, C)

    # --- residual + LayerNorm1 -----------------------------------------------
    x = q_in + attn
    mu = jnp.mean(x, axis=-1, keepdims=True)
    var = jnp.mean((x - mu) ** 2, axis=-1, keepdims=True)
    x = (x - mu) * jax.lax.rsqrt(var + EPS) * g1_ref[...] + be1_ref[...]

    # --- feed-forward: linear2(ReLU(linear1(x))) ------------------------------
    h1 = jnp.maximum(mm(x, w1_ref[...]) + b1_ref[...], 0.0)
    ff = mm(h1, w2_ref[...]) + b2_ref[...]

    # --- residual + LayerNorm2 -----------------------------------------------
    y = x + ff
    mu = jnp.mean(y, axis=-1, keepdims=True)
    var = jnp.mean((y - mu) ** 2, axis=-1, keepdims=True)
    y = (y - mu) * jax.lax.rsqrt(var + EPS) * g2_ref[...] + be2_ref[...]

    # TODO(synk): output lane width is 32 (<128); folding windows onto the lane
    # axis would make stores lane-dense (mainly a v5e concern).
    out_ref[...] = y.reshape(TB, N_VOX, C_OUT).astype(out_ref.dtype)


# ---------------- host-side weight preprocessing (done once, outside kernel) -
def _preprocess_params(p):
    scale = 1.0 / math.sqrt(HEAD_DIM)

    def split_heads(w, b, s=1.0):
        # w: (C_out_proj, C_in) PyTorch layout; rows h*Dh:(h+1)*Dh are head h.
        w_h = (w.T * s).reshape(C_IN, NUM_HEADS, HEAD_DIM).transpose(1, 0, 2)
        b_h = (b * s).reshape(NUM_HEADS, 1, HEAD_DIM)
        return w_h.astype(MXU_DTYPE), b_h.astype(jnp.float32)

    wq_h, bq_h = split_heads(p["wq"], p["bq"], scale)   # scale folded into q
    wk_h, bk_h = split_heads(p["wk"], p["bk"])
    wv_h, bv_h = split_heads(p["wv"], p["bv"])
    wo_h = p["wo"].T.reshape(NUM_HEADS, HEAD_DIM, C_OUT).astype(MXU_DTYPE)

    return (
        p["wp"].T.astype(jnp.float32), p["bp"],          # (3,C), (1,C)
        wq_h, bq_h, wk_h, bk_h, wv_h, bv_h,
        wo_h, p["bo"],
        p["g1"], p["be1"],
        p["w1"].T.astype(MXU_DTYPE), p["b1"],            # (C,F), (1,F)
        p["w2"].T.astype(MXU_DTYPE), p["b2"],            # (F,C), (1,C)
        p["g2"], p["be2"],
    )


def attention3d_forward(feat, coords, params, tb=TB_WINDOWS):
    """feat: (B, N, C_IN) f32, coords: (B, N, 3) f32 -> (B, N, C_OUT) f32."""
    B, N, C = feat.shape
    assert N == N_VOX and C == C_IN and B % tb == 0

    weight_args = _preprocess_params(params)
    args = (feat, coords) + weight_args

    def full_spec(a):
        nd = a.ndim
        return pl.BlockSpec(a.shape, lambda i, _nd=nd: (0,) * _nd)

    in_specs = [
        pl.BlockSpec((tb, N_VOX, C_IN), lambda i: (i, 0, 0)),
        pl.BlockSpec((tb, N_VOX, 3), lambda i: (i, 0, 0)),
    ] + [full_spec(a) for a in weight_args]
    out_specs = pl.BlockSpec((tb, N_VOX, C_OUT), lambda i: (i, 0, 0))

    return pl.pallas_call(
        attention3d_kernel,
        out_shape=jax.ShapeDtypeStruct((B, N_VOX, C_OUT), jnp.float32),
        grid=(B // tb,),
        in_specs=in_specs,
        out_specs=out_specs,
        compiler_params=pltpu.CompilerParams(
            dimension_semantics=("parallel",)),
    )(*args)


# ---------------- pure-JAX reference (PyTorch-layout params) -----------------
def attention3d_reference(feat, coords, p):
    B, N, C = feat.shape
    pos = jnp.maximum(jnp.einsum('bnk,ck->bnc', coords, p["wp"]) + p["bp"], 0.0)
    q = jnp.einsum('bnc,dc->bnd', feat, p["wq"]) + p["bq"]
    k = jnp.einsum('bnc,dc->bnd', feat + pos, p["wk"]) + p["bk"]
    v = jnp.einsum('bnc,dc->bnd', feat, p["wv"]) + p["bv"]
    qh = q.reshape(B, N, NUM_HEADS, HEAD_DIM) * (1.0 / math.sqrt(HEAD_DIM))
    kh = k.reshape(B, N, NUM_HEADS, HEAD_DIM)
    vh = v.reshape(B, N, NUM_HEADS, HEAD_DIM)
    s = jnp.einsum('bnhd,bmhd->bhnm', qh, kh)
    pm = jax.nn.softmax(s, axis=-1)
    o = jnp.einsum('bhnm,bmhd->bnhd', pm, vh).reshape(B, N, C)
    attn = jnp.einsum('bnc,dc->bnd', o, p["wo"]) + p["bo"]

    def ln(x, g, b):
        mu = jnp.mean(x, axis=-1, keepdims=True)
        var = jnp.mean((x - mu) ** 2, axis=-1, keepdims=True)
        return (x - mu) * jax.lax.rsqrt(var + EPS) * g + b

    x = ln(feat + attn, p["g1"], p["be1"])
    ff = jnp.maximum(jnp.einsum('bnc,fc->bnf', x, p["w1"]) + p["b1"], 0.0)
    ff = jnp.einsum('bnf,cf->bnc', ff, p["w2"]) + p["b2"]
    return ln(x + ff, p["g2"], p["be2"])


def make_params(key):
    ks = jax.random.split(key, 16)

    def w(k, shape, fan_in):
        return jax.random.normal(k, shape, jnp.float32) / math.sqrt(fan_in)

    return {
        "wp": w(ks[0], (C_IN, 3), 3),            "bp": w(ks[1], (1, C_IN), C_IN),
        "wq": w(ks[2], (C_IN, C_IN), C_IN),      "bq": 0.1 * w(ks[10], (1, C_IN), C_IN),
        "wk": w(ks[3], (C_IN, C_IN), C_IN),      "bk": 0.1 * w(ks[11], (1, C_IN), C_IN),
        "wv": w(ks[4], (C_IN, C_IN), C_IN),      "bv": 0.1 * w(ks[12], (1, C_IN), C_IN),
        "wo": w(ks[5], (C_IN, C_IN), C_IN),      "bo": 0.1 * w(ks[13], (1, C_IN), C_IN),
        "g1": jnp.ones((1, C_IN), jnp.float32),  "be1": jnp.zeros((1, C_IN), jnp.float32),
        "w1": w(ks[6], (C_FF, C_IN), C_IN),      "b1": w(ks[7], (1, C_FF), C_FF),
        "w2": w(ks[8], (C_OUT, C_FF), C_FF),     "b2": w(ks[9], (1, C_OUT), C_OUT),
        "g2": jnp.ones((1, C_OUT), jnp.float32), "be2": jnp.zeros((1, C_OUT), jnp.float32),
    }


if __name__ == "__main__":
    key = jax.random.PRNGKey(0)
    k_feat, k_coord, k_par = jax.random.split(key, 3)

    B = 16  # number of voxel windows batched through one pallas_call
    voxel_features = jax.random.normal(k_feat, (B, N_VOX, C_IN), jnp.float32)
    # coords as with_coords() would produce: (idx + 0.5) * voxel_size + min_range
    voxel_size = jnp.asarray([0.1, 0.1, 0.2], jnp.float32)
    min_range = jnp.asarray([-3.0, -3.0, -1.0], jnp.float32)
    idx = jax.random.randint(k_coord, (B, N_VOX, 3), 0, 40).astype(jnp.float32)
    coords = (idx + 0.5) * voxel_size + min_range

    params = make_params(k_par)

    out = attention3d_forward(voxel_features, coords, params)
    out = jax.block_until_ready(out)

    ref = attention3d_reference(voxel_features, coords, params)
    assert out.shape == (B, N_VOX, C_OUT)
    assert jnp.all(jnp.isfinite(out))
    assert jnp.allclose(out, ref, rtol=1e-2, atol=1e-2), "kernel/reference mismatch"

    # TODO(synk): dropout (train mode), BatchNorm1d running-stats variant and
    # the sparse neighbor-gather / bs_cnt handling of the VOTR subclasses are
    # not modeled here (base-class forward() is abstract).
    print("KERNEL_OK")
</pallas_src>

<mosaic_0001>
module attributes {stable_mosaic.version = 11 : i64} {
  func.func @attention3d_kernel(%arg0: i32, %arg1: memref<4x64x32xf32, #tpu.memory_space<vmem>>, %arg2: memref<4x64x3xf32, #tpu.memory_space<vmem>>, %arg3: memref<3x32xf32, #tpu.memory_space<vmem>>, %arg4: memref<1x32xf32, #tpu.memory_space<vmem>>, %arg5: memref<4x32x8xf32, #tpu.memory_space<vmem>>, %arg6: memref<4x1x8xf32, #tpu.memory_space<vmem>>, %arg7: memref<4x32x8xf32, #tpu.memory_space<vmem>>, %arg8: memref<4x1x8xf32, #tpu.memory_space<vmem>>, %arg9: memref<4x32x8xf32, #tpu.memory_space<vmem>>, %arg10: memref<4x1x8xf32, #tpu.memory_space<vmem>>, %arg11: memref<4x8x32xf32, #tpu.memory_space<vmem>>, %arg12: memref<1x32xf32, #tpu.memory_space<vmem>>, %arg13: memref<1x32xf32, #tpu.memory_space<vmem>>, %arg14: memref<1x32xf32, #tpu.memory_space<vmem>>, %arg15: memref<32x64xf32, #tpu.memory_space<vmem>>, %arg16: memref<1x64xf32, #tpu.memory_space<vmem>>, %arg17: memref<64x32xf32, #tpu.memory_space<vmem>>, %arg18: memref<1x32xf32, #tpu.memory_space<vmem>>, %arg19: memref<1x32xf32, #tpu.memory_space<vmem>>, %arg20: memref<1x32xf32, #tpu.memory_space<vmem>>, %arg21: memref<4x64x32xf32, #tpu.memory_space<vmem>>) attributes {dimension_semantics = [#tpu.dimension_semantics<parallel>], iteration_bounds = array<i64: 4>, scalar_prefetch = 0 : i64, scratch_operands = 0 : i64, tpu.core_type = #tpu.core_type<tc>, window_params = [{transform_indices = @transform_0, window_bounds = array<i64: 4, 64, 32>}, {transform_indices = @transform_1, window_bounds = array<i64: 4, 64, 3>}, {pipeline_mode = #tpu.pipeline_mode<synchronous>, transform_indices = @transform_2, window_bounds = array<i64: 3, 32>}, {pipeline_mode = #tpu.pipeline_mode<synchronous>, transform_indices = @transform_3, window_bounds = array<i64: 1, 32>}, {pipeline_mode = #tpu.pipeline_mode<synchronous>, transform_indices = @transform_4, window_bounds = array<i64: 4, 32, 8>}, {pipeline_mode = #tpu.pipeline_mode<synchronous>, transform_indices = @transform_5, window_bounds = array<i64: 4, 1, 8>}, {pipeline_mode = #tpu.pipeline_mode<synchronous>, transform_indices = @transform_6, window_bounds = array<i64: 4, 32, 8>}, {pipeline_mode = #tpu.pipeline_mode<synchronous>, transform_indices = @transform_7, window_bounds = array<i64: 4, 1, 8>}, {pipeline_mode = #tpu.pipeline_mode<synchronous>, transform_indices = @transform_8, window_bounds = array<i64: 4, 32, 8>}, {pipeline_mode = #tpu.pipeline_mode<synchronous>, transform_indices = @transform_9, window_bounds = array<i64: 4, 1, 8>}, {pipeline_mode = #tpu.pipeline_mode<synchronous>, transform_indices = @transform_10, window_bounds = array<i64: 4, 8, 32>}, {pipeline_mode = #tpu.pipeline_mode<synchronous>, transform_indices = @transform_11, window_bounds = array<i64: 1, 32>}, {pipeline_mode = #tpu.pipeline_mode<synchronous>, transform_indices = @transform_12, window_bounds = array<i64: 1, 32>}, {pipeline_mode = #tpu.pipeline_mode<synchronous>, transform_indices = @transform_13, window_bounds = array<i64: 1, 32>}, {pipeline_mode = #tpu.pipeline_mode<synchronous>, transform_indices = @transform_14, window_bounds = array<i64: 32, 64>}, {pipeline_mode = #tpu.pipeline_mode<synchronous>, transform_indices = @transform_15, window_bounds = array<i64: 1, 64>}, {pipeline_mode = #tpu.pipeline_mode<synchronous>, transform_indices = @transform_16, window_bounds = array<i64: 64, 32>}, {pipeline_mode = #tpu.pipeline_mode<synchronous>, transform_indices = @transform_17, window_bounds = array<i64: 1, 32>}, {pipeline_mode = #tpu.pipeline_mode<synchronous>, transform_indices = @transform_18, window_bounds = array<i64: 1, 32>}, {pipeline_mode = #tpu.pipeline_mode<synchronous>, transform_indices = @transform_19, window_bounds = array<i64: 1, 32>}, {transform_indices = @transform_20, window_bounds = array<i64: 4, 64, 32>}]} {
    %c0 = arith.constant 0 : index
    %c0_0 = arith.constant 0 : index
    %c0_1 = arith.constant 0 : index
    %0 = vector.load %arg1[%c0, %c0_0, %c0_1] : memref<4x64x32xf32, #tpu.memory_space<vmem>>, vector<4x64x32xf32>
    %c0_2 = arith.constant 0 : index
    %c0_3 = arith.constant 0 : index
    %c0_4 = arith.constant 0 : index
    %1 = vector.load %arg2[%c0_2, %c0_3, %c0_4] : memref<4x64x3xf32, #tpu.memory_space<vmem>>, vector<4x64x3xf32>
    %c0_5 = arith.constant 0 : index
    %c0_6 = arith.constant 0 : index
    %2 = vector.load %arg3[%c0_5, %c0_6] : memref<3x32xf32, #tpu.memory_space<vmem>>, vector<3x32xf32>
    %3 = vector.extract_strided_slice %1 {offsets = [0, 0, 0], sizes = [4, 64, 1], strides = [1, 1, 1]} : vector<4x64x3xf32> to vector<4x64x1xf32>
    %4 = vector.extract_strided_slice %2 {offsets = [0, 0], sizes = [1, 32], strides = [1, 1]} : vector<3x32xf32> to vector<1x32xf32>
    %5 = vector.shape_cast %4 : vector<1x32xf32> to vector<1x1x32xf32>
    %6 = vector.broadcast %3 : vector<4x64x1xf32> to vector<4x64x32xf32>
    %7 = vector.broadcast %5 : vector<1x1x32xf32> to vector<4x64x32xf32>
    %8 = arith.mulf %6, %7 : vector<4x64x32xf32>
    %9 = vector.extract_strided_slice %1 {offsets = [0, 0, 1], sizes = [4, 64, 1], strides = [1, 1, 1]} : vector<4x64x3xf32> to vector<4x64x1xf32>
    %10 = vector.extract_strided_slice %2 {offsets = [1, 0], sizes = [1, 32], strides = [1, 1]} : vector<3x32xf32> to vector<1x32xf32>
    %11 = vector.shape_cast %10 : vector<1x32xf32> to vector<1x1x32xf32>
    %12 = vector.broadcast %9 : vector<4x64x1xf32> to vector<4x64x32xf32>
    %13 = vector.broadcast %11 : vector<1x1x32xf32> to vector<4x64x32xf32>
    %14 = arith.mulf %12, %13 : vector<4x64x32xf32>
    %15 = arith.addf %8, %14 : vector<4x64x32xf32>
    %16 = vector.extract_strided_slice %1 {offsets = [0, 0, 2], sizes = [4, 64, 1], strides = [1, 1, 1]} : vector<4x64x3xf32> to vector<4x64x1xf32>
    %17 = vector.extract_strided_slice %2 {offsets = [2, 0], sizes = [1, 32], strides = [1, 1]} : vector<3x32xf32> to vector<1x32xf32>
    %18 = vector.shape_cast %17 : vector<1x32xf32> to vector<1x1x32xf32>
    %19 = vector.broadcast %16 : vector<4x64x1xf32> to vector<4x64x32xf32>
    %20 = vector.broadcast %18 : vector<1x1x32xf32> to vector<4x64x32xf32>
    %21 = arith.mulf %19, %20 : vector<4x64x32xf32>
    %22 = arith.addf %15, %21 : vector<4x64x32xf32>
    %c0_7 = arith.constant 0 : index
    %c0_8 = arith.constant 0 : index
    %23 = vector.load %arg4[%c0_7, %c0_8] : memref<1x32xf32, #tpu.memory_space<vmem>>, vector<1x32xf32>
    %24 = vector.shape_cast %23 : vector<1x32xf32> to vector<1x1x32xf32>
    %25 = vector.broadcast %24 : vector<1x1x32xf32> to vector<4x64x32xf32>
    %26 = arith.addf %22, %25 : vector<4x64x32xf32>
    %cst = arith.constant 0.000000e+00 : f32
    %27 = vector.broadcast %cst : f32 to vector<4x64x32xf32>
    %28 = arith.maximumf %26, %27 : vector<4x64x32xf32>
    %29 = vector.shape_cast %0 : vector<4x64x32xf32> to vector<256x32xf32>
    %30 = arith.addf %0, %28 : vector<4x64x32xf32>
    %31 = vector.shape_cast %30 : vector<4x64x32xf32> to vector<256x32xf32>
    %cst_9 = arith.constant 0.000000e+00 : f32
    %32 = vector.broadcast %cst_9 : f32 to vector<256x32xf32>
    %c0_10 = arith.constant 0 : index
    %c0_11 = arith.constant 0 : index
    %c0_12 = arith.constant 0 : index
    %33 = vector.load %arg5[%c0_10, %c0_11, %c0_12] : memref<4x32x8xf32, #tpu.memory_space<vmem>>, vector<1x32x8xf32>
    %34 = vector.shape_cast %33 : vector<1x32x8xf32> to vector<32x8xf32>
    %cst_13 = arith.constant dense<0.000000e+00> : vector<256x8xf32>
    %35 = tpu.matmul %29, %34, %cst_13 {dimension_numbers = #tpu.dot_dimension_numbers<[1], [0], [0], [1], [0, 0, 1, 1], [], []>} : vector<256x32xf32>, vector<32x8xf32>, vector<256x8xf32> -> vector<256x8xf32>
    %c0_14 = arith.constant 0 : index
    %c0_15 = arith.constant 0 : index
    %c0_16 = arith.constant 0 : index
    %36 = vector.load %arg6[%c0_14, %c0_15, %c0_16] : memref<4x1x8xf32, #tpu.memory_space<vmem>>, vector<1x1x8xf32>
    %37 = vector.shape_cast %36 : vector<1x1x8xf32> to vector<1x8xf32>
    %38 = vector.broadcast %37 : vector<1x8xf32> to vector<256x8xf32>
    %39 = arith.addf %35, %38 : vector<256x8xf32>
    %40 = vector.shape_cast %39 : vector<256x8xf32> to vector<4x64x8xf32>
    %c0_17 = arith.constant 0 : index
    %c0_18 = arith.constant 0 : index
    %c0_19 = arith.constant 0 : index
    %41 = vector.load %arg7[%c0_17, %c0_18, %c0_19] : memref<4x32x8xf32, #tpu.memory_space<vmem>>, vector<1x32x8xf32>
    %42 = vector.shape_cast %41 : vector<1x32x8xf32> to vector<32x8xf32>
    %cst_20 = arith.constant dense<0.000000e+00> : vector<256x8xf32>
    %43 = tpu.matmul %31, %42, %cst_20 {dimension_numbers = #tpu.dot_dimension_numbers<[1], [0], [0], [1], [0, 0, 1, 1], [], []>} : vector<256x32xf32>, vector<32x8xf32>, vector<256x8xf32> -> vector<256x8xf32>
    %c0_21 = arith.constant 0 : index
    %c0_22 = arith.constant 0 : index
    %c0_23 = arith.constant 0 : index
    %44 = vector.load %arg8[%c0_21, %c0_22, %c0_23] : memref<4x1x8xf32, #tpu.memory_space<vmem>>, vector<1x1x8xf32>
    %45 = vector.shape_cast %44 : vector<1x1x8xf32> to vector<1x8xf32>
    %46 = vector.broadcast %45 : vector<1x8xf32> to vector<256x8xf32>
    %47 = arith.addf %43, %46 : vector<256x8xf32>
    %48 = vector.shape_cast %47 : vector<256x8xf32> to vector<4x64x8xf32>
    %c0_24 = arith.constant 0 : index
    %c0_25 = arith.constant 0 : index
    %c0_26 = arith.constant 0 : index
    %49 = vector.load %arg9[%c0_24, %c0_25, %c0_26] : memref<4x32x8xf32, #tpu.memory_space<vmem>>, vector<1x32x8xf32>
    %50 = vector.shape_cast %49 : vector<1x32x8xf32> to vector<32x8xf32>
    %cst_27 = arith.constant dense<0.000000e+00> : vector<256x8xf32>
    %51 = tpu.matmul %29, %50, %cst_27 {dimension_numbers = #tpu.dot_dimension_numbers<[1], [0], [0], [1], [0, 0, 1, 1], [], []>} : vector<256x32xf32>, vector<32x8xf32>, vector<256x8xf32> -> vector<256x8xf32>
    %c0_28 = arith.constant 0 : index
    %c0_29 = arith.constant 0 : index
    %c0_30 = arith.constant 0 : index
    %52 = vector.load %arg10[%c0_28, %c0_29, %c0_30] : memref<4x1x8xf32, #tpu.memory_space<vmem>>, vector<1x1x8xf32>
    %53 = vector.shape_cast %52 : vector<1x1x8xf32> to vector<1x8xf32>
    %54 = vector.broadcast %53 : vector<1x8xf32> to vector<256x8xf32>
    %55 = arith.addf %51, %54 : vector<256x8xf32>
    %56 = vector.shape_cast %55 : vector<256x8xf32> to vector<4x64x8xf32>
    "tpu.trace_start"() <{level = 10 : i32, message = "bnd,bmd->bnm"}> : () -> ()
    %cst_31 = arith.constant dense<0.000000e+00> : vector<4x64x64xf32>
    %57 = tpu.matmul %40, %48, %cst_31 {dimension_numbers = #tpu.dot_dimension_numbers<[2], [2], [1], [1], [0, 0, 0, 1, 1, 1], [0], [0]>} : vector<4x64x8xf32>, vector<4x64x8xf32>, vector<4x64x64xf32> -> vector<4x64x64xf32>
    "tpu.trace_stop"() : () -> ()
    %cst_32 = arith.constant dense<0xFF800000> : vector<4x64xf32>
    %58 = vector.multi_reduction <maximumf>, %57, %cst_32 [2] : vector<4x64x64xf32> to vector<4x64xf32>
    %59 = vector.shape_cast %58 : vector<4x64xf32> to vector<4x64x1xf32>
    %60 = vector.broadcast %59 : vector<4x64x1xf32> to vector<4x64x64xf32>
    %61 = arith.subf %57, %60 : vector<4x64x64xf32>
    %62 = math.exp %61 : vector<4x64x64xf32>
    %cst_33 = arith.constant dense<0.000000e+00> : vector<4x64xf32>
    %63 = vector.multi_reduction <add>, %62, %cst_33 [2] : vector<4x64x64xf32> to vector<4x64xf32>
    %64 = vector.shape_cast %63 : vector<4x64xf32> to vector<4x64x1xf32>
    %65 = tpu.reciprocal %64 {approx = true} : vector<4x64x1xf32> -> vector<4x64x1xf32>
    %66 = vector.broadcast %65 : vector<4x64x1xf32> to vector<4x64x64xf32>
    %67 = arith.mulf %62, %66 : vector<4x64x64xf32>
    "tpu.trace_start"() <{level = 10 : i32, message = "bnm,bmd->bnd"}> : () -> ()
    %cst_34 = arith.constant dense<0.000000e+00> : vector<4x64x8xf32>
    %68 = tpu.matmul %67, %56, %cst_34 {dimension_numbers = #tpu.dot_dimension_numbers<[2], [1], [1], [2], [0, 0, 0, 1, 1, 2], [0], [0]>} : vector<4x64x64xf32>, vector<4x64x8xf32>, vector<4x64x8xf32> -> vector<4x64x8xf32>
    "tpu.trace_stop"() : () -> ()
    %69 = vector.shape_cast %68 : vector<4x64x8xf32> to vector<256x8xf32>
    %c0_35 = arith.constant 0 : index
    %c0_36 = arith.constant 0 : index
    %c0_37 = arith.constant 0 : index
    %70 = vector.load %arg11[%c0_35, %c0_36, %c0_37] : memref<4x8x32xf32, #tpu.memory_space<vmem>>, vector<1x8x32xf32>
    %71 = vector.shape_cast %70 : vector<1x8x32xf32> to vector<8x32xf32>
    %cst_38 = arith.constant dense<0.000000e+00> : vector<256x32xf32>
    %72 = tpu.matmul %69, %71, %cst_38 {dimension_numbers = #tpu.dot_dimension_numbers<[1], [0], [0], [1], [0, 0, 1, 1], [], []>} : vector<256x8xf32>, vector<8x32xf32>, vector<256x32xf32> -> vector<256x32xf32>
    %73 = arith.addf %32, %72 : vector<256x32xf32>
    %c1 = arith.constant 1 : index
    %c0_39 = arith.constant 0 : index
    %c0_40 = arith.constant 0 : index
    %74 = vector.load %arg5[%c1, %c0_39, %c0_40] : memref<4x32x8xf32, #tpu.memory_space<vmem>>, vector<1x32x8xf32>
    %75 = vector.shape_cast %74 : vector<1x32x8xf32> to vector<32x8xf32>
    %cst_41 = arith.constant dense<0.000000e+00> : vector<256x8xf32>
    %76 = tpu.matmul %29, %75, %cst_41 {dimension_numbers = #tpu.dot_dimension_numbers<[1], [0], [0], [1], [0, 0, 1, 1], [], []>} : vector<256x32xf32>, vector<32x8xf32>, vector<256x8xf32> -> vector<256x8xf32>
    %c1_42 = arith.constant 1 : index
    %c0_43 = arith.constant 0 : index
    %c0_44 = arith.constant 0 : index
    %77 = vector.load %arg6[%c1_42, %c0_43, %c0_44] : memref<4x1x8xf32, #tpu.memory_space<vmem>>, vector<1x1x8xf32>
    %78 = vector.shape_cast %77 : vector<1x1x8xf32> to vector<1x8xf32>
    %79 = vector.broadcast %78 : vector<1x8xf32> to vector<256x8xf32>
    %80 = arith.addf %76, %79 : vector<256x8xf32>
    %81 = vector.shape_cast %80 : vector<256x8xf32> to vector<4x64x8xf32>
    %c1_45 = arith.constant 1 : index
    %c0_46 = arith.constant 0 : index
    %c0_47 = arith.constant 0 : index
    %82 = vector.load %arg7[%c1_45, %c0_46, %c0_47] : memref<4x32x8xf32, #tpu.memory_space<vmem>>, vector<1x32x8xf32>
    %83 = vector.shape_cast %82 : vector<1x32x8xf32> to vector<32x8xf32>
    %cst_48 = arith.constant dense<0.000000e+00> : vector<256x8xf32>
    %84 = tpu.matmul %31, %83, %cst_48 {dimension_numbers = #tpu.dot_dimension_numbers<[1], [0], [0], [1], [0, 0, 1, 1], [], []>} : vector<256x32xf32>, vector<32x8xf32>, vector<256x8xf32> -> vector<256x8xf32>
    %c1_49 = arith.constant 1 : index
    %c0_50 = arith.constant 0 : index
    %c0_51 = arith.constant 0 : index
    %85 = vector.load %arg8[%c1_49, %c0_50, %c0_51] : memref<4x1x8xf32, #tpu.memory_space<vmem>>, vector<1x1x8xf32>
    %86 = vector.shape_cast %85 : vector<1x1x8xf32> to vector<1x8xf32>
    %87 = vector.broadcast %86 : vector<1x8xf32> to vector<256x8xf32>
    %88 = arith.addf %84, %87 : vector<256x8xf32>
    %89 = vector.shape_cast %88 : vector<256x8xf32> to vector<4x64x8xf32>
    %c1_52 = arith.constant 1 : index
    %c0_53 = arith.constant 0 : index
    %c0_54 = arith.constant 0 : index
    %90 = vector.load %arg9[%c1_52, %c0_53, %c0_54] : memref<4x32x8xf32, #tpu.memory_space<vmem>>, vector<1x32x8xf32>
    %91 = vector.shape_cast %90 : vector<1x32x8xf32> to vector<32x8xf32>
    %cst_55 = arith.constant dense<0.000000e+00> : vector<256x8xf32>
    %92 = tpu.matmul %29, %91, %cst_55 {dimension_numbers = #tpu.dot_dimension_numbers<[1], [0], [0], [1], [0, 0, 1, 1], [], []>} : vector<256x32xf32>, vector<32x8xf32>, vector<256x8xf32> -> vector<256x8xf32>
    %c1_56 = arith.constant 1 : index
    %c0_57 = arith.constant 0 : index
    %c0_58 = arith.constant 0 : index
    %93 = vector.load %arg10[%c1_56, %c0_57, %c0_58] : memref<4x1x8xf32, #tpu.memory_space<vmem>>, vector<1x1x8xf32>
    %94 = vector.shape_cast %93 : vector<1x1x8xf32> to vector<1x8xf32>
    %95 = vector.broadcast %94 : vector<1x8xf32> to vector<256x8xf32>
    %96 = arith.addf %92, %95 : vector<256x8xf32>
    %97 = vector.shape_cast %96 : vector<256x8xf32> to vector<4x64x8xf32>
    "tpu.trace_start"() <{level = 10 : i32, message = "bnd,bmd->bnm"}> : () -> ()
    %cst_59 = arith.constant dense<0.000000e+00> : vector<4x64x64xf32>
    %98 = tpu.matmul %81, %89, %cst_59 {dimension_numbers = #tpu.dot_dimension_numbers<[2], [2], [1], [1], [0, 0, 0, 1, 1, 1], [0], [0]>} : vector<4x64x8xf32>, vector<4x64x8xf32>, vector<4x64x64xf32> -> vector<4x64x64xf32>
    "tpu.trace_stop"() : () -> ()
    %cst_60 = arith.constant dense<0xFF800000> : vector<4x64xf32>
    %99 = vector.multi_reduction <maximumf>, %98, %cst_60 [2] : vector<4x64x64xf32> to vector<4x64xf32>
    %100 = vector.shape_cast %99 : vector<4x64xf32> to vector<4x64x1xf32>
    %101 = vector.broadcast %100 : vector<4x64x1xf32> to vector<4x64x64xf32>
    %102 = arith.subf %98, %101 : vector<4x64x64xf32>
    %103 = math.exp %102 : vector<4x64x64xf32>
    %cst_61 = arith.constant dense<0.000000e+00> : vector<4x64xf32>
    %104 = vector.multi_reduction <add>, %103, %cst_61 [2] : vector<4x64x64xf32> to vector<4x64xf32>
    %105 = vector.shape_cast %104 : vector<4x64xf32> to vector<4x64x1xf32>
    %106 = tpu.reciprocal %105 {approx = true} : vector<4x64x1xf32> -> vector<4x64x1xf32>
    %107 = vector.broadcast %106 : vector<4x64x1xf32> to vector<4x64x64xf32>
    %108 = arith.mulf %103, %107 : vector<4x64x64xf32>
    "tpu.trace_start"() <{level = 10 : i32, message = "bnm,bmd->bnd"}> : () -> ()
    %cst_62 = arith.constant dense<0.000000e+00> : vector<4x64x8xf32>
    %109 = tpu.matmul %108, %97, %cst_62 {dimension_numbers = #tpu.dot_dimension_numbers<[2], [1], [1], [2], [0, 0, 0, 1, 1, 2], [0], [0]>} : vector<4x64x64xf32>, vector<4x64x8xf32>, vector<4x64x8xf32> -> vector<4x64x8xf32>
    "tpu.trace_stop"() : () -> ()
    %110 = vector.shape_cast %109 : vector<4x64x8xf32> to vector<256x8xf32>
    %c1_63 = arith.constant 1 : index
    %c0_64 = arith.constant 0 : index
    %c0_65 = arith.constant 0 : index
    %111 = vector.load %arg11[%c1_63, %c0_64, %c0_65] : memref<4x8x32xf32, #tpu.memory_space<vmem>>, vector<1x8x32xf32>
    %112 = vector.shape_cast %111 : vector<1x8x32xf32> to vector<8x32xf32>
    %cst_66 = arith.constant dense<0.000000e+00> : vector<256x32xf32>
    %113 = tpu.matmul %110, %112, %cst_66 {dimension_numbers = #tpu.dot_dimension_numbers<[1], [0], [0], [1], [0, 0, 1, 1], [], []>} : vector<256x8xf32>, vector<8x32xf32>, vector<256x32xf32> -> vector<256x32xf32>
    %114 = arith.addf %73, %113 : vector<256x32xf32>
    %c2 = arith.constant 2 : index
    %c0_67 = arith.constant 0 : index
    %c0_68 = arith.constant 0 : index
    %115 = vector.load %arg5[%c2, %c0_67, %c0_68] : memref<4x32x8xf32, #tpu.memory_space<vmem>>, vector<1x32x8xf32>
    %116 = vector.shape_cast %115 : vector<1x32x8xf32> to vector<32x8xf32>
    %cst_69 = arith.constant dense<0.000000e+00> : vector<256x8xf32>
    %117 = tpu.matmul %29, %116, %cst_69 {dimension_numbers = #tpu.dot_dimension_numbers<[1], [0], [0], [1], [0, 0, 1, 1], [], []>} : vector<256x32xf32>, vector<32x8xf32>, vector<256x8xf32> -> vector<256x8xf32>
    %c2_70 = arith.constant 2 : index
    %c0_71 = arith.constant 0 : index
    %c0_72 = arith.constant 0 : index
    %118 = vector.load %arg6[%c2_70, %c0_71, %c0_72] : memref<4x1x8xf32, #tpu.memory_space<vmem>>, vector<1x1x8xf32>
    %119 = vector.shape_cast %118 : vector<1x1x8xf32> to vector<1x8xf32>
    %120 = vector.broadcast %119 : vector<1x8xf32> to vector<256x8xf32>
    %121 = arith.addf %117, %120 : vector<256x8xf32>
    %122 = vector.shape_cast %121 : vector<256x8xf32> to vector<4x64x8xf32>
    %c2_73 = arith.constant 2 : index
    %c0_74 = arith.constant 0 : index
    %c0_75 = arith.constant 0 : index
    %123 = vector.load %arg7[%c2_73, %c0_74, %c0_75] : memref<4x32x8xf32, #tpu.memory_space<vmem>>, vector<1x32x8xf32>
    %124 = vector.shape_cast %123 : vector<1x32x8xf32> to vector<32x8xf32>
    %cst_76 = arith.constant dense<0.000000e+00> : vector<256x8xf32>
    %125 = tpu.matmul %31, %124, %cst_76 {dimension_numbers = #tpu.dot_dimension_numbers<[1], [0], [0], [1], [0, 0, 1, 1], [], []>} : vector<256x32xf32>, vector<32x8xf32>, vector<256x8xf32> -> vector<256x8xf32>
    %c2_77 = arith.constant 2 : index
    %c0_78 = arith.constant 0 : index
    %c0_79 = arith.constant 0 : index
    %126 = vector.load %arg8[%c2_77, %c0_78, %c0_79] : memref<4x1x8xf32, #tpu.memory_space<vmem>>, vector<1x1x8xf32>
    %127 = vector.shape_cast %126 : vector<1x1x8xf32> to vector<1x8xf32>
    %128 = vector.broadcast %127 : vector<1x8xf32> to vector<256x8xf32>
    %129 = arith.addf %125, %128 : vector<256x8xf32>
    %130 = vector.shape_cast %129 : vector<256x8xf32> to vector<4x64x8xf32>
    %c2_80 = arith.constant 2 : index
    %c0_81 = arith.constant 0 : index
    %c0_82 = arith.constant 0 : index
    %131 = vector.load %arg9[%c2_80, %c0_81, %c0_82] : memref<4x32x8xf32, #tpu.memory_space<vmem>>, vector<1x32x8xf32>
    %132 = vector.shape_cast %131 : vector<1x32x8xf32> to vector<32x8xf32>
    %cst_83 = arith.constant dense<0.000000e+00> : vector<256x8xf32>
    %133 = tpu.matmul %29, %132, %cst_83 {dimension_numbers = #tpu.dot_dimension_numbers<[1], [0], [0], [1], [0, 0, 1, 1], [], []>} : vector<256x32xf32>, vector<32x8xf32>, vector<256x8xf32> -> vector<256x8xf32>
    %c2_84 = arith.constant 2 : index
    %c0_85 = arith.constant 0 : index
    %c0_86 = arith.constant 0 : index
    %134 = vector.load %arg10[%c2_84, %c0_85, %c0_86] : memref<4x1x8xf32, #tpu.memory_space<vmem>>, vector<1x1x8xf32>
    %135 = vector.shape_cast %134 : vector<1x1x8xf32> to vector<1x8xf32>
    %136 = vector.broadcast %135 : vector<1x8xf32> to vector<256x8xf32>
    %137 = arith.addf %133, %136 : vector<256x8xf32>
    %138 = vector.shape_cast %137 : vector<256x8xf32> to vector<4x64x8xf32>
    "tpu.trace_start"() <{level = 10 : i32, message = "bnd,bmd->bnm"}> : () -> ()
    %cst_87 = arith.constant dense<0.000000e+00> : vector<4x64x64xf32>
    %139 = tpu.matmul %122, %130, %cst_87 {dimension_numbers = #tpu.dot_dimension_numbers<[2], [2], [1], [1], [0, 0, 0, 1, 1, 1], [0], [0]>} : vector<4x64x8xf32>, vector<4x64x8xf32>, vector<4x64x64xf32> -> vector<4x64x64xf32>
    "tpu.trace_stop"() : () -> ()
    %cst_88 = arith.constant dense<0xFF800000> : vector<4x64xf32>
    %140 = vector.multi_reduction <maximumf>, %139, %cst_88 [2] : vector<4x64x64xf32> to vector<4x64xf32>
    %141 = vector.shape_cast %140 : vector<4x64xf32> to vector<4x64x1xf32>
    %142 = vector.broadcast %141 : vector<4x64x1xf32> to vector<4x64x64xf32>
    %143 = arith.subf %139, %142 : vector<4x64x64xf32>
    %144 = math.exp %143 : vector<4x64x64xf32>
    %cst_89 = arith.constant dense<0.000000e+00> : vector<4x64xf32>
    %145 = vector.multi_reduction <add>, %144, %cst_89 [2] : vector<4x64x64xf32> to vector<4x64xf32>
    %146 = vector.shape_cast %145 : vector<4x64xf32> to vector<4x64x1xf32>
    %147 = tpu.reciprocal %146 {approx = true} : vector<4x64x1xf32> -> vector<4x64x1xf32>
    %148 = vector.broadcast %147 : vector<4x64x1xf32> to vector<4x64x64xf32>
    %149 = arith.mulf %144, %148 : vector<4x64x64xf32>
    "tpu.trace_start"() <{level = 10 : i32, message = "bnm,bmd->bnd"}> : () -> ()
    %cst_90 = arith.constant dense<0.000000e+00> : vector<4x64x8xf32>
    %150 = tpu.matmul %149, %138, %cst_90 {dimension_numbers = #tpu.dot_dimension_numbers<[2], [1], [1], [2], [0, 0, 0, 1, 1, 2], [0], [0]>} : vector<4x64x64xf32>, vector<4x64x8xf32>, vector<4x64x8xf32> -> vector<4x64x8xf32>
    "tpu.trace_stop"() : () -> ()
    %151 = vector.shape_cast %150 : vector<4x64x8xf32> to vector<256x8xf32>
    %c2_91 = arith.constant 2 : index
    %c0_92 = arith.constant 0 : index
    %c0_93 = arith.constant 0 : index
    %152 = vector.load %arg11[%c2_91, %c0_92, %c0_93] : memref<4x8x32xf32, #tpu.memory_space<vmem>>, vector<1x8x32xf32>
    %153 = vector.shape_cast %152 : vector<1x8x32xf32> to vector<8x32xf32>
    %cst_94 = arith.constant dense<0.000000e+00> : vector<256x32xf32>
    %154 = tpu.matmul %151, %153, %cst_94 {dimension_numbers = #tpu.dot_dimension_numbers<[1], [0], [0], [1], [0, 0, 1, 1], [], []>} : vector<256x8xf32>, vector<8x32xf32>, vector<256x32xf32> -> vector<256x32xf32>
    %155 = arith.addf %114, %154 : vector<256x32xf32>
    %c3 = arith.constant 3 : index
    %c0_95 = arith.constant 0 : index
    %c0_96 = arith.constant 0 : index
    %156 = vector.load %arg5[%c3, %c0_95, %c0_96] : memref<4x32x8xf32, #tpu.memory_space<vmem>>, vector<1x32x8xf32>
    %157 = vector.shape_cast %156 : vector<1x32x8xf32> to vector<32x8xf32>
    %cst_97 = arith.constant dense<0.000000e+00> : vector<256x8xf32>
    %158 = tpu.matmul %29, %157, %cst_97 {dimension_numbers = #tpu.dot_dimension_numbers<[1], [0], [0], [1], [0, 0, 1, 1], [], []>} : vector<256x32xf32>, vector<32x8xf32>, vector<256x8xf32> -> vector<256x8xf32>
    %c3_98 = arith.constant 3 : index
    %c0_99 = arith.constant 0 : index
    %c0_100 = arith.constant 0 : index
    %159 = vector.load %arg6[%c3_98, %c0_99, %c0_100] : memref<4x1x8xf32, #tpu.memory_space<vmem>>, vector<1x1x8xf32>
    %160 = vector.shape_cast %159 : vector<1x1x8xf32> to vector<1x8xf32>
    %161 = vector.broadcast %160 : vector<1x8xf32> to vector<256x8xf32>
    %162 = arith.addf %158, %161 : vector<256x8xf32>
    %163 = vector.shape_cast %162 : vector<256x8xf32> to vector<4x64x8xf32>
    %c3_101 = arith.constant 3 : index
    %c0_102 = arith.constant 0 : index
    %c0_103 = arith.constant 0 : index
    %164 = vector.load %arg7[%c3_101, %c0_102, %c0_103] : memref<4x32x8xf32, #tpu.memory_space<vmem>>, vector<1x32x8xf32>
    %165 = vector.shape_cast %164 : vector<1x32x8xf32> to vector<32x8xf32>
    %cst_104 = arith.constant dense<0.000000e+00> : vector<256x8xf32>
    %166 = tpu.matmul %31, %165, %cst_104 {dimension_numbers = #tpu.dot_dimension_numbers<[1], [0], [0], [1], [0, 0, 1, 1], [], []>} : vector<256x32xf32>, vector<32x8xf32>, vector<256x8xf32> -> vector<256x8xf32>
    %c3_105 = arith.constant 3 : index
    %c0_106 = arith.constant 0 : index
    %c0_107 = arith.constant 0 : index
    %167 = vector.load %arg8[%c3_105, %c0_106, %c0_107] : memref<4x1x8xf32, #tpu.memory_space<vmem>>, vector<1x1x8xf32>
    %168 = vector.shape_cast %167 : vector<1x1x8xf32> to vector<1x8xf32>
    %169 = vector.broadcast %168 : vector<1x8xf32> to vector<256x8xf32>
    %170 = arith.addf %166, %169 : vector<256x8xf32>
    %171 = vector.shape_cast %170 : vector<256x8xf32> to vector<4x64x8xf32>
    %c3_108 = arith.constant 3 : index
    %c0_109 = arith.constant 0 : index
    %c0_110 = arith.constant 0 : index
    %172 = vector.load %arg9[%c3_108, %c0_109, %c0_110] : memref<4x32x8xf32, #tpu.memory_space<vmem>>, vector<1x32x8xf32>
    %173 = vector.shape_cast %172 : vector<1x32x8xf32> to vector<32x8xf32>
    %cst_111 = arith.constant dense<0.000000e+00> : vector<256x8xf32>
    %174 = tpu.matmul %29, %173, %cst_111 {dimension_numbers = #tpu.dot_dimension_numbers<[1], [0], [0], [1], [0, 0, 1, 1], [], []>} : vector<256x32xf32>, vector<32x8xf32>, vector<256x8xf32> -> vector<256x8xf32>
    %c3_112 = arith.constant 3 : index
    %c0_113 = arith.constant 0 : index
    %c0_114 = arith.constant 0 : index
    %175 = vector.load %arg10[%c3_112, %c0_113, %c0_114] : memref<4x1x8xf32, #tpu.memory_space<vmem>>, vector<1x1x8xf32>
    %176 = vector.shape_cast %175 : vector<1x1x8xf32> to vector<1x8xf32>
    %177 = vector.broadcast %176 : vector<1x8xf32> to vector<256x8xf32>
    %178 = arith.addf %174, %177 : vector<256x8xf32>
    %179 = vector.shape_cast %178 : vector<256x8xf32> to vector<4x64x8xf32>
    "tpu.trace_start"() <{level = 10 : i32, message = "bnd,bmd->bnm"}> : () -> ()
    %cst_115 = arith.constant dense<0.000000e+00> : vector<4x64x64xf32>
    %180 = tpu.matmul %163, %171, %cst_115 {dimension_numbers = #tpu.dot_dimension_numbers<[2], [2], [1], [1], [0, 0, 0, 1, 1, 1], [0], [0]>} : vector<4x64x8xf32>, vector<4x64x8xf32>, vector<4x64x64xf32> -> vector<4x64x64xf32>
    "tpu.trace_stop"() : () -> ()
    %cst_116 = arith.constant dense<0xFF800000> : vector<4x64xf32>
    %181 = vector.multi_reduction <maximumf>, %180, %cst_116 [2] : vector<4x64x64xf32> to vector<4x64xf32>
    %182 = vector.shape_cast %181 : vector<4x64xf32> to vector<4x64x1xf32>
    %183 = vector.broadcast %182 : vector<4x64x1xf32> to vector<4x64x64xf32>
    %184 = arith.subf %180, %183 : vector<4x64x64xf32>
    %185 = math.exp %184 : vector<4x64x64xf32>
    %cst_117 = arith.constant dense<0.000000e+00> : vector<4x64xf32>
    %186 = vector.multi_reduction <add>, %185, %cst_117 [2] : vector<4x64x64xf32> to vector<4x64xf32>
    %187 = vector.shape_cast %186 : vector<4x64xf32> to vector<4x64x1xf32>
    %188 = tpu.reciprocal %187 {approx = true} : vector<4x64x1xf32> -> vector<4x64x1xf32>
    %189 = vector.broadcast %188 : vector<4x64x1xf32> to vector<4x64x64xf32>
    %190 = arith.mulf %185, %189 : vector<4x64x64xf32>
    "tpu.trace_start"() <{level = 10 : i32, message = "bnm,bmd->bnd"}> : () -> ()
    %cst_118 = arith.constant dense<0.000000e+00> : vector<4x64x8xf32>
    %191 = tpu.matmul %190, %179, %cst_118 {dimension_numbers = #tpu.dot_dimension_numbers<[2], [1], [1], [2], [0, 0, 0, 1, 1, 2], [0], [0]>} : vector<4x64x64xf32>, vector<4x64x8xf32>, vector<4x64x8xf32> -> vector<4x64x8xf32>
    "tpu.trace_stop"() : () -> ()
    %192 = vector.shape_cast %191 : vector<4x64x8xf32> to vector<256x8xf32>
    %c3_119 = arith.constant 3 : index
    %c0_120 = arith.constant 0 : index
    %c0_121 = arith.constant 0 : index
    %193 = vector.load %arg11[%c3_119, %c0_120, %c0_121] : memref<4x8x32xf32, #tpu.memory_space<vmem>>, vector<1x8x32xf32>
    %194 = vector.shape_cast %193 : vector<1x8x32xf32> to vector<8x32xf32>
    %cst_122 = arith.constant dense<0.000000e+00> : vector<256x32xf32>
    %195 = tpu.matmul %192, %194, %cst_122 {dimension_numbers = #tpu.dot_dimension_numbers<[1], [0], [0], [1], [0, 0, 1, 1], [], []>} : vector<256x8xf32>, vector<8x32xf32>, vector<256x32xf32> -> vector<256x32xf32>
    %196 = arith.addf %155, %195 : vector<256x32xf32>
    %c0_123 = arith.constant 0 : index
    %c0_124 = arith.constant 0 : index
    %197 = vector.load %arg12[%c0_123, %c0_124] : memref<1x32xf32, #tpu.memory_space<vmem>>, vector<1x32xf32>
    %198 = vector.broadcast %197 : vector<1x32xf32> to vector<256x32xf32>
    %199 = arith.addf %196, %198 : vector<256x32xf32>
    %200 = arith.addf %29, %199 : vector<256x32xf32>
    %cst_125 = arith.constant dense<0.000000e+00> : vector<256xf32>
    %201 = vector.multi_reduction <add>, %200, %cst_125 [1] : vector<256x32xf32> to vector<256xf32>
    %202 = vector.shape_cast %201 : vector<256xf32> to vector<256x1xf32>
    %cst_126 = arith.constant 3.200000e+01 : f32
    %203 = vector.broadcast %cst_126 : f32 to vector<256x1xf32>
    %204 = arith.divf %202, %203 : vector<256x1xf32>
    %205 = vector.broadcast %204 : vector<256x1xf32> to vector<256x32xf32>
    %206 = arith.subf %200, %205 : vector<256x32xf32>
    %207 = arith.mulf %206, %206 : vector<256x32xf32>
    %cst_127 = arith.constant dense<0.000000e+00> : vector<256xf32>
    %208 = vector.multi_reduction <add>, %207, %cst_127 [1] : vector<256x32xf32> to vector<256xf32>
    %209 = vector.shape_cast %208 : vector<256xf32> to vector<256x1xf32>
    %cst_128 = arith.constant 3.200000e+01 : f32
    %210 = vector.broadcast %cst_128 : f32 to vector<256x1xf32>
    %211 = arith.divf %209, %210 : vector<256x1xf32>
    %212 = vector.broadcast %204 : vector<256x1xf32> to vector<256x32xf32>
    %213 = arith.subf %200, %212 : vector<256x32xf32>
    %cst_129 = arith.constant 9.99999974E-6 : f32
    %214 = vector.broadcast %cst_129 : f32 to vector<256x1xf32>
    %215 = arith.addf %211, %214 : vector<256x1xf32>
    %216 = math.rsqrt %215 : vector<256x1xf32>
    %217 = vector.broadcast %216 : vector<256x1xf32> to vector<256x32xf32>
    %218 = arith.mulf %213, %217 : vector<256x32xf32>
    %c0_130 = arith.constant 0 : index
    %c0_131 = arith.constant 0 : index
    %219 = vector.load %arg13[%c0_130, %c0_131] : memref<1x32xf32, #tpu.memory_space<vmem>>, vector<1x32xf32>
    %220 = vector.broadcast %219 : vector<1x32xf32> to vector<256x32xf32>
    %221 = arith.mulf %218, %220 : vector<256x32xf32>
    %c0_132 = arith.constant 0 : index
    %c0_133 = arith.constant 0 : index
    %222 = vector.load %arg14[%c0_132, %c0_133] : memref<1x32xf32, #tpu.memory_space<vmem>>, vector<1x32xf32>
    %223 = vector.broadcast %222 : vector<1x32xf32> to vector<256x32xf32>
    %224 = arith.addf %221, %223 : vector<256x32xf32>
    %c0_134 = arith.constant 0 : index
    %c0_135 = arith.constant 0 : index
    %225 = vector.load %arg15[%c0_134, %c0_135] : memref<32x64xf32, #tpu.memory_space<vmem>>, vector<32x64xf32>
    %cst_136 = arith.constant dense<0.000000e+00> : vector<256x64xf32>
    %226 = tpu.matmul %224, %225, %cst_136 {dimension_numbers = #tpu.dot_dimension_numbers<[1], [0], [0], [1], [0, 0, 1, 1], [], []>} : vector<256x32xf32>, vector<32x64xf32>, vector<256x64xf32> -> vector<256x64xf32>
    %c0_137 = arith.constant 0 : index
    %c0_138 = arith.constant 0 : index
    %227 = vector.load %arg16[%c0_137, %c0_138] : memref<1x64xf32, #tpu.memory_space<vmem>>, vector<1x64xf32>
    %228 = vector.broadcast %227 : vector<1x64xf32> to vector<256x64xf32>
    %229 = arith.addf %226, %228 : vector<256x64xf32>
    %cst_139 = arith.constant 0.000000e+00 : f32
    %230 = vector.broadcast %cst_139 : f32 to vector<256x64xf32>
    %231 = arith.maximumf %229, %230 : vector<256x64xf32>
    %c0_140 = arith.constant 0 : index
    %c0_141 = arith.constant 0 : index
    %232 = vector.load %arg17[%c0_140, %c0_141] : memref<64x32xf32, #tpu.memory_space<vmem>>, vector<64x32xf32>
    %cst_142 = arith.constant dense<0.000000e+00> : vector<256x32xf32>
    %233 = tpu.matmul %231, %232, %cst_142 {dimension_numbers = #tpu.dot_dimension_numbers<[1], [0], [0], [1], [0, 0, 1, 1], [], []>} : vector<256x64xf32>, vector<64x32xf32>, vector<256x32xf32> -> vector<256x32xf32>
    %c0_143 = arith.constant 0 : index
    %c0_144 = arith.constant 0 : index
    %234 = vector.load %arg18[%c0_143, %c0_144] : memref<1x32xf32, #tpu.memory_space<vmem>>, vector<1x32xf32>
    %235 = vector.broadcast %234 : vector<1x32xf32> to vector<256x32xf32>
    %236 = arith.addf %233, %235 : vector<256x32xf32>
    %237 = arith.addf %224, %236 : vector<256x32xf32>
    %cst_145 = arith.constant dense<0.000000e+00> : vector<256xf32>
    %238 = vector.multi_reduction <add>, %237, %cst_145 [1] : vector<256x32xf32> to vector<256xf32>
    %239 = vector.shape_cast %238 : vector<256xf32> to vector<256x1xf32>
    %cst_146 = arith.constant 3.200000e+01 : f32
    %240 = vector.broadcast %cst_146 : f32 to vector<256x1xf32>
    %241 = arith.divf %239, %240 : vector<256x1xf32>
    %242 = vector.broadcast %241 : vector<256x1xf32> to vector<256x32xf32>
    %243 = arith.subf %237, %242 : vector<256x32xf32>
    %244 = arith.mulf %243, %243 : vector<256x32xf32>
    %cst_147 = arith.constant dense<0.000000e+00> : vector<256xf32>
    %245 = vector.multi_reduction <add>, %244, %cst_147 [1] : vector<256x32xf32> to vector<256xf32>
    %246 = vector.shape_cast %245 : vector<256xf32> to vector<256x1xf32>
    %cst_148 = arith.constant 3.200000e+01 : f32
    %247 = vector.broadcast %cst_148 : f32 to vector<256x1xf32>
    %248 = arith.divf %246, %247 : vector<256x1xf32>
    %249 = vector.broadcast %241 : vector<256x1xf32> to vector<256x32xf32>
    %250 = arith.subf %237, %249 : vector<256x32xf32>
    %cst_149 = arith.constant 9.99999974E-6 : f32
    %251 = vector.broadcast %cst_149 : f32 to vector<256x1xf32>
    %252 = arith.addf %248, %251 : vector<256x1xf32>
    %253 = math.rsqrt %252 : vector<256x1xf32>
    %254 = vector.broadcast %253 : vector<256x1xf32> to vector<256x32xf32>
    %255 = arith.mulf %250, %254 : vector<256x32xf32>
    %c0_150 = arith.constant 0 : index
    %c0_151 = arith.constant 0 : index
    %256 = vector.load %arg19[%c0_150, %c0_151] : memref<1x32xf32, #tpu.memory_space<vmem>>, vector<1x32xf32>
    %257 = vector.broadcast %256 : vector<1x32xf32> to vector<256x32xf32>
    %258 = arith.mulf %255, %257 : vector<256x32xf32>
    %c0_152 = arith.constant 0 : index
    %c0_153 = arith.constant 0 : index
    %259 = vector.load %arg20[%c0_152, %c0_153] : memref<1x32xf32, #tpu.memory_space<vmem>>, vector<1x32xf32>
    %260 = vector.broadcast %259 : vector<1x32xf32> to vector<256x32xf32>
    %261 = arith.addf %258, %260 : vector<256x32xf32>
    %262 = vector.shape_cast %261 : vector<256x32xf32> to vector<4x64x32xf32>
    %c0_154 = arith.constant 0 : index
    %c0_155 = arith.constant 0 : index
    %c0_156 = arith.constant 0 : index
    %263 = vector.load %arg21[%c0_154, %c0_155, %c0_156] : memref<4x64x32xf32, #tpu.memory_space<vmem>>, vector<4x64x32xf32>
    tpu.vector_store %arg21[%c0_154, %c0_155, %c0_156], %262 {strides = array<i32>} : memref<4x64x32xf32, #tpu.memory_space<vmem>>, vector<4x64x32xf32>,
    return
  }
  func.func @transform_0(%arg0: i32) -> (i32, i32, i32) {
    %c0_i32 = arith.constant 0 : i32
    %c0_i32_0 = arith.constant 0 : i32
    %c0_i32_1 = arith.constant 0 : i32
    return %arg0, %c0_i32, %c0_i32_0 : i32, i32, i32
  }
  func.func @transform_1(%arg0: i32) -> (i32, i32, i32) {
    %c0_i32 = arith.constant 0 : i32
    %c0_i32_0 = arith.constant 0 : i32
    %c0_i32_1 = arith.constant 0 : i32
    return %arg0, %c0_i32, %c0_i32_0 : i32, i32, i32
  }
  func.func @transform_2(%arg0: i32) -> (i32, i32) {
    %c0_i32 = arith.constant 0 : i32
    %c0_i32_0 = arith.constant 0 : i32
    %c0_i32_1 = arith.constant 0 : i32
    return %c0_i32, %c0_i32_0 : i32, i32
  }
  func.func @transform_3(%arg0: i32) -> (i32, i32) {
    %c0_i32 = arith.constant 0 : i32
    %c0_i32_0 = arith.constant 0 : i32
    %c0_i32_1 = arith.constant 0 : i32
    return %c0_i32, %c0_i32_0 : i32, i32
  }
  func.func @transform_4(%arg0: i32) -> (i32, i32, i32) {
    %c0_i32 = arith.constant 0 : i32
    %c0_i32_0 = arith.constant 0 : i32
    %c0_i32_1 = arith.constant 0 : i32
    %c0_i32_2 = arith.constant 0 : i32
    return %c0_i32, %c0_i32_0, %c0_i32_1 : i32, i32, i32
  }
  func.func @transform_5(%arg0: i32) -> (i32, i32, i32) {
    %c0_i32 = arith.constant 0 : i32
    %c0_i32_0 = arith.constant 0 : i32
    %c0_i32_1 = arith.constant 0 : i32
    %c0_i32_2 = arith.constant 0 : i32
    return %c0_i32, %c0_i32_0, %c0_i32_1 : i32, i32, i32
  }
  func.func @transform_6(%arg0: i32) -> (i32, i32, i32) {
    %c0_i32 = arith.constant 0 : i32
    %c0_i32_0 = arith.constant 0 : i32
    %c0_i32_1 = arith.constant 0 : i32
    %c0_i32_2 = arith.constant 0 : i32
    return %c0_i32, %c0_i32_0, %c0_i32_1 : i32, i32, i32
  }
  func.func @transform_7(%arg0: i32) -> (i32, i32, i32) {
    %c0_i32 = arith.constant 0 : i32
    %c0_i32_0 = arith.constant 0 : i32
    %c0_i32_1 = arith.constant 0 : i32
    %c0_i32_2 = arith.constant 0 : i32
    return %c0_i32, %c0_i32_0, %c0_i32_1 : i32, i32, i32
  }
  func.func @transform_8(%arg0: i32) -> (i32, i32, i32) {
    %c0_i32 = arith.constant 0 : i32
    %c0_i32_0 = arith.constant 0 : i32
    %c0_i32_1 = arith.constant 0 : i32
    %c0_i32_2 = arith.constant 0 : i32
    return %c0_i32, %c0_i32_0, %c0_i32_1 : i32, i32, i32
  }
  func.func @transform_9(%arg0: i32) -> (i32, i32, i32) {
    %c0_i32 = arith.constant 0 : i32
    %c0_i32_0 = arith.constant 0 : i32
    %c0_i32_1 = arith.constant 0 : i32
    %c0_i32_2 = arith.constant 0 : i32
    return %c0_i32, %c0_i32_0, %c0_i32_1 : i32, i32, i32
  }
  func.func @transform_10(%arg0: i32) -> (i32, i32, i32) {
    %c0_i32 = arith.constant 0 : i32
    %c0_i32_0 = arith.constant 0 : i32
    %c0_i32_1 = arith.constant 0 : i32
    %c0_i32_2 = arith.constant 0 : i32
    return %c0_i32, %c0_i32_0, %c0_i32_1 : i32, i32, i32
  }
  func.func @transform_11(%arg0: i32) -> (i32, i32) {
    %c0_i32 = arith.constant 0 : i32
    %c0_i32_0 = arith.constant 0 : i32
    %c0_i32_1 = arith.constant 0 : i32
    return %c0_i32, %c0_i32_0 : i32, i32
  }
  func.func @transform_12(%arg0: i32) -> (i32, i32) {
    %c0_i32 = arith.constant 0 : i32
    %c0_i32_0 = arith.constant 0 : i32
    %c0_i32_1 = arith.constant 0 : i32
    return %c0_i32, %c0_i32_0 : i32, i32
  }
  func.func @transform_13(%arg0: i32) -> (i32, i32) {
    %c0_i32 = arith.constant 0 : i32
    %c0_i32_0 = arith.constant 0 : i32
    %c0_i32_1 = arith.constant 0 : i32
    return %c0_i32, %c0_i32_0 : i32, i32
  }
  func.func @transform_14(%arg0: i32) -> (i32, i32) {
    %c0_i32 = arith.constant 0 : i32
    %c0_i32_0 = arith.constant 0 : i32
    %c0_i32_1 = arith.constant 0 : i32
    return %c0_i32, %c0_i32_0 : i32, i32
  }
  func.func @transform_15(%arg0: i32) -> (i32, i32) {
    %c0_i32 = arith.constant 0 : i32
    %c0_i32_0 = arith.constant 0 : i32
    %c0_i32_1 = arith.constant 0 : i32
    return %c0_i32, %c0_i32_0 : i32, i32
  }
  func.func @transform_16(%arg0: i32) -> (i32, i32) {
    %c0_i32 = arith.constant 0 : i32
    %c0_i32_0 = arith.constant 0 : i32
    %c0_i32_1 = arith.constant 0 : i32
    return %c0_i32, %c0_i32_0 : i32, i32
  }
  func.func @transform_17(%arg0: i32) -> (i32, i32) {
    %c0_i32 = arith.constant 0 : i32
    %c0_i32_0 = arith.constant 0 : i32
    %c0_i32_1 = arith.constant 0 : i32
    return %c0_i32, %c0_i32_0 : i32, i32
  }
  func.func @transform_18(%arg0: i32) -> (i32, i32) {
    %c0_i32 = arith.constant 0 : i32
    %c0_i32_0 = arith.constant 0 : i32
    %c0_i32_1 = arith.constant 0 : i32
    return %c0_i32, %c0_i32_0 : i32, i32
  }
  func.func @transform_19(%arg0: i32) -> (i32, i32) {
    %c0_i32 = arith.constant 0 : i32
    %c0_i32_0 = arith.constant 0 : i32
    %c0_i32_1 = arith.constant 0 : i32
    return %c0_i32, %c0_i32_0 : i32, i32
  }
  func.func @transform_20(%arg0: i32) -> (i32, i32, i32) {
    %c0_i32 = arith.constant 0 : i32
    %c0_i32_0 = arith.constant 0 : i32
    %c0_i32_1 = arith.constant 0 : i32
    return %arg0, %c0_i32, %c0_i32_0 : i32, i32, i32
  }
}

</mosaic_0001>

<bundles_post_ra>
// kernel: tpu_custom_call.1
= control target key start
LH: loop header
LB: loop body
LE: loop exit
PB: predicated region body
PF: predicated region fallthrough
CT: control target
= control target key end

     0   :  { %s18970_s0 = inlined_call_operand.vmem [shape: f32[16,64,32], index: 0, kind: input, shape index: {}]   ;;  %s18971_s1 = inlined_call_operand.vmem [shape: f32[16,64,3], index: 1, kind: input, shape index: {}]   ;;  %s18972_s2 = inlined_call_operand.vmem [shape: f32[3,32], index: 2, kind: input, shape index: {}]   ;;  %s18973_s3 = inlined_call_operand.vmem [shape: f32[1,32], index: 3, kind: input, shape index: {}]   ;;  %s18974_s4 = inlined_call_operand.vmem [shape: f32[4,32,8], index: 4, kind: input, shape index: {}]   ;;  %s18975_s5 = inlined_call_operand.vmem [shape: f32[4,1,8], index: 5, kind: input, shape index: {}]   ;;  %s18976_s6 = inlined_call_operand.vmem [shape: f32[4,32,8], index: 6, kind: input, shape index: {}]   ;;  %s18977_s7 = inlined_call_operand.vmem [shape: f32[4,1,8], index: 7, kind: input, shape index: {}]   ;;  %s18978_s8 = inlined_call_operand.vmem [shape: f32[4,32,8], index: 8, kind: input, shape index: {}]   ;;  %s18979_s9 = inlined_call_operand.vmem [shape: f32[4,1,8], index: 9, kind: input, shape index: {}]   ;;  %s18980_s10 = inlined_call_operand.vmem [shape: f32[4,8,32], index: 10, kind: input, shape index: {}]   ;;  %s18981_s11 = inlined_call_operand.vmem [shape: f32[1,32], index: 11, kind: input, shape index: {}]   ;;  %s18982_s12 = inlined_call_operand.vmem [shape: f32[1,32], index: 12, kind: input, shape index: {}]   ;;  %s18983_s13 = inlined_call_operand.vmem [shape: f32[1,32], index: 13, kind: input, shape index: {}]   ;;  %s18984_s14 = inlined_call_operand.vmem [shape: f32[32,64], index: 14, kind: input, shape index: {}]   ;;  %s18985_s15 = inlined_call_operand.vmem [shape: f32[1,64], index: 15, kind: input, shape index: {}]   ;;  %s18986_s16 = inlined_call_operand.vmem [shape: f32[64,32], index: 16, kind: input, shape index: {}]   ;;  %s18987_s17 = inlined_call_operand.vmem [shape: f32[1,32], index: 17, kind: input, shape index: {}]   ;;  %s18988_s18 = inlined_call_operand.vmem [shape: f32[1,32], index: 18, kind: input, shape index: {}]   ;;  %s18989_s19 = inlined_call_operand.vmem [shape: f32[1,32], index: 19, kind: input, shape index: {}]   ;;  %s18990_s20 = inlined_call_operand.vmem [shape: f32[16,64,32], index: 20, kind: output, shape index: {}]  }
   0x1   :  { %19049 = sst [smem:[#allocation89_spill]] %s18970_s0 }
   0x2   :  { %19050 = sst [smem:[#allocation90_spill]] %s18971_s1  ;;  %s12109_s1 = smov 0  }
   0x3   :  { %19051 = sst [smem:[#allocation91_spill]] %s18972_s2 }
   0x4   :  { %19052 = sst [smem:[#allocation92_spill]] %s18973_s3 }
   0x5   :  { %19053 = sst [smem:[#allocation93_spill]] %s18974_s4 }
   0x6 LB: > { %s10082_s22 = sadd.s32 4294967295, %s11998_s1   ;;  %p10086_p0 = scmp.ge.s32.totalorder %s11998_s1, 1  ;;  %s11998_s1 = sphi %s12109_s1, %s30_s1  }
   0x7   : > { %p576_p1 = scmp.lt.s32.totalorder %s11998_s1, 5 }
   0x9   : > { %p577_p2 = pnand %p10086_p0, %p576_p1 }
   0xb   : > { %580 = sbr.rel (%p577_p2) target bundleno = 5208 (0x1458), region = 100 }
  0x10   : > { %s10087_s23 = sshll.u32 %s10082_s22, 2  ;;  %v18995_v0 = vmov 2   ;;  %v18993_v1 = vmov 1   ;;  %s19054_s3 = sld [smem:[#allocation90_spill]]  ;;  %v18994_v4 = vmov 0   ;;  %v12169_v20 = vld [vmem:[%s18976_s6 + $0x18] sm:$0xff] }
  0x11   : > { %11135 = vset.pattern.permute.xlu1 %v18995_v0  ;;  %11137 = vset.pattern.permute.xlu2 %v18993_v1  ;;  %p643_p3 = scmp.lt.s32.totalorder %s10087_s23, 15  ;;  %v12175_v22 = vld [vmem:[%s18976_s6 + $0x10] sm:$0xff]  ;;  %v12182_v23 = vld [vmem:[%s18976_s6 + $0x8] sm:$0xff]  ;;  %v12188_v24 = vld [vmem:[%s18976_s6] sm:$0xff]  ;;  %s19055_s25 = sld [smem:[#allocation91_spill]]  ;;  %vm1415_vm0 = vcmask 261120  }
  0x12   : > { %11133 = vset.pattern.permute.xlu0 %v18993_v1  ;;  %1741 = vmatpush.msra.mxu1 %v12169_v20  ;;  %s19056_s28 = sld [smem:[#allocation92_spill]]  ;;  %vm1963_vm1 = vcmask 64512   ;;  %vm2320_vm2 = vcmask 523264  }
  0x13   : > { %s19375_s23 = smov (!%p643_p3, %s10087_s23), 15  ;;  %s19057_s30 = sld [smem:[#allocation89_spill]] }
  0x14   : > { %s12120_s24 = sshll.u32 %s19375_s23, 6  ;;  %1742 = vmatpush.msra.mxu1 %v12175_v22  ;;  %s19058_s23 = sld [smem:[#allocation93_spill]] }
  0x15   : > { %s18370_s27 = scalar_lea.vmem %s18990_s20, %s12120_s24 }
  0x16   : > { %s12126_s26 = scalar_lea.vmem %s19054_s3, %s12120_s24  ;;  %1743 = vmatpush.msra.mxu1 %v12182_v23 }
  0x17   : > { %v696_v2 = vld [vmem:[%s12126_s26 + $0x8] sm:$0xff]  ;;  %v695_v3 = vld [vmem:[%s12126_s26] sm:$0xff]  ;;  %v697_v5 = vld [vmem:[%s12126_s26 + $0x10] sm:$0xff] }
  0x18   : > { %926 = vperm.xlu2 %11137, %v696_v2   ;;  %1115 = vperm.xlu1 %11135, %v695_v3   ;;  %v701_v6 = vld [vmem:[%s12126_s26 + $0x30] sm:$0xff]  ;;  %v698_v7 = vld [vmem:[%s12126_s26 + $0x18] sm:$0xff]  ;;  %v699_v9 = vld [vmem:[%s12126_s26 + $0x20] sm:$0xff] }
  0x19   : > { %922 = vperm.xlu0 %11133, %v695_v3   ;;  %v702_v8 = vld [vmem:[%s12126_s26 + $0x38] sm:$0xff]  ;;  %v700_v10 = vld [vmem:[%s12126_s26 + $0x28] sm:$0xff]  ;;  %v12148_v12 = vld [vmem:[%s12126_s26 + $0xd0] sm:$0xff]  ;;  %1744 = vmatpush.msra.mxu1 %v12188_v24  ;;  %s12222_s0 = scalar_lea.vmem %s19057_s30, %s12120_s24 }
  0x1a   : > { %v704_v11 = vld [vmem:[%s12126_s26 + $0x48] sm:$0xff]  ;;  %v719_v13 = vld [vmem:[%s12126_s26 + $0xc0] sm:$0xff]  ;;  %v12157_v15 = vld [vmem:[%s12126_s26 + $0xd8] sm:$0xff] }
  0x1b   : > { %v703_v14 = vld [vmem:[%s12126_s26 + $0x40] sm:$0xff]  ;;  %v706_v16 = vld [vmem:[%s12126_s26 + $0x58] sm:$0xff]  ;;  %v705_v18 = vld [vmem:[%s12126_s26 + $0x50] sm:$0xff] }
  0x1c   : > { %v720_v19 = vld [vmem:[%s12126_s26 + $0xc8] sm:$0xff]  ;;  %v727_v29 = vld [vmem:[%s19055_s25] sm:$0x7]  ;;  %v1410_v56 = vld [vmem:[%s19058_s23 + $0x18] sm:$0xff] }
  0x1d   : > { %v12198_v30 = vperm.slane %v727_v29, 1  ;;  %v12201_v31 = vperm.slane %v727_v29, 0  ;;  %v12203_v32 = vperm.slane %v727_v29, 2  ;;  %v12215_v41 = vld [vmem:[%s19056_s28] ss:$0 sm:$0xff]  ;;  %11109 = vmatpush.msra.mxu3 %v1410_v56  ;;  %v1409_v57 = vld [vmem:[%s19058_s23 + $0x10] sm:$0xff]  ;;  %1524 = vmatpush.msra.mxu0 %v1410_v56 }
  0x1e   : > { %v12230_v50 = vld [vmem:[%s12222_s0] sm:$0xff]  ;;  %v12248_v58 = vld [vmem:[%s12126_s26 + $0x70] sm:$0xff]  ;;  %v1408_v62 = vld [vmem:[%s19058_s23 + $0x8] sm:$0xff] }
  0x1f   : > { %v707_v52 = vld [vmem:[%s12126_s26 + $0x60] sm:$0xff]  ;;  %11110 = vmatpush.msra.mxu3 %v1409_v57  ;;  %1525 = vmatpush.msra.mxu0 %v1409_v57 }
  0x20   : > { %11138 = vset.pattern.permute.xlu2 %v18995_v0  ;;  %11136 = vset.pattern.permute.xlu1 %v18994_v4 }
  0x21   : > { %11134 = vset.pattern.permute.xlu0 %v18994_v4  ;;  %1119 = vperm.xlu2 %11138, %v696_v2  }
  0x22   : > { %735 = vperm.xlu1 %11136, %v696_v2   ;;  %730 = vperm.xlu0 %11134, %v695_v3   ;;  %v12257_v2 = vld [vmem:[%s12222_s0 + $0x8] sm:$0xff] }
  0x23   : > { %11111 = vmatpush.msra.mxu3 %v1408_v62  ;;  %1526 = vmatpush.msra.mxu0 %v1408_v62 }
  0x29   : > { %11139 = vset.pattern.permute.xlu2 %v18993_v1 }
  0x2a   : > { %740 = vperm.xlu1 %11136, %v697_v5   ;;  %760 = vperm.xlu0 %11134, %v701_v6  }
  0x2b   : > { %930 = vperm.xlu2 %11139, %v697_v5  }
  0x32   : > { %745 = vperm.xlu1 %11136, %v698_v7   ;;  %11144 = vset.pattern.permute.xlu0 %v18995_v0 }
  0x33   : > { %934 = vperm.xlu2 %11139, %v698_v7   ;;  %1123 = vperm.xlu0 %11144, %v697_v5   ;;  %v1407_v5 = vld [vmem:[%s19058_s23] sm:$0xff] }
  0x34   : > { %11112 = vmatpush.msra.mxu3 %v1407_v5  ;;  %1527 = vmatpush.msra.mxu0 %v1407_v5  ;;  %v12370_v5 = vld [vmem:[%s12222_s0 + $0xe0] sm:$0xff] }
  0x35   : > { %10096 = vmatmul.msk.f32.vlgmr.msra.gmra.mxu0 %vm1415_vm0, %v12230_v50 }
  0x36   : > { %11113 = vmatpush.msrb.mxu3 %v12169_v20 }
  0x38   : > { %11114 = vmatpush.msrb.mxu3 %v12175_v22 }
  0x3a   : > { %11140 = vset.pattern.permute.xlu1 %v18995_v0  ;;  %11115 = vmatpush.msrb.mxu3 %v12182_v23 }
  0x3b   : > { %11141 = vset.pattern.permute.xlu2 %v18994_v4  ;;  %1127 = vperm.xlu1 %11140, %v698_v7  }
  0x3c   : > { %1143 = vperm.xlu0 %11144, %v702_v8   ;;  %750 = vperm.xlu2 %11141, %v699_v9  }
  0x3d   : > { %11116 = vmatpush.msrb.mxu3 %v12188_v24  ;;  %10097 = vmatmul.msk.f32.gmra.mxu0 %vm1415_vm0, %v12257_v2 }
  0x43   : > { %1131 = vperm.xlu1 %11140, %v699_v9  }
  0x44   : > { %11147 = vset.pattern.permute.xlu0 %v18993_v1  ;;  %755 = vperm.xlu2 %11141, %v700_v10  }
  0x45   : > { %938 = vperm.xlu0 %11147, %v699_v9  }
  0x4b   : > { %11142 = vset.pattern.permute.xlu1 %v18993_v1 }
  0x4c   : > { %11143 = vset.pattern.permute.xlu2 %v18995_v0  ;;  %942 = vperm.xlu1 %11142, %v700_v10  }
  0x4d   : > { %1135 = vperm.xlu2 %11143, %v700_v10   ;;  %958 = vperm.xlu0 %11147, %v704_v11  }
  0x54   : > { %946 = vperm.xlu1 %11142, %v701_v6  }
  0x55   : > { %1139 = vperm.xlu2 %11143, %v701_v6   ;;  %1026 = vperm.xlu0 %11147, %v12148_v12  }
  0x5c   : > { %11145 = vset.pattern.permute.xlu1 %v18994_v4 }
  0x5d   : > { %11146 = vset.pattern.permute.xlu2 %v18993_v1  ;;  %765 = vperm.xlu1 %11145, %v702_v8  }
  0x5e   : > { %950 = vperm.xlu2 %11146, %v702_v8   ;;  %11158 = vset.pattern.permute.xlu0 %v18994_v4  ;;  %v12264_v8 = vld [vmem:[%s12222_s0 + $0xc0] sm:$0xff] }
  0x5f   : > { %850 = vperm.xlu0 %11158, %v719_v13   ;;  %10120 = vmatmul.msk.f32.vlgmr.msra.gmra.mxu3 %vm1415_vm0, %v12264_v8 }
  0x65   : > { %770 = vperm.xlu1 %11145, %v703_v14  }
  0x66   : > { %954 = vperm.xlu2 %11146, %v703_v14  }
  0x67   : > { %865 = vperm.xlu0 %11158, %v12157_v15  }
  0x6d   : > { %11148 = vset.pattern.permute.xlu1 %v18995_v0 }
  0x6e   : > { %11149 = vset.pattern.permute.xlu2 %v18994_v4  ;;  %1147 = vperm.xlu1 %11148, %v703_v14  }
  0x6f   : > { %775 = vperm.xlu2 %11149, %v704_v11   ;;  %11163 = vset.pattern.permute.xlu0 %v18995_v0 }
  0x70   : > { %1159 = vperm.xlu0 %11163, %v706_v16  }
  0x72   : > { %v927_v17 = vpop.permute.xlu2 %926 }
  0x73   : > { %v1051_v36 = vmul.f32 %v12198_v30, %v927_v17  ;;  %v12286_v17 = vld [vmem:[%s12222_s0 + $0x10] sm:$0xff] }
  0x74   : > { %10098 = vmatmul.msk.f32.gmra.mxu0 %vm1415_vm0, %v12286_v17 }
  0x76   : > { %1151 = vperm.xlu1 %11148, %v704_v11  }
  0x77   : > { %780 = vperm.xlu2 %11149, %v705_v18  }
  0x78   : > { %1215 = vperm.xlu0 %11163, %v720_v19  }
  0x7b   : > { %v1120_v21 = vpop.permute.xlu2 %1119 }
  0x7c   : > { %v1244_v44 = vmul.f32 %v12203_v32, %v1120_v21 }
  0x7e   : > { %11150 = vset.pattern.permute.xlu1 %v18993_v1 }
  0x7f   : > { %11151 = vset.pattern.permute.xlu2 %v18995_v0  ;;  %962 = vperm.xlu1 %11150, %v705_v18  }
  0x80   : > { %1155 = vperm.xlu2 %11151, %v705_v18   ;;  %1171 = vperm.xlu0 %11163, %v12248_v58  }
  0x85   : > { %v931_v25 = vpop.permute.xlu2 %930 }
  0x86   : > { %v1052_v59 = vmul.f32 %v12198_v30, %v931_v25 }
  0x87   : > { %1018 = vperm.xlu1 %11150, %v719_v13  }
  0x88   : > { %11152 = vset.pattern.permute.xlu2 %v18994_v4 }
  0x89   : > { %785 = vperm.xlu2 %11152, %v706_v16  }
  0x8a   : > { %v1116_v26 = vpop.permute.xlu1 %1115 }
  0x8b   : > { %v923_v27 = vpop.permute.xlu0 %922  ;;  %v1243_v40 = vmul.f32 %v12203_v32, %v1116_v26 }
  0x8c   : > { %v1050_v33 = vmul.f32 %v12198_v30, %v923_v27  ;;  %v12301_v27 = vld [vmem:[%s12222_s0 + $0xc8] sm:$0xff] }
  0x8d   : > { %v12193_v28 = vpop.permute.xlu2 %934  ;;  %10121 = vmatmul.msk.f32.gmra.mxu3 %vm1415_vm0, %v12301_v27 }
  0x8e   : > { %v1053_v18 = vmul.f32 %v12198_v30, %v12193_v28  ;;  %v708_v28 = vld [vmem:[%s12126_s26 + $0x68] sm:$0xff] }
  0x8f   : > { %966 = vperm.xlu1 %11150, %v706_v16  }
  0x91   : > { %11153 = vset.pattern.permute.xlu2 %v18995_v0 }
  0x92   : > { %1211 = vperm.xlu2 %11153, %v719_v13   ;;  %v12278_v13 = vld [vmem:[%s12126_s26 + $0xe0] sm:$0xff] }
  0x93   : > { %1227 = vperm.xlu0 %11163, %v12278_v13  }
  0x94   : > { %v736_v34 = vpop.permute.xlu1 %735  ;;  %v731_v35 = vpop.permute.xlu0 %730 }
  0x95   : > { %v890_v37 = vmul.f32 %v12201_v31, %v736_v34  ;;  %v889_v38 = vmul.f32 %v12201_v31, %v731_v35  ;;  %v12313_v34 = vld [vmem:[%s12222_s0 + $0x18] sm:$0xff] }
  0x96   : > { %v12209_v39 = vpop.permute.xlu2 %750  ;;  %10099 = vmatmul.msk.f32.gmra.mxu0 %vm1415_vm0, %v12313_v34 }
  0x97   : > { %v1083_v42 = vadd.f32 %v1051_v36, %v890_v37  ;;  %v1082_v43 = vadd.f32 %v1050_v33, %v889_v38  ;;  %11154 = vset.pattern.permute.xlu1 %v18994_v4  ;;  %v12322_v37 = vld [vmem:[%s12222_s0 + $0xd0] sm:$0xff] }
  0x98   : > { %855 = vperm.xlu1 %11154, %v720_v19   ;;  %10122 = vmatmul.msk.f32.gmra.mxu3 %vm1415_vm0, %v12322_v37 }
  0x99   : > { %v1275_v45 = vadd.f32 %v1243_v40, %v1082_v43  ;;  %v1276_v46 = vadd.f32 %v1244_v44, %v1083_v42  ;;  %v893_v40 = vmul.f32 %v12201_v31, %v12209_v39  ;;  %v12338_v39 = vld [vmem:[%s12222_s0 + $0xd8] sm:$0xff] }
  0x9a   : > { %11155 = vset.pattern.permute.xlu2 %v18993_v1 }
  0x9b   : > { %v1311_v47 = vadd.f32 %v12215_v41, %v1275_v45  ;;  %1022 = vperm.xlu2 %11155, %v720_v19   ;;  %v1312_v54 = vadd.f32 %v12215_v41, %v1276_v46  ;;  %11171 = vset.pattern.permute.xlu0 %v18993_v1 }
  0x9c   : > { %v741_v48 = vpop.permute.xlu1 %740  ;;  %v12227_v49 = vpop.permute.xlu0 %760 }
  0x9d   : > { %v1343_v51 = vmax.f32 %v1311_v47, 0.0  ;;  %v891_v60 = vmul.f32 %v12201_v31, %v741_v48  ;;  %v1344_v61 = vmax.f32 %v1312_v54, 0.0  ;;  %v12345_v54 = vld [vmem:[%s12222_s0 + $0x20] sm:$0xff] }
  0x9e   : > { %v12233_v53 = vpop.permute.xlu2 %755  ;;  %10100 = vmatmul.msk.f32.gmra.mxu0 %vm1415_vm0, %v12345_v54 }
  0x9f   : > { %v12237_v55 = vadd.f32 %v1343_v51, %v12230_v50  ;;  %v1084_v6 = vadd.f32 %v1052_v59, %v891_v60  ;;  %v12267_v9 = vadd.f32 %v1344_v61, %v12257_v2  ;;  %v894_v51 = vmul.f32 %v12201_v31, %v12233_v53 }
  0xa0   : > { %790 = vperm.xlu1 %11154, %v707_v52   ;;  %10123 = vmatmul.msk.f32.gmra.mxu3 %vm1415_vm0, %v12338_v39  ;;  %v895_v61 = vmul.f32 %v12201_v31, %v12227_v49  ;;  %v12377_v49 = vld [vmem:[%s12126_s26 + $0xe8] sm:$0xff] }
  0xa1   : > { %10128 = vmatmul.msk.f32.vlgmr.msra.gmra.mxu1 %vm1415_vm0, %v12237_v55  ;;  %1038 = vperm.xlu0 %11171, %v12377_v49  }
  0xa3   : > { %970 = vperm.xlu2 %11155, %v707_v52  }
  0xa4   : > { %v746_v63 = vpop.permute.xlu1 %745 }
  0xa5   : > { %v1124_v3 = vpop.permute.xlu0 %1123  ;;  %v892_v14 = vmul.f32 %v12201_v31, %v746_v63 }
  0xa6   : > { %v1245_v7 = vmul.f32 %v12203_v32, %v1124_v3  ;;  %v12366_v3 = vld [vmem:[%s12222_s0 + $0x28] sm:$0xff] }
  0xa7   : > { %v12269_v10 = vpop.permute.xlu2 %1135  ;;  %v1085_v21 = vadd.f32 %v1053_v18, %v892_v14  ;;  %10101 = vmatmul.msk.f32.gmra.mxu0 %vm1415_vm0, %v12366_v3 }
  0xa8   : > { %v1277_v11 = vadd.f32 %v1245_v7, %v1084_v6  ;;  %11156 = vset.pattern.permute.xlu1 %v18995_v0  ;;  %v1248_v57 = vmul.f32 %v12203_v32, %v12269_v10  ;;  %10124 = vmatmul.msk.f32.gmra.mxu3 %vm1415_vm0, %v12370_v5 }
  0xa9   : > { %1163 = vperm.xlu1 %11156, %v707_v52   ;;  %10129 = vmatmul.msk.f32.gmra.mxu1 %vm1415_vm0, %v12267_v9 }
  0xaa   : > { %v1313_v16 = vadd.f32 %v12215_v41, %v1277_v11  ;;  %11174 = vset.pattern.permute.xlu0 %v18994_v4 }
  0xab   : > { %11157 = vset.pattern.permute.xlu2 %v18994_v4 }
  0xac   : > { %v1345_v19 = vmax.f32 %v1313_v16, 0.0  ;;  %860 = vperm.xlu2 %11157, %v12148_v12  }
  0xad   : > { %v1128_v20 = vpop.permute.xlu1 %1127 }
  0xae   : > { %v1246_v22 = vmul.f32 %v12203_v32, %v1128_v20  ;;  %v12295_v25 = vpop.permute.xlu0 %1143  ;;  %v12298_v26 = vadd.f32 %v1345_v19, %v12286_v17 }
  0xaf   : > { %v1140_v29 = vpop.permute.xlu2 %1139 }
  0xb0   : > { %v1278_v23 = vadd.f32 %v1246_v22, %v1085_v21  ;;  %v1249_v10 = vmul.f32 %v12203_v32, %v1140_v29  ;;  %v12392_v21 = vld [vmem:[%s12222_s0 + $0x30] sm:$0xff]  ;;  %v12395_v22 = vld [vmem:[%s12222_s0 + $0xe8] sm:$0xff] }
  0xb1   : > { %11159 = vset.pattern.permute.xlu1 %v18994_v4  ;;  %10130 = vmatmul.msk.f32.gmra.mxu1 %vm1415_vm0, %v12298_v26 }
  0xb2   : > { %v1314_v33 = vadd.f32 %v12215_v41, %v1278_v23  ;;  %795 = vperm.xlu1 %11159, %v708_v28   ;;  %10125 = vmatmul.msk.f32.gmra.mxu3 %vm1415_vm0, %v12395_v22 }
  0xb3   : > { %10102 = vmatmul.msk.f32.gmra.mxu0 %vm1415_vm0, %v12392_v21 }
  0xb4   : > { %v1346_v24 = vmax.f32 %v1314_v33, 0.0  ;;  %11160 = vset.pattern.permute.xlu2 %v18993_v1 }
  0xb5   : > { %v1132_v35 = vpop.permute.xlu1 %1131  ;;  %974 = vperm.xlu2 %11160, %v708_v28  }
  0xb6   : > { %v12319_v36 = vadd.f32 %v1346_v24, %v12313_v34  ;;  %v1247_v44 = vmul.f32 %v12203_v32, %v1132_v35 }
  0xb7   : > { %v939_v38 = vpop.permute.xlu0 %938 }
  0xb8   : > { %v1054_v42 = vmul.f32 %v12198_v30, %v939_v38  ;;  %v951_v43 = vpop.permute.xlu2 %950 }
  0xb9   : > { %10131 = vmatmul.msk.f32.gmra.mxu1 %vm1415_vm0, %v12319_v36  ;;  %v1057_v20 = vmul.f32 %v12198_v30, %v951_v43 }
  0xba   : > { %v1086_v45 = vadd.f32 %v1054_v42, %v893_v40  ;;  %11161 = vset.pattern.permute.xlu1 %v18995_v0  ;;  %v12421_v42 = vld [vmem:[%s12222_s0 + $0x38] sm:$0xff] }
  0xbb   : > { %1219 = vperm.xlu1 %11161, %v12148_v12   ;;  %10103 = vmatmul.msk.f32.gmra.mxu0 %vm1415_vm0, %v12421_v42 }
  0xbc   : > { %v1279_v46 = vadd.f32 %v1247_v44, %v1086_v45 }
  0xbd   : > { %11162 = vset.pattern.permute.xlu2 %v18995_v0 }
  0xbe   : > { %v1315_v47 = vadd.f32 %v12215_v41, %v1279_v46  ;;  %v943_v48 = vpop.permute.xlu1 %942  ;;  %1167 = vperm.xlu2 %11162, %v708_v28   ;;  %v710_v46 = vld [vmem:[%s12126_s26 + $0x78] sm:$0xff] }
  0xbf   : > { %v1055_v52 = vmul.f32 %v12198_v30, %v943_v48  ;;  %v959_v44 = vpop.permute.xlu0 %958 }
  0xc0   : > { %v1347_v12 = vmax.f32 %v1315_v47, 0.0  ;;  %v12349_v56 = vpop.permute.xlu2 %954 }
  0xc1   : > { %v1087_v59 = vadd.f32 %v1055_v52, %v894_v51  ;;  %v12437_v51 = vld [vmem:[%s12222_s0 + $0xf8] sm:$0xff]  ;;  %v1058_v52 = vmul.f32 %v12198_v30, %v12349_v56 }
  0xc2   : > { %v12354_v60 = vadd.f32 %v1347_v12, %v12345_v54 }
  0xc3   : > { %v1280_v53 = vadd.f32 %v1248_v57, %v1087_v59  ;;  %11164 = vset.pattern.permute.xlu1 %v18993_v1 }
  0xc4   : > { %10132 = vmatmul.msk.f32.gmra.mxu1 %vm1415_vm0, %v12354_v60  ;;  %1030 = vperm.xlu1 %11164, %v12157_v15  }
  0xc5   : > { %v1316_v62 = vadd.f32 %v12215_v41, %v1280_v53 }
  0xc6   : > { %v947_v63 = vpop.permute.xlu1 %946  ;;  %11165 = vset.pattern.permute.xlu2 %v18994_v4 }
  0xc7   : > { %v1348_v6 = vmax.f32 %v1316_v62, 0.0  ;;  %v1056_v7 = vmul.f32 %v12198_v30, %v947_v63  ;;  %800 = vperm.xlu2 %11165, %v12248_v58   ;;  %v12446_v57 = vpop.permute.xlu0 %1026  ;;  %v1059_v63 = vmul.f32 %v12198_v30, %v959_v44 }
  0xc9   : > { %v1088_v11 = vadd.f32 %v1056_v7, %v895_v61  ;;  %v12381_v14 = vadd.f32 %v1348_v6, %v12366_v3  ;;  %v776_v16 = vpop.permute.xlu2 %775  ;;  %v12459_v7 = vld [vmem:[%s12222_s0 + $0x40] sm:$0xff] }
  0xca   : > { %v898_v56 = vmul.f32 %v12201_v31, %v776_v16  ;;  %10104 = vmatmul.msk.f32.gmra.mxu0 %vm1415_vm0, %v12459_v7 }
  0xcb   : > { %v1281_v18 = vadd.f32 %v1249_v10, %v1088_v11 }
  0xcc   : > { %10133 = vmatmul.msk.f32.gmra.mxu1 %vm1415_vm0, %v12381_v14  ;;  %978 = vperm.xlu1 %11164, %v12248_v58   ;;  %v1250_v58 = vmul.f32 %v12203_v32, %v12295_v25  ;;  %v12418_v25 = vld [vmem:[%s12222_s0 + $0xf0] sm:$0xff] }
  0xcd   : > { %v1317_v19 = vadd.f32 %v12215_v41, %v1281_v18  ;;  %10126 = vmatmul.msk.f32.gmra.mxu3 %vm1415_vm0, %v12418_v25  ;;  %v12462_v18 = vld [vmem:[%s12126_s26 + $0x80] sm:$0xff] }
  0xcf   : > { %v1349_v28 = vmax.f32 %v1317_v19, 0.0  ;;  %v766_v29 = vpop.permute.xlu1 %765  ;;  %11166 = vset.pattern.permute.xlu2 %v18995_v0  ;;  %v1091_v19 = vadd.f32 %v1059_v63, %v898_v56  ;;  %v12500_v56 = vld [vmem:[%s12222_s0 + $0x50] sm:$0xff] }
  0xd0   : > { %v896_v23 = vmul.f32 %v12201_v31, %v766_v29  ;;  %1223 = vperm.xlu2 %11166, %v12157_v15  }
  0xd1   : > { %v12405_v33 = vadd.f32 %v1349_v28, %v12392_v21  ;;  %v12407_v24 = vpop.permute.xlu2 %780  ;;  %v851_v28 = vpop.permute.xlu0 %850 }
  0xd2   : > { %v1089_v35 = vadd.f32 %v1057_v20, %v896_v23  ;;  %v899_v44 = vmul.f32 %v12201_v31, %v12407_v24 }
  0xd3   : > { %19059 = vst [vmem:[#allocation2_spill] sm:$0xff] %v12405_v33 }
  0xd4   : > { %v1282_v38 = vadd.f32 %v1250_v58, %v1089_v35  ;;  %10134 = vmatmul.msk.f32.gmra.mxu1 %vm1415_vm0, %v12405_v33  ;;  %11167 = vset.pattern.permute.xlu1 %v18994_v4  ;;  %v12479_v35 = vld [vmem:[%s12222_s0 + $0x48] sm:$0xff] }
  0xd5   : > { %870 = vperm.xlu1 %11167, %v12278_v13   ;;  %10127 = vmatmul.msk.f32.gmra.mxu3 %vm1415_vm0, %v12437_v51 }
  0xd6   : > { %v1318_v15 = vadd.f32 %v12215_v41, %v1282_v38  ;;  %10105 = vmatmul.msk.f32.gmra.mxu0 %vm1415_vm0, %v12479_v35 }
  0xd7   : > { %v771_v40 = vpop.permute.xlu1 %770 }
  0xd8   : > { %v1350_v43 = vmax.f32 %v1318_v15, 0.0  ;;  %11168 = vset.pattern.permute.xlu2 %v18993_v1  ;;  %v897_v48 = vmul.f32 %v12201_v31, %v771_v40 }
  0xd9   : > { %1034 = vperm.xlu2 %11168, %v12278_v13   ;;  %v12444_v13 = vld [vmem:[%s12126_s26 + $0xf8] sm:$0xff] }
  0xda   : > { %v12428_v45 = vadd.f32 %v1350_v43, %v12421_v42  ;;  %v1156_v47 = vpop.permute.xlu2 %1155  ;;  %885 = vperm.xlu0 %11174, %v12444_v13   ;;  %v1090_v59 = vadd.f32 %v1058_v52, %v897_v48  ;;  %v725_v43 = vld [vmem:[%s12126_s26 + $0xf0] sm:$0xff]  ;;  %v12494_v52 = vpop.permute.xlu0 %865 }
  0xdc   : > { %19060 = vst [vmem:[#allocation3_spill] sm:$0xff] %v12428_v45  ;;  %10135 = vmatmul.msk.f32.gmra.mxu1 %vm1415_vm0, %v12428_v45 }
  0xdd   : > { %805 = vperm.xlu1 %11167, %v710_v46  }
  0xde   : > { %10106 = vmatmul.msk.f32.gmra.mxu0 %vm1415_vm0, %v12500_v56 }
  0xe0   : > { %v1148_v12 = vpop.permute.xlu1 %1147 }
  0xe1   : > { %v1251_v53 = vmul.f32 %v12203_v32, %v1148_v12  ;;  %982 = vperm.xlu2 %11168, %v710_v46  }
  0xe2   : > { %11177 = vset.pattern.permute.xlu0 %v18995_v0 }
  0xe3   : > { %v1283_v61 = vadd.f32 %v1251_v53, %v1090_v59  ;;  %v12450_v62 = vpop.permute.xlu2 %785  ;;  %1179 = vperm.xlu0 %11177, %v12462_v18   ;;  %v913_v53 = vmul.f32 %v12201_v31, %v851_v28  ;;  %v1160_v28 = vpop.permute.xlu0 %1159 }
  0xe5   : > { %v1319_v6 = vadd.f32 %v12215_v41, %v1283_v61  ;;  %11169 = vset.pattern.permute.xlu1 %v18995_v0 }
  0xe6   : > { %1175 = vperm.xlu1 %11169, %v710_v46  }
  0xe7   : > { %v1351_v10 = vmax.f32 %v1319_v6, 0.0 }
  0xe8   : > { %v1152_v11 = vpop.permute.xlu1 %1151 }
  0xe9   : > { %v1252_v20 = vmul.f32 %v12203_v32, %v1152_v11  ;;  %v12467_v16 = vadd.f32 %v1351_v10, %v12459_v7  ;;  %11170 = vset.pattern.permute.xlu2 %v18994_v4 }
  0xea   : > { %875 = vperm.xlu2 %11170, %v12377_v49  }
  0xeb   : > { %19061 = vst [vmem:[#allocation4_spill] sm:$0xff] %v12467_v16  ;;  %v1284_v29 = vadd.f32 %v1252_v20, %v1091_v19  ;;  %10136 = vmatmul.msk.f32.gmra.mxu1 %vm1415_vm0, %v12467_v16  ;;  %11180 = vset.pattern.permute.xlu0 %v18993_v1 }
  0xec   : > { %v1212_v58 = vpop.permute.xlu2 %1211 }
  0xed   : > { %v1320_v23 = vadd.f32 %v12215_v41, %v1284_v29  ;;  %v1267_v63 = vmul.f32 %v12203_v32, %v1212_v58 }
  0xee   : > { %1231 = vperm.xlu1 %11169, %v12377_v49   ;;  %v1253_v49 = vmul.f32 %v12203_v32, %v1156_v47 }
  0xef   : > { %v1352_v38 = vmax.f32 %v1320_v23, 0.0  ;;  %v713_v23 = vld [vmem:[%s12126_s26 + $0x90] sm:$0xff] }
  0xf0   : > { %994 = vperm.xlu0 %11180, %v713_v23  }
  0xf1   : > { %v963_v15 = vpop.permute.xlu1 %962  ;;  %v12482_v40 = vadd.f32 %v1352_v38, %v12479_v35  ;;  %v900_v38 = vmul.f32 %v12201_v31, %v12450_v62 }
  0xf2   : > { %v1060_v46 = vmul.f32 %v12198_v30, %v963_v15  ;;  %880 = vperm.xlu2 %11170, %v725_v43  }
  0xf3   : > { %19062 = vst [vmem:[#allocation5_spill] sm:$0xff] %v12482_v40  ;;  %10137 = vmatmul.msk.f32.gmra.mxu1 %vm1415_vm0, %v12482_v40 }
  0xf4   : > { %v1092_v48 = vadd.f32 %v1060_v46, %v899_v44  ;;  %v1254_v44 = vmul.f32 %v12203_v32, %v1160_v28  ;;  %v12520_v46 = vld [vmem:[%s12222_s0 + $0x58] sm:$0xff]  ;;  %v712_v28 = vld [vmem:[%s12126_s26 + $0x88] sm:$0xff] }
  0xf5   : > { %v1023_v12 = vpop.permute.xlu2 %1022  ;;  %10107 = vmatmul.msk.f32.gmra.mxu0 %vm1415_vm0, %v12520_v46 }
  0xf6   : > { %v1285_v59 = vadd.f32 %v1253_v49, %v1092_v48  ;;  %11172 = vset.pattern.permute.xlu1 %v18993_v1 }
  0xf7   : > { %1042 = vperm.xlu1 %11172, %v725_v43  }
  0xf8   : > { %v1321_v24 = vadd.f32 %v12215_v41, %v1285_v59  ;;  %11183 = vset.pattern.permute.xlu0 %v18994_v4 }
  0xf9   : > { %v1019_v61 = vpop.permute.xlu1 %1018 }
  0xfa   : > { %v1353_v6 = vmax.f32 %v1321_v24, 0.0  ;;  %v1074_v47 = vmul.f32 %v12198_v30, %v1019_v61  ;;  %11173 = vset.pattern.permute.xlu2 %v18995_v0 }
  0xfb   : > { %1235 = vperm.xlu2 %11173, %v725_v43  }
  0xfc   : > { %v1106_v10 = vadd.f32 %v1074_v47, %v913_v53  ;;  %v12508_v11 = vadd.f32 %v1353_v6, %v12500_v56  ;;  %v1075_v53 = vmul.f32 %v12198_v30, %v1023_v12  ;;  %v12537_v6 = vld [vmem:[%s12222_s0 + $0x60] sm:$0xff] }
  0xfd   : > { %v971_v19 = vpop.permute.xlu2 %970  ;;  %10108 = vmatmul.msk.f32.gmra.mxu0 %vm1415_vm0, %v12537_v6 }
  0xfe   : > { %19063 = vst [vmem:[#allocation6_spill] sm:$0xff] %v12508_v11  ;;  %v1299_v20 = vadd.f32 %v1267_v63, %v1106_v10  ;;  %10138 = vmatmul.msk.f32.gmra.mxu1 %vm1415_vm0, %v12508_v11 }
  0xff   : > { %1046 = vperm.xlu1 %11172, %v12444_v13  }
 0x100   : > { %v1335_v29 = vadd.f32 %v12215_v41, %v1299_v20 }
 0x101   : > { %v967_v58 = vpop.permute.xlu1 %966 }
 0x102   : > { %v1367_v15 = vmax.f32 %v1335_v29, 0.0  ;;  %v1061_v43 = vmul.f32 %v12198_v30, %v967_v58 }
 0x103   : > { %1239 = vperm.xlu2 %11173, %v12444_v13   ;;  %v1216_v13 = vpop.permute.xlu0 %1215 }
 0x104   : > { %v1093_v49 = vadd.f32 %v1061_v43, %v900_v38  ;;  %v12526_v48 = vadd.f32 %v1367_v15, %v12264_v8  ;;  %v1268_v10 = vmul.f32 %v12203_v32, %v1216_v13  ;;  %v12554_v43 = vld [vmem:[%s12222_s0 + $0x68] sm:$0xff]  ;;  %v1062_v13 = vmul.f32 %v12198_v30, %v971_v19 }
 0x105   : > { %10109 = vmatmul.msk.f32.gmra.mxu0 %vm1415_vm0, %v12554_v43 }
 0x106   : > { %19064 = vst [vmem:[#allocation7_spill] sm:$0xff] %v12526_v48  ;;  %v1286_v59 = vadd.f32 %v1254_v44, %v1093_v49  ;;  %10152 = vmatmul.msk.f32.vlgmr.msrb.gmra.mxu3 %vm1415_vm0, %v12526_v48  ;;  %v12530_v62 = vpop.permute.xlu2 %860  ;;  %v12557_v44 = vld [vmem:[%s12126_s26 + $0xa0] sm:$0xff] }
 0x107   : > { %11175 = vset.pattern.permute.xlu1 %v18994_v4  ;;  %830 = vperm.xlu0 %11183, %v12557_v44  }
 0x108   : > { %v1322_v24 = vadd.f32 %v12215_v41, %v1286_v59  ;;  %810 = vperm.xlu1 %11175, %v12462_v18  }
 0x10a   : > { %v1354_v61 = vmax.f32 %v1322_v24, 0.0  ;;  %v856_v63 = vpop.permute.xlu1 %855 }
 0x10b   : > { %v914_v47 = vmul.f32 %v12201_v31, %v856_v63  ;;  %11176 = vset.pattern.permute.xlu2 %v18993_v1 }
 0x10c   : > { %v12546_v20 = vadd.f32 %v1354_v61, %v12520_v46  ;;  %986 = vperm.xlu2 %11176, %v12462_v18   ;;  %v12571_v61 = vld [vmem:[%s12126_s26 + $0xa8] sm:$0xff] }
 0x10d   : > { %v1107_v12 = vadd.f32 %v1075_v53, %v914_v47 }
 0x10e   : > { %19065 = vst [vmem:[#allocation8_spill] sm:$0xff] %v12546_v20  ;;  %10139 = vmatmul.msk.f32.gmra.mxu1 %vm1415_vm0, %v12546_v20 }
 0x10f   : > { %v1300_v29 = vadd.f32 %v1268_v10, %v1107_v12  ;;  %v975_v58 = vpop.permute.xlu2 %974  ;;  %11186 = vset.pattern.permute.xlu0 %v18995_v0 }
 0x110   : > { %815 = vperm.xlu1 %11175, %v712_v28   ;;  %1199 = vperm.xlu0 %11186, %v12571_v61  }
 0x111   : > { %v1336_v38 = vadd.f32 %v12215_v41, %v1300_v29 }
 0x112   : > { %v791_v15 = vpop.permute.xlu1 %790 }
 0x113   : > { %v1368_v49 = vmax.f32 %v1336_v38, 0.0  ;;  %v901_v59 = vmul.f32 %v12201_v31, %v791_v15  ;;  %v1063_v38 = vmul.f32 %v12198_v30, %v975_v58  ;;  %v12596_v58 = vld [vmem:[%s12222_s0 + $0x70] sm:$0xff] }
 0x114   : > { %990 = vperm.xlu2 %11176, %v712_v28   ;;  %10110 = vmatmul.msk.f32.gmra.mxu0 %vm1415_vm0, %v12596_v58 }
 0x115   : > { %v12563_v18 = vadd.f32 %v1368_v49, %v12301_v27  ;;  %v1094_v63 = vadd.f32 %v1062_v13, %v901_v59  ;;  %v714_v59 = vld [vmem:[%s12126_s26 + $0x98] sm:$0xff] }
 0x117   : > { %19066 = vst [vmem:[#allocation9_spill] sm:$0xff] %v12563_v18  ;;  %10153 = vmatmul.msk.f32.gmra.mxu3 %vm1415_vm0, %v12563_v18 }
 0x118   : > { %11178 = vset.pattern.permute.xlu1 %v18995_v0  ;;  %v1168_v24 = vpop.permute.xlu2 %1167  ;;  %11189 = vset.pattern.permute.xlu0 %v18993_v1 }
 0x119   : > { %1183 = vperm.xlu1 %11178, %v712_v28  }
 0x11b   : > { %v1164_v53 = vpop.permute.xlu1 %1163 }
 0x11c   : > { %v1255_v47 = vmul.f32 %v12203_v32, %v1164_v53  ;;  %11179 = vset.pattern.permute.xlu2 %v18994_v4  ;;  %v1256_v53 = vmul.f32 %v12203_v32, %v1168_v24 }
 0x11d   : > { %820 = vperm.xlu2 %11179, %v713_v23  }
 0x11e   : > { %v1287_v10 = vadd.f32 %v1255_v47, %v1094_v63  ;;  %v12577_v12 = vpop.f32.mrf.mxu1 }
 0x120   : > { %v1323_v28 = vadd.f32 %v12215_v41, %v1287_v10  ;;  %v915_v10 = vmul.f32 %v12201_v31, %v12530_v62 }
 0x121   : > { %1187 = vperm.xlu1 %11178, %v713_v23   ;;  %v12580_v19 = vpop.permute.xlu2 %800 }
 0x122   : > { %v1355_v29 = vmax.f32 %v1323_v28, 0.0 }
 0x124   : > { %v796_v15 = vpop.permute.xlu1 %795  ;;  %v12584_v49 = vadd.f32 %v1355_v29, %v12537_v6  ;;  %v1076_v29 = vmul.f32 %v12198_v30, %v12446_v57  ;;  %v12617_v57 = vld [vmem:[%s12126_s26 + $0xb8] sm:$0xff] }
 0x125   : > { %v902_v13 = vmul.f32 %v12201_v31, %v796_v15  ;;  %825 = vperm.xlu2 %11179, %v714_v59   ;;  %1014 = vperm.xlu0 %11189, %v12617_v57  }
 0x126   : > { %19067 = vst [vmem:[#allocation10_spill] sm:$0xff] %v12584_v49  ;;  %v12590_v63 = vpop.f32.mrf.mxu1  ;;  %10140 = vmatmul.msk.f32.gmra.mxu1 %vm1415_vm0, %v12584_v49 }
 0x127   : > { %v1095_v23 = vadd.f32 %v1063_v38, %v902_v13  ;;  %v1108_v13 = vadd.f32 %v1076_v29, %v915_v10  ;;  %v1844_v29 = vld [vmem:[%s18978_s8 + $0x10] sm:$0xff] }
 0x129   : > { %v1288_v47 = vadd.f32 %v1256_v53, %v1095_v23  ;;  %11181 = vset.pattern.permute.xlu1 %v18993_v1 }
 0x12a   : > { %998 = vperm.xlu1 %11181, %v714_v59   ;;  %v1224_v28 = vpop.permute.xlu2 %1223 }
 0x12b   : > { %v1324_v24 = vadd.f32 %v12215_v41, %v1288_v47 }
 0x12d   : > { %v1356_v38 = vmax.f32 %v1324_v24, 0.0  ;;  %v1220_v15 = vpop.permute.xlu1 %1219  ;;  %11182 = vset.pattern.permute.xlu2 %v18995_v0  ;;  %11190 = vset.pattern.permute.xlu0 %v18995_v0 }
 0x12e   : > { %v1269_v53 = vmul.f32 %v12203_v32, %v1220_v15  ;;  %1191 = vperm.xlu2 %11182, %v714_v59   ;;  %v12607_v62 = vpop.f32.mrf.mxu1  ;;  %v1845_v59 = vld [vmem:[%s18978_s8 + $0x18] sm:$0xff]  ;;  %v916_v15 = vmul.f32 %v12201_v31, %v12494_v52 }
 0x12f   : > { %v12610_v23 = vadd.f32 %v1356_v38, %v12554_v43  ;;  %11117 = vmatpush.msra.mxu3 %v1845_v59  ;;  %1862 = vmatpush.msra.mxu2 %v1845_v59 }
 0x130   : > { %v1301_v1 = vadd.f32 %v1269_v53, %v1108_v13  ;;  %v1270_v53 = vmul.f32 %v12203_v32, %v1224_v28  ;;  %v1172_v28 = vpop.permute.xlu0 %1171 }
 0x131   : > { %19068 = vst [vmem:[#allocation11_spill] sm:$0xff] %v12610_v23  ;;  %10141 = vmatmul.msk.f32.gmra.mxu1 %vm1415_vm0, %v12610_v23  ;;  %11118 = vmatpush.msra.mxu3 %v1844_v29  ;;  %v1257_v0 = vmul.f32 %v12203_v32, %v1172_v28 }
 0x132   : > { %v1337_v47 = vadd.f32 %v12215_v41, %v1301_v1  ;;  %1002 = vperm.xlu1 %11181, %v12557_v44   ;;  %1863 = vmatpush.msra.mxu2 %v1844_v29 }
 0x133   : > { %v1035_v24 = vpop.permute.xlu2 %1034 }
 0x134   : > { %v1369_v10 = vmax.f32 %v1337_v47, 0.0  ;;  %v1078_v28 = vmul.f32 %v12198_v30, %v1035_v24 }
 0x136   : > { %v1031_v38 = vpop.permute.xlu1 %1030  ;;  %v12627_v1 = vadd.f32 %v1369_v10, %v12322_v37  ;;  %1195 = vperm.xlu2 %11182, %v12557_v44   ;;  %v12636_v59 = vpop.f32.mrf.mxu1  ;;  %v1843_v10 = vld [vmem:[%s18978_s8 + $0x8] sm:$0xff]  ;;  %v1842_v44 = vld [vmem:[%s18978_s8] sm:$0xff] }
 0x137   : > { %v1077_v13 = vmul.f32 %v12198_v30, %v1031_v38  ;;  %11119 = vmatpush.msra.mxu3 %v1843_v10  ;;  %1864 = vmatpush.msra.mxu2 %v1843_v10 }
 0x138   : > { %19069 = vst [vmem:[#allocation12_spill] sm:$0xff] %v12627_v1  ;;  %10154 = vmatmul.msk.f32.gmra.mxu3 %vm1415_vm0, %v12627_v1 }
 0x139   : > { %v1109_v47 = vadd.f32 %v1077_v13, %v916_v15  ;;  %11120 = vmatpush.msra.mxu3 %v1842_v44  ;;  %1865 = vmatpush.msra.mxu2 %v1842_v44  ;;  %v19070_v13 = vmov 1  }
 0x13a   : > { %11184 = vset.pattern.permute.xlu1 %v18994_v4  ;;  %10160 = vmatmul.msk.f32.vlgmr.msra.gmra.mxu2 %vm1415_vm0, %v12230_v50  ;;  %v717_v4 = vld [vmem:[%s12126_s26 + $0xb0] sm:$0xff] }
 0x13b   : > { %v1302_v52 = vadd.f32 %v1270_v53, %v1109_v47  ;;  %835 = vperm.xlu1 %11184, %v12571_v61   ;;  %v983_v38 = vpop.permute.xlu2 %982  ;;  %v903_v53 = vmul.f32 %v12201_v31, %v12580_v19  ;;  %v1228_v19 = vpop.permute.xlu0 %1227 }
 0x13d   : > { %v1338_v29 = vadd.f32 %v12215_v41, %v1302_v52 }
 0x13e   : > { %v979_v15 = vpop.permute.xlu1 %978  ;;  %11185 = vset.pattern.permute.xlu2 %v19070_v13  ;;  %v12663_v13 = vld [vmem:[%s12222_s0 + $0x78] sm:$0xff] }
 0x13f   : > { %v1370_v47 = vmax.f32 %v1338_v29, 0.0  ;;  %v1064_v10 = vmul.f32 %v12198_v30, %v979_v15  ;;  %1006 = vperm.xlu2 %11185, %v12571_v61   ;;  %10111 = vmatmul.msk.f32.gmra.mxu0 %vm1415_vm0, %v12663_v13 }
 0x141   : > { %v1096_v52 = vadd.f32 %v1064_v10, %v903_v53  ;;  %v12657_v1 = vpop.f32.mrf.mxu1  ;;  %v12660_v44 = vadd.f32 %v1370_v47, %v12338_v39 }
 0x142   : > { %10161 = vmatmul.msk.f32.gmra.mxu2 %vm1415_vm0, %v12257_v2 }
 0x143   : > { %19071 = vst [vmem:[#allocation13_spill] sm:$0xff] %v12660_v44  ;;  %v1289_v50 = vadd.f32 %v1257_v0, %v1096_v52  ;;  %840 = vperm.xlu1 %11184, %v717_v4   ;;  %10155 = vmatmul.msk.f32.gmra.mxu3 %vm1415_vm0, %v12660_v44  ;;  %v1271_v52 = vmul.f32 %v12203_v32, %v1228_v19 }
 0x144   : > { %v876_v53 = vpop.permute.xlu2 %875 }
 0x145   : > { %v1325_v61 = vadd.f32 %v12215_v41, %v1289_v50  ;;  %v19073_v50 = vmov 2  }
 0x147   : > { %v1357_v29 = vmax.f32 %v1325_v61, 0.0  ;;  %v871_v15 = vpop.permute.xlu1 %870  ;;  %1010 = vperm.xlu2 %11185, %v717_v4  }
 0x148   : > { %v917_v47 = vmul.f32 %v12201_v31, %v871_v15  ;;  %v19074_v15 = vmov 0  }
 0x149   : > { %v1761_v10 = vpop.f32.mrf.mxu1  ;;  %v12675_v0 = vadd.f32 %v1357_v29, %v12596_v58 }
 0x14a   : > { %v1110_v44 = vadd.f32 %v1078_v28, %v917_v47  ;;  %10162 = vmatmul.msk.f32.gmra.mxu2 %vm1415_vm0, %v12286_v17  ;;  %v1065_v17 = vmul.f32 %v12198_v30, %v983_v38 }
 0x14b   : > { %19072 = vst [vmem:[#allocation14_spill] sm:$0xff] %v12675_v0  ;;  %11187 = vset.pattern.permute.xlu1 %v19073_v50  ;;  %10142 = vmatmul.msk.f32.gmra.mxu1 %vm1415_vm0, %v12675_v0 }
 0x14c   : > { %v1303_v24 = vadd.f32 %v1271_v52, %v1110_v44  ;;  %1203 = vperm.xlu1 %11187, %v717_v4   ;;  %v881_v28 = vpop.permute.xlu2 %880  ;;  %v12699_v44 = vld [vmem:[%s18977_s7] ss:$0 sm:$0xff] }
 0x14e   : > { %v1339_v2 = vadd.f32 %v12215_v41, %v1303_v24 }
 0x14f   : > { %v806_v61 = vpop.permute.xlu1 %805  ;;  %11188 = vset.pattern.permute.xlu2 %v19074_v15  ;;  %v1039_v15 = vpop.permute.xlu0 %1038 }
 0x150   : > { %v1371_v29 = vmax.f32 %v1339_v2, 0.0  ;;  %845 = vperm.xlu2 %11188, %v12617_v57   ;;  %v904_v4 = vmul.f32 %v12201_v31, %v806_v61 }
 0x151   : > { %v1764_v19 = vpop.f32.mrf.mxu1 }
 0x152   : > { %v12687_v47 = vadd.f32 %v1371_v29, %v12370_v5  ;;  %10163 = vmatmul.msk.f32.gmra.mxu2 %vm1415_vm0, %v12313_v34  ;;  %v1097_v50 = vadd.f32 %v1065_v17, %v904_v4  ;;  %v918_v34 = vmul.f32 %v12201_v31, %v876_v53  ;;  %v1765_v18 = vadd.f32 %v12699_v44, %v1764_v19 }
 0x153   : > { %v1762_v53 = vadd.f32 %v12699_v44, %v1761_v10 }
 0x154   : > { %19075 = vst [vmem:[#allocation15_spill] sm:$0xff] %v12687_v47  ;;  %1207 = vperm.xlu1 %11187, %v12617_v57   ;;  %10156 = vmatmul.msk.f32.gmra.mxu3 %vm1415_vm0, %v12687_v47  ;;  %v1079_v47 = vmul.f32 %v12198_v30, %v1039_v15  ;;  %v1756_v15 = vadd.f32 %v12699_v44, %v12636_v59 }
 0x155   : > { %v1236_v29 = vpop.permute.xlu2 %1235 }
 0x158   : > { %v1176_v52 = vpop.permute.xlu1 %1175 }
 0x159   : > { %v1258_v24 = vmul.f32 %v12203_v32, %v1176_v52  ;;  %v1767_v57 = vpop.f32.mrf.mxu1  ;;  %v1111_v52 = vadd.f32 %v1079_v47, %v918_v34  ;;  %v1273_v34 = vmul.f32 %v12203_v32, %v1236_v29 }
 0x15a   : > { %v1768_v2 = vadd.f32 %v12699_v44, %v1767_v57  ;;  %10164 = vmatmul.msk.f32.gmra.mxu2 %vm1415_vm0, %v12345_v54 }
 0x15b   : > { %v1290_v61 = vadd.f32 %v1258_v24, %v1097_v50 }
 0x15c   : > { %10192 = vmatpush.xpose.msk.msrb.mxu3 %vm1963_vm1, %v1768_v2 }
 0x15d   : > { %v1326_v38 = vadd.f32 %v12215_v41, %v1290_v61  ;;  %v1240_v19 = vpop.permute.xlu2 %1239  ;;  %v919_v61 = vmul.f32 %v12201_v31, %v881_v28 }
 0x15f   : > { %v1358_v4 = vmax.f32 %v1326_v38, 0.0 }
 0x160   : > { %v1232_v17 = vpop.permute.xlu1 %1231  ;;  %10193 = vmatpush.xpose.msk.msrb.mxu3 %vm1963_vm1, %v1765_v18  ;;  %v1759_v18 = vadd.f32 %v12699_v44, %v12657_v1  ;;  %v886_v1 = vpop.permute.xlu0 %885 }
 0x161   : > { %v1272_v50 = vmul.f32 %v12203_v32, %v1232_v17  ;;  %v12713_v24 = vadd.f32 %v1358_v4, %v12663_v13  ;;  %v1753_v17 = vadd.f32 %v12699_v44, %v12607_v62  ;;  %v920_v28 = vmul.f32 %v12201_v31, %v886_v1 }
 0x162   : > { %10165 = vmatmul.msk.f32.gmra.mxu2 %vm1415_vm0, %v12366_v3  ;;  %v1274_v62 = vmul.f32 %v12203_v32, %v1240_v19  ;;  %v12762_v19 = vpop.f32.mrf.mxu3 }
 0x163   : > { %19076 = vst [vmem:[#allocation16_spill] sm:$0xff] %v12713_v24  ;;  %v1304_v57 = vadd.f32 %v1272_v50, %v1111_v52  ;;  %10143 = vmatmul.msk.f32.gmra.mxu1 %vm1415_vm0, %v12713_v24  ;;  %v1750_v50 = vadd.f32 %v12699_v44, %v12590_v63 }
 0x164   : > { %10194 = vmatpush.xpose.msk.msrb.mxu3 %vm1963_vm1, %v1762_v53 }
 0x165   : > { %v1340_v54 = vadd.f32 %v12215_v41, %v1304_v57 }
 0x166   : > { %v987_v4 = vpop.permute.xlu2 %986 }
 0x167   : > { %v1372_v47 = vmax.f32 %v1340_v54, 0.0 }
 0x168   : > { %10195 = vmatpush.xpose.msk.msrb.mxu3 %vm1963_vm1, %v1759_v18  ;;  %v1747_v18 = vadd.f32 %v12699_v44, %v12577_v12  ;;  %v1180_v12 = vpop.permute.xlu0 %1179 }
 0x169   : > { %v1043_v2 = vpop.permute.xlu1 %1042  ;;  %v12726_v10 = vadd.f32 %v1372_v47, %v12395_v22 }
 0x16a   : > { %v1080_v38 = vmul.f32 %v12198_v30, %v1043_v2  ;;  %10166 = vmatmul.msk.f32.gmra.mxu2 %vm1415_vm0, %v12392_v21  ;;  %v12756_v2 = vld [vmem:[%s12222_s0 + $0x80] sm:$0xff] }
 0x16b   : > { %19077 = vst [vmem:[#allocation17_spill] sm:$0xff] %v12726_v10  ;;  %10157 = vmatmul.msk.f32.gmra.mxu3 %vm1415_vm0, %v12726_v10  ;;  %10112 = vmatmul.msk.f32.gmra.mxu0 %vm1415_vm0, %v12756_v2 }
 0x16c   : > { %v1112_v3 = vadd.f32 %v1080_v38, %v919_v61  ;;  %10196 = vmatpush.xpose.msk.msrb.mxu3 %vm1963_vm1, %v1756_v15  ;;  %v1066_v61 = vmul.f32 %v12198_v30, %v987_v4 }
 0x16e   : > { %v1305_v52 = vadd.f32 %v1273_v34, %v1112_v3  ;;  %v991_v63 = vpop.permute.xlu2 %990 }
 0x170   : > { %v1341_v59 = vadd.f32 %v12215_v41, %v1305_v52  ;;  %10197 = vmatpush.xpose.msk.msrb.mxu3 %vm1963_vm1, %v1753_v17 }
 0x171   : > { %v1047_v29 = vpop.permute.xlu1 %1046 }
 0x172   : > { %v1373_v53 = vmax.f32 %v1341_v59, 0.0  ;;  %v1081_v57 = vmul.f32 %v12198_v30, %v1047_v29  ;;  %10167 = vmatmul.msk.f32.gmra.mxu2 %vm1415_vm0, %v12421_v42  ;;  %v1259_v42 = vmul.f32 %v12203_v32, %v1180_v12  ;;  %v12777_v59 = vld [vmem:[%s12222_s0 + $0x88] sm:$0xff]  ;;  %v12782_v29 = vpop.f32.mrf.mxu3 }
 0x173   : > { %10113 = vmatmul.msk.f32.gmra.mxu0 %vm1415_vm0, %v12777_v59 }
 0x174   : > { %v1113_v54 = vadd.f32 %v1081_v57, %v920_v28  ;;  %10198 = vmatpush.xpose.msk.msrb.mxu3 %vm1963_vm1, %v1750_v50  ;;  %v12749_v21 = vadd.f32 %v1373_v53, %v12418_v25 }
 0x176   : > { %19078 = vst [vmem:[#allocation18_spill] sm:$0xff] %v12749_v21  ;;  %v1306_v47 = vadd.f32 %v1274_v62, %v1113_v54  ;;  %10158 = vmatmul.msk.f32.gmra.mxu3 %vm1415_vm0, %v12749_v21 }
 0x177   : > { %v821_v28 = vpop.permute.xlu2 %820 }
 0x178   : > { %v1342_v15 = vadd.f32 %v12215_v41, %v1306_v47  ;;  %10199 = vmatpush.xpose.msk.msrb.mxu3 %vm1963_vm1, %v1747_v18  ;;  %v995_v18 = vpop.permute.xlu0 %994 }
 0x17a   : > { %v1374_v34 = vmax.f32 %v1342_v15, 0.0  ;;  %v811_v38 = vpop.permute.xlu1 %810  ;;  %10168 = vmatmul.msk.f32.gmra.mxu2 %vm1415_vm0, %v12459_v7  ;;  %v1067_v7 = vmul.f32 %v12198_v30, %v991_v63  ;;  %v12800_v12 = vpop.f32.mrf.mxu3 }
 0x17b   : > { %v905_v3 = vmul.f32 %v12201_v31, %v811_v38  ;;  %v12815_v38 = vld [vmem:[%s19056_s28] ss:$0 sm:$0xff] }
 0x17c   : > { %v12770_v1 = vadd.f32 %v1374_v34, %v12437_v51  ;;  %v12810_v34 = vld [vmem:[%s12222_s0 + $0x98] sm:$0xff] }
 0x17d   : > { %v1098_v17 = vadd.f32 %v1066_v61, %v905_v3  ;;  %v1068_v61 = vmul.f32 %v12198_v30, %v995_v18 }
 0x17e   : > { %19079 = vst [vmem:[#allocation19_spill] sm:$0xff] %v12770_v1  ;;  %10159 = vmatmul.msk.f32.gmra.mxu3 %vm1415_vm0, %v12770_v1 }
 0x17f   : > { %v1291_v52 = vadd.f32 %v1259_v42, %v1098_v17  ;;  %v826_v15 = vpop.permute.xlu2 %825 }
 0x181   : > { %v1327_v4 = vadd.f32 %v12215_v41, %v1291_v52  ;;  %v12796_v41 = vld [vmem:[%s12222_s0 + $0x90] sm:$0xff] }
 0x182   : > { %v816_v50 = vpop.permute.xlu1 %815  ;;  %10169 = vmatmul.msk.f32.gmra.mxu2 %vm1415_vm0, %v12479_v35  ;;  %10114 = vmatmul.msk.f32.gmra.mxu0 %vm1415_vm0, %v12796_v41  ;;  %v907_v35 = vmul.f32 %v12201_v31, %v821_v28  ;;  %v12824_v28 = vpop.f32.mrf.mxu3 }
 0x183   : > { %v1359_v53 = vmax.f32 %v1327_v4, 0.0  ;;  %v906_v62 = vmul.f32 %v12201_v31, %v816_v50 }
 0x184   : > { %v1100_v42 = vadd.f32 %v1068_v61, %v907_v35  ;;  %v12849_v35 = vld [vmem:[%s12222_s0 + $0xa8] sm:$0xff]  ;;  %v831_v61 = vpop.permute.xlu0 %830 }
 0x185   : > { %v12785_v57 = vadd.f32 %v1359_v53, %v12756_v2  ;;  %v1099_v54 = vadd.f32 %v1067_v7, %v906_v62  ;;  %v12831_v53 = vld [vmem:[%s12222_s0 + $0xa0] sm:$0xff] }
 0x186   : > { %10184 = vmatmul.msk.f32.vlgmr.msra.gmra.mxu3 %vm1415_vm0, %v12264_v8 }
 0x187   : > { %19080 = vst [vmem:[#allocation20_spill] sm:$0xff] %v12785_v57  ;;  %10144 = vmatmul.msk.f32.gmra.mxu1 %vm1415_vm0, %v12785_v57 }
 0x18a   : > { %10170 = vmatmul.msk.f32.gmra.mxu2 %vm1415_vm0, %v12500_v56  ;;  %10115 = vmatmul.msk.f32.gmra.mxu0 %vm1415_vm0, %v12810_v34  ;;  %v1192_v56 = vpop.permute.xlu2 %1191 }
 0x18b   : > { %v1184_v47 = vpop.permute.xlu1 %1183 }
 0x18c   : > { %v1260_v8 = vmul.f32 %v12203_v32, %v1184_v47 }
 0x18e   : > { %v1292_v63 = vadd.f32 %v1260_v8, %v1099_v54  ;;  %10185 = vmatmul.msk.f32.gmra.mxu3 %vm1415_vm0, %v12301_v27  ;;  %v908_v54 = vmul.f32 %v12201_v31, %v826_v15  ;;  %v1262_v8 = vmul.f32 %v12203_v32, %v1192_v56  ;;  %v12853_v15 = vpop.f32.mrf.mxu3 }
 0x190   : > { %v1328_v3 = vadd.f32 %v12815_v38, %v1292_v63 }
 0x192   : > { %v1360_v27 = vmax.f32 %v1328_v3, 0.0  ;;  %10171 = vmatmul.msk.f32.gmra.mxu2 %vm1415_vm0, %v12520_v46  ;;  %10116 = vmatmul.msk.f32.gmra.mxu0 %vm1415_vm0, %v12831_v53  ;;  %v1196_v63 = vpop.permute.xlu2 %1195 }
 0x193   : > { %v1188_v17 = vpop.permute.xlu1 %1187 }
 0x194   : > { %v1261_v52 = vmul.f32 %v12203_v32, %v1188_v17  ;;  %v12822_v4 = vadd.f32 %v1360_v27, %v12777_v59  ;;  %v909_v27 = vmul.f32 %v12201_v31, %v831_v61  ;;  %v1529_v17 = vpop.f32.mrf.mxu0 }
 0x196   : > { %19081 = vst [vmem:[#allocation21_spill] sm:$0xff] %v12822_v4  ;;  %10186 = vmatmul.msk.f32.gmra.mxu3 %vm1415_vm0, %v12322_v37  ;;  %v1293_v50 = vadd.f32 %v1261_v52, %v1100_v42  ;;  %10145 = vmatmul.msk.f32.gmra.mxu1 %vm1415_vm0, %v12822_v4 }
 0x198   : > { %v1329_v62 = vadd.f32 %v12815_v38, %v1293_v50  ;;  %v1263_v50 = vmul.f32 %v12203_v32, %v1196_v63 }
 0x19a   : > { %v1361_v7 = vmax.f32 %v1329_v62, 0.0  ;;  %10172 = vmatmul.msk.f32.gmra.mxu2 %vm1415_vm0, %v12537_v6  ;;  %10117 = vmatmul.msk.f32.gmra.mxu0 %vm1415_vm0, %v12849_v35  ;;  %v12861_v6 = vpop.f32.mrf.mxu1 }
 0x19c   : > { %v999_v18 = vpop.permute.xlu1 %998  ;;  %v12840_v37 = vadd.f32 %v1361_v7, %v12796_v41  ;;  %v1532_v61 = vpop.f32.mrf.mxu0 }
 0x19d   : > { %v1069_v47 = vmul.f32 %v12198_v30, %v999_v18 }
 0x19e   : > { %19082 = vst [vmem:[#allocation22_spill] sm:$0xff] %v12840_v37  ;;  %10187 = vmatmul.msk.f32.gmra.mxu3 %vm1415_vm0, %v12338_v39  ;;  %10146 = vmatmul.msk.f32.gmra.mxu1 %vm1415_vm0, %v12840_v37 }
 0x19f   : > { %v1101_v46 = vadd.f32 %v1069_v47, %v908_v54  ;;  %v12869_v54 = vld [vmem:[%s12222_s0 + $0xb0] sm:$0xff]  ;;  %v1007_v47 = vpop.permute.xlu2 %1006 }
 0x1a0   : > { %v1071_v63 = vmul.f32 %v12198_v30, %v1007_v47 }
 0x1a1   : > { %v1294_v3 = vadd.f32 %v1262_v8, %v1101_v46  ;;  %v12877_v8 = vpop.f32.mrf.mxu3  ;;  %v1200_v46 = vpop.permute.xlu0 %1199 }
 0x1a2   : > { %10173 = vmatmul.msk.f32.gmra.mxu2 %vm1415_vm0, %v12554_v43  ;;  %10118 = vmatmul.msk.f32.gmra.mxu0 %vm1415_vm0, %v12869_v54 }
 0x1a3   : > { %v1330_v39 = vadd.f32 %v12815_v38, %v1294_v3 }
 0x1a4   : > { %v1003_v42 = vpop.permute.xlu1 %1002 }
 0x1a5   : > { %v1362_v52 = vmax.f32 %v1330_v39, 0.0  ;;  %v1070_v56 = vmul.f32 %v12198_v30, %v1003_v42 }
 0x1a6   : > { %10188 = vmatmul.msk.f32.gmra.mxu3 %vm1415_vm0, %v12370_v5 }
 0x1a7   : > { %v1102_v62 = vadd.f32 %v1070_v56, %v909_v27  ;;  %v12866_v7 = vadd.f32 %v1362_v52, %v12810_v34  ;;  %v1264_v27 = vmul.f32 %v12203_v32, %v1200_v46  ;;  %v12889_v52 = vld [vmem:[%s12222_s0 + $0xb8] sm:$0xff]  ;;  %v12893_v56 = vpop.f32.mrf.mxu1  ;;  %v1011_v47 = vpop.permute.xlu2 %1010 }
 0x1a8   : > { %v1535_v46 = vpop.f32.mrf.mxu0 }
 0x1a9   : > { %19083 = vst [vmem:[#allocation23_spill] sm:$0xff] %v12866_v7  ;;  %v1295_v18 = vadd.f32 %v1263_v50, %v1102_v62  ;;  %10147 = vmatmul.msk.f32.gmra.mxu1 %vm1415_vm0, %v12866_v7  ;;  %v12899_v62 = vpop.f32.mrf.mxu3 }
 0x1aa   : > { %10174 = vmatmul.msk.f32.gmra.mxu2 %vm1415_vm0, %v12596_v58  ;;  %10119 = vmatmul.msk.f32.gmra.mxu0 %vm1415_vm0, %v12889_v52 }
 0x1ab   : > { %v1331_v5 = vadd.f32 %v12815_v38, %v1295_v18 }
 0x1ad   : > { %v1363_v3 = vmax.f32 %v1331_v5, 0.0  ;;  %v836_v39 = vpop.permute.xlu1 %835 }
 0x1ae   : > { %v910_v43 = vmul.f32 %v12201_v31, %v836_v39  ;;  %10189 = vmatmul.msk.f32.gmra.mxu3 %vm1415_vm0, %v12395_v22 }
 0x1af   : > { %v12886_v42 = vadd.f32 %v1363_v3, %v12831_v53  ;;  %v12906_v58 = vpop.f32.mrf.mxu1 }
 0x1b0   : > { %v1103_v50 = vadd.f32 %v1071_v63, %v910_v43  ;;  %v1072_v43 = vmul.f32 %v12198_v30, %v1011_v47  ;;  %v12925_v47 = vld [vmem:[%s18975_s5] ss:$0 sm:$0xff] }
 0x1b1   : > { %19084 = vst [vmem:[#allocation24_spill] sm:$0xff] %v12886_v42  ;;  %10148 = vmatmul.msk.f32.gmra.mxu1 %vm1415_vm0, %v12886_v42  ;;  %v1530_v1 = vadd.f32 %v12925_v47, %v1529_v17  ;;  %v1533_v17 = vadd.f32 %v12925_v47, %v1532_v61 }
 0x1b2   : > { %v1296_v22 = vadd.f32 %v1264_v27, %v1103_v50  ;;  %10175 = vmatmul.msk.f32.gmra.mxu2 %vm1415_vm0, %v12663_v13  ;;  %v1015_v50 = vpop.permute.xlu0 %1014  ;;  %v12917_v13 = vpop.f32.mrf.mxu3 }
 0x1b4   : > { %v1332_v18 = vadd.f32 %v12815_v38, %v1296_v22 }
 0x1b5   : > { %v841_v5 = vpop.permute.xlu1 %840 }
 0x1b6   : > { %v1364_v3 = vmax.f32 %v1332_v18, 0.0  ;;  %10190 = vmatmul.msk.f32.gmra.mxu3 %vm1415_vm0, %v12418_v25  ;;  %v911_v39 = vmul.f32 %v12201_v31, %v841_v5  ;;  %v846_v25 = vpop.permute.xlu2 %845 }
 0x1b7   : > { %v1779_v5 = vpop.f32.mrf.mxu1 }
 0x1b8   : > { %v12909_v63 = vadd.f32 %v1364_v3, %v12849_v35  ;;  %v1104_v27 = vadd.f32 %v1072_v43, %v911_v39  ;;  %v1538_v3 = vpop.f32.mrf.mxu0  ;;  %v912_v43 = vmul.f32 %v12201_v31, %v846_v25 }
 0x1ba   : > { %19085 = vst [vmem:[#allocation25_spill] sm:$0xff] %v12909_v63  ;;  %10149 = vmatmul.msk.f32.gmra.mxu1 %vm1415_vm0, %v12909_v63  ;;  %10176 = vmatmul.msk.f32.gmra.mxu2 %vm1415_vm0, %v12756_v2 }
 0x1be   : > { %v1204_v22 = vpop.permute.xlu1 %1203  ;;  %10191 = vmatmul.msk.f32.gmra.mxu3 %vm1415_vm0, %v12437_v51  ;;  %v1073_v51 = vmul.f32 %v12198_v30, %v1015_v50 }
 0x1bf   : > { %v1265_v18 = vmul.f32 %v12203_v32, %v1204_v22  ;;  %v1782_v31 = vpop.f32.mrf.mxu1 }
 0x1c0   : > { %v1105_v10 = vadd.f32 %v1073_v51, %v912_v43 }
 0x1c1   : > { %v1297_v39 = vadd.f32 %v1265_v18, %v1104_v27  ;;  %v12938_v27 = vpop.f32.mrf.mxu3  ;;  %v1539_v18 = vadd.f32 %v12925_v47, %v1538_v3 }
 0x1c2   : > { %10177 = vmatmul.msk.f32.gmra.mxu2 %vm1415_vm0, %v12777_v59 }
 0x1c3   : > { %v1333_v21 = vadd.f32 %v12815_v38, %v1297_v39 }
 0x1c5   : > { %v1365_v22 = vmax.f32 %v1333_v21, 0.0  ;;  %v1541_v21 = vpop.f32.mrf.mxu0 }
 0x1c6   : > { %v1208_v48 = vpop.permute.xlu1 %1207  ;;  %10200 = vmatmul.msk.f32.vlgmr.msrb.gmra.mxu3 %vm1963_vm1, %v1530_v1  ;;  %v1542_v51 = vadd.f32 %v12925_v47, %v1541_v21  ;;  %v1780_v21 = vadd.f32 %v12699_v44, %v1779_v5 }
 0x1c7   : > { %v1266_v2 = vmul.f32 %v12203_v32, %v1208_v48  ;;  %v12934_v63 = vadd.f32 %v1365_v22, %v12869_v54  ;;  %v1785_v48 = vpop.f32.mrf.mxu1 }
 0x1c9   : > { %19086 = vst [vmem:[#allocation26_spill] sm:$0xff] %v12934_v63  ;;  %v1298_v30 = vadd.f32 %v1266_v2, %v1105_v10  ;;  %10150 = vmatmul.msk.f32.gmra.mxu1 %vm1415_vm0, %v12934_v63  ;;  %v12950_v59 = vpop.f32.mrf.mxu3  ;;  %v1536_v10 = vadd.f32 %v12925_v47, %v1535_v46 }
 0x1ca   : > { %10178 = vmatmul.msk.f32.gmra.mxu2 %vm1415_vm0, %v12796_v41 }
 0x1cb   : > { %v1334_v1 = vadd.f32 %v12815_v38, %v1298_v30  ;;  %v1783_v30 = vadd.f32 %v12699_v44, %v1782_v31 }
 0x1cd   : > { %v1366_v50 = vmax.f32 %v1334_v1, 0.0  ;;  %v1544_v61 = vpop.f32.mrf.mxu0 }
 0x1ce   : > { %10201 = vmatmul.msk.f32.gmra.mxu3 %vm1963_vm1, %v1533_v17  ;;  %v1545_v2 = vadd.f32 %v12925_v47, %v1544_v61 }
 0x1cf   : > { %v12946_v32 = vadd.f32 %v1366_v50, %v12889_v52  ;;  %v1788_v38 = vpop.f32.mrf.mxu1  ;;  %v1777_v50 = vadd.f32 %v12699_v44, %v12906_v58  ;;  %v1771_v58 = vadd.f32 %v12699_v44, %v12861_v6 }
 0x1d1   : > { %19087 = vst [vmem:[#allocation27_spill] sm:$0xff] %v12946_v32  ;;  %10151 = vmatmul.msk.f32.gmra.mxu1 %vm1415_vm0, %v12946_v32  ;;  %v12958_v25 = vpop.f32.mrf.mxu3 }
 0x1d2   : > { %10179 = vmatmul.msk.f32.gmra.mxu2 %vm1415_vm0, %v12810_v34  ;;  %v1789_v34 = vadd.f32 %v12699_v44, %v1788_v38 }
 0x1d5   : > { %v1547_v41 = vpop.f32.mrf.mxu0 }
 0x1d6   : > { %10202 = vmatmul.msk.f32.gmra.mxu3 %vm1963_vm1, %v1536_v10  ;;  %v1548_v1 = vadd.f32 %v12925_v47, %v1547_v41 }
 0x1d9   : > { %v12964_v43 = vpop.f32.mrf.mxu3 }
 0x1da   : > { %10180 = vmatmul.msk.f32.gmra.mxu2 %vm1415_vm0, %v12831_v53  ;;  %v1786_v53 = vadd.f32 %v12699_v44, %v1785_v48 }
 0x1dd   : > { %v1550_v3 = vpop.f32.mrf.mxu0 }
 0x1de   : > { %10203 = vmatmul.msk.f32.gmra.mxu3 %vm1963_vm1, %v1539_v18  ;;  %v1551_v31 = vadd.f32 %v12925_v47, %v1550_v3 }
 0x1e0   : > { %v1791_v39 = vpop.f32.mrf.mxu1 }
 0x1e1   : > { %v1792_v46 = vadd.f32 %v12699_v44, %v1791_v39  ;;  %v12975_v22 = vpop.f32.mrf.mxu3 }
 0x1e2   : > { %10181 = vmatmul.msk.f32.gmra.mxu2 %vm1415_vm0, %v12849_v35 }
 0x1e3   : > { %10208 = vmatpush.xpose.msk.msra.mxu3 %vm1963_vm1, %v1792_v46 }
 0x1e5   : > { %v1553_v17 = vpop.f32.mrf.mxu0 }
 0x1e6   : > { %10204 = vmatmul.msk.f32.gmra.mxu3 %vm1963_vm1, %v1542_v51 }
 0x1e7   : > { %10209 = vmatpush.xpose.msk.msra.mxu3 %vm1963_vm1, %v1789_v34 }
 0x1ea   : > { %10182 = vmatmul.msk.f32.gmra.mxu2 %vm1415_vm0, %v12869_v54  ;;  %v1774_v54 = vadd.f32 %v12699_v44, %v12893_v56 }
 0x1eb   : > { %10210 = vmatpush.xpose.msk.msra.mxu3 %vm1963_vm1, %v1786_v53 }
 0x1ed   : > { %v1556_v48 = vpop.f32.mrf.mxu0 }
 0x1ee   : > { %10205 = vmatmul.msk.f32.gmra.mxu3 %vm1963_vm1, %v1545_v2  ;;  %v12985_v35 = vpop.f32.mrf.mxu3  ;;  %v1557_v38 = vadd.f32 %v12925_v47, %v1556_v48 }
 0x1ef   : > { %10211 = vmatpush.xpose.msk.msra.mxu3 %vm1963_vm1, %v1783_v30 }
 0x1f2   : > { %10183 = vmatmul.msk.f32.gmra.mxu2 %vm1415_vm0, %v12889_v52  ;;  %v1554_v52 = vadd.f32 %v12925_v47, %v1553_v17 }
 0x1f3   : > { %10212 = vmatpush.xpose.msk.msra.mxu3 %vm1963_vm1, %v1780_v21 }
 0x1f5   : > { %v1559_v61 = vpop.f32.mrf.mxu0 }
 0x1f6   : > { %10206 = vmatmul.msk.f32.gmra.mxu3 %vm1963_vm1, %v1548_v1  ;;  %v1560_v6 = vadd.f32 %v12925_v47, %v1559_v61 }
 0x1f7   : > { %10213 = vmatpush.xpose.msk.msra.mxu3 %vm1963_vm1, %v1777_v50 }
 0x1f9   : > { %v12997_v5 = vpop.f32.mrf.mxu3 }
 0x1fb   : > { %10214 = vmatpush.xpose.msk.msra.mxu3 %vm1963_vm1, %v1774_v54 }
 0x1fd   : > { %v1562_v41 = vpop.f32.mrf.mxu0 }
 0x1fe   : > { %10207 = vmatmul.msk.f32.gmra.mxu3 %vm1963_vm1, %v1551_v31  ;;  %v1563_v3 = vadd.f32 %v12925_v47, %v1562_v41 }
 0x1ff   : > { %10215 = vmatpush.xpose.msk.msra.mxu3 %vm1963_vm1, %v1771_v58 }
 0x201   : > { %v1839_v10 = vpop.f32.mrf.mxu3 }
 0x204   : > { %v1794_v18 = vpop.f32.mrf.mxu1 }
 0x205   : > { %v1565_v34 = vpop.f32.mrf.mxu0 }
 0x206   : > { %10216 = vmatmul.msk.f32.vlgmr.msra.gmra.mxu3 %vm1963_vm1, %v1554_v52  ;;  %v1566_v30 = vadd.f32 %v12925_v47, %v1565_v34 }
 0x209   : > { %v13007_v56 = vpop.f32.mrf.mxu3 }
 0x20d   : > { %v1568_v21 = vpop.f32.mrf.mxu0 }
 0x20e   : > { %10217 = vmatmul.msk.f32.gmra.mxu3 %vm1963_vm1, %v1557_v38  ;;  %v1569_v50 = vadd.f32 %v12925_v47, %v1568_v21 }
 0x211   : > { %v13011_v39 = vpop.f32.mrf.mxu3 }
 0x213   : > { %v1797_v46 = vpop.f32.mrf.mxu1 }
 0x215   : > { %v1571_v54 = vpop.f32.mrf.mxu0 }
 0x216   : > { %10218 = vmatmul.msk.f32.gmra.mxu3 %vm1963_vm1, %v1560_v6  ;;  %v1572_v48 = vadd.f32 %v12925_v47, %v1571_v54 }
 0x219   : > { %v13015_v51 = vpop.f32.mrf.mxu3 }
 0x21b   : > { %v1800_v53 = vpop.f32.mrf.mxu1 }
 0x21d   : > { %v1574_v52 = vpop.f32.mrf.mxu0 }
 0x21e   : > { %10219 = vmatmul.msk.f32.gmra.mxu3 %vm1963_vm1, %v1563_v3  ;;  %v1575_v38 = vadd.f32 %v12925_v47, %v1574_v52 }
 0x221   : > { %v13019_v2 = vpop.f32.mrf.mxu3 }
 0x225   : > { %v1577_v32 = vpop.f32.mrf.mxu0 }
 0x226   : > { %10220 = vmatmul.msk.f32.gmra.mxu3 %vm1963_vm1, %v1566_v30  ;;  %v1803_v17 = vpop.f32.mrf.mxu1 }
 0x227   : > { %v1804_v63 = vadd.f32 %v12699_v44, %v1803_v17  ;;  %v1840_v17 = vadd.f32 %v12699_v44, %v1839_v10 }
 0x229   : > { %v13023_v1 = vpop.f32.mrf.mxu3 }
 0x22e   : > { %10221 = vmatmul.msk.f32.gmra.mxu3 %vm1963_vm1, %v1569_v50  ;;  %v1806_v58 = vpop.f32.mrf.mxu1 }
 0x22f   : > { %v1807_v52 = vadd.f32 %v12699_v44, %v1806_v58  ;;  %v1580_v58 = vpop.f32.mrf.mxu0 }
 0x230   : > { %v1581_v10 = vadd.f32 %v12925_v47, %v1580_v58 }
 0x231   : > { %v13027_v31 = vpop.f32.mrf.mxu3 }
 0x236   : > { %10222 = vmatmul.msk.f32.gmra.mxu3 %vm1963_vm1, %v1572_v48 }
 0x237   : > { %v1809_v41 = vpop.f32.mrf.mxu1 }
 0x238   : > { %v1810_v48 = vadd.f32 %v12699_v44, %v1809_v41  ;;  %v1798_v41 = vadd.f32 %v12699_v44, %v1797_v46  ;;  %v1837_v46 = vadd.f32 %v12699_v44, %v12997_v5 }
 0x239   : > { %v13031_v61 = vpop.f32.mrf.mxu3 }
 0x23e   : > { %10223 = vmatmul.msk.f32.gmra.mxu3 %vm1963_vm1, %v1575_v38 }
 0x241   : > { %v1960_v6 = vpop.f32.mrf.mxu3 }
 0x246   : > { %v1812_v34 = vpop.f32.mrf.mxu1 }
 0x247   : > { %v1813_v50 = vadd.f32 %v12699_v44, %v1812_v34  ;;  %v1801_v34 = vadd.f32 %v12699_v44, %v1800_v53 }
 0x249   : > { %v13035_v3 = vpop.f32.mrf.mxu3 }
 0x24e   : > { %v1815_v30 = vpop.f32.mrf.mxu1 }
 0x24f   : > { %v1816_v21 = vadd.f32 %v12699_v44, %v1815_v30 }
 0x251   : > { %v13039_v54 = vpop.f32.mrf.mxu3  ;;  %10224 = vmatpush.xpose.msk.msrb.mxu3 %vm1963_vm1, %v1816_v21  ;;  %v1795_v21 = vadd.f32 %v12699_v44, %v1794_v18  ;;  %v1834_v18 = vadd.f32 %v12699_v44, %v12985_v35  ;;  %v1825_v35 = vadd.f32 %v12699_v44, %v12958_v25  ;;  %v1819_v25 = vadd.f32 %v12699_v44, %v12938_v27 }
 0x255   : > { %10225 = vmatpush.xpose.msk.msrb.mxu3 %vm1963_vm1, %v1813_v50 }
 0x259   : > { %v13045_v38 = vpop.f32.mrf.mxu3  ;;  %10226 = vmatpush.xpose.msk.msrb.mxu3 %vm1963_vm1, %v1810_v48  ;;  %v1578_v48 = vadd.f32 %v12925_v47, %v1577_v32  ;;  %v1831_v32 = vadd.f32 %v12699_v44, %v12975_v22 }
 0x25d   : > { %10227 = vmatpush.xpose.msk.msrb.mxu3 %vm1963_vm1, %v1807_v52 }
 0x261   : > { %v13051_v30 = vpop.f32.mrf.mxu3  ;;  %10228 = vmatpush.xpose.msk.msrb.mxu3 %vm1963_vm1, %v1804_v63  ;;  %v1583_v63 = vpop.f32.mrf.mxu0 }
 0x265   : > { %10229 = vmatpush.xpose.msk.msrb.mxu3 %vm1963_vm1, %v1801_v34  ;;  %v1828_v34 = vadd.f32 %v12699_v44, %v12964_v43  ;;  %v13097_v43 = vld [vmem:[%s18979_s9] ss:$0 sm:$0xff] }
 0x269   : > { %v13057_v50 = vpop.f32.mrf.mxu3  ;;  %10230 = vmatpush.xpose.msk.msrb.mxu3 %vm1963_vm1, %v1798_v41  ;;  %v1586_v5 = vpop.f32.mrf.mxu0  ;;  %v1584_v41 = vadd.f32 %v12925_v47, %v1583_v63 }
 0x26d   : > { %10231 = vmatpush.xpose.msk.msrb.mxu3 %vm1963_vm1, %v1795_v21  ;;  %v1822_v21 = vadd.f32 %v12699_v44, %v12950_v59  ;;  %v1955_v44 = vadd.f32 %v13097_v43, %v13027_v31  ;;  %v1946_v31 = vadd.f32 %v13097_v43, %v13015_v51 }
 0x270   : > { %10232 = vmatmul.msk.f32.vlgmr.msrb.gmra.mxu3 %vm1963_vm1, %v1578_v48  ;;  %v1961_v48 = vadd.f32 %v13097_v43, %v1960_v6  ;;  %v1952_v6 = vadd.f32 %v13097_v43, %v13023_v1  ;;  %v1943_v1 = vadd.f32 %v13097_v43, %v13011_v39 }
 0x271   : > { %10240 = vmatpush.xpose.msk.msra.mxu3 %vm1963_vm1, %v1840_v17  ;;  %v13067_v53 = vpop.f32.mrf.mxu3  ;;  %v1589_v58 = vpop.f32.mrf.mxu0  ;;  %v1587_v17 = vadd.f32 %v12925_v47, %v1586_v5 }
 0x275   : > { %10241 = vmatpush.xpose.msk.msra.mxu3 %vm1963_vm1, %v1837_v46  ;;  %v1958_v46 = vadd.f32 %v13097_v43, %v13031_v61 }
 0x278   : > { %10233 = vmatmul.msk.f32.gmra.mxu3 %vm1963_vm1, %v1581_v10  ;;  %v1949_v10 = vadd.f32 %v13097_v43, %v13019_v2  ;;  %v1940_v2 = vadd.f32 %v13097_v43, %v13007_v56 }
 0x279   : > { %10242 = vmatpush.xpose.msk.msra.mxu3 %vm1963_vm1, %v1834_v18  ;;  %v13077_v52 = vpop.f32.mrf.mxu3  ;;  %v1590_v18 = vadd.f32 %v12925_v47, %v1589_v58  ;;  %v1592_v27 = vpop.f32.mrf.mxu0 }
 0x27a   : > { %v1593_v5 = vadd.f32 %v12925_v47, %v1592_v27 }
 0x27d   : > { %10243 = vmatpush.xpose.msk.msra.mxu3 %vm1963_vm1, %v1831_v32 }
 0x280   : > { %10234 = vmatmul.msk.f32.gmra.mxu3 %vm1963_vm1, %v1584_v41 }
 0x281   : > { %10244 = vmatpush.xpose.msk.msra.mxu3 %vm1963_vm1, %v1828_v34  ;;  %v13087_v22 = vpop.f32.mrf.mxu3  ;;  %v1595_v34 = vpop.f32.mrf.mxu0 }
 0x282   : > { %v1596_v51 = vadd.f32 %v12925_v47, %v1595_v34 }
 0x285   : > { %10245 = vmatpush.xpose.msk.msra.mxu3 %vm1963_vm1, %v1825_v35 }
 0x288   : > { %10235 = vmatmul.msk.f32.gmra.mxu3 %vm1963_vm1, %v1587_v17 }
 0x289   : > { %10246 = vmatpush.xpose.msk.msra.mxu3 %vm1963_vm1, %v1822_v21  ;;  %v13103_v63 = vpop.f32.mrf.mxu3  ;;  %v1598_v39 = vpop.f32.mrf.mxu0 }
 0x28a   : > { %v2345_v59 = vsel %vm2320_vm2, %v13103_v63, -inf  ;;  %v1599_v56 = vadd.f32 %v12925_v47, %v1598_v39 }
 0x28b   : > { %2346 = vmax.xlane.f32.xlu2 %v2345_v59 }
 0x28d   : > { %10247 = vmatpush.xpose.msk.msra.mxu3 %vm1963_vm1, %v1819_v25 }
 0x290   : > { %10236 = vmatmul.msk.f32.gmra.mxu3 %vm1963_vm1, %v1590_v18  ;;  %v1605_v18 = vadd.f32 %v12925_v47, %v12782_v29  ;;  %v1611_v29 = vadd.f32 %v12925_v47, %v12824_v28 }
 0x291   : > { %2900 = vmatpush.msrb.mxu3 %v1961_v48  ;;  %v13118_v32 = vpop.f32.mrf.mxu3  ;;  %v1602_v48 = vadd.f32 %v12925_v47, %v12762_v19  ;;  %v1608_v19 = vadd.f32 %v12925_v47, %v12800_v12  ;;  %v1617_v12 = vadd.f32 %v12925_v47, %v12877_v8 }
 0x292   : > { %v2348_v61 = vsel %vm2320_vm2, %v13118_v32, -inf }
 0x293   : > { %2901 = vmatpush.msrb.mxu3 %v1958_v46  ;;  %2349 = vmax.xlane.f32.xlu1 %v2348_v61  ;;  %v1614_v61 = vadd.f32 %v12925_v47, %v12853_v15 }
 0x295   : > { %2902 = vmatpush.msrb.mxu3 %v1955_v44 }
 0x297   : > { %2903 = vmatpush.msrb.mxu3 %v1952_v6 }
 0x298   : > { %10237 = vmatmul.msk.f32.gmra.mxu3 %vm1963_vm1, %v1593_v5  ;;  %v1620_v5 = vadd.f32 %v12925_v47, %v12899_v62 }
 0x299   : > { %2904 = vmatpush.msrb.mxu3 %v1949_v10  ;;  %v2124_v41 = vpop.f32.mrf.mxu3 }
 0x29a   : > { %v2351_v35 = vsel %vm2320_vm2, %v2124_v41, -inf }
 0x29b   : > { %2905 = vmatpush.msrb.mxu3 %v1946_v31  ;;  %2352 = vmax.xlane.f32.xlu0 %v2351_v35  ;;  %v13173_v31 = vpop.f32.mrf.mxu2 }
 0x29d   : > { %2906 = vmatpush.msrb.mxu3 %v1943_v1  ;;  %v1623_v1 = vadd.f32 %v12925_v47, %v12917_v13 }
 0x29f   : > { %2907 = vmatpush.msrb.mxu3 %v1940_v2 }
 0x2a0   : > { %10238 = vmatmul.msk.f32.gmra.mxu3 %vm1963_vm1, %v1596_v51 }
 0x2a1   : > { %v13133_v58 = vpop.f32.mrf.mxu3 }
 0x2a2   : > { %v2354_v21 = vsel %vm2320_vm2, %v13133_v58, -inf }
 0x2a3   : > { %2355 = vmax.xlane.f32.xlu2 %v2354_v21  ;;  %v13178_v28 = vpop.f32.mrf.mxu2 }
 0x2a8   : > { %10239 = vmatmul.msk.f32.gmra.mxu3 %vm1963_vm1, %v1599_v56 }
 0x2a9   : > { %v13139_v17 = vpop.f32.mrf.mxu3 }
 0x2aa   : > { %v2357_v25 = vsel %vm2320_vm2, %v13139_v17, -inf }
 0x2ab   : > { %2358 = vmax.xlane.f32.xlu2 %v2357_v25  ;;  %v13183_v15 = vpop.f32.mrf.mxu2 }
 0x2b0   : > { %10248 = vmatmul.msk.f32.vlgmr.msra.gmra.mxu3 %vm1963_vm1, %v1602_v48 }
 0x2b1   : > { %v13146_v59 = vpop.f32.mrf.mxu3 }
 0x2b2   : > { %v2360_v46 = vsel %vm2320_vm2, %v13146_v59, -inf }
 0x2b3   : > { %2361 = vmax.xlane.f32.xlu1 %v2360_v46  ;;  %v13185_v2 = vpop.f32.mrf.mxu2 }
 0x2b8   : > { %10249 = vmatmul.msk.f32.gmra.mxu3 %vm1963_vm1, %v1605_v18 }
 0x2b9   : > { %v13153_v44 = vpop.f32.mrf.mxu3 }
 0x2ba   : > { %v2363_v27 = vsel %vm2320_vm2, %v13153_v44, -inf }
 0x2bb   : > { %2364 = vmax.xlane.f32.xlu2 %v2363_v27  ;;  %v13187_v8 = vpop.f32.mrf.mxu2 }
 0x2c0   : > { %10250 = vmatmul.msk.f32.gmra.mxu3 %vm1963_vm1, %v1608_v19 }
 0x2c1   : > { %v13160_v6 = vpop.f32.mrf.mxu3 }
 0x2c2   : > { %v2366_v10 = vsel %vm2320_vm2, %v13160_v6, -inf }
 0x2c3   : > { %2367 = vmax.xlane.f32.xlu1 %v2366_v10  ;;  %v13190_v62 = vpop.f32.mrf.mxu2 }
 0x2c8   : > { %10251 = vmatmul.msk.f32.gmra.mxu3 %vm1963_vm1, %v1611_v29 }
 0x2cb   : > { %v1885_v25 = vpop.f32.mrf.mxu2 }
 0x2d0   : > { %10252 = vmatmul.msk.f32.gmra.mxu3 %vm1963_vm1, %v1614_v61 }
 0x2d8   : > { %10253 = vmatmul.msk.f32.gmra.mxu3 %vm1963_vm1, %v1617_v12 }
 0x2e0   : > { %10254 = vmatmul.msk.f32.gmra.mxu3 %vm1963_vm1, %v1620_v5 }
 0x2e8   : > { %10255 = vmatmul.msk.f32.gmra.mxu3 %vm1963_vm1, %v1623_v1 }
 0x2fe   : > { %v2347_v34 = vpop.xlane.xlu2 %2346 }
 0x2ff   : > { %v2425_v35 = vsub.f32 %v13103_v63, %v2347_v34 }
 0x301   : > { %v2465_v51 = vmul.f32 1.442695, %v2425_v35 }
 0x303   : > { %11211 = vpow2.f32 %v2465_v51  ;;  %v2321_v51 = vsel %vm2320_vm2, %v13035_v3, -inf }
 0x306   : > { %v2350_v39 = vpop.xlane.xlu1 %2349 }
 0x307   : > { %v2426_v21 = vsub.f32 %v13118_v32, %v2350_v39  ;;  %v1888_v32 = vpop.f32.mrf.mxu2 }
 0x309   : > { %v13193_v56 = vpop.eup %11211  ;;  %v2467_v13 = vmul.f32 1.442695, %v2426_v21 }
 0x30a   : > { %v2537_v47 = vsel %vm2320_vm2, %v13193_v56, 0.0 }
 0x30b   : > { %11213 = vpow2.f32 %v2467_v13  ;;  %2538 = vadd.xlane.f32.xlu0 %v2537_v47 }
 0x30e   : > { %v2353_v48 = vpop.xlane.xlu0 %2352 }
 0x30f   : > { %v2427_v46 = vsub.f32 %v2124_v41, %v2353_v48  ;;  %v13206_v41 = vpop.f32.mrf.mxu2 }
 0x311   : > { %v13197_v18 = vpop.eup %11213  ;;  %v2469_v63 = vmul.f32 1.442695, %v2427_v46 }
 0x312   : > { %v2540_v27 = vsel %vm2320_vm2, %v13197_v18, 0.0 }
 0x313   : > { %11215 = vpow2.f32 %v2469_v63  ;;  %2541 = vadd.xlane.f32.xlu2 %v2540_v27 }
 0x316   : > { %v2356_v19 = vpop.xlane.xlu2 %2355 }
 0x317   : > { %v2428_v10 = vsub.f32 %v13133_v58, %v2356_v19  ;;  %v13215_v39 = vpop.f32.mrf.mxu2 }
 0x319   : > { %v13202_v29 = vpop.eup %11215  ;;  %v2471_v61 = vmul.f32 1.442695, %v2428_v10 }
 0x31a   : > { %v2543_v12 = vsel %vm2320_vm2, %v13202_v29, 0.0 }
 0x31b   : > { %11217 = vpow2.f32 %v2471_v61  ;;  %2544 = vadd.xlane.f32.xlu0 %v2543_v12  ;;  %v2324_v61 = vsel %vm2320_vm2, %v13039_v54, -inf }
 0x31e   : > { %v2359_v5 = vpop.xlane.xlu2 %2358 }
 0x31f   : > { %v2429_v1 = vsub.f32 %v13139_v17, %v2359_v5  ;;  %v13222_v46 = vpop.f32.mrf.mxu2 }
 0x321   : > { %v13209_v34 = vpop.eup %11217  ;;  %v2473_v35 = vmul.f32 1.442695, %v2429_v1 }
 0x322   : > { %v2546_v58 = vsel %vm2320_vm2, %v13209_v34, 0.0 }
 0x323   : > { %11219 = vpow2.f32 %v2473_v35  ;;  %2322 = vmax.xlane.f32.xlu0 %v2321_v51  ;;  %2547 = vadd.xlane.f32.xlu1 %v2546_v58  ;;  %v2327_v58 = vsel %vm2320_vm2, %v13045_v38, -inf }
 0x326   : > { %v2362_v21 = vpop.xlane.xlu1 %2361 }
 0x327   : > { %v2430_v13 = vsub.f32 %v13146_v59, %v2362_v21  ;;  %v1900_v12 = vpop.f32.mrf.mxu2 }
 0x329   : > { %v13218_v47 = vpop.eup %11219  ;;  %v2475_v17 = vmul.f32 1.442695, %v2430_v13 }
 0x32a   : > { %v2549_v48 = vsel %vm2320_vm2, %v13218_v47, 0.0 }
 0x32b   : > { %11221 = vpow2.f32 %v2475_v17  ;;  %2550 = vadd.xlane.f32.xlu2 %v2549_v48  ;;  %v2330_v17 = vsel %vm2320_vm2, %v13051_v30, -inf }
 0x32e   : > { %v2365_v63 = vpop.xlane.xlu2 %2364 }
 0x32f   : > { %v2431_v27 = vsub.f32 %v13153_v44, %v2365_v63  ;;  %v1903_v21 = vpop.f32.mrf.mxu2  ;;  %v1889_v63 = vadd.f32 %v13097_v43, %v1888_v32  ;;  %v2336_v32 = vsel %vm2320_vm2, %v13067_v53, -inf }
 0x331   : > { %v13225_v19 = vpop.eup %11221  ;;  %v2477_v10 = vmul.f32 1.442695, %v2431_v27  ;;  %v1886_v27 = vadd.f32 %v13097_v43, %v1885_v25  ;;  %2705 = vmatpush.msrb.mxu0 %v1889_v63  ;;  %v1877_v25 = vadd.f32 %v13097_v43, %v13185_v2 }
 0x332   : > { %v2552_v59 = vsel %vm2320_vm2, %v13225_v19, 0.0 }
 0x333   : > { %11223 = vpow2.f32 %v2477_v10  ;;  %2325 = vmax.xlane.f32.xlu2 %v2324_v61  ;;  %2553 = vadd.xlane.f32.xlu1 %v2552_v59  ;;  %v1883_v61 = vadd.f32 %v13097_v43, %v13190_v62  ;;  %v1880_v59 = vadd.f32 %v13097_v43, %v13187_v8  ;;  %v1871_v8 = vadd.f32 %v13097_v43, %v13178_v28 }
 0x334   : > { %2706 = vmatpush.msrb.mxu0 %v1886_v27  ;;  %v1901_v28 = vadd.f32 %v13097_v43, %v1900_v12  ;;  %v1895_v27 = vadd.f32 %v13097_v43, %v13215_v39 }
 0x336   : > { %v2368_v5 = vpop.xlane.xlu1 %2367  ;;  %2707 = vmatpush.msrb.mxu0 %v1883_v61 }
 0x337   : > { %v2432_v1 = vsub.f32 %v13160_v6, %v2368_v5  ;;  %v2333_v6 = vsel %vm2320_vm2, %v13057_v50, -inf  ;;  %v1906_v10 = vpop.f32.mrf.mxu2  ;;  %v2339_v5 = vsel %vm2320_vm2, %v13077_v52, -inf }
 0x338   : > { %2708 = vmatpush.msrb.mxu0 %v1880_v59 }
 0x339   : > { %v13232_v35 = vpop.eup %11223  ;;  %v2479_v51 = vmul.f32 1.442695, %v2432_v1  ;;  %v1874_v1 = vadd.f32 %v13097_v43, %v13183_v15 }
 0x33a   : > { %v2555_v44 = vsel %vm2320_vm2, %v13232_v35, 0.0  ;;  %2709 = vmatpush.msrb.mxu0 %v1877_v25 }
 0x33b   : > { %11225 = vpow2.f32 %v2479_v51  ;;  %2556 = vadd.xlane.f32.xlu0 %v2555_v44  ;;  %2328 = vmax.xlane.f32.xlu1 %v2327_v58  ;;  %v1868_v51 = vadd.f32 %v13097_v43, %v13173_v31  ;;  %v2342_v44 = vsel %vm2320_vm2, %v13087_v22, -inf  ;;  %v1904_v31 = vadd.f32 %v13097_v43, %v1903_v21 }
 0x33c   : > { %2710 = vmatpush.msrb.mxu0 %v1874_v1 }
 0x33e   : > { %2711 = vmatpush.msrb.mxu0 %v1871_v8 }
 0x33f   : > { %v1909_v62 = vpop.f32.mrf.mxu2 }
 0x340   : > { %2712 = vmatpush.msrb.mxu0 %v1868_v51  ;;  %v1910_v15 = vadd.f32 %v13097_v43, %v1909_v62 }
 0x341   : > { %v13238_v13 = vpop.eup %11225 }
 0x342   : > { %v2558_v48 = vsel %vm2320_vm2, %v13238_v13, 0.0 }
 0x343   : > { %2331 = vmax.xlane.f32.xlu0 %v2330_v17  ;;  %2334 = vmax.xlane.f32.xlu1 %v2333_v6  ;;  %v1907_v17 = vadd.f32 %v13097_v43, %v1906_v10  ;;  %v13269_v6 = vpop.f32.mrf.mxu3  ;;  %v1892_v10 = vadd.f32 %v13097_v43, %v13206_v41 }
 0x344   : > { %2559 = vadd.xlane.f32.xlu2 %v2558_v48  ;;  %v1898_v48 = vadd.f32 %v13097_v43, %v13222_v46 }
 0x347   : > { %v1912_v2 = vpop.f32.mrf.mxu2 }
 0x348   : > { %v1913_v58 = vadd.f32 %v13097_v43, %v1912_v2 }
 0x34a   : > { %2770 = vmatpush.msrb.mxu1 %v1913_v58 }
 0x34b   : > { %2340 = vmax.xlane.f32.xlu0 %v2339_v5  ;;  %v13275_v63 = vpop.f32.mrf.mxu3 }
 0x34c   : > { %2337 = vmax.xlane.f32.xlu2 %v2336_v32  ;;  %2771 = vmatpush.msrb.mxu1 %v1910_v15 }
 0x34e   : > { %2772 = vmatpush.msrb.mxu1 %v1907_v17 }
 0x350   : > { %2773 = vmatpush.msrb.mxu1 %v1904_v31 }
 0x352   : > { %2774 = vmatpush.msrb.mxu1 %v1901_v28  ;;  %v10326_v28 = vld [vmem:[%s18976_s6 + $0x28] sm:$0xff] }
 0x353   : > { %v13281_v61 = vpop.f32.mrf.mxu3 }
 0x354   : > { %2343 = vmax.xlane.f32.xlu2 %v2342_v44  ;;  %2775 = vmatpush.msrb.mxu1 %v1898_v48 }
 0x356   : > { %2776 = vmatpush.msrb.mxu1 %v1895_v27 }
 0x358   : > { %2777 = vmatpush.msrb.mxu1 %v1892_v10 }
 0x35b   : > { %v13283_v21 = vpop.f32.mrf.mxu3 }
 0x363   : > { %v13285_v59 = vpop.f32.mrf.mxu3 }
 0x36b   : > { %v13289_v39 = vpop.f32.mrf.mxu3 }
 0x373   : > { %v13293_v62 = vpop.f32.mrf.mxu3 }
 0x37b   : > { %v13299_v17 = vpop.f32.mrf.mxu3 }
 0x37e   : > { %v2539_v12 = vpop.xlane.xlu0 %2538 }
 0x37f   : > { %11227 = vrcp.f32 %v2539_v12 }
 0x385   : > { %v11228_v46 = vpop.eup %11227 }
 0x386   : > { %v2649_v5 = vmul.f32 %v11228_v46, %v13193_v56  ;;  %v2542_v32 = vpop.xlane.xlu2 %2541 }
 0x387   : > { %11229 = vrcp.f32 %v2542_v32 }
 0x388   : > { %10264 = vmatmul.msk.f32.vlgmr.msrb.gmra.mxu1 %vm2320_vm2, %v2649_v5  ;;  %v10325_v5 = vld [vmem:[%s18976_s6 + $0x20] sm:$0xff] }
 0x38d   : > { %v11230_v25 = vpop.eup %11229 }
 0x38e   : > { %v2545_v43 = vpop.xlane.xlu0 %2544  ;;  %v2650_v41 = vmul.f32 %v11230_v25, %v13197_v18  ;;  %v13321_v25 = vpop.f32.mrf.mxu3 }
 0x38f   : > { %11231 = vrcp.f32 %v2545_v43 }
 0x390   : > { %10265 = vmatmul.msk.f32.gmra.mxu1 %vm2320_vm2, %v2650_v41 }
 0x395   : > { %v11232_v1 = vpop.eup %11231 }
 0x396   : > { %v2323_v8 = vpop.xlane.xlu0 %2322  ;;  %v2548_v51 = vpop.xlane.xlu1 %2547  ;;  %v2651_v56 = vmul.f32 %v11232_v1, %v13202_v29 }
 0x397   : > { %v2417_v44 = vsub.f32 %v13035_v3, %v2323_v8  ;;  %11233 = vrcp.f32 %v2548_v51  ;;  %v10328_v3 = vld [vmem:[%s18976_s6 + $0x38] sm:$0xff] }
 0x398   : > { %10266 = vmatmul.msk.f32.gmra.mxu1 %vm2320_vm2, %v2651_v56 }
 0x399   : > { %v2449_v2 = vmul.f32 1.442695, %v2417_v44  ;;  %3079 = vmatpush.msra.mxu1 %v10328_v3  ;;  %v13330_v44 = vpop.f32.mrf.mxu3 }
 0x39b   : > { %11235 = vpow2.f32 %v2449_v2 }
 0x39d   : > { %v11234_v58 = vpop.eup %11233 }
 0x39e   : > { %v2551_v15 = vpop.xlane.xlu2 %2550  ;;  %v2652_v18 = vmul.f32 %v11234_v58, %v13209_v34  ;;  %v10327_v34 = vld [vmem:[%s18976_s6 + $0x30] sm:$0xff] }
 0x39f   : > { %11237 = vrcp.f32 %v2551_v15  ;;  %3080 = vmatpush.msra.mxu1 %v10327_v34 }
 0x3a0   : > { %10267 = vmatmul.msk.f32.gmra.mxu1 %vm2320_vm2, %v2652_v18 }
 0x3a1   : > { %v13302_v31 = vpop.eup %11235  ;;  %3081 = vmatpush.msra.mxu1 %v10326_v28 }
 0x3a2   : > { %v2513_v29 = vsel %vm2320_vm2, %v13302_v31, 0.0 }
 0x3a3   : > { %2514 = vadd.xlane.f32.xlu1 %v2513_v29  ;;  %3082 = vmatpush.msra.mxu1 %v10325_v5 }
 0x3a5   : > { %v11238_v48 = vpop.eup %11237 }
 0x3a6   : > { %v2326_v27 = vpop.xlane.xlu2 %2325  ;;  %v2554_v10 = vpop.xlane.xlu1 %2553  ;;  %v2653_v12 = vmul.f32 %v11238_v48, %v13218_v47 }
 0x3a7   : > { %v2418_v46 = vsub.f32 %v13039_v54, %v2326_v27  ;;  %11239 = vrcp.f32 %v2554_v10 }
 0x3a8   : > { %10268 = vmatmul.msk.f32.gmra.mxu1 %vm2320_vm2, %v2653_v12 }
 0x3a9   : > { %v2451_v32 = vmul.f32 1.442695, %v2418_v46 }
 0x3ab   : > { %11241 = vpow2.f32 %v2451_v32 }
 0x3ad   : > { %v11240_v43 = vpop.eup %11239 }
 0x3ae   : > { %v2557_v41 = vpop.xlane.xlu0 %2556  ;;  %v2329_v1 = vpop.xlane.xlu1 %2328  ;;  %v2654_v47 = vmul.f32 %v11240_v43, %v13225_v19 }
 0x3af   : > { %11243 = vrcp.f32 %v2557_v41  ;;  %v2419_v54 = vsub.f32 %v13045_v38, %v2329_v1 }
 0x3b0   : > { %10269 = vmatmul.msk.f32.gmra.mxu1 %vm2320_vm2, %v2654_v47 }
 0x3b1   : > { %v13326_v8 = vpop.eup %11241  ;;  %v2453_v51 = vmul.f32 1.442695, %v2419_v54 }
 0x3b2   : > { %v2516_v56 = vsel %vm2320_vm2, %v13326_v8, 0.0 }
 0x3b3   : > { %11245 = vpow2.f32 %v2453_v51  ;;  %2517 = vadd.xlane.f32.xlu0 %v2516_v56 }
 0x3b5   : > { %v11244_v2 = vpop.eup %11243 }
 0x3b6   : > { %v2332_v58 = vpop.xlane.xlu0 %2331  ;;  %v2335_v15 = vpop.xlane.xlu1 %2334  ;;  %v2655_v19 = vmul.f32 %v11244_v2, %v13232_v35 }
 0x3b7   : > { %v2420_v18 = vsub.f32 %v13051_v30, %v2332_v58  ;;  %v2560_v38 = vpop.xlane.xlu2 %2559  ;;  %v2421_v3 = vsub.f32 %v13057_v50, %v2335_v15  ;;  %v13340_v35 = vpop.f32.mrf.mxu3 }
 0x3b8   : > { %11247 = vrcp.f32 %v2560_v38  ;;  %10270 = vmatmul.msk.f32.gmra.mxu1 %vm2320_vm2, %v2655_v19  ;;  %v2396_v19 = vsel %vm2320_vm2, %v13330_v44, -inf  ;;  %v2393_v38 = vsel %vm2320_vm2, %v13321_v25, -inf }
 0x3b9   : > { %v13336_v29 = vpop.eup %11245  ;;  %v2455_v34 = vmul.f32 1.442695, %v2420_v18  ;;  %v2457_v28 = vmul.f32 1.442695, %v2421_v3  ;;  %v2369_v3 = vsel %vm2320_vm2, %v13269_v6, -inf }
 0x3ba   : > { %v2519_v48 = vsel %vm2320_vm2, %v13336_v29, 0.0 }
 0x3bb   : > { %11249 = vpow2.f32 %v2455_v34  ;;  %2520 = vadd.xlane.f32.xlu1 %v2519_v48  ;;  %v2399_v34 = vsel %vm2320_vm2, %v13340_v35, -inf }
 0x3bc   : > { %11251 = vpow2.f32 %v2457_v28 }
 0x3be   : > { %v11248_v27 = vpop.eup %11247  ;;  %v2341_v30 = vpop.xlane.xlu0 %2340 }
 0x3bf   : > { %v2423_v10 = vsub.f32 %v13077_v52, %v2341_v30  ;;  %v2338_v50 = vpop.xlane.xlu2 %2337  ;;  %v2656_v12 = vmul.f32 %v11248_v27, %v13238_v13  ;;  %v2372_v30 = vsel %vm2320_vm2, %v13275_v63, -inf }
 0x3c0   : > { %v2422_v46 = vsub.f32 %v13067_v53, %v2338_v50  ;;  %v13354_v53 = vpop.f32.mrf.mxu3 }
 0x3c1   : > { %v13345_v5 = vpop.eup %11249  ;;  %v2461_v32 = vmul.f32 1.442695, %v2423_v10  ;;  %10271 = vmatmul.msk.f32.gmra.mxu1 %vm2320_vm2, %v2656_v12  ;;  %v2402_v28 = vsel %vm2320_vm2, %v13354_v53, -inf  ;;  %v2375_v12 = vsel %vm2320_vm2, %v13281_v61, -inf }
 0x3c2   : > { %v13348_v43 = vpop.eup %11251  ;;  %v2459_v41 = vmul.f32 1.442695, %v2422_v46  ;;  %v2522_v1 = vsel %vm2320_vm2, %v13345_v5, 0.0 }
 0x3c3   : > { %11253 = vpow2.f32 %v2461_v32  ;;  %2523 = vadd.xlane.f32.xlu2 %v2522_v1  ;;  %v2525_v52 = vsel %vm2320_vm2, %v13348_v43, 0.0 }
 0x3c4   : > { %11255 = vpow2.f32 %v2459_v41  ;;  %2526 = vadd.xlane.f32.xlu0 %v2525_v52  ;;  %v2378_v41 = vsel %vm2320_vm2, %v13283_v21, -inf  ;;  %v2381_v52 = vsel %vm2320_vm2, %v13285_v59, -inf }
 0x3c7   : > { %v2344_v13 = vpop.xlane.xlu2 %2343 }
 0x3c8   : > { %v2424_v47 = vsub.f32 %v13087_v22, %v2344_v13  ;;  %v13371_v15 = vpop.f32.mrf.mxu3 }
 0x3c9   : > { %v13357_v54 = vpop.eup %11253  ;;  %10330 = vmatmul.msk.f32.vlgmr.msra.gmra.mxu1 %vm1415_vm0, %v12237_v55  ;;  %v2405_v10 = vsel %vm2320_vm2, %v13371_v15, -inf }
 0x3ca   : > { %v13361_v51 = vpop.eup %11255  ;;  %v2463_v56 = vmul.f32 1.442695, %v2424_v47  ;;  %v2531_v2 = vsel %vm2320_vm2, %v13357_v54, 0.0 }
 0x3cb   : > { %2532 = vadd.xlane.f32.xlu2 %v2531_v2  ;;  %v2528_v58 = vsel %vm2320_vm2, %v13361_v51, 0.0 }
 0x3cc   : > { %11257 = vpow2.f32 %v2463_v56  ;;  %2529 = vadd.xlane.f32.xlu1 %v2528_v58 }
 0x3d0   : > { %v13387_v48 = vpop.f32.mrf.mxu3 }
 0x3d1   : > { %10331 = vmatmul.msk.f32.gmra.mxu1 %vm1415_vm0, %v12267_v9  ;;  %v2408_v27 = vsel %vm2320_vm2, %v13387_v48, -inf }
 0x3d2   : > { %v13369_v22 = vpop.eup %11257 }
 0x3d3   : > { %v2534_v18 = vsel %vm2320_vm2, %v13369_v22, 0.0  ;;  %2397 = vmax.xlane.f32.xlu2 %v2396_v19 }
 0x3d4   : > { %2535 = vadd.xlane.f32.xlu0 %v2534_v18  ;;  %2394 = vmax.xlane.f32.xlu1 %v2393_v38 }
 0x3d8   : > { %v13397_v50 = vpop.f32.mrf.mxu3 }
 0x3d9   : > { %10332 = vmatmul.msk.f32.gmra.mxu1 %vm1415_vm0, %v12298_v26  ;;  %v2411_v46 = vsel %vm2320_vm2, %v13397_v50, -inf }
 0x3db   : > { %2370 = vmax.xlane.f32.xlu2 %v2369_v3 }
 0x3dc   : > { %2400 = vmax.xlane.f32.xlu0 %v2399_v34  ;;  %2403 = vmax.xlane.f32.xlu1 %v2402_v28 }
 0x3e0   : > { %v13405_v32 = vpop.f32.mrf.mxu3 }
 0x3e1   : > { %10333 = vmatmul.msk.f32.gmra.mxu1 %vm1415_vm0, %v12319_v36  ;;  %v2414_v1 = vsel %vm2320_vm2, %v13405_v32, -inf }
 0x3e3   : > { %2409 = vmax.xlane.f32.xlu2 %v2408_v27 }
 0x3e4   : > { %2373 = vmax.xlane.f32.xlu1 %v2372_v30  ;;  %2406 = vmax.xlane.f32.xlu0 %v2405_v10 }
 0x3e9   : > { %10334 = vmatmul.msk.f32.gmra.mxu1 %vm1415_vm0, %v12354_v60 }
 0x3ec   : > { %2376 = vmax.xlane.f32.xlu0 %v2375_v12  ;;  %2412 = vmax.xlane.f32.xlu1 %v2411_v46 }
 0x3f1   : > { %10335 = vmatmul.msk.f32.gmra.mxu1 %vm1415_vm0, %v12381_v14 }
 0x3f4   : > { %2379 = vmax.xlane.f32.xlu0 %v2378_v41  ;;  %2415 = vmax.xlane.f32.xlu1 %v2414_v1 }
 0x3f9   : > { %10336 = vmatmul.msk.f32.gmra.mxu1 %vm1415_vm0, %v12405_v33 }
 0x3fc   : > { %2382 = vmax.xlane.f32.xlu0 %v2381_v52 }
 0x401   : > { %10337 = vmatmul.msk.f32.gmra.mxu1 %vm1415_vm0, %v12428_v45 }
 0x405   : > { %v13419_v13 = vpop.f32.mrf.mxu1 }
 0x406   : > { %19088 = vst [vmem:[#allocation28_spill] sm:$0xff] %v13419_v13 }
 0x409   : > { %10338 = vmatmul.msk.f32.gmra.mxu1 %vm1415_vm0, %v12467_v16 }
 0x40d   : > { %v13423_v47 = vpop.f32.mrf.mxu1 }
 0x40e   : > { %19089 = vst [vmem:[#allocation29_spill] sm:$0xff] %v13423_v47  ;;  %v13694_v47 = vld [vmem:[%s12222_s0 + $0x50] sm:$0xff] }
 0x411   : > { %10339 = vmatmul.msk.f32.gmra.mxu1 %vm1415_vm0, %v12482_v40 }
 0x415   : > { %v13427_v56 = vpop.f32.mrf.mxu1 }
 0x416   : > { %19090 = vst [vmem:[#allocation30_spill] sm:$0xff] %v13427_v56  ;;  %v2515_v2 = vpop.xlane.xlu1 %2514 }
 0x417   : > { %11259 = vrcp.f32 %v2515_v2 }
 0x419   : > { %10340 = vmatmul.msk.f32.gmra.mxu1 %vm1415_vm0, %v12508_v11 }
 0x41d   : > { %v11260_v58 = vpop.eup %11259  ;;  %v13431_v19 = vpop.f32.mrf.mxu1 }
 0x41e   : > { %19091 = vst [vmem:[#allocation31_spill] sm:$0xff] %v13431_v19  ;;  %v2641_v18 = vmul.f32 %v11260_v58, %v13302_v31 }
 0x420   : > { %10256 = vmatmul.msk.f32.vlgmr.msrb.gmra.mxu0 %vm2320_vm2, %v2641_v18 }
 0x421   : > { %10341 = vmatmul.msk.f32.gmra.mxu1 %vm1415_vm0, %v12546_v20 }
 0x425   : > { %v13437_v38 = vpop.f32.mrf.mxu1 }
 0x426   : > { %19092 = vst [vmem:[#allocation32_spill] sm:$0xff] %v13437_v38  ;;  %v2518_v3 = vpop.xlane.xlu0 %2517 }
 0x427   : > { %11261 = vrcp.f32 %v2518_v3 }
 0x429   : > { %10342 = vmatmul.msk.f32.gmra.mxu1 %vm1415_vm0, %v12584_v49  ;;  %v13682_v49 = vld [vmem:[%s12222_s0 + $0x48] sm:$0xff] }
 0x42d   : > { %v11262_v34 = vpop.eup %11261  ;;  %v13441_v28 = vpop.f32.mrf.mxu1 }
 0x42e   : > { %19093 = vst [vmem:[#allocation33_spill] sm:$0xff] %v13441_v28  ;;  %v2521_v27 = vpop.xlane.xlu1 %2520  ;;  %v2642_v30 = vmul.f32 %v11262_v34, %v13326_v8  ;;  %v19105_v28 = vld [vmem:[#allocation18_spill] sm:$0xff] }
 0x42f   : > { %11263 = vrcp.f32 %v2521_v27 }
 0x430   : > { %10257 = vmatmul.msk.f32.gmra.mxu0 %vm2320_vm2, %v2642_v30 }
 0x431   : > { %10343 = vmatmul.msk.f32.gmra.mxu1 %vm1415_vm0, %v12610_v23 }
 0x435   : > { %v11264_v31 = vpop.eup %11263  ;;  %v13447_v10 = vpop.f32.mrf.mxu1 }
 0x436   : > { %19094 = vst [vmem:[#allocation34_spill] sm:$0xff] %v13447_v10  ;;  %v2524_v12 = vpop.xlane.xlu2 %2523  ;;  %v2643_v46 = vmul.f32 %v11264_v31, %v13336_v29 }
 0x437   : > { %11265 = vrcp.f32 %v2524_v12  ;;  %v2527_v41 = vpop.xlane.xlu0 %2526 }
 0x438   : > { %10258 = vmatmul.msk.f32.gmra.mxu0 %vm2320_vm2, %v2643_v46  ;;  %11267 = vrcp.f32 %v2527_v41 }
 0x439   : > { %10344 = vmatmul.msk.f32.gmra.mxu1 %vm1415_vm0, %v12675_v0  ;;  %v13673_v0 = vld [vmem:[%s12222_s0 + $0x40] sm:$0xff] }
 0x43d   : > { %v11266_v8 = vpop.eup %11265 }
 0x43e   : > { %v13453_v1 = vpop.f32.mrf.mxu1  ;;  %v2533_v52 = vpop.xlane.xlu2 %2532  ;;  %v2644_v2 = vmul.f32 %v11266_v8, %v13345_v5 }
 0x43f   : > { %19095 = vst [vmem:[#allocation35_spill] sm:$0xff] %v13453_v1  ;;  %v2530_v58 = vpop.xlane.xlu1 %2529  ;;  %v11268_v29 = vpop.eup %11267  ;;  %v19104_v1 = vld [vmem:[#allocation17_spill] sm:$0xff] }
 0x440   : > { %10259 = vmatmul.msk.f32.gmra.mxu0 %vm2320_vm2, %v2644_v2  ;;  %11269 = vrcp.f32 %v2530_v58  ;;  %v2645_v34 = vmul.f32 %v11268_v29, %v13348_v43 }
 0x441   : > { %10345 = vmatmul.msk.f32.gmra.mxu1 %vm1415_vm0, %v12713_v24 }
 0x446   : > { %v13459_v18 = vpop.f32.mrf.mxu1  ;;  %v2398_v3 = vpop.xlane.xlu2 %2397 }
 0x447   : > { %v2536_v27 = vpop.xlane.xlu0 %2535  ;;  %v2395_v30 = vpop.xlane.xlu1 %2394  ;;  %v2442_v12 = vsub.f32 %v13330_v44, %v2398_v3 }
 0x448   : > { %v2441_v31 = vsub.f32 %v13321_v25, %v2395_v30  ;;  %10260 = vmatmul.msk.f32.gmra.mxu0 %vm2320_vm2, %v2645_v34  ;;  %v11270_v46 = vpop.eup %11269 }
 0x449   : > { %10346 = vmatmul.msk.f32.gmra.mxu1 %vm1415_vm0, %v12785_v57  ;;  %v2499_v41 = vmul.f32 1.442695, %v2442_v12  ;;  %v2646_v43 = vmul.f32 %v11270_v46, %v13361_v51 }
 0x44a   : > { %v2497_v5 = vmul.f32 1.442695, %v2441_v31 }
 0x44c   : > { %11271 = vpow2.f32 %v2497_v5 }
 0x44d   : > { %11273 = vrcp.f32 %v2533_v52 }
 0x44e   : > { %v13467_v8 = vpop.f32.mrf.mxu1  ;;  %v2371_v2 = vpop.xlane.xlu2 %2370  ;;  %11275 = vpow2.f32 %v2499_v41 }
 0x44f   : > { %v2401_v58 = vpop.xlane.xlu0 %2400  ;;  %v2404_v29 = vpop.xlane.xlu1 %2403  ;;  %11277 = vrcp.f32 %v2536_v27 }
 0x450   : > { %v2443_v25 = vsub.f32 %v13340_v35, %v2401_v58  ;;  %v2444_v34 = vsub.f32 %v13354_v53, %v2404_v29  ;;  %10261 = vmatmul.msk.f32.gmra.mxu0 %vm2320_vm2, %v2646_v43  ;;  %v2433_v58 = vsub.f32 %v13269_v6, %v2371_v2 }
 0x451   : > { %10347 = vmatmul.msk.f32.gmra.mxu1 %vm1415_vm0, %v12822_v4  ;;  %v19103_v4 = vld [vmem:[#allocation15_spill] sm:$0xff] }
 0x452   : > { %v13475_v44 = vpop.eup %11271  ;;  %v2501_v52 = vmul.f32 1.442695, %v2443_v25  ;;  %v2503_v3 = vmul.f32 1.442695, %v2444_v34 }
 0x453   : > { %v11274_v30 = vpop.eup %11273  ;;  %v2585_v51 = vsel %vm2320_vm2, %v13475_v44, 0.0 }
 0x454   : > { %11279 = vpow2.f32 %v2501_v52  ;;  %2586 = vadd.xlane.f32.xlu2 %v2585_v51  ;;  %v2647_v53 = vmul.f32 %v11274_v30, %v13357_v54  ;;  %v13482_v12 = vpop.eup %11275 }
 0x455   : > { %11281 = vpow2.f32 %v2503_v3  ;;  %v11278_v27 = vpop.eup %11277  ;;  %v2588_v34 = vsel %vm2320_vm2, %v13482_v12, 0.0  ;;  %v2481_v3 = vmul.f32 1.442695, %v2433_v58 }
 0x456   : > { %v13479_v35 = vpop.f32.mrf.mxu1  ;;  %v2410_v41 = vpop.xlane.xlu2 %2409  ;;  %v2648_v2 = vmul.f32 %v11278_v27, %v13369_v22  ;;  %v2387_v22 = vsel %vm2320_vm2, %v13293_v62, -inf }
 0x457   : > { %v2374_v31 = vpop.xlane.xlu1 %2373  ;;  %v2407_v5 = vpop.xlane.xlu0 %2406  ;;  %v2446_v54 = vsub.f32 %v13387_v48, %v2410_v41  ;;  %v2384_v41 = vsel %vm2320_vm2, %v13289_v39, -inf }
 0x458   : > { %v2445_v46 = vsub.f32 %v13371_v15, %v2407_v5  ;;  %10262 = vmatmul.msk.f32.gmra.mxu0 %vm2320_vm2, %v2647_v53  ;;  %v2434_v53 = vsub.f32 %v13275_v63, %v2374_v31 }
 0x459   : > { %10348 = vmatmul.msk.f32.gmra.mxu1 %vm1415_vm0, %v12840_v37  ;;  %v2507_v30 = vmul.f32 1.442695, %v2446_v54 }
 0x45a   : > { %v13488_v43 = vpop.eup %11279  ;;  %v2505_v29 = vmul.f32 1.442695, %v2445_v46  ;;  %v2483_v63 = vmul.f32 1.442695, %v2434_v53 }
 0x45b   : > { %v13491_v25 = vpop.eup %11281  ;;  %v2591_v15 = vsel %vm2320_vm2, %v13488_v43, 0.0 }
 0x45c   : > { %v2594_v52 = vsel %vm2320_vm2, %v13491_v25, 0.0  ;;  %2589 = vadd.xlane.f32.xlu2 %v2588_v34  ;;  %2592 = vadd.xlane.f32.xlu1 %v2591_v15  ;;  %11283 = vpow2.f32 %v2505_v29 }
 0x45d   : > { %2595 = vadd.xlane.f32.xlu0 %v2594_v52  ;;  %11285 = vpow2.f32 %v2481_v3  ;;  %v10291_v3 = vld [vmem:[%s19058_s23 + $0x38] sm:$0xff] }
 0x45e   : > { %v13500_v6 = vpop.f32.mrf.mxu1  ;;  %11287 = vpow2.f32 %v2507_v30  ;;  %2956 = vmatpush.msra.mxu0 %v10291_v3 }
 0x45f   : > { %v2377_v48 = vpop.xlane.xlu0 %2376  ;;  %v2413_v51 = vpop.xlane.xlu1 %2412  ;;  %11289 = vpow2.f32 %v2483_v63  ;;  %v10288_v63 = vld [vmem:[%s19058_s23 + $0x20] sm:$0xff] }
 0x460   : > { %10263 = vmatmul.msk.f32.gmra.mxu0 %vm2320_vm2, %v2648_v2  ;;  %v2435_v5 = vsub.f32 %v13281_v61, %v2377_v48  ;;  %v2447_v52 = vsub.f32 %v13397_v50, %v2413_v51  ;;  %v2390_v50 = vsel %vm2320_vm2, %v13299_v17, -inf }
 0x461   : > { %10349 = vmatmul.msk.f32.gmra.mxu1 %vm1415_vm0, %v12866_v7  ;;  %v19102_v7 = vld [vmem:[#allocation13_spill] sm:$0xff] }
 0x462   : > { %v13508_v46 = vpop.eup %11283  ;;  %v2485_v31 = vmul.f32 1.442695, %v2435_v5  ;;  %v2509_v53 = vmul.f32 1.442695, %v2447_v52  ;;  %v13555_v52 = vld [vmem:[%s12222_s0] sm:$0xff] }
 0x463   : > { %v2597_v27 = vsel %vm2320_vm2, %v13508_v46, 0.0  ;;  %v13518_v54 = vpop.eup %11285 }
 0x464   : > { %2385 = vmax.xlane.f32.xlu2 %v2384_v41  ;;  %2388 = vmax.xlane.f32.xlu1 %v2387_v22  ;;  %v13521_v15 = vpop.eup %11287  ;;  %11291 = vpow2.f32 %v2485_v31  ;;  %v2561_v48 = vsel %vm2320_vm2, %v13518_v54, 0.0 }
 0x465   : > { %2598 = vadd.xlane.f32.xlu0 %v2597_v27  ;;  %v2600_v51 = vsel %vm2320_vm2, %v13521_v15, 0.0  ;;  %v13542_v22 = vpop.eup %11289 }
 0x466   : > { %v13516_v58 = vpop.f32.mrf.mxu1  ;;  %v2564_v3 = vsel %vm2320_vm2, %v13542_v22, 0.0 }
 0x467   : > { %v2380_v61 = vpop.xlane.xlu0 %2379  ;;  %v2416_v29 = vpop.xlane.xlu1 %2415 }
 0x468   : > { %v2436_v34 = vsub.f32 %v13283_v21, %v2380_v61  ;;  %v2448_v30 = vsub.f32 %v13405_v32, %v2416_v29  ;;  %v10290_v21 = vld [vmem:[%s19058_s23 + $0x30] sm:$0xff]  ;;  %v10289_v32 = vld [vmem:[%s19058_s23 + $0x28] sm:$0xff]  ;;  %v19096_v61 = vld [vmem:[#allocation25_spill] sm:$0xff] }
 0x469   : > { %10350 = vmatmul.msk.f32.gmra.mxu1 %vm1415_vm0, %v12886_v42  ;;  %2957 = vmatpush.msra.mxu0 %v10290_v21 }
 0x46a   : > { %v2487_v2 = vmul.f32 1.442695, %v2436_v34  ;;  %v2511_v5 = vmul.f32 1.442695, %v2448_v30  ;;  %v13547_v31 = vpop.eup %11291 }
 0x46b   : > { %2958 = vmatpush.msra.mxu0 %v10289_v32  ;;  %v2567_v30 = vsel %vm2320_vm2, %v13547_v31, 0.0 }
 0x46c   : > { %11293 = vpow2.f32 %v2487_v2  ;;  %2562 = vadd.xlane.f32.xlu2 %v2561_v48  ;;  %2391 = vmax.xlane.f32.xlu1 %v2390_v50 }
 0x46d   : > { %2601 = vadd.xlane.f32.xlu0 %v2600_v51  ;;  %11295 = vpow2.f32 %v2509_v53  ;;  %2959 = vmatpush.msra.mxu0 %v10288_v63  ;;  %v19097_v51 = vld [vmem:[#allocation26_spill] sm:$0xff]  ;;  %v13572_v53 = vld [vmem:[%s12222_s0 + $0x8] sm:$0xff] }
 0x46e   : > { %v3099_v41 = vpop.f32.mrf.mxu1  ;;  %11297 = vpow2.f32 %v2511_v5  ;;  %10293 = vmatmul.msk.f32.vlgmr.msra.gmra.mxu0 %vm1415_vm0, %v13555_v52 }
 0x46f   : > { %v2383_v27 = vpop.xlane.xlu0 %2382 }
 0x470   : > { %v2437_v34 = vsub.f32 %v13285_v59, %v2383_v27  ;;  %v13583_v27 = vld [vmem:[%s18977_s7 + $0x1] ss:$0 sm:$0xff] }
 0x471   : > { %10351 = vmatmul.msk.f32.gmra.mxu1 %vm1415_vm0, %v19096_v61  ;;  %v13611_v61 = vld [vmem:[%s12222_s0 + $0x18] sm:$0xff] }
 0x472   : > { %v13551_v29 = vpop.eup %11293  ;;  %v2489_v21 = vmul.f32 1.442695, %v2437_v34 }
 0x473   : > { %v2570_v2 = vsel %vm2320_vm2, %v13551_v29, 0.0  ;;  %v13565_v59 = vpop.eup %11295 }
 0x474   : > { %2565 = vadd.xlane.f32.xlu2 %v2564_v3  ;;  %2568 = vadd.xlane.f32.xlu1 %v2567_v30  ;;  %v13567_v50 = vpop.eup %11297  ;;  %11299 = vpow2.f32 %v2489_v21  ;;  %v2603_v32 = vsel %vm2320_vm2, %v13565_v59, 0.0  ;;  %v13586_v3 = vpop.f32.mrf.mxu2  ;;  %v19098_v30 = vld [vmem:[#allocation27_spill] sm:$0xff]  ;;  %v13594_v21 = vld [vmem:[%s12222_s0 + $0x10] sm:$0xff] }
 0x475   : > { %2571 = vadd.xlane.f32.xlu0 %v2570_v2  ;;  %v2606_v5 = vsel %vm2320_vm2, %v13567_v50, 0.0 }
 0x476   : > { %v3102_v48 = vpop.f32.mrf.mxu1  ;;  %10294 = vmatmul.msk.f32.gmra.mxu0 %vm1415_vm0, %v13572_v53 }
 0x479   : > { %10352 = vmatmul.msk.f32.gmra.mxu1 %vm1415_vm0, %v19097_v51 }
 0x47a   : > { %v13588_v2 = vpop.eup %11299 }
 0x47c   : > { %2604 = vadd.xlane.f32.xlu2 %v2603_v32  ;;  %2607 = vadd.xlane.f32.xlu1 %v2606_v5  ;;  %v3103_v32 = vadd.f32 %v13583_v27, %v3102_v48  ;;  %v2573_v5 = vsel %vm2320_vm2, %v13588_v2, 0.0  ;;  %v13605_v51 = vpop.f32.mrf.mxu2  ;;  %v3097_v48 = vadd.f32 %v13583_v27, %v13516_v58  ;;  %v3091_v58 = vadd.f32 %v13583_v27, %v13479_v35 }
 0x47d   : > { %v3085_v35 = vadd.f32 %v13583_v27, %v13459_v18 }
 0x47e   : > { %v3105_v63 = vpop.f32.mrf.mxu1  ;;  %10295 = vmatmul.msk.f32.gmra.mxu0 %vm1415_vm0, %v13594_v21 }
 0x47f   : > { %v3106_v34 = vadd.f32 %v13583_v27, %v3105_v63 }
 0x481   : > { %10353 = vmatmul.msk.f32.gmra.mxu1 %vm1415_vm0, %v19098_v30  ;;  %10399 = vmatpush.xpose.msk.msra.mxu3 %vm1963_vm1, %v3106_v34  ;;  %v3100_v30 = vadd.f32 %v13583_v27, %v3099_v41  ;;  %v19099_v34 = vld [vmem:[#allocation7_spill] sm:$0xff]  ;;  %v3094_v41 = vadd.f32 %v13583_v27, %v13500_v6  ;;  %v3088_v6 = vadd.f32 %v13583_v27, %v13467_v8 }
 0x484   : > { %2574 = vadd.xlane.f32.xlu2 %v2573_v5  ;;  %v1921_v5 = vpop.f32.mrf.mxu2 }
 0x485   : > { %10400 = vmatpush.xpose.msk.msra.mxu3 %vm1963_vm1, %v3103_v32 }
 0x486   : > { %v13602_v63 = vpop.f32.mrf.mxu1  ;;  %10296 = vmatmul.msk.f32.gmra.mxu0 %vm1415_vm0, %v13611_v61 }
 0x489   : > { %10354 = vmatmul.msk.f32.gmra.mxu1 %vm1415_vm0, %v19099_v34  ;;  %10401 = vmatpush.xpose.msk.msra.mxu3 %vm1963_vm1, %v3100_v30  ;;  %v19100_v34 = vld [vmem:[#allocation9_spill] sm:$0xff]  ;;  %v13626_v30 = vld [vmem:[%s12222_s0 + $0x20] sm:$0xff] }
 0x48c   : > { %v1924_v42 = vpop.f32.mrf.mxu2 }
 0x48d   : > { %10402 = vmatpush.xpose.msk.msra.mxu3 %vm1963_vm1, %v3097_v48 }
 0x48e   : > { %v13618_v32 = vpop.f32.mrf.mxu1  ;;  %10297 = vmatmul.msk.f32.gmra.mxu0 %vm1415_vm0, %v13626_v30 }
 0x491   : > { %10355 = vmatmul.msk.f32.gmra.mxu1 %vm1415_vm0, %v19100_v34  ;;  %10403 = vmatpush.xpose.msk.msra.mxu3 %vm1963_vm1, %v3094_v41  ;;  %v19101_v34 = vld [vmem:[#allocation12_spill] sm:$0xff]  ;;  %v13641_v41 = vld [vmem:[%s12222_s0 + $0x28] sm:$0xff] }
 0x494   : > { %v1927_v8 = vpop.f32.mrf.mxu2 }
 0x495   : > { %10404 = vmatpush.xpose.msk.msra.mxu3 %vm1963_vm1, %v3091_v58 }
 0x496   : > { %v13633_v48 = vpop.f32.mrf.mxu1  ;;  %10298 = vmatmul.msk.f32.gmra.mxu0 %vm1415_vm0, %v13641_v41 }
 0x499   : > { %10356 = vmatmul.msk.f32.gmra.mxu1 %vm1415_vm0, %v19101_v34  ;;  %10405 = vmatpush.xpose.msk.msra.mxu3 %vm1963_vm1, %v3088_v6  ;;  %v13653_v34 = vld [vmem:[%s12222_s0 + $0x30] sm:$0xff] }
 0x49c   : > { %v1930_v18 = vpop.f32.mrf.mxu2 }
 0x49d   : > { %10406 = vmatpush.xpose.msk.msra.mxu3 %vm1963_vm1, %v3085_v35  ;;  %v13657_v6 = vpop.f32.mrf.mxu0  ;;  %v13664_v35 = vld [vmem:[%s12222_s0 + $0x38] sm:$0xff] }
 0x49e   : > { %v13648_v58 = vpop.f32.mrf.mxu1  ;;  %10299 = vmatmul.msk.f32.gmra.mxu0 %vm1415_vm0, %v13653_v34 }
 0x4a1   : > { %10357 = vmatmul.msk.f32.gmra.mxu1 %vm1415_vm0, %v19102_v7 }
 0x4a4   : > { %v1933_v24 = vpop.f32.mrf.mxu2 }
 0x4a6   : > { %v13659_v37 = vpop.f32.mrf.mxu1  ;;  %10300 = vmatmul.msk.f32.gmra.mxu0 %vm1415_vm0, %v13664_v35 }
 0x4a9   : > { %10358 = vmatmul.msk.f32.gmra.mxu1 %vm1415_vm0, %v19103_v4 }
 0x4ac   : > { %v1936_v23 = vpop.f32.mrf.mxu2 }
 0x4ad   : > { %v13668_v7 = vpop.f32.mrf.mxu0 }
 0x4ae   : > { %v3123_v57 = vpop.f32.mrf.mxu1  ;;  %10301 = vmatmul.msk.f32.gmra.mxu0 %vm1415_vm0, %v13673_v0 }
 0x4b1   : > { %10359 = vmatmul.msk.f32.gmra.mxu1 %vm1415_vm0, %v19104_v1  ;;  %v11864_v1 = vld [vmem:[%s18979_s9] ss:$0 sm:$0xff] }
 0x4b2   : > { %v1937_v38 = vadd.f32 %v11864_v1, %v1936_v23  ;;  %v1934_v20 = vadd.f32 %v11864_v1, %v1933_v24  ;;  %v1931_v11 = vadd.f32 %v11864_v1, %v1930_v18  ;;  %v1928_v40 = vadd.f32 %v11864_v1, %v1927_v8  ;;  %v13705_v18 = vld [vmem:[%s12222_s0 + $0x58] sm:$0xff] }
 0x4b3   : > { %v1925_v23 = vadd.f32 %v11864_v1, %v1924_v42  ;;  %v1922_v24 = vadd.f32 %v11864_v1, %v1921_v5  ;;  %v1916_v8 = vadd.f32 %v11864_v1, %v13586_v3 }
 0x4b4   : > { %2835 = vmatpush.msrb.mxu2 %v1937_v38 }
 0x4b5   : > { %v13677_v10 = vpop.f32.mrf.mxu0 }
 0x4b6   : > { %v3126_v4 = vpop.f32.mrf.mxu1  ;;  %10302 = vmatmul.msk.f32.gmra.mxu0 %vm1415_vm0, %v13682_v49  ;;  %2836 = vmatpush.msrb.mxu2 %v1934_v20  ;;  %v1919_v20 = vadd.f32 %v11864_v1, %v13605_v51  ;;  %v13716_v1 = vld [vmem:[%s12222_s0 + $0x60] sm:$0xff] }
 0x4b8   : > { %2837 = vmatpush.msrb.mxu2 %v1931_v11 }
 0x4b9   : > { %10360 = vmatmul.msk.f32.gmra.mxu1 %vm1415_vm0, %v19105_v28  ;;  %v19106_v28 = vld [vmem:[#allocation19_spill] sm:$0xff] }
 0x4ba   : > { %2838 = vmatpush.msrb.mxu2 %v1928_v40 }
 0x4bc   : > { %2839 = vmatpush.msrb.mxu2 %v1925_v23 }
 0x4bd   : > { %v13689_v56 = vpop.f32.mrf.mxu0 }
 0x4be   : > { %v3129_v19 = vpop.f32.mrf.mxu1  ;;  %10303 = vmatmul.msk.f32.gmra.mxu0 %vm1415_vm0, %v13694_v47  ;;  %2840 = vmatpush.msrb.mxu2 %v1922_v24 }
 0x4c0   : > { %2841 = vmatpush.msrb.mxu2 %v1919_v20  ;;  %v3127_v20 = vadd.f32 %v13583_v27, %v3126_v4 }
 0x4c1   : > { %10361 = vmatmul.msk.f32.gmra.mxu1 %vm1415_vm0, %v19106_v28 }
 0x4c2   : > { %2842 = vmatpush.msrb.mxu2 %v1916_v8 }
 0x4c5   : > { %v13702_v40 = vpop.f32.mrf.mxu0 }
 0x4c6   : > { %v13698_v38 = vpop.f32.mrf.mxu1  ;;  %10304 = vmatmul.msk.f32.gmra.mxu0 %vm1415_vm0, %v13705_v18 }
 0x4c7   : > { %v2587_v11 = vpop.xlane.xlu2 %2586 }
 0x4c8   : > { %11301 = vrcp.f32 %v2587_v11  ;;  %v3130_v11 = vadd.f32 %v13583_v27, %v3129_v19 }
 0x4cd   : > { %v13720_v3 = vpop.f32.mrf.mxu0 }
 0x4ce   : > { %v11302_v42 = vpop.eup %11301  ;;  %v13709_v5 = vpop.f32.mrf.mxu1  ;;  %10305 = vmatmul.msk.f32.gmra.mxu0 %vm1415_vm0, %v13716_v1 }
 0x4cf   : > { %v2665_v23 = vmul.f32 %v11302_v42, %v13475_v44  ;;  %v2590_v51 = vpop.xlane.xlu2 %2589  ;;  %v2593_v24 = vpop.xlane.xlu1 %2592 }
 0x4d0   : > { %11303 = vrcp.f32 %v2590_v51  ;;  %v2596_v44 = vpop.xlane.xlu0 %2595 }
 0x4d1   : > { %10280 = vmatmul.msk.f32.vlgmr.msrb.gmra.mxu3 %vm2320_vm2, %v2665_v23  ;;  %11305 = vrcp.f32 %v2593_v24  ;;  %v13733_v24 = vld [vmem:[%s12222_s0 + $0x68] sm:$0xff] }
 0x4d2   : > { %10415 = vmatpush.xpose.msk.msrb.mxu3 %vm1963_vm1, %v3130_v11  ;;  %v3124_v11 = vadd.f32 %v13583_v27, %v3123_v57 }
 0x4d5   : > { %v13739_v57 = vpop.f32.mrf.mxu0 }
 0x4d6   : > { %v11304_v8 = vpop.eup %11303  ;;  %10416 = vmatpush.xpose.msk.msrb.mxu3 %vm1963_vm1, %v3127_v20  ;;  %v13724_v19 = vpop.f32.mrf.mxu1  ;;  %10306 = vmatmul.msk.f32.gmra.mxu0 %vm1415_vm0, %v13733_v24  ;;  %19107 = vst [vmem:[#allocation36_spill] sm:$0xff] %v13739_v57 }
 0x4d7   : > { %v2386_v42 = vpop.xlane.xlu2 %2385  ;;  %v2389_v23 = vpop.xlane.xlu1 %2388  ;;  %v2666_v51 = vmul.f32 %v11304_v8, %v13482_v12  ;;  %v3121_v12 = vadd.f32 %v13583_v27, %v13659_v37 }
 0x4d8   : > { %v2438_v28 = vsub.f32 %v13289_v39, %v2386_v42  ;;  %v2439_v16 = vsub.f32 %v13293_v62, %v2389_v23  ;;  %v11306_v20 = vpop.eup %11305  ;;  %v2599_v39 = vpop.xlane.xlu0 %2598  ;;  %v3118_v42 = vadd.f32 %v13583_v27, %v13648_v58 }
 0x4d9   : > { %10281 = vmatmul.msk.f32.gmra.mxu3 %vm2320_vm2, %v2666_v51  ;;  %v2667_v8 = vmul.f32 %v11306_v20, %v13488_v43 }
 0x4da   : > { %v2491_v4 = vmul.f32 1.442695, %v2438_v28  ;;  %v2493_v13 = vmul.f32 1.442695, %v2439_v16  ;;  %10417 = vmatpush.xpose.msk.msrb.mxu3 %vm1963_vm1, %v3124_v11 }
 0x4dc   : > { %11307 = vpow2.f32 %v2491_v4 }
 0x4dd   : > { %11309 = vpow2.f32 %v2493_v13 }
 0x4de   : > { %11311 = vrcp.f32 %v2596_v44  ;;  %10418 = vmatpush.xpose.msk.msrb.mxu3 %vm1963_vm1, %v3121_v12  ;;  %v13742_v16 = vpop.f32.mrf.mxu1  ;;  %v13753_v44 = vld [vmem:[%s12222_s0 + $0x70] sm:$0xff] }
 0x4df   : > { %v2563_v62 = vpop.xlane.xlu2 %2562  ;;  %v2392_v28 = vpop.xlane.xlu1 %2391  ;;  %10307 = vmatmul.msk.f32.gmra.mxu0 %vm1415_vm0, %v13753_v44 }
 0x4e0   : > { %11313 = vrcp.f32 %v2563_v62  ;;  %v2440_v37 = vsub.f32 %v13299_v17, %v2392_v28  ;;  %v3115_v17 = vadd.f32 %v13583_v27, %v13633_v48  ;;  %v3112_v48 = vadd.f32 %v13583_v27, %v13618_v32 }
 0x4e1   : > { %10282 = vmatmul.msk.f32.gmra.mxu3 %vm2320_vm2, %v2667_v8  ;;  %v13772_v8 = vpop.f32.mrf.mxu0 }
 0x4e2   : > { %v13749_v23 = vpop.eup %11307  ;;  %v2495_v13 = vmul.f32 1.442695, %v2440_v37  ;;  %10419 = vmatpush.xpose.msk.msrb.mxu3 %vm1963_vm1, %v3118_v42  ;;  %19108 = vst [vmem:[#allocation37_spill] sm:$0xff] %v13772_v8  ;;  %v2602_v42 = vpop.xlane.xlu0 %2601  ;;  %v13780_v37 = vld [vmem:[%s12222_s0 + $0x78] sm:$0xff] }
 0x4e3   : > { %v13757_v51 = vpop.eup %11309  ;;  %v2576_v43 = vsel %vm2320_vm2, %v13749_v23, 0.0 }
 0x4e4   : > { %v11312_v58 = vpop.eup %11311  ;;  %11315 = vpow2.f32 %v2495_v13  ;;  %2577 = vadd.xlane.f32.xlu0 %v2576_v43  ;;  %v2579_v11 = vsel %vm2320_vm2, %v13757_v51, 0.0  ;;  %v3109_v13 = vadd.f32 %v13583_v27, %v13602_v63  ;;  %v13794_v63 = vld [vmem:[%s12222_s0 + $0x80] sm:$0xff] }
 0x4e5   : > { %2580 = vadd.xlane.f32.xlu1 %v2579_v11  ;;  %11317 = vrcp.f32 %v2599_v39  ;;  %v2668_v28 = vmul.f32 %v11312_v58, %v13491_v25 }
 0x4e6   : > { %v11314_v4 = vpop.eup %11313  ;;  %10420 = vmatpush.xpose.msk.msrb.mxu3 %vm1963_vm1, %v3115_v17  ;;  %v13766_v20 = vpop.f32.mrf.mxu1 }
 0x4e7   : > { %v2657_v12 = vmul.f32 %v11314_v4, %v13518_v54  ;;  %v2566_v62 = vpop.xlane.xlu2 %2565  ;;  %10308 = vmatmul.msk.f32.gmra.mxu0 %vm1415_vm0, %v13780_v37  ;;  %v2569_v25 = vpop.xlane.xlu1 %2568 }
 0x4e8   : > { %11319 = vrcp.f32 %v2566_v62 }
 0x4e9   : > { %10272 = vmatmul.msk.f32.vlgmr.msrb.gmra.mxu2 %vm2320_vm2, %v2657_v12  ;;  %10283 = vmatmul.msk.f32.gmra.mxu3 %vm2320_vm2, %v2668_v28  ;;  %11321 = vrcp.f32 %v2602_v42 }
 0x4ea   : > { %v13776_v39 = vpop.eup %11315  ;;  %10421 = vmatpush.xpose.msk.msrb.mxu3 %vm1963_vm1, %v3112_v48  ;;  %11323 = vrcp.f32 %v2569_v25  ;;  %v2572_v62 = vpop.xlane.xlu0 %2571 }
 0x4eb   : > { %v2582_v54 = vsel %vm2320_vm2, %v13776_v39, 0.0  ;;  %v11318_v32 = vpop.eup %11317  ;;  %v2961_v4 = vpop.f32.mrf.mxu0  ;;  %11325 = vrcp.f32 %v2572_v62  ;;  %v13812_v62 = vld [vmem:[%s12222_s0 + $0x90] sm:$0xff] }
 0x4ec   : > { %2583 = vadd.xlane.f32.xlu2 %v2582_v54  ;;  %v2669_v11 = vmul.f32 %v11318_v32, %v13508_v46  ;;  %v13803_v32 = vld [vmem:[%s12222_s0 + $0x88] sm:$0xff] }
 0x4ee   : > { %v11320_v43 = vpop.eup %11319  ;;  %10422 = vmatpush.xpose.msk.msrb.mxu3 %vm1963_vm1, %v3109_v13  ;;  %v3147_v58 = vpop.f32.mrf.mxu1 }
 0x4ef   : > { %v2658_v17 = vmul.f32 %v11320_v43, %v13542_v22  ;;  %v2605_v12 = vpop.xlane.xlu2 %2604  ;;  %10309 = vmatmul.msk.f32.gmra.mxu0 %vm1415_vm0, %v13794_v63  ;;  %v11322_v28 = vpop.eup %11321 }
 0x4f0   : > { %v11324_v48 = vpop.eup %11323  ;;  %11327 = vrcp.f32 %v2605_v12  ;;  %v2670_v42 = vmul.f32 %v11322_v28, %v13521_v15  ;;  %v2608_v54 = vpop.xlane.xlu1 %2607 }
 0x4f1   : > { %10273 = vmatmul.msk.f32.gmra.mxu2 %vm2320_vm2, %v2658_v17  ;;  %10284 = vmatmul.msk.f32.gmra.mxu3 %vm2320_vm2, %v2669_v11  ;;  %v2659_v46 = vmul.f32 %v11324_v48, %v13547_v31  ;;  %v11326_v13 = vpop.eup %11325  ;;  %11329 = vrcp.f32 %v2608_v54  ;;  %v13825_v54 = vld [vmem:[%s18975_s5 + $0x1] ss:$0 sm:$0xff] }
 0x4f2   : > { %v2660_v15 = vmul.f32 %v11326_v13, %v13551_v29  ;;  %v13828_v13 = vld [vmem:[%s12222_s0 + $0x98] sm:$0xff] }
 0x4f3   : > { %v2964_v25 = vpop.f32.mrf.mxu0 }
 0x4f6   : > { %v3150_v22 = vpop.f32.mrf.mxu1  ;;  %v11328_v17 = vpop.eup %11327 }
 0x4f7   : > { %10310 = vmatmul.msk.f32.gmra.mxu0 %vm1415_vm0, %v13803_v32  ;;  %v2575_v43 = vpop.xlane.xlu2 %2574  ;;  %v2671_v11 = vmul.f32 %v11328_v17, %v13565_v59  ;;  %v11330_v28 = vpop.eup %11329 }
 0x4f8   : > { %11331 = vrcp.f32 %v2575_v43 }
 0x4f9   : > { %10274 = vmatmul.msk.f32.gmra.mxu2 %vm2320_vm2, %v2659_v46  ;;  %10285 = vmatmul.msk.f32.gmra.mxu3 %vm2320_vm2, %v2670_v42  ;;  %v2672_v42 = vmul.f32 %v11330_v28, %v13567_v50  ;;  %v2965_v28 = vadd.f32 %v13825_v54, %v2964_v25 }
 0x4fb   : > { %v2967_v12 = vpop.f32.mrf.mxu0 }
 0x4fc   : > { %v2968_v25 = vadd.f32 %v13825_v54, %v2967_v12 }
 0x4fe   : > { %v3153_v31 = vpop.f32.mrf.mxu1  ;;  %v11332_v48 = vpop.eup %11331 }
 0x4ff   : > { %10311 = vmatmul.msk.f32.gmra.mxu0 %vm1415_vm0, %v13812_v62  ;;  %v2661_v29 = vmul.f32 %v11332_v48, %v13588_v2  ;;  %v2962_v2 = vadd.f32 %v13825_v54, %v2961_v4  ;;  %v3154_v50 = vadd.f32 %v13583_v27, %v3153_v31  ;;  %v3148_v4 = vadd.f32 %v13583_v27, %v3147_v58  ;;  %v13850_v48 = vld [vmem:[%s12222_s0 + $0xa8] sm:$0xff] }
 0x500   : > { %v3142_v58 = vadd.f32 %v13583_v27, %v13742_v16  ;;  %v3136_v16 = vadd.f32 %v13583_v27, %v13709_v5 }
 0x501   : > { %10275 = vmatmul.msk.f32.gmra.mxu2 %vm2320_vm2, %v2660_v15  ;;  %10286 = vmatmul.msk.f32.gmra.mxu3 %vm2320_vm2, %v2671_v11  ;;  %v13839_v15 = vld [vmem:[%s12222_s0 + $0xa0] sm:$0xff]  ;;  %v3151_v11 = vadd.f32 %v13583_v27, %v3150_v22  ;;  %v3145_v22 = vadd.f32 %v13583_v27, %v13766_v20  ;;  %v3139_v20 = vadd.f32 %v13583_v27, %v13724_v19 }
 0x502   : > { %v3133_v19 = vadd.f32 %v13583_v27, %v13698_v38  ;;  %v13895_v38 = vld [vmem:[%s12222_s0 + $0xc8] sm:$0xff] }
 0x503   : > { %v2970_v59 = vpop.f32.mrf.mxu0 }
 0x506   : > { %v13816_v46 = vpop.f32.mrf.mxu1 }
 0x507   : > { %10312 = vmatmul.msk.f32.gmra.mxu0 %vm1415_vm0, %v13828_v13 }
 0x509   : > { %10276 = vmatmul.msk.f32.gmra.mxu2 %vm2320_vm2, %v2661_v29  ;;  %10287 = vmatmul.msk.f32.gmra.mxu3 %vm2320_vm2, %v2672_v42 }
 0x50b   : > { %v2973_v43 = vpop.f32.mrf.mxu0 }
 0x50e   : > { %v13834_v17 = vpop.f32.mrf.mxu1 }
 0x50f   : > { %10313 = vmatmul.msk.f32.gmra.mxu0 %vm1415_vm0, %v13839_v15 }
 0x511   : > { %10407 = vmatmul.msk.f32.vlgmr.msra.gmra.mxu3 %vm1963_vm1, %v2962_v2  ;;  %v13865_v2 = vld [vmem:[%s12222_s0 + $0xb0] sm:$0xff] }
 0x512   : > { %10431 = vmatpush.xpose.msk.msra.mxu3 %vm1963_vm1, %v3154_v50  ;;  %v2971_v50 = vadd.f32 %v13825_v54, %v2970_v59  ;;  %v2974_v59 = vadd.f32 %v13825_v54, %v2973_v43 }
 0x513   : > { %v2976_v31 = vpop.f32.mrf.mxu0 }
 0x516   : > { %10432 = vmatpush.xpose.msk.msra.mxu3 %vm1963_vm1, %v3151_v11  ;;  %v13854_v29 = vpop.f32.mrf.mxu1 }
 0x517   : > { %10314 = vmatmul.msk.f32.gmra.mxu0 %vm1415_vm0, %v13850_v48 }
 0x519   : > { %10408 = vmatmul.msk.f32.gmra.mxu3 %vm1963_vm1, %v2965_v28  ;;  %v13878_v28 = vld [vmem:[%s12222_s0 + $0xb8] sm:$0xff] }
 0x51a   : > { %10433 = vmatpush.xpose.msk.msra.mxu3 %vm1963_vm1, %v3148_v4 }
 0x51b   : > { %v2979_v42 = vpop.f32.mrf.mxu0 }
 0x51c   : > { %v2980_v43 = vadd.f32 %v13825_v54, %v2979_v42 }
 0x51e   : > { %10434 = vmatpush.xpose.msk.msra.mxu3 %vm1963_vm1, %v3145_v22  ;;  %v3165_v12 = vpop.f32.mrf.mxu1  ;;  %v13888_v22 = vld [vmem:[%s12222_s0 + $0xc0] sm:$0xff] }
 0x51f   : > { %10315 = vmatmul.msk.f32.gmra.mxu0 %vm1415_vm0, %v13865_v2 }
 0x521   : > { %10409 = vmatmul.msk.f32.gmra.mxu3 %vm1963_vm1, %v2968_v25  ;;  %v2977_v25 = vadd.f32 %v13825_v54, %v2976_v31 }
 0x522   : > { %10435 = vmatpush.xpose.msk.msra.mxu3 %vm1963_vm1, %v3142_v58 }
 0x523   : > { %v2982_v11 = vpop.f32.mrf.mxu0 }
 0x526   : > { %10436 = vmatpush.xpose.msk.msra.mxu3 %vm1963_vm1, %v3139_v20  ;;  %v3168_v5 = vpop.f32.mrf.mxu1 }
 0x527   : > { %10316 = vmatmul.msk.f32.gmra.mxu0 %vm1415_vm0, %v13878_v28 }
 0x529   : > { %10410 = vmatmul.msk.f32.gmra.mxu3 %vm1963_vm1, %v2971_v50 }
 0x52a   : > { %10437 = vmatpush.xpose.msk.msra.mxu3 %vm1963_vm1, %v3136_v16  ;;  %v13902_v16 = vld [vmem:[%s12222_s0 + $0xd0] sm:$0xff] }
 0x52b   : > { %v2985_v4 = vpop.f32.mrf.mxu0 }
 0x52c   : > { %v2986_v45 = vadd.f32 %v13825_v54, %v2985_v4 }
 0x52e   : > { %10438 = vmatpush.xpose.msk.msra.mxu3 %vm1963_vm1, %v3133_v19  ;;  %v3171_v20 = vpop.f32.mrf.mxu1  ;;  %v2983_v19 = vadd.f32 %v13825_v54, %v2982_v11  ;;  %v13918_v11 = vld [vmem:[%s12222_s0 + $0xe0] sm:$0xff] }
 0x52f   : > { %10317 = vmatmul.msk.f32.gmra.mxu0 %vm1415_vm0, %v13888_v22 }
 0x531   : > { %10411 = vmatmul.msk.f32.gmra.mxu3 %vm1963_vm1, %v2974_v59 }
 0x533   : > { %v2988_v58 = vpop.f32.mrf.mxu0 }
 0x534   : > { %v2989_v57 = vadd.f32 %v13825_v54, %v2988_v58  ;;  %v3169_v58 = vadd.f32 %v13583_v27, %v3168_v5  ;;  %v13946_v5 = vld [vmem:[%s12222_s0 + $0xf0] sm:$0xff] }
 0x536   : > { %v3174_v31 = vpop.f32.mrf.mxu1 }
 0x537   : > { %10318 = vmatmul.msk.f32.gmra.mxu0 %vm1415_vm0, %v13895_v38 }
 0x539   : > { %10412 = vmatmul.msk.f32.gmra.mxu3 %vm1963_vm1, %v2977_v25  ;;  %v13909_v25 = vld [vmem:[%s12222_s0 + $0xd8] sm:$0xff] }
 0x53b   : > { %v2991_v50 = vpop.f32.mrf.mxu0 }
 0x53e   : > { %v3177_v42 = vpop.f32.mrf.mxu1 }
 0x53f   : > { %10319 = vmatmul.msk.f32.gmra.mxu0 %vm1415_vm0, %v13902_v16 }
 0x541   : > { %10413 = vmatmul.msk.f32.gmra.mxu3 %vm1963_vm1, %v2980_v43  ;;  %v3178_v43 = vadd.f32 %v13583_v27, %v3177_v42  ;;  %v3172_v42 = vadd.f32 %v13583_v27, %v3171_v20 }
 0x543   : > { %v2994_v59 = vpop.f32.mrf.mxu0 }
 0x547   : > { %10320 = vmatmul.msk.f32.gmra.mxu0 %vm1415_vm0, %v13909_v25 }
 0x549   : > { %10414 = vmatmul.msk.f32.gmra.mxu3 %vm1963_vm1, %v2983_v19  ;;  %v3175_v19 = vadd.f32 %v13583_v27, %v3174_v31 }
 0x54b   : > { %v2997_v8 = vpop.f32.mrf.mxu0 }
 0x54f   : > { %10321 = vmatmul.msk.f32.gmra.mxu0 %vm1415_vm0, %v13918_v11 }
 0x551   : > { %10423 = vmatmul.msk.f32.vlgmr.msrb.gmra.mxu3 %vm1963_vm1, %v2986_v45 }
 0x552   : > { %10447 = vmatpush.xpose.msk.msrb.mxu3 %vm1963_vm1, %v3178_v43  ;;  %v13931_v43 = vld [vmem:[%s12222_s0 + $0xe8] sm:$0xff] }
 0x553   : > { %v3000_v45 = vpop.f32.mrf.mxu0 }
 0x554   : > { %v13923_v33 = vpop.f32.mrf.mxu3 }
 0x555   : > { %19109 = vst [vmem:[#allocation38_spill] sm:$0xff] %v13923_v33 }
 0x556   : > { %10448 = vmatpush.xpose.msk.msrb.mxu3 %vm1963_vm1, %v3175_v19  ;;  %v2992_v19 = vadd.f32 %v13825_v54, %v2991_v50 }
 0x557   : > { %v2578_v4 = vpop.xlane.xlu0 %2577  ;;  %10322 = vmatmul.msk.f32.gmra.mxu0 %vm1415_vm0, %v13931_v43 }
 0x558   : > { %11333 = vrcp.f32 %v2578_v4  ;;  %v2581_v31 = vpop.xlane.xlu1 %2580  ;;  %v3166_v4 = vadd.f32 %v13583_v27, %v3165_v12  ;;  %v2995_v12 = vadd.f32 %v13825_v54, %v2994_v59 }
 0x559   : > { %10424 = vmatmul.msk.f32.gmra.mxu3 %vm1963_vm1, %v2989_v57  ;;  %11335 = vrcp.f32 %v2581_v31 }
 0x55a   : > { %10449 = vmatpush.xpose.msk.msrb.mxu3 %vm1963_vm1, %v3172_v42 }
 0x55c   : > { %v13936_v33 = vpop.f32.mrf.mxu3  ;;  %v3003_v42 = vpop.f32.mrf.mxu0 }
 0x55d   : > { %19110 = vst [vmem:[#allocation39_spill] sm:$0xff] %v13936_v33 }
 0x55e   : > { %v11334_v20 = vpop.eup %11333  ;;  %10450 = vmatpush.xpose.msk.msrb.mxu3 %vm1963_vm1, %v3169_v58 }
 0x55f   : > { %v2662_v57 = vmul.f32 %v11334_v20, %v13749_v23  ;;  %10323 = vmatmul.msk.f32.gmra.mxu0 %vm1415_vm0, %v13946_v5  ;;  %v2584_v50 = vpop.xlane.xlu2 %2583  ;;  %v11336_v31 = vpop.eup %11335  ;;  %v3163_v23 = vadd.f32 %v13583_v27, %v13854_v29  ;;  %v3160_v20 = vadd.f32 %v13583_v27, %v13834_v17  ;;  %v13963_v29 = vld [vmem:[%s12222_s0 + $0xf8] sm:$0xff]  ;;  %v2998_v17 = vadd.f32 %v13825_v54, %v2997_v8 }
 0x560   : > { %11337 = vrcp.f32 %v2584_v50  ;;  %v3004_v8 = vadd.f32 %v13825_v54, %v3003_v42 }
 0x561   : > { %10277 = vmatmul.msk.f32.gmra.mxu2 %vm2320_vm2, %v2662_v57  ;;  %10425 = vmatmul.msk.f32.gmra.mxu3 %vm1963_vm1, %v2992_v19  ;;  %v2663_v19 = vmul.f32 %v11336_v31, %v13757_v51 }
 0x562   : > { %10451 = vmatpush.xpose.msk.msrb.mxu3 %vm1963_vm1, %v3166_v4  ;;  %v3157_v4 = vadd.f32 %v13583_v27, %v13816_v46 }
 0x564   : > { %v13952_v58 = vpop.f32.mrf.mxu3  ;;  %v3006_v57 = vpop.f32.mrf.mxu0 }
 0x565   : > { %19111 = vst [vmem:[#allocation40_spill] sm:$0xff] %v13952_v58  ;;  %v3007_v42 = vadd.f32 %v13825_v54, %v3006_v57 }
 0x566   : > { %10452 = vmatpush.xpose.msk.msrb.mxu3 %vm1963_vm1, %v3163_v23  ;;  %v11338_v59 = vpop.eup %11337 }
 0x567   : > { %10324 = vmatmul.msk.f32.gmra.mxu0 %vm1415_vm0, %v13963_v29  ;;  %v2664_v50 = vmul.f32 %v11338_v59, %v13776_v39  ;;  %v10365_v39 = vld [vmem:[%s18978_s8 + $0x38] sm:$0xff]  ;;  %v10363_v59 = vld [vmem:[%s18978_s8 + $0x28] sm:$0xff] }
 0x568   : > { %3202 = vmatpush.msra.mxu2 %v10365_v39 }
 0x569   : > { %10278 = vmatmul.msk.f32.gmra.mxu2 %vm2320_vm2, %v2663_v19  ;;  %10426 = vmatmul.msk.f32.gmra.mxu3 %vm1963_vm1, %v2995_v12  ;;  %v3001_v12 = vadd.f32 %v13825_v54, %v3000_v45 }
 0x56a   : > { %10453 = vmatpush.xpose.msk.msrb.mxu3 %vm1963_vm1, %v3160_v20  ;;  %v10364_v20 = vld [vmem:[%s18978_s8 + $0x30] sm:$0xff] }
 0x56b   : > { %3203 = vmatpush.msra.mxu2 %v10364_v20 }
 0x56c   : > { %v13969_v51 = vpop.f32.mrf.mxu3  ;;  %v3009_v31 = vpop.f32.mrf.mxu0 }
 0x56d   : > { %19112 = vst [vmem:[#allocation41_spill] sm:$0xff] %v13969_v51  ;;  %3204 = vmatpush.msra.mxu2 %v10363_v59 }
 0x56e   : > { %10454 = vmatpush.xpose.msk.msrb.mxu3 %vm1963_vm1, %v3157_v4  ;;  %v10362_v4 = vld [vmem:[%s18978_s8 + $0x20] sm:$0xff] }
 0x56f   : > { %3205 = vmatpush.msra.mxu2 %v10362_v4 }
 0x571   : > { %10279 = vmatmul.msk.f32.gmra.mxu2 %vm2320_vm2, %v2664_v50  ;;  %10427 = vmatmul.msk.f32.gmra.mxu3 %vm1963_vm1, %v2998_v17 }
 0x574   : > { %v13976_v23 = vpop.f32.mrf.mxu3  ;;  %v3012_v19 = vpop.f32.mrf.mxu0 }
 0x575   : > { %19113 = vst [vmem:[#allocation42_spill] sm:$0xff] %v13976_v23  ;;  %v3013_v39 = vadd.f32 %v13825_v54, %v3012_v19 }
 0x579   : > { %10428 = vmatmul.msk.f32.gmra.mxu3 %vm1963_vm1, %v3001_v12  ;;  %10367 = vmatmul.msk.f32.vlgmr.msra.gmra.mxu2 %vm1415_vm0, %v13555_v52  ;;  %v3010_v12 = vadd.f32 %v13825_v54, %v3009_v31 }
 0x57c   : > { %v13980_v27 = vpop.f32.mrf.mxu3  ;;  %v3015_v46 = vpop.f32.mrf.mxu0 }
 0x57d   : > { %19114 = vst [vmem:[#allocation43_spill] sm:$0xff] %v13980_v27 }
 0x581   : > { %10429 = vmatmul.msk.f32.gmra.mxu3 %vm1963_vm1, %v3004_v8  ;;  %10368 = vmatmul.msk.f32.gmra.mxu2 %vm1415_vm0, %v13572_v53  ;;  %v3016_v53 = vadd.f32 %v13825_v54, %v3015_v46 }
 0x584   : > { %v13990_v45 = vpop.f32.mrf.mxu3  ;;  %v3018_v17 = vpop.f32.mrf.mxu0 }
 0x585   : > { %19115 = vst [vmem:[#allocation44_spill] sm:$0xff] %v13990_v45 }
 0x589   : > { %10430 = vmatmul.msk.f32.gmra.mxu3 %vm1963_vm1, %v3007_v42  ;;  %10369 = vmatmul.msk.f32.gmra.mxu2 %vm1415_vm0, %v13594_v21  ;;  %v3019_v21 = vadd.f32 %v13825_v54, %v3018_v17 }
 0x58c   : > { %v14002_v50 = vpop.f32.mrf.mxu3  ;;  %v3021_v8 = vpop.f32.mrf.mxu0 }
 0x58d   : > { %19116 = vst [vmem:[#allocation45_spill] sm:$0xff] %v14002_v50 }
 0x591   : > { %10439 = vmatmul.msk.f32.vlgmr.msra.gmra.mxu3 %vm1963_vm1, %v3010_v12  ;;  %10370 = vmatmul.msk.f32.gmra.mxu2 %vm1415_vm0, %v13611_v61  ;;  %v3022_v61 = vadd.f32 %v13825_v54, %v3021_v8 }
 0x594   : > { %v14008_v57 = vpop.f32.mrf.mxu3  ;;  %v3024_v59 = vpop.f32.mrf.mxu0 }
 0x595   : > { %v3659_v52 = vsel %vm2320_vm2, %v14008_v57, -inf }
 0x596   : > { %3660 = vmax.xlane.f32.xlu0 %v3659_v52 }
 0x599   : > { %10440 = vmatmul.msk.f32.gmra.mxu3 %vm1963_vm1, %v3013_v39  ;;  %10371 = vmatmul.msk.f32.gmra.mxu2 %vm1415_vm0, %v13626_v30  ;;  %v3025_v30 = vadd.f32 %v13825_v54, %v3024_v59  ;;  %v14056_v59 = vpop.f32.mrf.mxu2 }
 0x59c   : > { %v14016_v31 = vpop.f32.mrf.mxu3  ;;  %v3027_v4 = vpop.f32.mrf.mxu0 }
 0x59d   : > { %v3662_v20 = vsel %vm2320_vm2, %v14016_v31, -inf }
 0x59e   : > { %3663 = vmax.xlane.f32.xlu1 %v3662_v20 }
 0x5a1   : > { %10441 = vmatmul.msk.f32.gmra.mxu3 %vm1963_vm1, %v3016_v53  ;;  %10372 = vmatmul.msk.f32.gmra.mxu2 %vm1415_vm0, %v13641_v41  ;;  %v3028_v41 = vadd.f32 %v13825_v54, %v3027_v4 }
 0x5a4   : > { %v14024_v19 = vpop.f32.mrf.mxu3  ;;  %v3030_v17 = vpop.f32.mrf.mxu0 }
 0x5a5   : > { %v3665_v42 = vsel %vm2320_vm2, %v14024_v19, -inf }
 0x5a6   : > { %3666 = vmax.xlane.f32.xlu2 %v3665_v42 }
 0x5a9   : > { %10442 = vmatmul.msk.f32.gmra.mxu3 %vm1963_vm1, %v3019_v21  ;;  %10373 = vmatmul.msk.f32.gmra.mxu2 %vm1415_vm0, %v13653_v34  ;;  %v3031_v34 = vadd.f32 %v13825_v54, %v3030_v17 }
 0x5ac   : > { %v14032_v46 = vpop.f32.mrf.mxu3  ;;  %v3033_v53 = vpop.f32.mrf.mxu0 }
 0x5ad   : > { %v3668_v12 = vsel %vm2320_vm2, %v14032_v46, -inf }
 0x5ae   : > { %3669 = vmax.xlane.f32.xlu0 %v3668_v12  ;;  %v3034_v12 = vadd.f32 %v13825_v54, %v3033_v53 }
 0x5b1   : > { %10443 = vmatmul.msk.f32.gmra.mxu3 %vm1963_vm1, %v3022_v61  ;;  %10374 = vmatmul.msk.f32.gmra.mxu2 %vm1415_vm0, %v13664_v35  ;;  %v14066_v61 = vpop.f32.mrf.mxu2 }
 0x5b4   : > { %v14040_v39 = vpop.f32.mrf.mxu3  ;;  %v3036_v4 = vpop.f32.mrf.mxu0 }
 0x5b5   : > { %v3671_v52 = vsel %vm2320_vm2, %v14040_v39, -inf }
 0x5b6   : > { %3672 = vmax.xlane.f32.xlu1 %v3671_v52 }
 0x5b9   : > { %10444 = vmatmul.msk.f32.gmra.mxu3 %vm1963_vm1, %v3025_v30  ;;  %10375 = vmatmul.msk.f32.gmra.mxu2 %vm1415_vm0, %v13673_v0  ;;  %v3037_v0 = vadd.f32 %v13825_v54, %v3036_v4 }
 0x5bc   : > { %v14048_v8 = vpop.f32.mrf.mxu3  ;;  %v3039_v17 = vpop.f32.mrf.mxu0 }
 0x5bd   : > { %v3674_v20 = vsel %vm2320_vm2, %v14048_v8, -inf }
 0x5be   : > { %3675 = vmax.xlane.f32.xlu2 %v3674_v20 }
 0x5c1   : > { %10445 = vmatmul.msk.f32.gmra.mxu3 %vm1963_vm1, %v3028_v41  ;;  %10376 = vmatmul.msk.f32.gmra.mxu2 %vm1415_vm0, %v13682_v49  ;;  %v14079_v41 = vpop.f32.mrf.mxu2 }
 0x5c2   : > { %19117 = vst [vmem:[#allocation46_spill] sm:$0xff] %v14079_v41 }
 0x5c4   : > { %v14058_v21 = vpop.f32.mrf.mxu3  ;;  %v3042_v53 = vpop.f32.mrf.mxu0 }
 0x5c5   : > { %v3677_v42 = vsel %vm2320_vm2, %v14058_v21, -inf }
 0x5c6   : > { %3678 = vmax.xlane.f32.xlu0 %v3677_v42 }
 0x5c9   : > { %10446 = vmatmul.msk.f32.gmra.mxu3 %vm1963_vm1, %v3031_v34  ;;  %10377 = vmatmul.msk.f32.gmra.mxu2 %vm1415_vm0, %v13694_v47  ;;  %v3040_v34 = vadd.f32 %v13825_v54, %v3039_v17  ;;  %v14087_v42 = vpop.f32.mrf.mxu2 }
 0x5ca   : > { %19118 = vst [vmem:[#allocation47_spill] sm:$0xff] %v14087_v42 }
 0x5cc   : > { %v14068_v35 = vpop.f32.mrf.mxu3  ;;  %v3045_v4 = vpop.f32.mrf.mxu0 }
 0x5cd   : > { %v3680_v30 = vsel %vm2320_vm2, %v14068_v35, -inf  ;;  %v3046_v17 = vadd.f32 %v13825_v54, %v3045_v4 }
 0x5ce   : > { %3681 = vmax.xlane.f32.xlu2 %v3680_v30 }
 0x5d1   : > { %10455 = vmatmul.msk.f32.vlgmr.msrb.gmra.mxu3 %vm1963_vm1, %v3034_v12  ;;  %10378 = vmatmul.msk.f32.gmra.mxu2 %vm1415_vm0, %v13705_v18  ;;  %v3043_v12 = vadd.f32 %v13825_v54, %v3042_v53  ;;  %v14098_v47 = vpop.f32.mrf.mxu2 }
 0x5d2   : > { %19119 = vst [vmem:[#allocation48_spill] sm:$0xff] %v14098_v47 }
 0x5d4   : > { %v14076_v52 = vpop.f32.mrf.mxu3 }
 0x5d9   : > { %10456 = vmatmul.msk.f32.gmra.mxu3 %vm1963_vm1, %v3037_v0  ;;  %10379 = vmatmul.msk.f32.gmra.mxu2 %vm1415_vm0, %v13716_v1  ;;  %v3048_v0 = vpop.f32.mrf.mxu0 }
 0x5da   : > { %v3049_v1 = vadd.f32 %v13825_v54, %v3048_v0 }
 0x5dc   : > { %v14084_v20 = vpop.f32.mrf.mxu3 }
 0x5dd   : > { %v3686_v51 = vsel %vm2320_vm2, %v14084_v20, -inf }
 0x5e1   : > { %10457 = vmatmul.msk.f32.gmra.mxu3 %vm1963_vm1, %v3040_v34  ;;  %10380 = vmatmul.msk.f32.gmra.mxu2 %vm1415_vm0, %v13733_v24  ;;  %v3051_v34 = vpop.f32.mrf.mxu0 }
 0x5e2   : > { %v3052_v24 = vadd.f32 %v13825_v54, %v3051_v34 }
 0x5e4   : > { %v14092_v49 = vpop.f32.mrf.mxu3  ;;  %v14106_v18 = vpop.f32.mrf.mxu2 }
 0x5e5   : > { %19120 = vst [vmem:[#allocation49_spill] sm:$0xff] %v14106_v18  ;;  %v3689_v58 = vsel %vm2320_vm2, %v14092_v49, -inf }
 0x5e9   : > { %10458 = vmatmul.msk.f32.gmra.mxu3 %vm1963_vm1, %v3043_v12  ;;  %10381 = vmatmul.msk.f32.gmra.mxu2 %vm1415_vm0, %v13753_v44 }
 0x5ec   : > { %v14100_v30 = vpop.f32.mrf.mxu3  ;;  %v14114_v12 = vpop.f32.mrf.mxu2 }
 0x5ed   : > { %19121 = vst [vmem:[#allocation50_spill] sm:$0xff] %v14114_v12  ;;  %v3692_v33 = vsel %vm2320_vm2, %v14100_v30, -inf }
 0x5f1   : > { %10459 = vmatmul.msk.f32.gmra.mxu3 %vm1963_vm1, %v3046_v17  ;;  %10382 = vmatmul.msk.f32.gmra.mxu2 %vm1415_vm0, %v13780_v37  ;;  %v3054_v17 = vpop.f32.mrf.mxu0 }
 0x5f2   : > { %v3055_v0 = vadd.f32 %v13825_v54, %v3054_v17 }
 0x5f4   : > { %v14108_v53 = vpop.f32.mrf.mxu3  ;;  %v14125_v45 = vpop.f32.mrf.mxu2 }
 0x5f5   : > { %19122 = vst [vmem:[#allocation51_spill] sm:$0xff] %v14125_v45  ;;  %v3695_v45 = vsel %vm2320_vm2, %v14108_v53, -inf }
 0x5f9   : > { %10460 = vmatmul.msk.f32.gmra.mxu3 %vm1963_vm1, %v3049_v1  ;;  %10383 = vmatmul.msk.f32.gmra.mxu2 %vm1415_vm0, %v13794_v63 }
 0x5fc   : > { %v14116_v4 = vpop.f32.mrf.mxu3  ;;  %v14133_v37 = vpop.f32.mrf.mxu2 }
 0x601   : > { %10461 = vmatmul.msk.f32.gmra.mxu3 %vm1963_vm1, %v3052_v24  ;;  %10384 = vmatmul.msk.f32.gmra.mxu2 %vm1415_vm0, %v13803_v32 }
 0x604   : > { %v14122_v50 = vpop.f32.mrf.mxu3 }
 0x609   : > { %v3661_v44 = vpop.xlane.xlu0 %3660  ;;  %10462 = vmatmul.msk.f32.gmra.mxu3 %vm1963_vm1, %v3055_v0  ;;  %v14144_v0 = vpop.f32.mrf.mxu2  ;;  %10385 = vmatmul.msk.f32.gmra.mxu2 %vm1415_vm0, %v13812_v62 }
 0x60a   : > { %v3755_v1 = vsub.f32 %v14008_v57, %v3661_v44 }
 0x60c   : > { %v3787_v34 = vmul.f32 1.442695, %v3755_v1  ;;  %v14131_v27 = vpop.f32.mrf.mxu3 }
 0x60e   : > { %11339 = vpow2.f32 %v3787_v34 }
 0x611   : > { %v3664_v54 = vpop.xlane.xlu1 %3663  ;;  %10386 = vmatmul.msk.f32.gmra.mxu2 %vm1415_vm0, %v13828_v13 }
 0x612   : > { %v3756_v24 = vsub.f32 %v14016_v31, %v3664_v54  ;;  %v3683_v54 = vsel %vm2320_vm2, %v14076_v52, -inf }
 0x614   : > { %v14138_v17 = vpop.eup %11339  ;;  %v3789_v63 = vmul.f32 1.442695, %v3756_v24  ;;  %v14140_v23 = vpop.f32.mrf.mxu3 }
 0x615   : > { %v3851_v57 = vsel %vm2320_vm2, %v14138_v17, 0.0 }
 0x616   : > { %11341 = vpow2.f32 %v3789_v63  ;;  %3852 = vadd.xlane.f32.xlu1 %v3851_v57  ;;  %v14157_v63 = vpop.f32.mrf.mxu2 }
 0x619   : > { %v3667_v44 = vpop.xlane.xlu2 %3666  ;;  %10387 = vmatmul.msk.f32.gmra.mxu2 %vm1415_vm0, %v13839_v15 }
 0x61a   : > { %v3757_v32 = vsub.f32 %v14024_v19, %v3667_v44 }
 0x61c   : > { %v14149_v1 = vpop.eup %11341  ;;  %v3791_v31 = vmul.f32 1.442695, %v3757_v32  ;;  %v14151_v34 = vpop.f32.mrf.mxu3 }
 0x61d   : > { %v3854_v24 = vsel %vm2320_vm2, %v14149_v1, 0.0 }
 0x61e   : > { %11343 = vpow2.f32 %v3791_v31  ;;  %3684 = vmax.xlane.f32.xlu1 %v3683_v54  ;;  %3855 = vadd.xlane.f32.xlu0 %v3854_v24  ;;  %v3216_v54 = vpop.f32.mrf.mxu2 }
 0x621   : > { %v3670_v62 = vpop.xlane.xlu0 %3669  ;;  %10388 = vmatmul.msk.f32.gmra.mxu2 %vm1415_vm0, %v13850_v48 }
 0x622   : > { %v3758_v19 = vsub.f32 %v14032_v46, %v3670_v62 }
 0x624   : > { %v14162_v57 = vpop.eup %11343  ;;  %v3793_v44 = vmul.f32 1.442695, %v3758_v19  ;;  %v14164_v32 = vpop.f32.mrf.mxu3 }
 0x625   : > { %v3857_v31 = vsel %vm2320_vm2, %v14162_v57, 0.0 }
 0x626   : > { %11345 = vpow2.f32 %v3793_v44  ;;  %3687 = vmax.xlane.f32.xlu1 %v3686_v51  ;;  %3858 = vadd.xlane.f32.xlu0 %v3857_v31  ;;  %v3219_v51 = vpop.f32.mrf.mxu2 }
 0x629   : > { %v3673_v13 = vpop.xlane.xlu1 %3672  ;;  %10389 = vmatmul.msk.f32.gmra.mxu2 %vm1415_vm0, %v13865_v2 }
 0x62a   : > { %v3759_v46 = vsub.f32 %v14040_v39, %v3673_v13 }
 0x62c   : > { %v14173_v24 = vpop.eup %11345  ;;  %v3795_v62 = vmul.f32 1.442695, %v3759_v46  ;;  %v14175_v19 = vpop.f32.mrf.mxu3 }
 0x62d   : > { %v3860_v44 = vsel %vm2320_vm2, %v14173_v24, 0.0 }
 0x62e   : > { %11347 = vpow2.f32 %v3795_v62  ;;  %3690 = vmax.xlane.f32.xlu1 %v3689_v58  ;;  %3861 = vadd.xlane.f32.xlu0 %v3860_v44  ;;  %v3222_v58 = vpop.f32.mrf.mxu2 }
 0x631   : > { %v3676_v15 = vpop.xlane.xlu2 %3675  ;;  %10390 = vmatmul.msk.f32.gmra.mxu2 %vm1415_vm0, %v13878_v28 }
 0x632   : > { %v3760_v39 = vsub.f32 %v14048_v8, %v3676_v15 }
 0x634   : > { %v14184_v31 = vpop.eup %11347  ;;  %v3797_v13 = vmul.f32 1.442695, %v3760_v39  ;;  %v14186_v46 = vpop.f32.mrf.mxu3 }
 0x635   : > { %v3863_v62 = vsel %vm2320_vm2, %v14184_v31, 0.0 }
 0x636   : > { %11349 = vpow2.f32 %v3797_v13  ;;  %3693 = vmax.xlane.f32.xlu1 %v3692_v33  ;;  %3864 = vadd.xlane.f32.xlu0 %v3863_v62  ;;  %v3225_v33 = vpop.f32.mrf.mxu2  ;;  %v14209_v62 = vld [vmem:[%s18979_s9 + $0x1] ss:$0 sm:$0xff] }
 0x639   : > { %v3679_v48 = vpop.xlane.xlu0 %3678  ;;  %10391 = vmatmul.msk.f32.gmra.mxu2 %vm1415_vm0, %v13888_v22 }
 0x63a   : > { %v3761_v8 = vsub.f32 %v14058_v21, %v3679_v48 }
 0x63c   : > { %v14195_v44 = vpop.eup %11349  ;;  %v3799_v15 = vmul.f32 1.442695, %v3761_v8  ;;  %v14197_v39 = vpop.f32.mrf.mxu3 }
 0x63d   : > { %v3866_v13 = vsel %vm2320_vm2, %v14195_v44, 0.0 }
 0x63e   : > { %11351 = vpow2.f32 %v3799_v15  ;;  %3696 = vmax.xlane.f32.xlu1 %v3695_v45  ;;  %3867 = vadd.xlane.f32.xlu0 %v3866_v13  ;;  %v3698_v45 = vsel %vm2320_vm2, %v14116_v4, -inf  ;;  %v3228_v28 = vpop.f32.mrf.mxu2 }
 0x63f   : > { %v3229_v13 = vadd.f32 %v14209_v62, %v3228_v28  ;;  %v3704_v28 = vsel %vm2320_vm2, %v14131_v27, -inf }
 0x641   : > { %v3682_v2 = vpop.xlane.xlu2 %3681  ;;  %4043 = vmatpush.msrb.mxu0 %v3229_v13  ;;  %10392 = vmatmul.msk.f32.gmra.mxu2 %vm1415_vm0, %v13895_v38 }
 0x642   : > { %v3762_v21 = vsub.f32 %v14068_v35, %v3682_v2  ;;  %v3226_v35 = vadd.f32 %v14209_v62, %v3225_v33  ;;  %v3223_v2 = vadd.f32 %v14209_v62, %v3222_v58  ;;  %v3701_v33 = vsel %vm2320_vm2, %v14122_v50, -inf }
 0x643   : > { %v3208_v58 = vadd.f32 %v14209_v62, %v14133_v37 }
 0x644   : > { %v14211_v48 = vpop.eup %11351  ;;  %v3801_v8 = vmul.f32 1.442695, %v3762_v21  ;;  %v14213_v12 = vpop.f32.mrf.mxu3  ;;  %v3220_v21 = vadd.f32 %v14209_v62, %v3219_v51  ;;  %4044 = vmatpush.msrb.mxu0 %v3226_v35  ;;  %v3214_v51 = vadd.f32 %v14209_v62, %v14157_v63 }
 0x645   : > { %v3869_v15 = vsel %vm2320_vm2, %v14211_v48, 0.0 }
 0x646   : > { %11353 = vpow2.f32 %v3801_v8  ;;  %3699 = vmax.xlane.f32.xlu1 %v3698_v45  ;;  %3870 = vadd.xlane.f32.xlu0 %v3869_v15  ;;  %v3217_v8 = vadd.f32 %v14209_v62, %v3216_v54  ;;  %v14234_v22 = vpop.f32.mrf.mxu2  ;;  %v3211_v54 = vadd.f32 %v14209_v62, %v14144_v0 }
 0x647   : > { %4045 = vmatpush.msrb.mxu0 %v3223_v2 }
 0x649   : > { %4046 = vmatpush.msrb.mxu0 %v3220_v21  ;;  %10393 = vmatmul.msk.f32.gmra.mxu2 %vm1415_vm0, %v13902_v16 }
 0x64b   : > { %4047 = vmatpush.msrb.mxu0 %v3217_v8 }
 0x64c   : > { %v14225_v18 = vpop.eup %11353  ;;  %v14227_v47 = vpop.f32.mrf.mxu3 }
 0x64d   : > { %v3872_v45 = vsel %vm2320_vm2, %v14225_v18, 0.0  ;;  %4048 = vmatpush.msrb.mxu0 %v3214_v51 }
 0x64e   : > { %3702 = vmax.xlane.f32.xlu1 %v3701_v33  ;;  %3873 = vadd.xlane.f32.xlu0 %v3872_v45  ;;  %v3234_v38 = vpop.f32.mrf.mxu2 }
 0x64f   : > { %4049 = vmatpush.msrb.mxu0 %v3211_v54 }
 0x651   : > { %4050 = vmatpush.msrb.mxu0 %v3208_v58  ;;  %10394 = vmatmul.msk.f32.gmra.mxu2 %vm1415_vm0, %v13909_v25 }
 0x654   : > { %v14244_v15 = vpop.f32.mrf.mxu3 }
 0x655   : > { %v3731_v63 = vsel %vm2320_vm2, %v14244_v15, -inf }
 0x656   : > { %3705 = vmax.xlane.f32.xlu1 %v3704_v28  ;;  %3732 = vmax.xlane.f32.xlu2 %v3731_v63  ;;  %v3237_v35 = vpop.f32.mrf.mxu2 }
 0x657   : > { %v3238_v41 = vadd.f32 %v14209_v62, %v3237_v35 }
 0x659   : > { %10395 = vmatmul.msk.f32.gmra.mxu2 %vm1415_vm0, %v13918_v11 }
 0x65c   : > { %v14252_v0 = vpop.f32.mrf.mxu3 }
 0x65d   : > { %v3734_v37 = vsel %vm2320_vm2, %v14252_v0, -inf }
 0x65e   : > { %3735 = vmax.xlane.f32.xlu2 %v3734_v37  ;;  %v3240_v21 = vpop.f32.mrf.mxu2 }
 0x65f   : > { %v3241_v42 = vadd.f32 %v14209_v62, %v3240_v21  ;;  %v3710_v21 = vsel %vm2320_vm2, %v14151_v34, -inf }
 0x661   : > { %10396 = vmatmul.msk.f32.gmra.mxu2 %vm1415_vm0, %v13931_v43 }
 0x664   : > { %v14258_v13 = vpop.f32.mrf.mxu3 }
 0x665   : > { %v3737_v2 = vsel %vm2320_vm2, %v14258_v13, -inf }
 0x666   : > { %3738 = vmax.xlane.f32.xlu2 %v3737_v2  ;;  %v3243_v25 = vpop.f32.mrf.mxu2 }
 0x669   : > { %10397 = vmatmul.msk.f32.gmra.mxu2 %vm1415_vm0, %v13946_v5 }
 0x66c   : > { %v14264_v16 = vpop.f32.mrf.mxu3 }
 0x66d   : > { %v3740_v8 = vsel %vm2320_vm2, %v14264_v16, -inf }
 0x66e   : > { %3741 = vmax.xlane.f32.xlu2 %v3740_v8  ;;  %v3246_v11 = vpop.f32.mrf.mxu2 }
 0x671   : > { %10398 = vmatmul.msk.f32.gmra.mxu2 %vm1415_vm0, %v13963_v29 }
 0x674   : > { %v14270_v33 = vpop.f32.mrf.mxu3 }
 0x675   : > { %v3743_v45 = vsel %vm2320_vm2, %v14270_v33, -inf }
 0x676   : > { %3744 = vmax.xlane.f32.xlu2 %v3743_v45  ;;  %v3249_v43 = vpop.f32.mrf.mxu2  ;;  %v3247_v45 = vadd.f32 %v14209_v62, %v3246_v11 }
 0x677   : > { %v3250_v5 = vadd.f32 %v14209_v62, %v3249_v43 }
 0x67c   : > { %v14276_v51 = vpop.f32.mrf.mxu3 }
 0x67d   : > { %v3746_v54 = vsel %vm2320_vm2, %v14276_v51, -inf }
 0x67e   : > { %3747 = vmax.xlane.f32.xlu2 %v3746_v54  ;;  %v3252_v37 = vpop.f32.mrf.mxu2  ;;  %v3244_v54 = vadd.f32 %v14209_v62, %v3243_v25  ;;  %v3235_v25 = vadd.f32 %v14209_v62, %v3234_v38  ;;  %v3713_v38 = vsel %vm2320_vm2, %v14164_v32, -inf }
 0x67f   : > { %v3253_v2 = vadd.f32 %v14209_v62, %v3252_v37 }
 0x681   : > { %4108 = vmatpush.msrb.mxu1 %v3253_v2 }
 0x683   : > { %4109 = vmatpush.msrb.mxu1 %v3250_v5 }
 0x684   : > { %v14282_v58 = vpop.f32.mrf.mxu3 }
 0x685   : > { %v3749_v28 = vsel %vm2320_vm2, %v14282_v58, -inf  ;;  %4110 = vmatpush.msrb.mxu1 %v3247_v45 }
 0x686   : > { %3750 = vmax.xlane.f32.xlu2 %v3749_v28  ;;  %v14298_v2 = vpop.f32.mrf.mxu2 }
 0x687   : > { %4111 = vmatpush.msrb.mxu1 %v3244_v54 }
 0x689   : > { %v3853_v63 = vpop.xlane.xlu1 %3852  ;;  %4112 = vmatpush.msrb.mxu1 %v3241_v42 }
 0x68a   : > { %11355 = vrcp.f32 %v3853_v63 }
 0x68b   : > { %4113 = vmatpush.msrb.mxu1 %v3238_v41 }
 0x68c   : > { %v14288_v8 = vpop.f32.mrf.mxu3 }
 0x68d   : > { %v3752_v29 = vsel %vm2320_vm2, %v14288_v8, -inf  ;;  %4114 = vmatpush.msrb.mxu1 %v3235_v25 }
 0x68e   : > { %3753 = vmax.xlane.f32.xlu1 %v3752_v29  ;;  %v14307_v29 = vpop.f32.mrf.mxu2 }
 0x690   : > { %v11356_v28 = vpop.eup %11355 }
 0x691   : > { %v3979_v43 = vmul.f32 %v11356_v28, %v14138_v17  ;;  %v3856_v63 = vpop.xlane.xlu0 %3855  ;;  %v3685_v37 = vpop.xlane.xlu1 %3684  ;;  %v3232_v17 = vadd.f32 %v14209_v62, %v14234_v22 }
 0x692   : > { %11357 = vrcp.f32 %v3856_v63  ;;  %v3763_v11 = vsub.f32 %v14076_v52, %v3685_v37  ;;  %v3707_v63 = vsel %vm2320_vm2, %v14140_v23, -inf }
 0x693   : > { %10463 = vmatmul.msk.f32.vlgmr.msrb.gmra.mxu0 %vm2320_vm2, %v3979_v43  ;;  %4115 = vmatpush.msrb.mxu1 %v3232_v17  ;;  %v3716_v43 = vsel %vm2320_vm2, %v14175_v19, -inf }
 0x694   : > { %v3803_v5 = vmul.f32 1.442695, %v3763_v11 }
 0x696   : > { %11359 = vpow2.f32 %v3803_v5  ;;  %3711 = vmax.xlane.f32.xlu1 %v3710_v21  ;;  %v3261_v28 = vpop.f32.mrf.mxu2 }
 0x698   : > { %v11358_v35 = vpop.eup %11357 }
 0x699   : > { %v3859_v52 = vpop.xlane.xlu0 %3858  ;;  %v3980_v45 = vmul.f32 %v11358_v35, %v14149_v1 }
 0x69a   : > { %11361 = vrcp.f32 %v3859_v52 }
 0x69b   : > { %10464 = vmatmul.msk.f32.gmra.mxu0 %vm2320_vm2, %v3980_v45  ;;  %v3722_v45 = vsel %vm2320_vm2, %v14197_v39, -inf }
 0x69c   : > { %v14310_v42 = vpop.eup %11359 }
 0x69d   : > { %v3875_v22 = vsel %vm2320_vm2, %v14310_v42, 0.0 }
 0x69e   : > { %3714 = vmax.xlane.f32.xlu1 %v3713_v38  ;;  %3876 = vadd.xlane.f32.xlu0 %v3875_v22  ;;  %v3264_v5 = vpop.f32.mrf.mxu2 }
 0x6a0   : > { %v11362_v41 = vpop.eup %11361 }
 0x6a1   : > { %v3862_v54 = vpop.xlane.xlu0 %3861  ;;  %v3981_v1 = vmul.f32 %v11362_v41, %v14162_v57  ;;  %v3719_v57 = vsel %vm2320_vm2, %v14186_v46, -inf }
 0x6a2   : > { %11363 = vrcp.f32 %v3862_v54  ;;  %v3688_v54 = vpop.xlane.xlu1 %3687 }
 0x6a3   : > { %10465 = vmatmul.msk.f32.gmra.mxu0 %vm2320_vm2, %v3981_v1 }
 0x6a6   : > { %3717 = vmax.xlane.f32.xlu1 %v3716_v43  ;;  %3708 = vmax.xlane.f32.xlu0 %v3707_v63  ;;  %v3267_v52 = vpop.f32.mrf.mxu2 }
 0x6a8   : > { %v11364_v37 = vpop.eup %11363 }
 0x6a9   : > { %v3865_v11 = vpop.xlane.xlu0 %3864  ;;  %v3982_v25 = vmul.f32 %v11364_v37, %v14173_v24 }
 0x6aa   : > { %11365 = vrcp.f32 %v3865_v11  ;;  %v3691_v11 = vpop.xlane.xlu1 %3690 }
 0x6ab   : > { %10466 = vmatmul.msk.f32.gmra.mxu0 %vm2320_vm2, %v3982_v25 }
 0x6ae   : > { %3720 = vmax.xlane.f32.xlu1 %v3719_v57  ;;  %v3270_v41 = vpop.f32.mrf.mxu2 }
 0x6b0   : > { %v11366_v21 = vpop.eup %11365 }
 0x6b1   : > { %v3868_v17 = vpop.xlane.xlu0 %3867  ;;  %v3983_v35 = vmul.f32 %v11366_v21, %v14184_v31  ;;  %v3725_v31 = vsel %vm2320_vm2, %v14213_v12, -inf }
 0x6b2   : > { %11367 = vrcp.f32 %v3868_v17 }
 0x6b3   : > { %10467 = vmatmul.msk.f32.gmra.mxu0 %vm2320_vm2, %v3983_v35 }
 0x6b6   : > { %3723 = vmax.xlane.f32.xlu1 %v3722_v45  ;;  %v3273_v37 = vpop.f32.mrf.mxu2 }
 0x6b7   : > { %v3274_v35 = vadd.f32 %v14209_v62, %v3273_v37  ;;  %v3259_v37 = vadd.f32 %v14209_v62, %v14307_v29 }
 0x6b8   : > { %v11368_v24 = vpop.eup %11367 }
 0x6b9   : > { %v3871_v38 = vpop.xlane.xlu0 %3870  ;;  %v3984_v22 = vmul.f32 %v11368_v24, %v14195_v44 }
 0x6ba   : > { %11369 = vrcp.f32 %v3871_v38  ;;  %v3271_v38 = vadd.f32 %v14209_v62, %v3270_v41  ;;  %v3765_v41 = vsub.f32 %v14092_v49, %v3691_v11 }
 0x6bb   : > { %10468 = vmatmul.msk.f32.gmra.mxu0 %vm2320_vm2, %v3984_v22  ;;  %v3268_v22 = vadd.f32 %v14209_v62, %v3267_v52 }
 0x6be   : > { %3726 = vmax.xlane.f32.xlu1 %v3725_v31  ;;  %v3276_v17 = vpop.f32.mrf.mxu2  ;;  %v3694_v31 = vpop.xlane.xlu1 %3693 }
 0x6bf   : > { %v3277_v45 = vadd.f32 %v14209_v62, %v3276_v17 }
 0x6c0   : > { %v11370_v1 = vpop.eup %11369 }
 0x6c1   : > { %v3874_v43 = vpop.xlane.xlu0 %3873  ;;  %v3985_v63 = vmul.f32 %v11370_v1, %v14211_v48  ;;  %v3764_v48 = vsub.f32 %v14084_v20, %v3688_v54  ;;  %4173 = vmatpush.msrb.mxu2 %v3277_v45  ;;  %v3262_v20 = vadd.f32 %v14209_v62, %v3261_v28  ;;  %v3807_v28 = vmul.f32 1.442695, %v3765_v41 }
 0x6c2   : > { %11371 = vrcp.f32 %v3874_v43 }
 0x6c3   : > { %10469 = vmatmul.msk.f32.gmra.mxu0 %vm2320_vm2, %v3985_v63  ;;  %4174 = vmatpush.msrb.mxu2 %v3274_v35 }
 0x6c5   : > { %4175 = vmatpush.msrb.mxu2 %v3271_v38 }
 0x6c6   : > { %v14346_v63 = vpop.f32.mrf.mxu2  ;;  %v3697_v29 = vpop.xlane.xlu1 %3696 }
 0x6c7   : > { %4176 = vmatpush.msrb.mxu2 %v3268_v22 }
 0x6c8   : > { %v11372_v25 = vpop.eup %11371 }
 0x6c9   : > { %v3733_v44 = vpop.xlane.xlu2 %3732  ;;  %v3986_v57 = vmul.f32 %v11372_v25, %v14225_v18  ;;  %v3805_v18 = vmul.f32 1.442695, %v3764_v48 }
 0x6ca   : > { %v3779_v21 = vsub.f32 %v14244_v15, %v3733_v44  ;;  %v3265_v15 = vadd.f32 %v14209_v62, %v3264_v5 }
 0x6cb   : > { %10470 = vmatmul.msk.f32.gmra.mxu0 %vm2320_vm2, %v3986_v57 }
 0x6cc   : > { %v3835_v24 = vmul.f32 1.442695, %v3779_v21  ;;  %4177 = vmatpush.msrb.mxu2 %v3265_v15  ;;  %v3766_v21 = vsub.f32 %v14100_v30, %v3694_v31  ;;  %v3767_v30 = vsub.f32 %v14108_v53, %v3697_v29 }
 0x6ce   : > { %11373 = vpow2.f32 %v3835_v24  ;;  %4178 = vmatpush.msrb.mxu2 %v3262_v20  ;;  %v14361_v11 = vpop.f32.mrf.mxu2  ;;  %v3700_v31 = vpop.xlane.xlu1 %3699 }
 0x6cf   : > { %11375 = vpow2.f32 %v3805_v18 }
 0x6d0   : > { %4179 = vmatpush.msrb.mxu2 %v3259_v37  ;;  %v3768_v37 = vsub.f32 %v14116_v4, %v3700_v31 }
 0x6d1   : > { %v3736_v1 = vpop.xlane.xlu2 %3735 }
 0x6d2   : > { %v3780_v43 = vsub.f32 %v14252_v0, %v3736_v1  ;;  %v3256_v0 = vadd.f32 %v14209_v62, %v14298_v2 }
 0x6d4   : > { %v14349_v54 = vpop.eup %11373  ;;  %v3837_v52 = vmul.f32 1.442695, %v3780_v43  ;;  %4180 = vmatpush.msrb.mxu2 %v3256_v0  ;;  %v3811_v43 = vmul.f32 1.442695, %v3767_v30 }
 0x6d5   : > { %v3923_v5 = vsel %vm2320_vm2, %v14349_v54, 0.0  ;;  %v14358_v44 = vpop.eup %11375 }
 0x6d6   : > { %11377 = vpow2.f32 %v3837_v52  ;;  %3924 = vadd.xlane.f32.xlu2 %v3923_v5  ;;  %v3878_v35 = vsel %vm2320_vm2, %v14358_v44, 0.0  ;;  %v14373_v38 = vpop.f32.mrf.mxu2 }
 0x6d7   : > { %11379 = vpow2.f32 %v3807_v28 }
 0x6d9   : > { %v3739_v25 = vpop.xlane.xlu2 %3738 }
 0x6da   : > { %v3781_v49 = vsub.f32 %v14258_v13, %v3739_v25  ;;  %v3809_v13 = vmul.f32 1.442695, %v3766_v21  ;;  %v3703_v25 = vpop.xlane.xlu1 %3702 }
 0x6dc   : > { %v14363_v57 = vpop.eup %11377  ;;  %v3839_v17 = vmul.f32 1.442695, %v3781_v49  ;;  %v3813_v49 = vmul.f32 1.442695, %v3768_v37 }
 0x6dd   : > { %v3926_v2 = vsel %vm2320_vm2, %v14363_v57, 0.0  ;;  %v14370_v48 = vpop.eup %11379 }
 0x6de   : > { %11381 = vpow2.f32 %v3839_v17  ;;  %3927 = vadd.xlane.f32.xlu0 %v3926_v2  ;;  %3879 = vadd.xlane.f32.xlu2 %v3878_v35  ;;  %v3881_v1 = vsel %vm2320_vm2, %v14370_v48, 0.0  ;;  %v14385_v52 = vpop.f32.mrf.mxu2  ;;  %v3769_v35 = vsub.f32 %v14122_v50, %v3703_v25 }
 0x6df   : > { %11383 = vpow2.f32 %v3809_v13 }
 0x6e0   : > { %v3815_v30 = vmul.f32 1.442695, %v3769_v35 }
 0x6e1   : > { %v3742_v45 = vpop.xlane.xlu2 %3741 }
 0x6e2   : > { %v3782_v24 = vsub.f32 %v14264_v16, %v3742_v45 }
 0x6e4   : > { %v14375_v22 = vpop.eup %11381  ;;  %v3841_v18 = vmul.f32 1.442695, %v3782_v24 }
 0x6e5   : > { %v3929_v15 = vsel %vm2320_vm2, %v14375_v22, 0.0  ;;  %v14382_v20 = vpop.eup %11383 }
 0x6e6   : > { %11385 = vpow2.f32 %v3841_v18  ;;  %3930 = vadd.xlane.f32.xlu0 %v3929_v15  ;;  %3882 = vadd.xlane.f32.xlu2 %v3881_v1  ;;  %v3884_v28 = vsel %vm2320_vm2, %v14382_v20, 0.0  ;;  %v3291_v17 = vpop.f32.mrf.mxu2  ;;  %v3706_v18 = vpop.xlane.xlu1 %3705 }
 0x6e7   : > { %11387 = vpow2.f32 %v3811_v43  ;;  %v3770_v50 = vsub.f32 %v14131_v27, %v3706_v18 }
 0x6e9   : > { %v3745_v16 = vpop.xlane.xlu2 %3744 }
 0x6ea   : > { %v3783_v41 = vsub.f32 %v14270_v33, %v3745_v16  ;;  %v10495_v33 = vld [vmem:[%s18980_s10 + $0x8] sm:$0xff] }
 0x6eb   : > { %4384 = vmatpush.msra.mxu0 %v10495_v33 }
 0x6ec   : > { %v14387_v53 = vpop.eup %11385  ;;  %v3843_v5 = vmul.f32 1.442695, %v3783_v41 }
 0x6ed   : > { %v3932_v0 = vsel %vm2320_vm2, %v14387_v53, 0.0  ;;  %v14397_v21 = vpop.eup %11387 }
 0x6ee   : > { %11389 = vpow2.f32 %v3843_v5  ;;  %3933 = vadd.xlane.f32.xlu0 %v3932_v0  ;;  %3885 = vadd.xlane.f32.xlu2 %v3884_v28  ;;  %v3887_v24 = vsel %vm2320_vm2, %v14397_v21, 0.0  ;;  %v3294_v1 = vpop.f32.mrf.mxu2  ;;  %v3817_v5 = vmul.f32 1.442695, %v3770_v50 }
 0x6ef   : > { %11391 = vpow2.f32 %v3813_v49 }
 0x6f1   : > { %v3748_v29 = vpop.xlane.xlu2 %3747 }
 0x6f2   : > { %v3784_v4 = vsub.f32 %v14276_v51, %v3748_v29 }
 0x6f4   : > { %v14400_v2 = vpop.eup %11389  ;;  %v3845_v13 = vmul.f32 1.442695, %v3784_v4 }
 0x6f5   : > { %v3935_v45 = vsel %vm2320_vm2, %v14400_v2, 0.0  ;;  %v14407_v51 = vpop.eup %11391 }
 0x6f6   : > { %11393 = vpow2.f32 %v3845_v13  ;;  %3936 = vadd.xlane.f32.xlu0 %v3935_v45  ;;  %3888 = vadd.xlane.f32.xlu2 %v3887_v24  ;;  %v3890_v37 = vsel %vm2320_vm2, %v14407_v51, 0.0  ;;  %v3297_v25 = vpop.f32.mrf.mxu2 }
 0x6f7   : > { %11395 = vpow2.f32 %v3815_v30 }
 0x6f9   : > { %v3751_v31 = vpop.xlane.xlu2 %3750 }
 0x6fa   : > { %v3785_v15 = vsub.f32 %v14282_v58, %v3751_v31  ;;  %v3295_v31 = vadd.f32 %v14209_v62, %v3294_v1  ;;  %v3286_v1 = vadd.f32 %v14209_v62, %v14373_v38 }
 0x6fc   : > { %v14410_v43 = vpop.eup %11393  ;;  %v3847_v16 = vmul.f32 1.442695, %v3785_v15  ;;  %v3292_v15 = vadd.f32 %v14209_v62, %v3291_v17  ;;  %v3283_v17 = vadd.f32 %v14209_v62, %v14361_v11 }
 0x6fd   : > { %v3938_v41 = vsel %vm2320_vm2, %v14410_v43, 0.0  ;;  %v14417_v28 = vpop.eup %11395 }
 0x6fe   : > { %11397 = vpow2.f32 %v3847_v16  ;;  %3939 = vadd.xlane.f32.xlu0 %v3938_v41  ;;  %3891 = vadd.xlane.f32.xlu2 %v3890_v37  ;;  %v3893_v29 = vsel %vm2320_vm2, %v14417_v28, 0.0  ;;  %v3300_v13 = vpop.f32.mrf.mxu2  ;;  %v3289_v16 = vadd.f32 %v14209_v62, %v14385_v52  ;;  %v3280_v52 = vadd.f32 %v14209_v62, %v14346_v63 }
 0x6ff   : > { %11399 = vpow2.f32 %v3817_v5  ;;  %v3301_v45 = vadd.f32 %v14209_v62, %v3300_v13 }
 0x701   : > { %v3754_v0 = vpop.xlane.xlu1 %3753  ;;  %4238 = vmatpush.msra.mxu3 %v3301_v45 }
 0x702   : > { %v3786_v58 = vsub.f32 %v14288_v8, %v3754_v0  ;;  %v3298_v8 = vadd.f32 %v14209_v62, %v3297_v25 }
 0x704   : > { %v14420_v49 = vpop.eup %11397  ;;  %v3849_v27 = vmul.f32 1.442695, %v3786_v58  ;;  %4239 = vmatpush.msra.mxu3 %v3298_v8  ;;  %v3728_v58 = vsel %vm2320_vm2, %v14227_v47, -inf }
 0x705   : > { %v3941_v33 = vsel %vm2320_vm2, %v14420_v49, 0.0  ;;  %v14426_v35 = vpop.eup %11399 }
 0x706   : > { %11401 = vpow2.f32 %v3849_v27  ;;  %3942 = vadd.xlane.f32.xlu0 %v3941_v33  ;;  %3894 = vadd.xlane.f32.xlu2 %v3893_v29  ;;  %v3896_v30 = vsel %vm2320_vm2, %v14426_v35, 0.0 }
 0x707   : > { %4240 = vmatpush.msra.mxu3 %v3295_v31 }
 0x709   : > { %v3712_v4 = vpop.xlane.xlu1 %3711  ;;  %4241 = vmatpush.msra.mxu3 %v3292_v15 }
 0x70a   : > { %v3772_v62 = vsub.f32 %v14151_v34, %v3712_v4 }
 0x70b   : > { %4242 = vmatpush.msra.mxu3 %v3289_v16 }
 0x70c   : > { %v14430_v24 = vpop.eup %11401  ;;  %v3821_v45 = vmul.f32 1.442695, %v3772_v62 }
 0x70d   : > { %v3944_v18 = vsel %vm2320_vm2, %v14430_v24, 0.0  ;;  %4243 = vmatpush.msra.mxu3 %v3286_v1 }
 0x70e   : > { %3897 = vadd.xlane.f32.xlu2 %v3896_v30  ;;  %3945 = vadd.xlane.f32.xlu1 %v3944_v18 }
 0x70f   : > { %4244 = vmatpush.msra.mxu3 %v3283_v17 }
 0x710   : > { %v4052_v50 = vpop.f32.mrf.mxu0 }
 0x711   : > { %10496 = vmatmul.msk.f32.vlgmr.msra.gmra.mxu0 %vm1963_vm1, %v4052_v50  ;;  %v3877_v41 = vpop.xlane.xlu0 %3876  ;;  %v3715_v37 = vpop.xlane.xlu1 %3714  ;;  %4245 = vmatpush.msra.mxu3 %v3280_v52 }
 0x712   : > { %11403 = vrcp.f32 %v3877_v41  ;;  %v3773_v5 = vsub.f32 %v14164_v32, %v3715_v37 }
 0x714   : > { %v3823_v0 = vmul.f32 1.442695, %v3773_v5 }
 0x716   : > { %11405 = vpow2.f32 %v3823_v0  ;;  %3729 = vmax.xlane.f32.xlu2 %v3728_v58 }
 0x718   : > { %v11404_v25 = vpop.eup %11403  ;;  %v4055_v32 = vpop.f32.mrf.mxu0 }
 0x719   : > { %v3987_v27 = vmul.f32 %v11404_v25, %v14310_v42  ;;  %10497 = vmatmul.msk.f32.gmra.mxu0 %vm1963_vm1, %v4055_v32  ;;  %v3709_v38 = vpop.xlane.xlu0 %3708  ;;  %v3718_v33 = vpop.xlane.xlu1 %3717 }
 0x71a   : > { %v3771_v11 = vsub.f32 %v14140_v23, %v3709_v38  ;;  %v3774_v29 = vsub.f32 %v14175_v19, %v3718_v33 }
 0x71b   : > { %10471 = vmatmul.msk.f32.vlgmr.msrb.gmra.mxu1 %vm2320_vm2, %v3987_v27 }
 0x71c   : > { %v14455_v13 = vpop.eup %11405  ;;  %v3819_v63 = vmul.f32 1.442695, %v3771_v11  ;;  %v3825_v8 = vmul.f32 1.442695, %v3774_v29 }
 0x71d   : > { %v3905_v42 = vsel %vm2320_vm2, %v14455_v13, 0.0 }
 0x71e   : > { %11407 = vpow2.f32 %v3819_v63  ;;  %3906 = vadd.xlane.f32.xlu1 %v3905_v42 }
 0x71f   : > { %11409 = vpow2.f32 %v3825_v8 }
 0x720   : > { %v4058_v30 = vpop.f32.mrf.mxu0  ;;  %11411 = vpow2.f32 %v3821_v45 }
 0x721   : > { %10498 = vmatmul.msk.f32.gmra.mxu0 %vm1963_vm1, %v4058_v30  ;;  %v3721_v23 = vpop.xlane.xlu1 %3720 }
 0x722   : > { %v3775_v18 = vsub.f32 %v14186_v46, %v3721_v23 }
 0x724   : > { %v14461_v19 = vpop.eup %11407  ;;  %v3827_v15 = vmul.f32 1.442695, %v3775_v18 }
 0x725   : > { %v14464_v31 = vpop.eup %11409  ;;  %v3899_v34 = vsel %vm2320_vm2, %v14461_v19, 0.0 }
 0x726   : > { %3900 = vadd.xlane.f32.xlu0 %v3899_v34  ;;  %v3908_v4 = vsel %vm2320_vm2, %v14464_v31, 0.0  ;;  %v14471_v41 = vpop.eup %11411  ;;  %11413 = vpow2.f32 %v3827_v15 }
 0x727   : > { %3909 = vadd.xlane.f32.xlu2 %v3908_v4  ;;  %v3902_v5 = vsel %vm2320_vm2, %v14471_v41, 0.0 }
 0x728   : > { %v4061_v50 = vpop.f32.mrf.mxu0 }
 0x729   : > { %10499 = vmatmul.msk.f32.gmra.mxu0 %vm1963_vm1, %v4061_v50  ;;  %v3724_v16 = vpop.xlane.xlu1 %3723 }
 0x72a   : > { %v3776_v37 = vsub.f32 %v14197_v39, %v3724_v16 }
 0x72c   : > { %v3829_v46 = vmul.f32 1.442695, %v3776_v37  ;;  %v14477_v17 = vpop.eup %11413 }
 0x72d   : > { %v3911_v39 = vsel %vm2320_vm2, %v14477_v17, 0.0 }
 0x72e   : > { %11415 = vpow2.f32 %v3829_v46  ;;  %3903 = vadd.xlane.f32.xlu0 %v3902_v5 }
 0x730   : > { %v4064_v1 = vpop.f32.mrf.mxu0 }
 0x731   : > { %10500 = vmatmul.msk.f32.gmra.mxu0 %vm1963_vm1, %v4064_v1  ;;  %v3727_v0 = vpop.xlane.xlu1 %3726 }
 0x732   : > { %v3777_v58 = vsub.f32 %v14213_v12, %v3727_v0 }
 0x734   : > { %v14480_v52 = vpop.eup %11415  ;;  %v3831_v25 = vmul.f32 1.442695, %v3777_v58 }
 0x735   : > { %v3914_v32 = vsel %vm2320_vm2, %v14480_v52, 0.0 }
 0x736   : > { %11417 = vpow2.f32 %v3831_v25  ;;  %3912 = vadd.xlane.f32.xlu0 %v3911_v39  ;;  %3915 = vadd.xlane.f32.xlu1 %v3914_v32 }
 0x738   : > { %v4067_v27 = vpop.f32.mrf.mxu0 }
 0x739   : > { %10501 = vmatmul.msk.f32.gmra.mxu0 %vm1963_vm1, %v4067_v27 }
 0x73c   : > { %v14487_v38 = vpop.eup %11417 }
 0x73d   : > { %v3917_v12 = vsel %vm2320_vm2, %v14487_v38, 0.0 }
 0x73e   : > { %3918 = vadd.xlane.f32.xlu2 %v3917_v12 }
 0x740   : > { %v4070_v33 = vpop.f32.mrf.mxu0 }
 0x741   : > { %10502 = vmatmul.msk.f32.gmra.mxu0 %vm1963_vm1, %v4070_v33  ;;  %v2933_v33 = vld [vmem:[%s18980_s10] sm:$0xff] }
 0x742   : > { %4593 = vmatpush.msra.mxu1 %v2933_v33 }
 0x748   : > { %v4073_v11 = vpop.f32.mrf.mxu0 }
 0x749   : > { %v3925_v29 = vpop.xlane.xlu2 %3924  ;;  %10503 = vmatmul.msk.f32.gmra.mxu0 %vm1963_vm1, %v4073_v11  ;;  %v10597_v11 = vld [vmem:[%s18976_s6 + $0x40] sm:$0xff] }
 0x74a   : > { %11419 = vrcp.f32 %v3925_v29 }
 0x750   : > { %v11420_v62 = vpop.eup %11419 }
 0x751   : > { %v4003_v63 = vmul.f32 %v11420_v62, %v14349_v54  ;;  %v3928_v8 = vpop.xlane.xlu0 %3927  ;;  %v3880_v42 = vpop.xlane.xlu2 %3879 }
 0x752   : > { %11421 = vrcp.f32 %v3928_v8 }
 0x753   : > { %11423 = vrcp.f32 %v3880_v42  ;;  %10487 = vmatmul.msk.f32.vlgmr.msra.gmra.mxu3 %vm2320_vm2, %v4003_v63 }
 0x758   : > { %v11422_v45 = vpop.eup %11421 }
 0x759   : > { %v11424_v30 = vpop.eup %11423  ;;  %v3931_v23 = vpop.xlane.xlu0 %3930  ;;  %v4004_v34 = vmul.f32 %v11422_v45, %v14363_v57 }
 0x75a   : > { %v3883_v18 = vpop.xlane.xlu2 %3882  ;;  %11425 = vrcp.f32 %v3931_v23  ;;  %v3988_v4 = vmul.f32 %v11424_v30, %v14358_v44 }
 0x75b   : > { %11427 = vrcp.f32 %v3883_v18  ;;  %10488 = vmatmul.msk.f32.gmra.mxu3 %vm2320_vm2, %v4004_v34 }
 0x75c   : > { %10472 = vmatmul.msk.f32.gmra.mxu1 %vm2320_vm2, %v3988_v4 }
 0x760   : > { %v11426_v54 = vpop.eup %11425 }
 0x761   : > { %v11428_v15 = vpop.eup %11427  ;;  %v3934_v50 = vpop.xlane.xlu0 %3933  ;;  %v4005_v37 = vmul.f32 %v11426_v54, %v14375_v22  ;;  %v10599_v22 = vld [vmem:[%s18976_s6 + $0x50] sm:$0xff] }
 0x762   : > { %v3886_v16 = vpop.xlane.xlu2 %3885  ;;  %11429 = vrcp.f32 %v3934_v50  ;;  %v3989_v46 = vmul.f32 %v11428_v15, %v14370_v48  ;;  %v10600_v48 = vld [vmem:[%s18976_s6 + $0x58] sm:$0xff] }
 0x763   : > { %11431 = vrcp.f32 %v3886_v16  ;;  %10489 = vmatmul.msk.f32.gmra.mxu3 %vm2320_vm2, %v4005_v37 }
 0x764   : > { %10473 = vmatmul.msk.f32.gmra.mxu1 %vm2320_vm2, %v3989_v46  ;;  %4836 = vmatpush.msrb.mxu3 %v10600_v48 }
 0x766   : > { %4837 = vmatpush.msrb.mxu3 %v10599_v22  ;;  %v19125_v22 = vld [vmem:[#allocation37_spill] sm:$0xff] }
 0x768   : > { %v11430_v44 = vpop.eup %11429 }
 0x769   : > { %v11432_v57 = vpop.eup %11431  ;;  %v3937_v5 = vpop.xlane.xlu0 %3936  ;;  %v4006_v0 = vmul.f32 %v11430_v44, %v14387_v53  ;;  %v10598_v53 = vld [vmem:[%s18976_s6 + $0x48] sm:$0xff] }
 0x76a   : > { %v3889_v1 = vpop.xlane.xlu2 %3888  ;;  %11433 = vrcp.f32 %v3937_v5  ;;  %v3990_v58 = vmul.f32 %v11432_v57, %v14382_v20  ;;  %4838 = vmatpush.msrb.mxu3 %v10598_v53  ;;  %v19126_v53 = vld [vmem:[#allocation3_spill] sm:$0xff] }
 0x76b   : > { %11435 = vrcp.f32 %v3889_v1  ;;  %10490 = vmatmul.msk.f32.gmra.mxu3 %vm2320_vm2, %v4006_v0  ;;  %v19123_v0 = vld [vmem:[#allocation36_spill] sm:$0xff] }
 0x76c   : > { %10474 = vmatmul.msk.f32.gmra.mxu1 %vm2320_vm2, %v3990_v58  ;;  %4839 = vmatpush.msrb.mxu3 %v10597_v11  ;;  %v19124_v58 = vld [vmem:[#allocation2_spill] sm:$0xff] }
 0x76d   : > { %v19131_v11 = vld [vmem:[#allocation30_spill] sm:$0xff] }
 0x770   : > { %v11434_v25 = vpop.eup %11433 }
 0x771   : > { %v11436_v20 = vpop.eup %11435  ;;  %v3940_v39 = vpop.xlane.xlu0 %3939  ;;  %v4007_v27 = vmul.f32 %v11434_v25, %v14400_v2 }
 0x772   : > { %v3892_v32 = vpop.xlane.xlu2 %3891  ;;  %11437 = vrcp.f32 %v3940_v39  ;;  %v3991_v12 = vmul.f32 %v11436_v20, %v14397_v21  ;;  %v19127_v20 = vld [vmem:[#allocation28_spill] sm:$0xff] }
 0x773   : > { %11439 = vrcp.f32 %v3892_v32  ;;  %10491 = vmatmul.msk.f32.gmra.mxu3 %vm2320_vm2, %v4007_v27  ;;  %v19128_v39 = vld [vmem:[#allocation4_spill] sm:$0xff]  ;;  %v19129_v27 = vld [vmem:[#allocation29_spill] sm:$0xff] }
 0x774   : > { %10475 = vmatmul.msk.f32.gmra.mxu1 %vm2320_vm2, %v3991_v12  ;;  %v19130_v12 = vld [vmem:[#allocation5_spill] sm:$0xff] }
 0x778   : > { %v11438_v2 = vpop.eup %11437 }
 0x779   : > { %v11440_v29 = vpop.eup %11439  ;;  %v3943_v62 = vpop.xlane.xlu0 %3942  ;;  %v4008_v63 = vmul.f32 %v11438_v2, %v14410_v43  ;;  %v19132_v2 = vld [vmem:[#allocation6_spill] sm:$0xff] }
 0x77a   : > { %v3895_v21 = vpop.xlane.xlu2 %3894  ;;  %11441 = vrcp.f32 %v3943_v62  ;;  %v3992_v8 = vmul.f32 %v11440_v29, %v14407_v51 }
 0x77b   : > { %11443 = vrcp.f32 %v3895_v21  ;;  %10492 = vmatmul.msk.f32.gmra.mxu3 %vm2320_vm2, %v4008_v63  ;;  %v19133_v21 = vld [vmem:[#allocation31_spill] sm:$0xff]  ;;  %v19134_v63 = vld [vmem:[#allocation8_spill] sm:$0xff] }
 0x77c   : > { %10476 = vmatmul.msk.f32.gmra.mxu1 %vm2320_vm2, %v3992_v8 }
 0x780   : > { %v11442_v42 = vpop.eup %11441 }
 0x781   : > { %v11444_v45 = vpop.eup %11443  ;;  %v3946_v23 = vpop.xlane.xlu1 %3945  ;;  %v4009_v18 = vmul.f32 %v11442_v42, %v14420_v49 }
 0x782   : > { %v3898_v30 = vpop.xlane.xlu2 %3897  ;;  %v3993_v34 = vmul.f32 %v11444_v45, %v14417_v28  ;;  %v19135_v45 = vld [vmem:[#allocation32_spill] sm:$0xff] }
 0x783   : > { %11445 = vrcp.f32 %v3898_v30  ;;  %10493 = vmatmul.msk.f32.gmra.mxu3 %vm2320_vm2, %v4009_v18  ;;  %v19136_v30 = vld [vmem:[#allocation10_spill] sm:$0xff] }
 0x784   : > { %11447 = vrcp.f32 %v3946_v23  ;;  %10477 = vmatmul.msk.f32.gmra.mxu1 %vm2320_vm2, %v3993_v34  ;;  %v10563_v23 = vld [vmem:[%s19058_s23 + $0x58] sm:$0xff]  ;;  %v10562_v34 = vld [vmem:[%s19058_s23 + $0x50] sm:$0xff] }
 0x785   : > { %4713 = vmatpush.msra.mxu2 %v10563_v23  ;;  %v19157_v23 = vld [vmem:[#allocation49_spill] sm:$0xff] }
 0x787   : > { %4714 = vmatpush.msra.mxu2 %v10562_v34  ;;  %v19158_v34 = vld [vmem:[#allocation25_spill] sm:$0xff] }
 0x789   : > { %v11446_v51 = vpop.eup %11445 }
 0x78a   : > { %v11448_v43 = vpop.eup %11447  ;;  %v3730_v4 = vpop.xlane.xlu2 %3729  ;;  %v3994_v54 = vmul.f32 %v11446_v51, %v14426_v35 }
 0x78b   : > { %v3778_v15 = vsub.f32 %v14227_v47, %v3730_v4  ;;  %v4010_v50 = vmul.f32 %v11448_v43, %v14430_v24  ;;  %v10561_v43 = vld [vmem:[%s19058_s23 + $0x48] sm:$0xff]  ;;  %v10560_v4 = vld [vmem:[%s19058_s23 + $0x40] sm:$0xff] }
 0x78c   : > { %10478 = vmatmul.msk.f32.gmra.mxu1 %vm2320_vm2, %v3994_v54  ;;  %4715 = vmatpush.msra.mxu2 %v10561_v43  ;;  %v19137_v54 = vld [vmem:[#allocation33_spill] sm:$0xff] }
 0x78d   : > { %v3833_v16 = vmul.f32 1.442695, %v3778_v15  ;;  %10494 = vmatmul.msk.f32.gmra.mxu3 %vm2320_vm2, %v4010_v50  ;;  %v19138_v15 = vld [vmem:[#allocation11_spill] sm:$0xff] }
 0x78e   : > { %4716 = vmatpush.msra.mxu2 %v10560_v4 }
 0x78f   : > { %11449 = vpow2.f32 %v3833_v16 }
 0x791   : > { %v3907_v46 = vpop.xlane.xlu1 %3906 }
 0x794   : > { %10528 = vmatmul.msk.f32.vlgmr.msra.gmra.mxu1 %vm1963_vm1, %v13657_v6 }
 0x795   : > { %v14539_v28 = vpop.eup %11449  ;;  %10602 = vmatmul.msk.f32.vlgmr.msrb.gmra.mxu3 %vm1415_vm0, %v12237_v55 }
 0x796   : > { %v3920_v49 = vsel %vm2320_vm2, %v14539_v28, 0.0 }
 0x797   : > { %3921 = vadd.xlane.f32.xlu0 %v3920_v49  ;;  %v19139_v49 = vld [vmem:[#allocation34_spill] sm:$0xff] }
 0x798   : > { %v4117_v47 = vpop.f32.mrf.mxu1 }
 0x799   : > { %10504 = vmatmul.msk.f32.gmra.mxu0 %vm1963_vm1, %v4117_v47  ;;  %v3901_v35 = vpop.xlane.xlu0 %3900  ;;  %v19140_v47 = vld [vmem:[#allocation14_spill] sm:$0xff] }
 0x79a   : > { %11451 = vrcp.f32 %v3901_v35 }
 0x79c   : > { %10529 = vmatmul.msk.f32.gmra.mxu1 %vm1963_vm1, %v13668_v7 }
 0x79d   : > { %10603 = vmatmul.msk.f32.gmra.mxu3 %vm1415_vm0, %v12267_v9 }
 0x7a0   : > { %v11452_v24 = vpop.eup %11451 }
 0x7a1   : > { %v3995_v6 = vmul.f32 %v11452_v24, %v14461_v19  ;;  %v3904_v37 = vpop.xlane.xlu0 %3903  ;;  %v3910_v19 = vpop.xlane.xlu2 %3909 }
 0x7a2   : > { %11453 = vrcp.f32 %v3904_v37  ;;  %v19141_v37 = vld [vmem:[#allocation35_spill] sm:$0xff] }
 0x7a3   : > { %10479 = vmatmul.msk.f32.vlgmr.msrb.gmra.mxu2 %vm2320_vm2, %v3995_v6  ;;  %11455 = vrcp.f32 %v3907_v46  ;;  %v19142_v46 = vld [vmem:[#allocation16_spill] sm:$0xff] }
 0x7a4   : > { %10530 = vmatmul.msk.f32.gmra.mxu1 %vm1963_vm1, %v13677_v10  ;;  %11457 = vrcp.f32 %v3910_v19 }
 0x7a5   : > { %10604 = vmatmul.msk.f32.gmra.mxu3 %vm1415_vm0, %v12298_v26 }
 0x7a8   : > { %v11454_v44 = vpop.eup %11453 }
 0x7a9   : > { %v3996_v7 = vmul.f32 %v11454_v44, %v14471_v41  ;;  %v11456_v57 = vpop.eup %11455  ;;  %v3913_v41 = vpop.xlane.xlu0 %3912 }
 0x7aa   : > { %v3997_v10 = vmul.f32 %v11456_v57, %v14455_v13  ;;  %v11458_v5 = vpop.eup %11457  ;;  %11459 = vrcp.f32 %v3913_v41  ;;  %v3916_v13 = vpop.xlane.xlu1 %3915 }
 0x7ab   : > { %10480 = vmatmul.msk.f32.gmra.mxu2 %vm2320_vm2, %v3996_v7  ;;  %11461 = vrcp.f32 %v3916_v13 }
 0x7ac   : > { %10531 = vmatmul.msk.f32.gmra.mxu1 %vm1963_vm1, %v13689_v56  ;;  %v3998_v56 = vmul.f32 %v11458_v5, %v14464_v31 }
 0x7ad   : > { %10605 = vmatmul.msk.f32.gmra.mxu3 %vm1415_vm0, %v12319_v36 }
 0x7b0   : > { %v11460_v1 = vpop.eup %11459 }
 0x7b1   : > { %v3919_v31 = vpop.xlane.xlu2 %3918  ;;  %v11462_v48 = vpop.eup %11461 }
 0x7b2   : > { %11463 = vrcp.f32 %v3919_v31 }
 0x7b3   : > { %10481 = vmatmul.msk.f32.gmra.mxu2 %vm2320_vm2, %v3997_v10  ;;  %v19144_v10 = vld [vmem:[#allocation20_spill] sm:$0xff] }
 0x7b4   : > { %10532 = vmatmul.msk.f32.gmra.mxu1 %vm1963_vm1, %v13702_v40  ;;  %v3999_v40 = vmul.f32 %v11460_v1, %v14477_v17  ;;  %v14683_v1 = vld [vmem:[%s12222_s0 + $0x8] sm:$0xff] }
 0x7b5   : > { %10606 = vmatmul.msk.f32.gmra.mxu3 %vm1415_vm0, %v12354_v60 }
 0x7b8   : > { %v11464_v17 = vpop.eup %11463 }
 0x7b9   : > { %v4001_v25 = vmul.f32 %v11464_v17, %v14487_v38  ;;  %v19152_v17 = vld [vmem:[#allocation23_spill] sm:$0xff] }
 0x7bb   : > { %10482 = vmatmul.msk.f32.gmra.mxu2 %vm2320_vm2, %v3998_v56  ;;  %v14670_v56 = vld [vmem:[%s12222_s0] sm:$0xff] }
 0x7bc   : > { %10533 = vmatmul.msk.f32.gmra.mxu1 %vm1963_vm1, %v13720_v3  ;;  %v4000_v3 = vmul.f32 %v11462_v48, %v14480_v52 }
 0x7bd   : > { %10607 = vmatmul.msk.f32.gmra.mxu3 %vm1415_vm0, %v12381_v14 }
 0x7c3   : > { %10483 = vmatmul.msk.f32.gmra.mxu2 %vm2320_vm2, %v3999_v40  ;;  %v19148_v40 = vld [vmem:[#allocation46_spill] sm:$0xff] }
 0x7c4   : > { %10534 = vmatmul.msk.f32.gmra.mxu1 %vm1963_vm1, %v19123_v0  ;;  %v19149_v0 = vld [vmem:[#allocation22_spill] sm:$0xff] }
 0x7c5   : > { %10608 = vmatmul.msk.f32.gmra.mxu3 %vm1415_vm0, %v19124_v58 }
 0x7cb   : > { %10484 = vmatmul.msk.f32.gmra.mxu2 %vm2320_vm2, %v4000_v3  ;;  %v14697_v3 = vld [vmem:[%s12222_s0 + $0x10] sm:$0xff] }
 0x7cc   : > { %10535 = vmatmul.msk.f32.gmra.mxu1 %vm1963_vm1, %v19125_v22  ;;  %v19151_v22 = vld [vmem:[#allocation47_spill] sm:$0xff] }
 0x7cd   : > { %10609 = vmatmul.msk.f32.gmra.mxu3 %vm1415_vm0, %v19126_v53 }
 0x7d3   : > { %10485 = vmatmul.msk.f32.gmra.mxu2 %vm2320_vm2, %v4001_v25 }
 0x7d4   : > { %10536 = vmatmul.msk.f32.gmra.mxu1 %vm1963_vm1, %v19127_v20 }
 0x7d5   : > { %10610 = vmatmul.msk.f32.gmra.mxu3 %vm1415_vm0, %v19128_v39 }
 0x7d6   : > { %v14594_v52 = vpop.f32.mrf.mxu3 }
 0x7d9   : > { %v4120_v32 = vpop.f32.mrf.mxu1 }
 0x7da   : > { %10505 = vmatmul.msk.f32.gmra.mxu0 %vm1963_vm1, %v4120_v32 }
 0x7dc   : > { %10537 = vmatmul.msk.f32.gmra.mxu1 %vm1963_vm1, %v19129_v27  ;;  %v14709_v27 = vld [vmem:[%s12222_s0 + $0x18] sm:$0xff] }
 0x7dd   : > { %10611 = vmatmul.msk.f32.gmra.mxu3 %vm1415_vm0, %v19130_v12 }
 0x7de   : > { %v14601_v38 = vpop.f32.mrf.mxu3 }
 0x7e1   : > { %v4123_v33 = vpop.f32.mrf.mxu1 }
 0x7e2   : > { %10506 = vmatmul.msk.f32.gmra.mxu0 %vm1963_vm1, %v4123_v33  ;;  %v19154_v33 = vld [vmem:[#allocation48_spill] sm:$0xff] }
 0x7e4   : > { %10538 = vmatmul.msk.f32.gmra.mxu1 %vm1963_vm1, %v19131_v11  ;;  %v19155_v11 = vld [vmem:[#allocation24_spill] sm:$0xff] }
 0x7e5   : > { %10612 = vmatmul.msk.f32.gmra.mxu3 %vm1415_vm0, %v19132_v2 }
 0x7e6   : > { %v14608_v29 = vpop.f32.mrf.mxu3 }
 0x7e9   : > { %v4126_v62 = vpop.f32.mrf.mxu1 }
 0x7ea   : > { %10507 = vmatmul.msk.f32.gmra.mxu0 %vm1963_vm1, %v4126_v62 }
 0x7ec   : > { %10539 = vmatmul.msk.f32.gmra.mxu1 %vm1963_vm1, %v19133_v21 }
 0x7ed   : > { %10613 = vmatmul.msk.f32.gmra.mxu3 %vm1415_vm0, %v19134_v63 }
 0x7ee   : > { %v14615_v8 = vpop.f32.mrf.mxu3 }
 0x7f1   : > { %v4129_v42 = vpop.f32.mrf.mxu1 }
 0x7f2   : > { %10508 = vmatmul.msk.f32.gmra.mxu0 %vm1963_vm1, %v4129_v42 }
 0x7f4   : > { %10540 = vmatmul.msk.f32.gmra.mxu1 %vm1963_vm1, %v19135_v45  ;;  %v14721_v45 = vld [vmem:[%s12222_s0 + $0x20] sm:$0xff] }
 0x7f5   : > { %10614 = vmatmul.msk.f32.gmra.mxu3 %vm1415_vm0, %v19136_v30  ;;  %v15118_v30 = vld [vmem:[%s12222_s0 + $0xf8] sm:$0xff] }
 0x7f6   : > { %v14625_v18 = vpop.f32.mrf.mxu3 }
 0x7f9   : > { %v4132_v51 = vpop.f32.mrf.mxu1 }
 0x7fa   : > { %10509 = vmatmul.msk.f32.gmra.mxu0 %vm1963_vm1, %v4132_v51 }
 0x7fc   : > { %10541 = vmatmul.msk.f32.gmra.mxu1 %vm1963_vm1, %v19137_v54  ;;  %v14733_v54 = vld [vmem:[%s12222_s0 + $0x28] sm:$0xff] }
 0x7fd   : > { %10615 = vmatmul.msk.f32.gmra.mxu3 %vm1415_vm0, %v19138_v15 }
 0x7fe   : > { %v14641_v50 = vpop.f32.mrf.mxu3 }
 0x801   : > { %v4135_v16 = vpop.f32.mrf.mxu1 }
 0x802   : > { %10510 = vmatmul.msk.f32.gmra.mxu0 %vm1963_vm1, %v4135_v16  ;;  %v19160_v16 = vld [vmem:[#allocation50_spill] sm:$0xff] }
 0x804   : > { %10542 = vmatmul.msk.f32.gmra.mxu1 %vm1963_vm1, %v19139_v49  ;;  %v19161_v49 = vld [vmem:[#allocation26_spill] sm:$0xff] }
 0x805   : > { %10616 = vmatmul.msk.f32.gmra.mxu3 %vm1415_vm0, %v19140_v47 }
 0x806   : > { %v14648_v35 = vpop.f32.mrf.mxu3 }
 0x809   : > { %v4138_v24 = vpop.f32.mrf.mxu1 }
 0x80a   : > { %v3922_v6 = vpop.xlane.xlu0 %3921  ;;  %10511 = vmatmul.msk.f32.gmra.mxu0 %vm1963_vm1, %v4138_v24 }
 0x80b   : > { %11465 = vrcp.f32 %v3922_v6 }
 0x80c   : > { %10543 = vmatmul.msk.f32.gmra.mxu1 %vm1963_vm1, %v19141_v37 }
 0x80d   : > { %10617 = vmatmul.msk.f32.gmra.mxu3 %vm1415_vm0, %v19142_v46  ;;  %v15107_v46 = vld [vmem:[%s12222_s0 + $0xf0] sm:$0xff] }
 0x810   : > { %v14655_v44 = vpop.f32.mrf.mxu3 }
 0x811   : > { %v11466_v7 = vpop.eup %11465  ;;  %v14657_v19 = vpop.f32.mrf.mxu1 }
 0x812   : > { %19143 = vst [vmem:[#allocation36_spill] sm:$0xff] %v14657_v19  ;;  %v4002_v57 = vmul.f32 %v11466_v7, %v14539_v28  ;;  %v19146_v28 = vld [vmem:[#allocation21_spill] sm:$0xff]  ;;  %v14745_v7 = vld [vmem:[%s12222_s0 + $0x30] sm:$0xff]  ;;  %v14858_v19 = vld [vmem:[%s12222_s0 + $0x68] sm:$0xff] }
 0x814   : > { %10486 = vmatmul.msk.f32.gmra.mxu2 %vm2320_vm2, %v4002_v57  ;;  %10544 = vmatmul.msk.f32.gmra.mxu1 %vm1963_vm1, %v14056_v59  ;;  %v19163_v57 = vld [vmem:[#allocation51_spill] sm:$0xff] }
 0x815   : > { %10618 = vmatmul.msk.f32.gmra.mxu3 %vm1415_vm0, %v19144_v10 }
 0x818   : > { %v14665_v41 = vpop.f32.mrf.mxu3 }
 0x819   : > { %v14667_v5 = vpop.f32.mrf.mxu1 }
 0x81a   : > { %19145 = vst [vmem:[#allocation2_spill] sm:$0xff] %v14667_v5 }
 0x81c   : > { %10565 = vmatmul.msk.f32.vlgmr.msra.gmra.mxu2 %vm1415_vm0, %v14670_v56  ;;  %10545 = vmatmul.msk.f32.gmra.mxu1 %vm1963_vm1, %v14066_v61 }
 0x81d   : > { %10619 = vmatmul.msk.f32.gmra.mxu3 %vm1415_vm0, %v19146_v28  ;;  %v15098_v28 = vld [vmem:[%s12222_s0 + $0xe8] sm:$0xff] }
 0x820   : > { %v14678_v59 = vpop.f32.mrf.mxu3 }
 0x821   : > { %v14680_v13 = vpop.f32.mrf.mxu1 }
 0x822   : > { %19147 = vst [vmem:[#allocation37_spill] sm:$0xff] %v14680_v13 }
 0x824   : > { %10566 = vmatmul.msk.f32.gmra.mxu2 %vm1415_vm0, %v14683_v1  ;;  %10546 = vmatmul.msk.f32.gmra.mxu1 %vm1963_vm1, %v19148_v40  ;;  %v19164_v40 = vld [vmem:[#allocation27_spill] sm:$0xff] }
 0x825   : > { %10620 = vmatmul.msk.f32.gmra.mxu3 %vm1415_vm0, %v19149_v0 }
 0x826   : > { %v4182_v61 = vpop.f32.mrf.mxu2 }
 0x827   : > { %10512 = vmatmul.msk.f32.gmra.mxu0 %vm1963_vm1, %v4182_v61  ;;  %v14756_v61 = vld [vmem:[%s18977_s7 + $0x2] ss:$0 sm:$0xff] }
 0x828   : > { %v14691_v31 = vpop.f32.mrf.mxu3 }
 0x829   : > { %v14694_v48 = vpop.f32.mrf.mxu1 }
 0x82a   : > { %19150 = vst [vmem:[#allocation3_spill] sm:$0xff] %v14694_v48  ;;  %v19184_v48 = vld [vmem:[#allocation17_spill] sm:$0xff] }
 0x82c   : > { %10567 = vmatmul.msk.f32.gmra.mxu2 %vm1415_vm0, %v14697_v3  ;;  %10547 = vmatmul.msk.f32.gmra.mxu1 %vm1963_vm1, %v19151_v22 }
 0x82d   : > { %10621 = vmatmul.msk.f32.gmra.mxu3 %vm1415_vm0, %v19152_v17 }
 0x82e   : > { %v4185_v25 = vpop.f32.mrf.mxu2 }
 0x82f   : > { %10513 = vmatmul.msk.f32.gmra.mxu0 %vm1963_vm1, %v4185_v25 }
 0x830   : > { %v4850_v20 = vpop.f32.mrf.mxu3 }
 0x831   : > { %v14706_v32 = vpop.f32.mrf.mxu1 }
 0x832   : > { %19153 = vst [vmem:[#allocation28_spill] sm:$0xff] %v14706_v32  ;;  %v14847_v32 = vld [vmem:[%s12222_s0 + $0x60] sm:$0xff] }
 0x834   : > { %10568 = vmatmul.msk.f32.gmra.mxu2 %vm1415_vm0, %v14709_v27  ;;  %10548 = vmatmul.msk.f32.gmra.mxu1 %vm1963_vm1, %v19154_v33 }
 0x835   : > { %10622 = vmatmul.msk.f32.gmra.mxu3 %vm1415_vm0, %v19155_v11 }
 0x836   : > { %v4188_v62 = vpop.f32.mrf.mxu2 }
 0x837   : > { %10514 = vmatmul.msk.f32.gmra.mxu0 %vm1963_vm1, %v4188_v62 }
 0x838   : > { %v4853_v21 = vpop.f32.mrf.mxu3 }
 0x839   : > { %v14718_v42 = vpop.f32.mrf.mxu1 }
 0x83a   : > { %19156 = vst [vmem:[#allocation4_spill] sm:$0xff] %v14718_v42  ;;  %v14834_v42 = vld [vmem:[%s12222_s0 + $0x58] sm:$0xff] }
 0x83c   : > { %10569 = vmatmul.msk.f32.gmra.mxu2 %vm1415_vm0, %v14721_v45  ;;  %10549 = vmatmul.msk.f32.gmra.mxu1 %vm1963_vm1, %v19157_v23  ;;  %v14764_v23 = vld [vmem:[%s12222_s0 + $0x38] sm:$0xff] }
 0x83d   : > { %10623 = vmatmul.msk.f32.gmra.mxu3 %vm1415_vm0, %v19158_v34 }
 0x83e   : > { %v4191_v51 = vpop.f32.mrf.mxu2 }
 0x83f   : > { %10515 = vmatmul.msk.f32.gmra.mxu0 %vm1963_vm1, %v4191_v51 }
 0x840   : > { %v4856_v43 = vpop.f32.mrf.mxu3 }
 0x841   : > { %v14730_v4 = vpop.f32.mrf.mxu1 }
 0x842   : > { %19159 = vst [vmem:[#allocation29_spill] sm:$0xff] %v14730_v4 }
 0x844   : > { %10570 = vmatmul.msk.f32.gmra.mxu2 %vm1415_vm0, %v14733_v54  ;;  %10550 = vmatmul.msk.f32.gmra.mxu1 %vm1963_vm1, %v19160_v16  ;;  %v19166_v16 = vld [vmem:[#allocation38_spill] sm:$0xff] }
 0x845   : > { %10624 = vmatmul.msk.f32.gmra.mxu3 %vm1415_vm0, %v19161_v49 }
 0x846   : > { %v4194_v24 = vpop.f32.mrf.mxu2 }
 0x847   : > { %10516 = vmatmul.msk.f32.gmra.mxu0 %vm1963_vm1, %v4194_v24  ;;  %v19167_v24 = vld [vmem:[#allocation7_spill] sm:$0xff] }
 0x848   : > { %v4859_v6 = vpop.f32.mrf.mxu3 }
 0x849   : > { %v14742_v37 = vpop.f32.mrf.mxu1  ;;  %v4860_v51 = vadd.f32 %v14756_v61, %v4859_v6  ;;  %v14782_v6 = vld [vmem:[%s12222_s0 + $0x40] sm:$0xff] }
 0x84a   : > { %19162 = vst [vmem:[#allocation30_spill] sm:$0xff] %v14742_v37  ;;  %v14818_v37 = vld [vmem:[%s12222_s0 + $0x50] sm:$0xff] }
 0x84c   : > { %10571 = vmatmul.msk.f32.gmra.mxu2 %vm1415_vm0, %v14745_v7  ;;  %10551 = vmatmul.msk.f32.gmra.mxu1 %vm1963_vm1, %v19163_v57 }
 0x84d   : > { %10625 = vmatmul.msk.f32.gmra.mxu3 %vm1415_vm0, %v19164_v40 }
 0x84e   : > { %v4197_v22 = vpop.f32.mrf.mxu2 }
 0x84f   : > { %10517 = vmatmul.msk.f32.gmra.mxu0 %vm1963_vm1, %v4197_v22 }
 0x850   : > { %v4862_v25 = vpop.f32.mrf.mxu3 }
 0x851   : > { %v4863_v33 = vadd.f32 %v14756_v61, %v4862_v25  ;;  %v14760_v62 = vpop.f32.mrf.mxu1  ;;  %v4857_v25 = vadd.f32 %v14756_v61, %v4856_v43 }
 0x852   : > { %19165 = vst [vmem:[#allocation31_spill] sm:$0xff] %v14760_v62  ;;  %v19170_v62 = vld [vmem:[#allocation9_spill] sm:$0xff] }
 0x853   : > { %10671 = vmatpush.xpose.msk.msrb.mxu1 %vm1963_vm1, %v4863_v33 }
 0x854   : > { %10572 = vmatmul.msk.f32.gmra.mxu2 %vm1415_vm0, %v14764_v23  ;;  %10552 = vmatmul.msk.f32.gmra.mxu1 %vm1963_vm1, %v19166_v16  ;;  %v4854_v16 = vadd.f32 %v14756_v61, %v4853_v21  ;;  %v4848_v21 = vadd.f32 %v14756_v61, %v14691_v31  ;;  %v4842_v31 = vadd.f32 %v14756_v61, %v14665_v41  ;;  %v19179_v41 = vld [vmem:[#allocation42_spill] sm:$0xff] }
 0x855   : > { %10626 = vmatmul.msk.f32.gmra.mxu3 %vm1415_vm0, %v19167_v24 }
 0x856   : > { %v4200_v57 = vpop.f32.mrf.mxu2 }
 0x857   : > { %10672 = vmatpush.xpose.msk.msrb.mxu1 %vm1963_vm1, %v4860_v51  ;;  %10518 = vmatmul.msk.f32.gmra.mxu0 %vm1963_vm1, %v4200_v57  ;;  %v19169_v51 = vld [vmem:[#allocation39_spill] sm:$0xff]  ;;  %v4851_v57 = vadd.f32 %v14756_v61, %v4850_v20 }
 0x858   : > { %v14774_v22 = vpop.f32.mrf.mxu3 }
 0x859   : > { %v14778_v33 = vpop.f32.mrf.mxu1 }
 0x85a   : > { %19168 = vst [vmem:[#allocation32_spill] sm:$0xff] %v14778_v33  ;;  %v14799_v33 = vld [vmem:[%s12222_s0 + $0x48] sm:$0xff] }
 0x85b   : > { %10673 = vmatpush.xpose.msk.msrb.mxu1 %vm1963_vm1, %v4857_v25 }
 0x85c   : > { %10573 = vmatmul.msk.f32.gmra.mxu2 %vm1415_vm0, %v14782_v6  ;;  %10553 = vmatmul.msk.f32.gmra.mxu1 %vm1963_vm1, %v19169_v51  ;;  %v19172_v51 = vld [vmem:[#allocation40_spill] sm:$0xff] }
 0x85d   : > { %10627 = vmatmul.msk.f32.gmra.mxu3 %vm1415_vm0, %v19170_v62 }
 0x85f   : > { %10674 = vmatpush.xpose.msk.msrb.mxu1 %vm1963_vm1, %v4854_v16  ;;  %v19173_v16 = vld [vmem:[#allocation12_spill] sm:$0xff] }
 0x860   : > { %v14792_v43 = vpop.f32.mrf.mxu3 }
 0x861   : > { %v14795_v25 = vpop.f32.mrf.mxu1 }
 0x862   : > { %19171 = vst [vmem:[#allocation33_spill] sm:$0xff] %v14795_v25 }
 0x863   : > { %10675 = vmatpush.xpose.msk.msrb.mxu1 %vm1963_vm1, %v4851_v57  ;;  %v4845_v57 = vadd.f32 %v14756_v61, %v14678_v59 }
 0x864   : > { %10574 = vmatmul.msk.f32.gmra.mxu2 %vm1415_vm0, %v14799_v33  ;;  %10554 = vmatmul.msk.f32.gmra.mxu1 %vm1963_vm1, %v19172_v51  ;;  %v19175_v51 = vld [vmem:[#allocation41_spill] sm:$0xff] }
 0x865   : > { %10628 = vmatmul.msk.f32.gmra.mxu3 %vm1415_vm0, %v19173_v16 }
 0x867   : > { %10676 = vmatpush.xpose.msk.msrb.mxu1 %vm1963_vm1, %v4848_v21  ;;  %v19176_v21 = vld [vmem:[#allocation13_spill] sm:$0xff] }
 0x868   : > { %v14810_v20 = vpop.f32.mrf.mxu3 }
 0x869   : > { %v14814_v25 = vpop.f32.mrf.mxu1 }
 0x86a   : > { %19174 = vst [vmem:[#allocation34_spill] sm:$0xff] %v14814_v25 }
 0x86b   : > { %10677 = vmatpush.xpose.msk.msrb.mxu1 %vm1963_vm1, %v4845_v57  ;;  %v14829_v57 = vpop.f32.mrf.mxu0 }
 0x86c   : > { %10575 = vmatmul.msk.f32.gmra.mxu2 %vm1415_vm0, %v14818_v37  ;;  %10555 = vmatmul.msk.f32.gmra.mxu1 %vm1963_vm1, %v19175_v51  ;;  %19177 = vst [vmem:[#allocation35_spill] sm:$0xff] %v14829_v57  ;;  %v19180_v51 = vld [vmem:[#allocation15_spill] sm:$0xff] }
 0x86d   : > { %10629 = vmatmul.msk.f32.gmra.mxu3 %vm1415_vm0, %v19176_v21  ;;  %v19191_v21 = vld [vmem:[#allocation19_spill] sm:$0xff] }
 0x86f   : > { %10678 = vmatpush.xpose.msk.msrb.mxu1 %vm1963_vm1, %v4842_v31 }
 0x870   : > { %v4874_v59 = vpop.f32.mrf.mxu3 }
 0x871   : > { %v14831_v25 = vpop.f32.mrf.mxu1 }
 0x872   : > { %19178 = vst [vmem:[#allocation46_spill] sm:$0xff] %v14831_v25  ;;  %v19183_v25 = vld [vmem:[#allocation43_spill] sm:$0xff] }
 0x873   : > { %v14844_v13 = vpop.f32.mrf.mxu0 }
 0x874   : > { %10576 = vmatmul.msk.f32.gmra.mxu2 %vm1415_vm0, %v14834_v42  ;;  %10556 = vmatmul.msk.f32.gmra.mxu1 %vm1963_vm1, %v19179_v41  ;;  %19182 = vst [vmem:[#allocation48_spill] sm:$0xff] %v14844_v13  ;;  %v19187_v13 = vld [vmem:[#allocation18_spill] sm:$0xff] }
 0x875   : > { %10630 = vmatmul.msk.f32.gmra.mxu3 %vm1415_vm0, %v19180_v51 }
 0x878   : > { %v4877_v4 = vpop.f32.mrf.mxu3 }
 0x879   : > { %v14842_v31 = vpop.f32.mrf.mxu1 }
 0x87a   : > { %19181 = vst [vmem:[#allocation47_spill] sm:$0xff] %v14842_v31  ;;  %v19186_v31 = vld [vmem:[#allocation44_spill] sm:$0xff] }
 0x87b   : > { %v14866_v57 = vpop.f32.mrf.mxu0 }
 0x87c   : > { %10577 = vmatmul.msk.f32.gmra.mxu2 %vm1415_vm0, %v14847_v32  ;;  %10557 = vmatmul.msk.f32.gmra.mxu1 %vm1963_vm1, %v19183_v25  ;;  %19188 = vst [vmem:[#allocation50_spill] sm:$0xff] %v14866_v57 }
 0x87d   : > { %10631 = vmatmul.msk.f32.gmra.mxu3 %vm1415_vm0, %v19184_v48  ;;  %v14871_v48 = vld [vmem:[%s12222_s0 + $0x70] sm:$0xff] }
 0x880   : > { %v4880_v41 = vpop.f32.mrf.mxu3 }
 0x881   : > { %v14855_v5 = vpop.f32.mrf.mxu1 }
 0x882   : > { %19185 = vst [vmem:[#allocation49_spill] sm:$0xff] %v14855_v5  ;;  %v19190_v5 = vld [vmem:[#allocation45_spill] sm:$0xff] }
 0x884   : > { %10578 = vmatmul.msk.f32.gmra.mxu2 %vm1415_vm0, %v14858_v19  ;;  %10558 = vmatmul.msk.f32.gmra.mxu1 %vm1963_vm1, %v19186_v31  ;;  %v14879_v31 = vpop.f32.mrf.mxu0 }
 0x885   : > { %10632 = vmatmul.msk.f32.gmra.mxu3 %vm1415_vm0, %v19187_v13  ;;  %19192 = vst [vmem:[#allocation38_spill] sm:$0xff] %v14879_v31 }
 0x888   : > { %v4883_v25 = vpop.f32.mrf.mxu3 }
 0x889   : > { %v14868_v51 = vpop.f32.mrf.mxu1 }
 0x88a   : > { %19189 = vst [vmem:[#allocation51_spill] sm:$0xff] %v14868_v51  ;;  %v14886_v51 = vld [vmem:[%s12222_s0 + $0x78] sm:$0xff] }
 0x88c   : > { %10579 = vmatmul.msk.f32.gmra.mxu2 %vm1415_vm0, %v14871_v48  ;;  %10559 = vmatmul.msk.f32.gmra.mxu1 %vm1963_vm1, %v19190_v5  ;;  %v4884_v5 = vadd.f32 %v14756_v61, %v4883_v25  ;;  %v14896_v31 = vpop.f32.mrf.mxu0  ;;  %v14909_v25 = vld [vmem:[%s18975_s5 + $0x2] ss:$0 sm:$0xff] }
 0x88d   : > { %10633 = vmatmul.msk.f32.gmra.mxu3 %vm1415_vm0, %v19191_v21  ;;  %19194 = vst [vmem:[#allocation40_spill] sm:$0xff] %v14896_v31 }
 0x890   : > { %v4886_v13 = vpop.f32.mrf.mxu3 }
 0x891   : > { %v4887_v57 = vadd.f32 %v14756_v61, %v4886_v13  ;;  %v14882_v16 = vpop.f32.mrf.mxu1  ;;  %v4881_v13 = vadd.f32 %v14756_v61, %v4880_v41 }
 0x892   : > { %19193 = vst [vmem:[#allocation39_spill] sm:$0xff] %v14882_v16 }
 0x893   : > { %10687 = vmatpush.xpose.msk.msrb.mxu2 %vm1963_vm1, %v4887_v57  ;;  %v14902_v57 = vld [vmem:[%s12222_s0 + $0x80] sm:$0xff] }
 0x894   : > { %10580 = vmatmul.msk.f32.gmra.mxu2 %vm1415_vm0, %v14886_v51 }
 0x897   : > { %10688 = vmatpush.xpose.msk.msrb.mxu2 %vm1963_vm1, %v4884_v5  ;;  %v4203_v21 = vpop.f32.mrf.mxu2 }
 0x898   : > { %v14892_v62 = vpop.f32.mrf.mxu3  ;;  %10519 = vmatmul.msk.f32.gmra.mxu0 %vm1963_vm1, %v4203_v21  ;;  %v4878_v21 = vadd.f32 %v14756_v61, %v4877_v4  ;;  %v14923_v4 = vpop.f32.mrf.mxu0 }
 0x899   : > { %v14898_v16 = vpop.f32.mrf.mxu1  ;;  %19197 = vst [vmem:[#allocation43_spill] sm:$0xff] %v14923_v4 }
 0x89a   : > { %19195 = vst [vmem:[#allocation41_spill] sm:$0xff] %v14898_v16 }
 0x89b   : > { %10689 = vmatpush.xpose.msk.msrb.mxu2 %vm1963_vm1, %v4881_v13  ;;  %v4875_v13 = vadd.f32 %v14756_v61, %v4874_v59 }
 0x89c   : > { %10581 = vmatmul.msk.f32.gmra.mxu2 %vm1415_vm0, %v14902_v57 }
 0x89f   : > { %10690 = vmatpush.xpose.msk.msrb.mxu2 %vm1963_vm1, %v4878_v21  ;;  %v4718_v41 = vpop.f32.mrf.mxu2  ;;  %v14926_v21 = vld [vmem:[%s12222_s0 + $0x88] sm:$0xff] }
 0x8a0   : > { %v4719_v5 = vadd.f32 %v14909_v25, %v4718_v41  ;;  %v14914_v16 = vpop.f32.mrf.mxu3  ;;  %10520 = vmatmul.msk.f32.gmra.mxu0 %vm1963_vm1, %v14594_v52  ;;  %v4872_v41 = vadd.f32 %v14756_v61, %v14810_v20  ;;  %v14945_v20 = vld [vmem:[%s12222_s0 + $0x90] sm:$0xff] }
 0x8a1   : > { %v14919_v31 = vpop.f32.mrf.mxu1 }
 0x8a2   : > { %19196 = vst [vmem:[#allocation42_spill] sm:$0xff] %v14919_v31  ;;  %10679 = vmatmul.msk.f32.vlgmr.msrb.gmra.mxu1 %vm1963_vm1, %v4719_v5  ;;  %v4869_v5 = vadd.f32 %v14756_v61, %v14792_v43 }
 0x8a3   : > { %10691 = vmatpush.xpose.msk.msrb.mxu2 %vm1963_vm1, %v4875_v13 }
 0x8a4   : > { %10582 = vmatmul.msk.f32.gmra.mxu2 %vm1415_vm0, %v14926_v21 }
 0x8a7   : > { %10692 = vmatpush.xpose.msk.msrb.mxu2 %vm1963_vm1, %v4872_v41  ;;  %v4721_v52 = vpop.f32.mrf.mxu2  ;;  %v4866_v41 = vadd.f32 %v14756_v61, %v14774_v22 }
 0x8a8   : > { %v4722_v59 = vadd.f32 %v14909_v25, %v4721_v52  ;;  %v14934_v31 = vpop.f32.mrf.mxu3  ;;  %10521 = vmatmul.msk.f32.gmra.mxu0 %vm1963_vm1, %v14601_v38  ;;  %v14951_v52 = vpop.f32.mrf.mxu0 }
 0x8a9   : > { %v14940_v13 = vpop.f32.mrf.mxu1  ;;  %19199 = vst [vmem:[#allocation45_spill] sm:$0xff] %v14951_v52 }
 0x8aa   : > { %19198 = vst [vmem:[#allocation44_spill] sm:$0xff] %v14940_v13  ;;  %10680 = vmatmul.msk.f32.gmra.mxu1 %vm1963_vm1, %v4722_v59 }
 0x8ab   : > { %10693 = vmatpush.xpose.msk.msrb.mxu2 %vm1963_vm1, %v4869_v5  ;;  %v14961_v5 = vld [vmem:[%s12222_s0 + $0x98] sm:$0xff] }
 0x8ac   : > { %10583 = vmatmul.msk.f32.gmra.mxu2 %vm1415_vm0, %v14945_v20 }
 0x8af   : > { %10694 = vmatpush.xpose.msk.msrb.mxu2 %vm1963_vm1, %v4866_v41  ;;  %v4724_v38 = vpop.f32.mrf.mxu2 }
 0x8b0   : > { %v4725_v43 = vadd.f32 %v14909_v25, %v4724_v38  ;;  %v4898_v13 = vpop.f32.mrf.mxu3  ;;  %10522 = vmatmul.msk.f32.gmra.mxu0 %vm1963_vm1, %v14608_v29  ;;  %v14965_v41 = vpop.f32.mrf.mxu0 }
 0x8b1   : > { %v14957_v59 = vpop.f32.mrf.mxu1  ;;  %19201 = vst [vmem:[#allocation53_spill] sm:$0xff] %v14965_v41 }
 0x8b2   : > { %19200 = vst [vmem:[#allocation52_spill] sm:$0xff] %v14957_v59  ;;  %10681 = vmatmul.msk.f32.gmra.mxu1 %vm1963_vm1, %v4725_v43  ;;  %v14974_v43 = vld [vmem:[%s12222_s0 + $0xa0] sm:$0xff] }
 0x8b4   : > { %10584 = vmatmul.msk.f32.gmra.mxu2 %vm1415_vm0, %v14961_v5 }
 0x8b7   : > { %v4727_v22 = vpop.f32.mrf.mxu2 }
 0x8b8   : > { %v4728_v4 = vadd.f32 %v14909_v25, %v4727_v22  ;;  %v4901_v38 = vpop.f32.mrf.mxu3  ;;  %10523 = vmatmul.msk.f32.gmra.mxu0 %vm1963_vm1, %v14615_v8  ;;  %v14978_v52 = vpop.f32.mrf.mxu0 }
 0x8b9   : > { %v14970_v29 = vpop.f32.mrf.mxu1  ;;  %19203 = vst [vmem:[#allocation55_spill] sm:$0xff] %v14978_v52 }
 0x8ba   : > { %19202 = vst [vmem:[#allocation54_spill] sm:$0xff] %v14970_v29  ;;  %10682 = vmatmul.msk.f32.gmra.mxu1 %vm1963_vm1, %v4728_v4  ;;  %v14987_v4 = vld [vmem:[%s12222_s0 + $0xa8] sm:$0xff] }
 0x8bc   : > { %10585 = vmatmul.msk.f32.gmra.mxu2 %vm1415_vm0, %v14974_v43 }
 0x8bf   : > { %v4730_v59 = vpop.f32.mrf.mxu2 }
 0x8c0   : > { %v4731_v41 = vadd.f32 %v14909_v25, %v4730_v59  ;;  %v4904_v22 = vpop.f32.mrf.mxu3  ;;  %10524 = vmatmul.msk.f32.gmra.mxu0 %vm1963_vm1, %v14625_v18  ;;  %v14991_v24 = vpop.f32.mrf.mxu0 }
 0x8c1   : > { %v14983_v8 = vpop.f32.mrf.mxu1  ;;  %19205 = vst [vmem:[#allocation57_spill] sm:$0xff] %v14991_v24 }
 0x8c2   : > { %19204 = vst [vmem:[#allocation56_spill] sm:$0xff] %v14983_v8  ;;  %10683 = vmatmul.msk.f32.gmra.mxu1 %vm1963_vm1, %v4731_v41  ;;  %v15000_v41 = vld [vmem:[%s12222_s0 + $0xb0] sm:$0xff] }
 0x8c4   : > { %10586 = vmatmul.msk.f32.gmra.mxu2 %vm1415_vm0, %v14987_v4 }
 0x8c7   : > { %v4733_v29 = vpop.f32.mrf.mxu2 }
 0x8c8   : > { %v4734_v52 = vadd.f32 %v14909_v25, %v4733_v29  ;;  %v4907_v59 = vpop.f32.mrf.mxu3  ;;  %10525 = vmatmul.msk.f32.gmra.mxu0 %vm1963_vm1, %v14641_v50  ;;  %v15008_v49 = vpop.f32.mrf.mxu0 }
 0x8c9   : > { %v14996_v18 = vpop.f32.mrf.mxu1  ;;  %19207 = vst [vmem:[#allocation59_spill] sm:$0xff] %v15008_v49  ;;  %v15076_v49 = vld [vmem:[%s12222_s0 + $0xd8] sm:$0xff] }
 0x8ca   : > { %19206 = vst [vmem:[#allocation58_spill] sm:$0xff] %v14996_v18  ;;  %10684 = vmatmul.msk.f32.gmra.mxu1 %vm1963_vm1, %v4734_v52  ;;  %v15015_v52 = vld [vmem:[%s12222_s0 + $0xb8] sm:$0xff] }
 0x8cc   : > { %10587 = vmatmul.msk.f32.gmra.mxu2 %vm1415_vm0, %v15000_v41 }
 0x8cf   : > { %v4736_v8 = vpop.f32.mrf.mxu2 }
 0x8d0   : > { %v4737_v40 = vadd.f32 %v14909_v25, %v4736_v8  ;;  %v4910_v24 = vpop.f32.mrf.mxu3  ;;  %10526 = vmatmul.msk.f32.gmra.mxu0 %vm1963_vm1, %v14648_v35  ;;  %v4908_v8 = vadd.f32 %v14756_v61, %v4907_v59  ;;  %v15031_v59 = vpop.f32.mrf.mxu0 }
 0x8d1   : > { %v4911_v29 = vadd.f32 %v14756_v61, %v4910_v24  ;;  %v15010_v50 = vpop.f32.mrf.mxu1  ;;  %19210 = vst [vmem:[#allocation62_spill] sm:$0xff] %v15031_v59 }
 0x8d2   : > { %19208 = vst [vmem:[#allocation60_spill] sm:$0xff] %v15010_v50  ;;  %10685 = vmatmul.msk.f32.gmra.mxu1 %vm1963_vm1, %v4737_v40  ;;  %v4905_v40 = vadd.f32 %v14756_v61, %v4904_v22 }
 0x8d3   : > { %10703 = vmatpush.xpose.msk.msra.mxu3 %vm1963_vm1, %v4911_v29 }
 0x8d4   : > { %10588 = vmatmul.msk.f32.gmra.mxu2 %vm1415_vm0, %v15015_v52 }
 0x8d7   : > { %10704 = vmatpush.xpose.msk.msra.mxu3 %vm1963_vm1, %v4908_v8  ;;  %v4739_v35 = vpop.f32.mrf.mxu2  ;;  %v15034_v8 = vld [vmem:[%s12222_s0 + $0xc0] sm:$0xff] }
 0x8d8   : > { %v4740_v24 = vadd.f32 %v14909_v25, %v4739_v35  ;;  %v15022_v18 = vpop.f32.mrf.mxu3  ;;  %10527 = vmatmul.msk.f32.gmra.mxu0 %vm1963_vm1, %v14655_v44  ;;  %v4902_v35 = vadd.f32 %v14756_v61, %v4901_v38  ;;  %v15053_v50 = vpop.f32.mrf.mxu0 }
 0x8d9   : > { %v15028_v29 = vpop.f32.mrf.mxu1  ;;  %19212 = vst [vmem:[#allocation64_spill] sm:$0xff] %v15053_v50 }
 0x8da   : > { %10686 = vmatmul.msk.f32.gmra.mxu1 %vm1963_vm1, %v4740_v24  ;;  %19209 = vst [vmem:[#allocation61_spill] sm:$0xff] %v15028_v29  ;;  %v4899_v24 = vadd.f32 %v14756_v61, %v4898_v13  ;;  %v4896_v29 = vadd.f32 %v14756_v61, %v14934_v31  ;;  %v4893_v13 = vadd.f32 %v14756_v61, %v14914_v16 }
 0x8db   : > { %10705 = vmatpush.xpose.msk.msra.mxu3 %vm1963_vm1, %v4905_v40  ;;  %v15045_v40 = vld [vmem:[%s12222_s0 + $0xc8] sm:$0xff]  ;;  %v4890_v31 = vadd.f32 %v14756_v61, %v14892_v62 }
 0x8dc   : > { %10589 = vmatmul.msk.f32.gmra.mxu2 %vm1415_vm0, %v15034_v8 }
 0x8df   : > { %10706 = vmatpush.xpose.msk.msra.mxu3 %vm1963_vm1, %v4902_v35  ;;  %v4742_v44 = vpop.f32.mrf.mxu2 }
 0x8e0   : > { %v15040_v22 = vpop.f32.mrf.mxu3  ;;  %v15073_v50 = vpop.f32.mrf.mxu0 }
 0x8e1   : > { %v15051_v38 = vpop.f32.mrf.mxu1  ;;  %19214 = vst [vmem:[#allocation66_spill] sm:$0xff] %v15073_v50 }
 0x8e2   : > { %19211 = vst [vmem:[#allocation63_spill] sm:$0xff] %v15051_v38 }
 0x8e3   : > { %10707 = vmatpush.xpose.msk.msra.mxu3 %vm1963_vm1, %v4899_v24  ;;  %v15062_v24 = vld [vmem:[%s12222_s0 + $0xd0] sm:$0xff] }
 0x8e4   : > { %10590 = vmatmul.msk.f32.gmra.mxu2 %vm1415_vm0, %v15045_v40 }
 0x8e7   : > { %10708 = vmatpush.xpose.msk.msra.mxu3 %vm1963_vm1, %v4896_v29  ;;  %v4745_v35 = vpop.f32.mrf.mxu2 }
 0x8e8   : > { %v15056_v59 = vpop.f32.mrf.mxu3 }
 0x8e9   : > { %v15068_v38 = vpop.f32.mrf.mxu1 }
 0x8ea   : > { %19213 = vst [vmem:[#allocation65_spill] sm:$0xff] %v15068_v38  ;;  %v15084_v38 = vpop.f32.mrf.mxu0 }
 0x8eb   : > { %10709 = vmatpush.xpose.msk.msra.mxu3 %vm1963_vm1, %v4893_v13  ;;  %19216 = vst [vmem:[#allocation68_spill] sm:$0xff] %v15084_v38 }
 0x8ec   : > { %10591 = vmatmul.msk.f32.gmra.mxu2 %vm1415_vm0, %v15062_v24 }
 0x8ef   : > { %10710 = vmatpush.xpose.msk.msra.mxu3 %vm1963_vm1, %v4890_v31  ;;  %v15071_v29 = vpop.f32.mrf.mxu2  ;;  %v15087_v31 = vld [vmem:[%s12222_s0 + $0xe0] sm:$0xff] }
 0x8f0   : > { %v4922_v16 = vpop.f32.mrf.mxu3 }
 0x8f1   : > { %v15082_v62 = vpop.f32.mrf.mxu1 }
 0x8f2   : > { %19215 = vst [vmem:[#allocation67_spill] sm:$0xff] %v15082_v62  ;;  %v15095_v0 = vpop.f32.mrf.mxu0 }
 0x8f3   : > { %19218 = vst [vmem:[#allocation70_spill] sm:$0xff] %v15095_v0 }
 0x8f4   : > { %10592 = vmatmul.msk.f32.gmra.mxu2 %vm1415_vm0, %v15076_v49 }
 0x8f7   : > { %v15080_v13 = vpop.f32.mrf.mxu2 }
 0x8f8   : > { %v4925_v34 = vpop.f32.mrf.mxu3 }
 0x8f9   : > { %v15093_v17 = vpop.f32.mrf.mxu1 }
 0x8fa   : > { %19217 = vst [vmem:[#allocation69_spill] sm:$0xff] %v15093_v17  ;;  %v15104_v10 = vpop.f32.mrf.mxu0 }
 0x8fb   : > { %19219 = vst [vmem:[#allocation71_spill] sm:$0xff] %v15104_v10 }
 0x8fc   : > { %10593 = vmatmul.msk.f32.gmra.mxu2 %vm1415_vm0, %v15087_v31 }
 0x8ff   : > { %v15091_v50 = vpop.f32.mrf.mxu2 }
 0x900   : > { %v4928_v11 = vpop.f32.mrf.mxu3 }
 0x901   : > { %v15111_v47 = vpop.f32.mrf.mxu1  ;;  %v4929_v12 = vadd.f32 %v14756_v61, %v4928_v11 }
 0x902   : > { %19220 = vst [vmem:[#allocation72_spill] sm:$0xff] %v15111_v47  ;;  %v15123_v63 = vpop.f32.mrf.mxu0 }
 0x903   : > { %19221 = vst [vmem:[#allocation73_spill] sm:$0xff] %v15123_v63 }
 0x904   : > { %10594 = vmatmul.msk.f32.gmra.mxu2 %vm1415_vm0, %v15098_v28 }
 0x907   : > { %v15102_v62 = vpop.f32.mrf.mxu2 }
 0x908   : > { %v4931_v38 = vpop.f32.mrf.mxu3 }
 0x909   : > { %v4932_v10 = vadd.f32 %v14756_v61, %v4931_v38  ;;  %v15125_v2 = vpop.f32.mrf.mxu1 }
 0x90a   : > { %19222 = vst [vmem:[#allocation74_spill] sm:$0xff] %v15125_v2  ;;  %v15138_v2 = vpop.f32.mrf.mxu0 }
 0x90b   : > { %19223 = vst [vmem:[#allocation75_spill] sm:$0xff] %v15138_v2 }
 0x90c   : > { %10595 = vmatmul.msk.f32.gmra.mxu2 %vm1415_vm0, %v15107_v46 }
 0x90f   : > { %v15113_v17 = vpop.f32.mrf.mxu2 }
 0x910   : > { %v4934_v0 = vpop.f32.mrf.mxu3 }
 0x911   : > { %v4935_v15 = vadd.f32 %v14756_v61, %v4934_v0  ;;  %v4743_v0 = vadd.f32 %v14909_v25, %v4742_v44  ;;  %v4923_v44 = vadd.f32 %v14756_v61, %v4922_v16  ;;  %v4920_v16 = vadd.f32 %v14756_v61, %v15056_v59 }
 0x912   : > { %v4917_v59 = vadd.f32 %v14756_v61, %v15040_v22 }
 0x913   : > { %10719 = vmatpush.xpose.msk.msra.mxu1 %vm1963_vm1, %v4935_v15  ;;  %v4926_v15 = vadd.f32 %v14756_v61, %v4925_v34  ;;  %v10636_v34 = vld [vmem:[%s18978_s8 + $0x50] sm:$0xff] }
 0x914   : > { %10596 = vmatmul.msk.f32.gmra.mxu2 %vm1415_vm0, %v15118_v30 }
 0x917   : > { %10720 = vmatpush.xpose.msk.msra.mxu1 %vm1963_vm1, %v4932_v10  ;;  %v15128_v47 = vpop.f32.mrf.mxu2 }
 0x91b   : > { %10721 = vmatpush.xpose.msk.msra.mxu1 %vm1963_vm1, %v4929_v12  ;;  %v10637_v12 = vld [vmem:[%s18978_s8 + $0x58] sm:$0xff] }
 0x91c   : > { %10695 = vmatmul.msk.f32.vlgmr.msrb.gmra.mxu2 %vm1963_vm1, %v4743_v0  ;;  %v4746_v0 = vadd.f32 %v14909_v25, %v4745_v35  ;;  %4959 = vmatpush.msrb.mxu0 %v10637_v12  ;;  %v15170_v12 = vpop.f32.mrf.mxu0 }
 0x91d   : > { %19224 = vst [vmem:[#allocation76_spill] sm:$0xff] %v15170_v12 }
 0x91e   : > { %4960 = vmatpush.msrb.mxu0 %v10636_v34  ;;  %v4749_v34 = vadd.f32 %v14909_v25, %v15071_v29 }
 0x91f   : > { %10722 = vmatpush.xpose.msk.msra.mxu1 %vm1963_vm1, %v4926_v15  ;;  %v4766_v38 = vpop.f32.mrf.mxu2  ;;  %v15136_v63 = vpop.f32.mrf.mxu1  ;;  %v10635_v15 = vld [vmem:[%s18978_s8 + $0x48] sm:$0xff] }
 0x920   : > { %v4767_v10 = vadd.f32 %v14909_v25, %v4766_v38  ;;  %v5416_v11 = vsel %vm2320_vm2, %v15136_v63, -inf  ;;  %4961 = vmatpush.msrb.mxu0 %v10635_v15 }
 0x921   : > { %5417 = vmax.xlane.f32.xlu1 %v5416_v11 }
 0x922   : > { %10711 = vmatmul.msk.f32.vlgmr.msra.gmra.mxu3 %vm1963_vm1, %v4767_v10 }
 0x923   : > { %10723 = vmatpush.xpose.msk.msra.mxu1 %vm1963_vm1, %v4923_v44  ;;  %v10634_v44 = vld [vmem:[%s18978_s8 + $0x40] sm:$0xff] }
 0x924   : > { %10696 = vmatmul.msk.f32.gmra.mxu2 %vm1963_vm1, %v4746_v0  ;;  %4962 = vmatpush.msrb.mxu0 %v10634_v44  ;;  %v4914_v0 = vadd.f32 %v14756_v61, %v15022_v18  ;;  %v15192_v61 = vpop.f32.mrf.mxu0 }
 0x925   : > { %10639 = vmatmul.msk.f32.vlgmr.msrb.gmra.mxu0 %vm1415_vm0, %v14670_v56  ;;  %v4752_v56 = vadd.f32 %v14909_v25, %v15080_v13  ;;  %19225 = vst [vmem:[#allocation77_spill] sm:$0xff] %v15192_v61  ;;  %v4755_v13 = vadd.f32 %v14909_v25, %v15091_v50  ;;  %v4758_v50 = vadd.f32 %v14909_v25, %v15102_v62  ;;  %v19268_v61 = vld [vmem:[#allocation19_spill] sm:$0xff] }
 0x926   : > { %v4761_v62 = vadd.f32 %v14909_v25, %v15113_v17  ;;  %v4764_v17 = vadd.f32 %v14909_v25, %v15128_v47 }
 0x927   : > { %10724 = vmatpush.xpose.msk.msra.mxu1 %vm1963_vm1, %v4920_v16  ;;  %v4769_v38 = vpop.f32.mrf.mxu2  ;;  %v15160_v11 = vpop.f32.mrf.mxu1 }
 0x928   : > { %v4770_v35 = vadd.f32 %v14909_v25, %v4769_v38  ;;  %v5419_v10 = vsel %vm2320_vm2, %v15160_v11, -inf }
 0x929   : > { %5420 = vmax.xlane.f32.xlu2 %v5419_v10 }
 0x92a   : > { %10712 = vmatmul.msk.f32.gmra.mxu3 %vm1963_vm1, %v4770_v35 }
 0x92b   : > { %10725 = vmatpush.xpose.msk.msra.mxu1 %vm1963_vm1, %v4917_v59 }
 0x92c   : > { %10697 = vmatmul.msk.f32.gmra.mxu2 %vm1963_vm1, %v4749_v34 }
 0x92d   : > { %10640 = vmatmul.msk.f32.gmra.mxu0 %vm1415_vm0, %v14683_v1  ;;  %v15206_v1 = vpop.f32.mrf.mxu0 }
 0x92e   : > { %19226 = vst [vmem:[#allocation78_spill] sm:$0xff] %v15206_v1 }
 0x92f   : > { %10726 = vmatpush.xpose.msk.msra.mxu1 %vm1963_vm1, %v4914_v0  ;;  %v4772_v22 = vpop.f32.mrf.mxu2  ;;  %v15182_v16 = vpop.f32.mrf.mxu1 }
 0x930   : > { %v4773_v15 = vadd.f32 %v14909_v25, %v4772_v22  ;;  %v5422_v29 = vsel %vm2320_vm2, %v15182_v16, -inf }
 0x931   : > { %5423 = vmax.xlane.f32.xlu0 %v5422_v29 }
 0x932   : > { %10713 = vmatmul.msk.f32.gmra.mxu3 %vm1963_vm1, %v4773_v15 }
 0x934   : > { %10698 = vmatmul.msk.f32.gmra.mxu2 %vm1963_vm1, %v4752_v56 }
 0x935   : > { %10641 = vmatmul.msk.f32.gmra.mxu0 %vm1415_vm0, %v14697_v3  ;;  %v15224_v56 = vpop.f32.mrf.mxu0 }
 0x936   : > { %19227 = vst [vmem:[#allocation79_spill] sm:$0xff] %v15224_v56 }
 0x937   : > { %v4775_v18 = vpop.f32.mrf.mxu2  ;;  %v15195_v38 = vpop.f32.mrf.mxu1 }
 0x938   : > { %v4776_v35 = vadd.f32 %v14909_v25, %v4775_v18  ;;  %v5425_v10 = vsel %vm2320_vm2, %v15195_v38, -inf }
 0x939   : > { %5426 = vmax.xlane.f32.xlu1 %v5425_v10 }
 0x93a   : > { %10714 = vmatmul.msk.f32.gmra.mxu3 %vm1963_vm1, %v4776_v35 }
 0x93c   : > { %10699 = vmatmul.msk.f32.gmra.mxu2 %vm1963_vm1, %v4755_v13 }
 0x93d   : > { %10642 = vmatmul.msk.f32.gmra.mxu0 %vm1415_vm0, %v14709_v27  ;;  %v15237_v13 = vpop.f32.mrf.mxu0 }
 0x93e   : > { %19228 = vst [vmem:[#allocation80_spill] sm:$0xff] %v15237_v13 }
 0x93f   : > { %v4778_v44 = vpop.f32.mrf.mxu2  ;;  %v15208_v59 = vpop.f32.mrf.mxu1 }
 0x940   : > { %v4779_v34 = vadd.f32 %v14909_v25, %v4778_v44  ;;  %v5428_v0 = vsel %vm2320_vm2, %v15208_v59, -inf }
 0x941   : > { %5429 = vmax.xlane.f32.xlu2 %v5428_v0 }
 0x942   : > { %10715 = vmatmul.msk.f32.gmra.mxu3 %vm1963_vm1, %v4779_v34 }
 0x944   : > { %10700 = vmatmul.msk.f32.gmra.mxu2 %vm1963_vm1, %v4758_v50 }
 0x945   : > { %10643 = vmatmul.msk.f32.gmra.mxu0 %vm1415_vm0, %v14721_v45  ;;  %v15253_v47 = vpop.f32.mrf.mxu0 }
 0x946   : > { %19229 = vst [vmem:[#allocation81_spill] sm:$0xff] %v15253_v47  ;;  %v16075_v47 = vld [vmem:[%s12222_s0 + $0xb8] sm:$0xff] }
 0x947   : > { %v4781_v3 = vpop.f32.mrf.mxu2  ;;  %v15219_v22 = vpop.f32.mrf.mxu1 }
 0x948   : > { %v4782_v15 = vadd.f32 %v14909_v25, %v4781_v3  ;;  %v5431_v29 = vsel %vm2320_vm2, %v15219_v22, -inf }
 0x949   : > { %5432 = vmax.xlane.f32.xlu0 %v5431_v29 }
 0x94a   : > { %10716 = vmatmul.msk.f32.gmra.mxu3 %vm1963_vm1, %v4782_v15 }
 0x94c   : > { %10701 = vmatmul.msk.f32.gmra.mxu2 %vm1963_vm1, %v4761_v62 }
 0x94d   : > { %10644 = vmatmul.msk.f32.gmra.mxu0 %vm1415_vm0, %v14733_v54  ;;  %v15259_v3 = vpop.f32.mrf.mxu0 }
 0x94e   : > { %19230 = vst [vmem:[#allocation82_spill] sm:$0xff] %v15259_v3 }
 0x94f   : > { %v4784_v27 = vpop.f32.mrf.mxu2  ;;  %v15232_v18 = vpop.f32.mrf.mxu1 }
 0x950   : > { %v4785_v35 = vadd.f32 %v14909_v25, %v4784_v27  ;;  %v5434_v10 = vsel %vm2320_vm2, %v15232_v18, -inf }
 0x951   : > { %5435 = vmax.xlane.f32.xlu1 %v5434_v10 }
 0x952   : > { %10717 = vmatmul.msk.f32.gmra.mxu3 %vm1963_vm1, %v4785_v35 }
 0x954   : > { %10702 = vmatmul.msk.f32.gmra.mxu2 %vm1963_vm1, %v4764_v17 }
 0x955   : > { %10645 = vmatmul.msk.f32.gmra.mxu0 %vm1415_vm0, %v14745_v7  ;;  %v15265_v7 = vpop.f32.mrf.mxu0 }
 0x956   : > { %19231 = vst [vmem:[#allocation83_spill] sm:$0xff] %v15265_v7 }
 0x957   : > { %v4787_v45 = vpop.f32.mrf.mxu2  ;;  %v15245_v44 = vpop.f32.mrf.mxu1 }
 0x958   : > { %v4788_v34 = vadd.f32 %v14909_v25, %v4787_v45  ;;  %v5437_v0 = vsel %vm2320_vm2, %v15245_v44, -inf }
 0x959   : > { %5438 = vmax.xlane.f32.xlu0 %v5437_v0 }
 0x95a   : > { %10718 = vmatmul.msk.f32.gmra.mxu3 %vm1963_vm1, %v4788_v34 }
 0x95d   : > { %10646 = vmatmul.msk.f32.gmra.mxu0 %vm1415_vm0, %v14764_v23  ;;  %v15272_v10 = vpop.f32.mrf.mxu0 }
 0x95e   : > { %19232 = vst [vmem:[#allocation84_spill] sm:$0xff] %v15272_v10 }
 0x95f   : > { %v4790_v50 = vpop.f32.mrf.mxu2 }
 0x960   : > { %v4791_v54 = vadd.f32 %v14909_v25, %v4790_v50 }
 0x962   : > { %10727 = vmatmul.msk.f32.vlgmr.msra.gmra.mxu1 %vm1963_vm1, %v4791_v54 }
 0x965   : > { %10647 = vmatmul.msk.f32.gmra.mxu0 %vm1415_vm0, %v14782_v6  ;;  %v15281_v45 = vpop.f32.mrf.mxu0 }
 0x966   : > { %19233 = vst [vmem:[#allocation85_spill] sm:$0xff] %v15281_v45 }
 0x967   : > { %v4793_v15 = vpop.f32.mrf.mxu2 }
 0x968   : > { %v4794_v29 = vadd.f32 %v14909_v25, %v4793_v15 }
 0x96a   : > { %10728 = vmatmul.msk.f32.gmra.mxu1 %vm1963_vm1, %v4794_v29 }
 0x96d   : > { %10648 = vmatmul.msk.f32.gmra.mxu0 %vm1415_vm0, %v14799_v33  ;;  %v15287_v0 = vpop.f32.mrf.mxu0 }
 0x96e   : > { %19234 = vst [vmem:[#allocation86_spill] sm:$0xff] %v15287_v0 }
 0x96f   : > { %v4796_v62 = vpop.f32.mrf.mxu2 }
 0x970   : > { %v4797_v27 = vadd.f32 %v14909_v25, %v4796_v62 }
 0x972   : > { %10729 = vmatmul.msk.f32.gmra.mxu1 %vm1963_vm1, %v4797_v27 }
 0x975   : > { %10649 = vmatmul.msk.f32.gmra.mxu0 %vm1415_vm0, %v14818_v37  ;;  %v15294_v15 = vpop.f32.mrf.mxu0 }
 0x976   : > { %19235 = vst [vmem:[#allocation87_spill] sm:$0xff] %v15294_v15 }
 0x977   : > { %v4799_v23 = vpop.f32.mrf.mxu2 }
 0x978   : > { %v4800_v35 = vadd.f32 %v14909_v25, %v4799_v23 }
 0x97a   : > { %10730 = vmatmul.msk.f32.gmra.mxu1 %vm1963_vm1, %v4800_v35 }
 0x97d   : > { %10650 = vmatmul.msk.f32.gmra.mxu0 %vm1415_vm0, %v14834_v42 }
 0x97f   : > { %v4802_v6 = vpop.f32.mrf.mxu2 }
 0x980   : > { %v4803_v17 = vadd.f32 %v14909_v25, %v4802_v6 }
 0x982   : > { %10731 = vmatmul.msk.f32.gmra.mxu1 %vm1963_vm1, %v4803_v17  ;;  %v15307_v17 = vpop.f32.mrf.mxu0 }
 0x983   : > { %19236 = vst [vmem:[#allocation88_spill] sm:$0xff] %v15307_v17 }
 0x985   : > { %10651 = vmatmul.msk.f32.gmra.mxu0 %vm1415_vm0, %v14847_v32 }
 0x987   : > { %v4805_v33 = vpop.f32.mrf.mxu2 }
 0x988   : > { %v4806_v34 = vadd.f32 %v14909_v25, %v4805_v33 }
 0x98a   : > { %10732 = vmatmul.msk.f32.gmra.mxu1 %vm1963_vm1, %v4806_v34 }
 0x98d   : > { %10652 = vmatmul.msk.f32.gmra.mxu0 %vm1415_vm0, %v14858_v19 }
 0x98f   : > { %v4808_v37 = vpop.f32.mrf.mxu2 }
 0x990   : > { %v4809_v50 = vadd.f32 %v14909_v25, %v4808_v37 }
 0x992   : > { %10733 = vmatmul.msk.f32.gmra.mxu1 %vm1963_vm1, %v4809_v50 }
 0x994   : > { %v5418_v42 = vpop.xlane.xlu1 %5417 }
 0x995   : > { %v5512_v54 = vsub.f32 %v15136_v63, %v5418_v42  ;;  %10653 = vmatmul.msk.f32.gmra.mxu0 %vm1415_vm0, %v14871_v48 }
 0x997   : > { %v5544_v29 = vmul.f32 1.442695, %v5512_v54  ;;  %v4811_v62 = vpop.f32.mrf.mxu2 }
 0x998   : > { %v4812_v27 = vadd.f32 %v14909_v25, %v4811_v62 }
 0x999   : > { %11467 = vpow2.f32 %v5544_v29 }
 0x99a   : > { %10734 = vmatmul.msk.f32.gmra.mxu1 %vm1963_vm1, %v4812_v27 }
 0x99c   : > { %v5421_v32 = vpop.xlane.xlu2 %5420 }
 0x99d   : > { %v5513_v23 = vsub.f32 %v15160_v11, %v5421_v32  ;;  %10654 = vmatmul.msk.f32.gmra.mxu0 %vm1415_vm0, %v14886_v51 }
 0x99f   : > { %v15301_v35 = vpop.eup %11467  ;;  %v5546_v19 = vmul.f32 1.442695, %v5513_v23  ;;  %v15303_v6 = vpop.f32.mrf.mxu2 }
 0x9a0   : > { %v5608_v63 = vsel %vm2320_vm2, %v15301_v35, 0.0  ;;  %v5440_v37 = vsel %vm2320_vm2, %v15303_v6, -inf }
 0x9a1   : > { %11469 = vpow2.f32 %v5546_v19  ;;  %5609 = vadd.xlane.f32.xlu2 %v5608_v63 }
 0x9a2   : > { %v15320_v42 = vpop.f32.mrf.mxu0 }
 0x9a4   : > { %v5424_v25 = vpop.xlane.xlu0 %5423 }
 0x9a5   : > { %v5514_v48 = vsub.f32 %v15182_v16, %v5424_v25  ;;  %10655 = vmatmul.msk.f32.gmra.mxu0 %vm1415_vm0, %v14902_v57 }
 0x9a7   : > { %v15312_v33 = vpop.eup %11469  ;;  %v5548_v11 = vmul.f32 1.442695, %v5514_v48  ;;  %v15314_v34 = vpop.f32.mrf.mxu2 }
 0x9a8   : > { %v5611_v50 = vsel %vm2320_vm2, %v15312_v33, 0.0  ;;  %v5443_v27 = vsel %vm2320_vm2, %v15314_v34, -inf }
 0x9a9   : > { %11471 = vpow2.f32 %v5548_v11  ;;  %5441 = vmax.xlane.f32.xlu2 %v5440_v37  ;;  %5612 = vadd.xlane.f32.xlu1 %v5611_v50 }
 0x9aa   : > { %v15333_v23 = vpop.f32.mrf.mxu0 }
 0x9ac   : > { %v5427_v51 = vpop.xlane.xlu1 %5426 }
 0x9ad   : > { %v5515_v16 = vsub.f32 %v15195_v38, %v5427_v51  ;;  %10656 = vmatmul.msk.f32.gmra.mxu0 %vm1415_vm0, %v14926_v21 }
 0x9af   : > { %v15325_v54 = vpop.eup %11471  ;;  %v5550_v29 = vmul.f32 1.442695, %v5515_v16  ;;  %v15327_v62 = vpop.f32.mrf.mxu2 }
 0x9b0   : > { %v5614_v32 = vsel %vm2320_vm2, %v15325_v54, 0.0  ;;  %v5446_v11 = vsel %vm2320_vm2, %v15327_v62, -inf }
 0x9b1   : > { %11473 = vpow2.f32 %v5550_v29  ;;  %5444 = vmax.xlane.f32.xlu1 %v5443_v27  ;;  %5615 = vadd.xlane.f32.xlu0 %v5614_v32 }
 0x9b2   : > { %v15346_v37 = vpop.f32.mrf.mxu0 }
 0x9b4   : > { %v5430_v57 = vpop.xlane.xlu2 %5429 }
 0x9b5   : > { %v5516_v38 = vsub.f32 %v15208_v59, %v5430_v57  ;;  %10657 = vmatmul.msk.f32.gmra.mxu0 %vm1415_vm0, %v14945_v20 }
 0x9b7   : > { %v15338_v19 = vpop.eup %11473  ;;  %v5552_v63 = vmul.f32 1.442695, %v5516_v38  ;;  %v15340_v25 = vpop.f32.mrf.mxu2 }
 0x9b8   : > { %v5617_v48 = vsel %vm2320_vm2, %v15338_v19, 0.0  ;;  %v5449_v29 = vsel %vm2320_vm2, %v15340_v25, -inf }
 0x9b9   : > { %11475 = vpow2.f32 %v5552_v63  ;;  %5618 = vadd.xlane.f32.xlu2 %v5617_v48  ;;  %5447 = vmax.xlane.f32.xlu0 %v5446_v11 }
 0x9ba   : > { %v4973_v32 = vpop.f32.mrf.mxu0 }
 0x9bc   : > { %v5433_v21 = vpop.xlane.xlu0 %5432 }
 0x9bd   : > { %v5517_v59 = vsub.f32 %v15219_v22, %v5433_v21  ;;  %10658 = vmatmul.msk.f32.gmra.mxu0 %vm1415_vm0, %v14961_v5 }
 0x9bf   : > { %v15351_v50 = vpop.eup %11475  ;;  %v5554_v51 = vmul.f32 1.442695, %v5517_v59  ;;  %v15353_v16 = vpop.f32.mrf.mxu2 }
 0x9c0   : > { %v5620_v27 = vsel %vm2320_vm2, %v15351_v50, 0.0  ;;  %v5452_v63 = vsel %vm2320_vm2, %v15353_v16, -inf }
 0x9c1   : > { %11477 = vpow2.f32 %v5554_v51  ;;  %5450 = vmax.xlane.f32.xlu2 %v5449_v29  ;;  %5621 = vadd.xlane.f32.xlu1 %v5620_v27 }
 0x9c2   : > { %v4976_v21 = vpop.f32.mrf.mxu0 }
 0x9c4   : > { %v5436_v20 = vpop.xlane.xlu1 %5435 }
 0x9c5   : > { %v5518_v22 = vsub.f32 %v15232_v18, %v5436_v20  ;;  %10659 = vmatmul.msk.f32.gmra.mxu0 %vm1415_vm0, %v14974_v43 }
 0x9c7   : > { %v15362_v57 = vpop.eup %11477  ;;  %v5556_v38 = vmul.f32 1.442695, %v5518_v22  ;;  %v15368_v11 = vpop.f32.mrf.mxu2 }
 0x9c8   : > { %v5623_v48 = vsel %vm2320_vm2, %v15362_v57, 0.0  ;;  %v5455_v29 = vsel %vm2320_vm2, %v15368_v11, -inf }
 0x9c9   : > { %11479 = vpow2.f32 %v5556_v38  ;;  %5453 = vmax.xlane.f32.xlu1 %v5452_v63  ;;  %5624 = vadd.xlane.f32.xlu0 %v5623_v48 }
 0x9ca   : > { %v4979_v20 = vpop.f32.mrf.mxu0 }
 0x9cc   : > { %v5439_v5 = vpop.xlane.xlu0 %5438 }
 0x9cd   : > { %v5519_v18 = vsub.f32 %v15245_v44, %v5439_v5  ;;  %10660 = vmatmul.msk.f32.gmra.mxu0 %vm1415_vm0, %v14987_v4  ;;  %v15396_v4 = vld [vmem:[%s18979_s9 + $0x2] ss:$0 sm:$0xff] }
 0x9ce   : > { %v4974_v15 = vadd.f32 %v15396_v4, %v4973_v32  ;;  %v4965_v32 = vadd.f32 %v15396_v4, %v15320_v42 }
 0x9cf   : > { %v15373_v59 = vpop.eup %11479  ;;  %v5558_v51 = vmul.f32 1.442695, %v5519_v18  ;;  %v15381_v43 = vpop.f32.mrf.mxu2 }
 0x9d0   : > { %v5626_v27 = vsel %vm2320_vm2, %v15373_v59, 0.0  ;;  %v5458_v44 = vsel %vm2320_vm2, %v15381_v43, -inf }
 0x9d1   : > { %11481 = vpow2.f32 %v5558_v51  ;;  %5456 = vmax.xlane.f32.xlu1 %v5455_v29  ;;  %5627 = vadd.xlane.f32.xlu0 %v5626_v27 }
 0x9d2   : > { %v4982_v63 = vpop.f32.mrf.mxu0 }
 0x9d5   : > { %10661 = vmatmul.msk.f32.gmra.mxu0 %vm1415_vm0, %v15000_v41  ;;  %v4983_v41 = vadd.f32 %v15396_v4, %v4982_v63 }
 0x9d7   : > { %v15383_v22 = vpop.eup %11481  ;;  %v15391_v48 = vpop.f32.mrf.mxu2 }
 0x9d8   : > { %v5629_v38 = vsel %vm2320_vm2, %v15383_v22, 0.0  ;;  %v5461_v18 = vsel %vm2320_vm2, %v15391_v48, -inf }
 0x9d9   : > { %5459 = vmax.xlane.f32.xlu1 %v5458_v44  ;;  %5630 = vadd.xlane.f32.xlu0 %v5629_v38  ;;  %v4980_v44 = vadd.f32 %v15396_v4, %v4979_v20  ;;  %v4977_v38 = vadd.f32 %v15396_v4, %v4976_v21  ;;  %v4968_v21 = vadd.f32 %v15396_v4, %v15333_v23 }
 0x9da   : > { %v4985_v29 = vpop.f32.mrf.mxu0 }
 0x9db   : > { %v4986_v27 = vadd.f32 %v15396_v4, %v4985_v29 }
 0x9dd   : > { %10662 = vmatmul.msk.f32.gmra.mxu0 %vm1415_vm0, %v15015_v52  ;;  %5800 = vmatpush.msra.mxu2 %v4986_v27  ;;  %v4971_v52 = vadd.f32 %v15396_v4, %v15346_v37 }
 0x9df   : > { %v15398_v5 = vpop.f32.mrf.mxu1  ;;  %5801 = vmatpush.msra.mxu2 %v4983_v41  ;;  %v15445_v41 = vpop.f32.mrf.mxu3 }
 0x9e0   : > { %v5488_v51 = vsel %vm2320_vm2, %v15398_v5, -inf }
 0x9e1   : > { %5462 = vmax.xlane.f32.xlu1 %v5461_v18  ;;  %5489 = vmax.xlane.f32.xlu2 %v5488_v51 }
 0x9e2   : > { %5802 = vmatpush.msra.mxu2 %v4980_v44  ;;  %v15415_v63 = vpop.f32.mrf.mxu0 }
 0x9e4   : > { %5803 = vmatpush.msra.mxu2 %v4977_v38 }
 0x9e5   : > { %10663 = vmatmul.msk.f32.gmra.mxu0 %vm1415_vm0, %v15034_v8 }
 0x9e6   : > { %5804 = vmatpush.msra.mxu2 %v4974_v15 }
 0x9e7   : > { %v15410_v17 = vpop.f32.mrf.mxu1 }
 0x9e8   : > { %v5491_v18 = vsel %vm2320_vm2, %v15410_v17, -inf  ;;  %5805 = vmatpush.msra.mxu2 %v4971_v52 }
 0x9e9   : > { %5492 = vmax.xlane.f32.xlu2 %v5491_v18 }
 0x9ea   : > { %5806 = vmatpush.msra.mxu2 %v4968_v21  ;;  %v15429_v37 = vpop.f32.mrf.mxu0 }
 0x9ec   : > { %5807 = vmatpush.msra.mxu2 %v4965_v32 }
 0x9ed   : > { %10664 = vmatmul.msk.f32.gmra.mxu0 %vm1415_vm0, %v15045_v40 }
 0x9ef   : > { %v15425_v20 = vpop.f32.mrf.mxu1 }
 0x9f0   : > { %v5494_v51 = vsel %vm2320_vm2, %v15425_v20, -inf }
 0x9f1   : > { %5495 = vmax.xlane.f32.xlu2 %v5494_v51 }
 0x9f2   : > { %v15439_v42 = vpop.f32.mrf.mxu0 }
 0x9f5   : > { %10665 = vmatmul.msk.f32.gmra.mxu0 %vm1415_vm0, %v15062_v24  ;;  %v15455_v24 = vpop.f32.mrf.mxu3 }
 0x9f7   : > { %v15433_v8 = vpop.f32.mrf.mxu1 }
 0x9f8   : > { %v5497_v15 = vsel %vm2320_vm2, %v15433_v8, -inf }
 0x9f9   : > { %5498 = vmax.xlane.f32.xlu2 %v5497_v15 }
 0x9fa   : > { %v4997_v40 = vpop.f32.mrf.mxu0 }
 0x9fd   : > { %10666 = vmatmul.msk.f32.gmra.mxu0 %vm1415_vm0, %v15076_v49  ;;  %v15463_v32 = vpop.f32.mrf.mxu3 }
 0x9ff   : > { %v15441_v23 = vpop.f32.mrf.mxu1 }
 0xa00   : > { %v5500_v29 = vsel %vm2320_vm2, %v15441_v23, -inf }
 0xa01   : > { %5501 = vmax.xlane.f32.xlu1 %v5500_v29 }
 0xa02   : > { %v5000_v38 = vpop.f32.mrf.mxu0 }
 0xa05   : > { %10667 = vmatmul.msk.f32.gmra.mxu0 %vm1415_vm0, %v15087_v31  ;;  %v5470_v31 = vsel %vm2320_vm2, %v15463_v32, -inf }
 0xa07   : > { %v15449_v27 = vpop.f32.mrf.mxu1 }
 0xa08   : > { %v5503_v44 = vsel %vm2320_vm2, %v15449_v27, -inf }
 0xa09   : > { %5504 = vmax.xlane.f32.xlu1 %v5503_v44 }
 0xa0a   : > { %v5003_v21 = vpop.f32.mrf.mxu0 }
 0xa0d   : > { %10668 = vmatmul.msk.f32.gmra.mxu0 %vm1415_vm0, %v15098_v28 }
 0xa0f   : > { %v15457_v18 = vpop.f32.mrf.mxu1 }
 0xa10   : > { %v5506_v52 = vsel %vm2320_vm2, %v15457_v18, -inf }
 0xa11   : > { %5507 = vmax.xlane.f32.xlu1 %v5506_v52 }
 0xa12   : > { %v5006_v28 = vpop.f32.mrf.mxu0 }
 0xa14   : > { %v5610_v49 = vpop.xlane.xlu2 %5609 }
 0xa15   : > { %11483 = vrcp.f32 %v5610_v49  ;;  %10669 = vmatmul.msk.f32.gmra.mxu0 %vm1415_vm0, %v15107_v46 }
 0xa19   : > { %5471 = vmax.xlane.f32.xlu1 %v5470_v31 }
 0xa1b   : > { %v11484_v51 = vpop.eup %11483 }
 0xa1c   : > { %v5736_v15 = vmul.f32 %v11484_v51, %v15301_v35  ;;  %v5442_v29 = vpop.xlane.xlu2 %5441  ;;  %v5613_v44 = vpop.xlane.xlu1 %5612 }
 0xa1d   : > { %v5520_v52 = vsub.f32 %v15303_v6, %v5442_v29  ;;  %11485 = vrcp.f32 %v5613_v44  ;;  %10670 = vmatmul.msk.f32.gmra.mxu0 %vm1415_vm0, %v15118_v30  ;;  %v5009_v51 = vpop.f32.mrf.mxu0  ;;  %v5007_v6 = vadd.f32 %v15396_v4, %v5006_v28  ;;  %v5004_v44 = vadd.f32 %v15396_v4, %v5003_v21 }
 0xa1e   : > { %10735 = vmatmul.msk.f32.vlgmr.msra.gmra.mxu2 %vm2320_vm2, %v5736_v15  ;;  %v5010_v15 = vadd.f32 %v15396_v4, %v5009_v51  ;;  %v4995_v21 = vadd.f32 %v15396_v4, %v15439_v42 }
 0xa1f   : > { %v5560_v0 = vmul.f32 1.442695, %v5520_v52 }
 0xa20   : > { %5865 = vmatpush.msrb.mxu3 %v5010_v15 }
 0xa21   : > { %11487 = vpow2.f32 %v5560_v0 }
 0xa22   : > { %5866 = vmatpush.msrb.mxu3 %v5007_v6 }
 0xa23   : > { %v11486_v49 = vpop.eup %11485 }
 0xa24   : > { %v5445_v31 = vpop.xlane.xlu1 %5444  ;;  %v5616_v45 = vpop.xlane.xlu0 %5615  ;;  %v5737_v46 = vmul.f32 %v11486_v49, %v15312_v33  ;;  %5867 = vmatpush.msrb.mxu3 %v5004_v44 }
 0xa25   : > { %v5521_v35 = vsub.f32 %v15314_v34, %v5445_v31  ;;  %11489 = vrcp.f32 %v5616_v45  ;;  %v5001_v45 = vadd.f32 %v15396_v4, %v5000_v38  ;;  %v4998_v34 = vadd.f32 %v15396_v4, %v4997_v40 }
 0xa26   : > { %10736 = vmatmul.msk.f32.gmra.mxu2 %vm2320_vm2, %v5737_v46  ;;  %v15488_v46 = vpop.f32.mrf.mxu0  ;;  %v4992_v40 = vadd.f32 %v15396_v4, %v15429_v37 }
 0xa27   : > { %v15479_v29 = vpop.eup %11487  ;;  %v5562_v0 = vmul.f32 1.442695, %v5521_v35  ;;  %5868 = vmatpush.msrb.mxu3 %v5001_v45 }
 0xa28   : > { %v5632_v30 = vsel %vm2320_vm2, %v15479_v29, 0.0 }
 0xa29   : > { %11491 = vpow2.f32 %v5562_v0  ;;  %5633 = vadd.xlane.f32.xlu0 %v5632_v30  ;;  %5869 = vmatpush.msrb.mxu3 %v4998_v34 }
 0xa2b   : > { %v11490_v33 = vpop.eup %11489  ;;  %5870 = vmatpush.msrb.mxu3 %v4995_v21  ;;  %v5467_v21 = vsel %vm2320_vm2, %v15455_v24, -inf }
 0xa2c   : > { %v5619_v52 = vpop.xlane.xlu2 %5618  ;;  %v5448_v28 = vpop.xlane.xlu0 %5447  ;;  %v5738_v49 = vmul.f32 %v11490_v33, %v15325_v54 }
 0xa2d   : > { %11493 = vrcp.f32 %v5619_v52  ;;  %v5522_v31 = vsub.f32 %v15327_v62, %v5448_v28  ;;  %v4989_v62 = vadd.f32 %v15396_v4, %v15415_v63  ;;  %5871 = vmatpush.msrb.mxu3 %v4992_v40  ;;  %v5464_v63 = vsel %vm2320_vm2, %v15445_v41, -inf }
 0xa2e   : > { %10737 = vmatmul.msk.f32.gmra.mxu2 %vm2320_vm2, %v5738_v49  ;;  %v15503_v37 = vpop.f32.mrf.mxu0 }
 0xa2f   : > { %v15493_v38 = vpop.eup %11491  ;;  %v5564_v35 = vmul.f32 1.442695, %v5522_v31  ;;  %5872 = vmatpush.msrb.mxu3 %v4989_v62 }
 0xa30   : > { %v5635_v54 = vsel %vm2320_vm2, %v15493_v38, 0.0 }
 0xa31   : > { %11495 = vpow2.f32 %v5564_v35  ;;  %5636 = vadd.xlane.f32.xlu0 %v5635_v54 }
 0xa33   : > { %v11494_v42 = vpop.eup %11493 }
 0xa34   : > { %v5451_v51 = vpop.xlane.xlu2 %5450  ;;  %v5622_v6 = vpop.xlane.xlu1 %5621  ;;  %v5739_v15 = vmul.f32 %v11494_v42, %v15338_v19 }
 0xa35   : > { %v5523_v0 = vsub.f32 %v15340_v25, %v5451_v51  ;;  %11497 = vrcp.f32 %v5622_v6 }
 0xa36   : > { %10738 = vmatmul.msk.f32.gmra.mxu2 %vm2320_vm2, %v5739_v15  ;;  %v15514_v28 = vpop.f32.mrf.mxu0 }
 0xa37   : > { %v15506_v30 = vpop.eup %11495  ;;  %v5566_v44 = vmul.f32 1.442695, %v5523_v0  ;;  %v15532_v0 = vpop.f32.mrf.mxu1 }
 0xa38   : > { %v5638_v45 = vsel %vm2320_vm2, %v15506_v30, 0.0 }
 0xa39   : > { %11499 = vpow2.f32 %v5566_v44  ;;  %5465 = vmax.xlane.f32.xlu0 %v5464_v63  ;;  %5639 = vadd.xlane.f32.xlu2 %v5638_v45  ;;  %v5509_v63 = vsel %vm2320_vm2, %v15532_v0, -inf }
 0xa3b   : > { %v11498_v19 = vpop.eup %11497 }
 0xa3c   : > { %v5454_v25 = vpop.xlane.xlu1 %5453  ;;  %v5625_v33 = vpop.xlane.xlu0 %5624  ;;  %v5740_v34 = vmul.f32 %v11498_v19, %v15351_v50 }
 0xa3d   : > { %v5524_v52 = vsub.f32 %v15353_v16, %v5454_v25  ;;  %11501 = vrcp.f32 %v5625_v33 }
 0xa3e   : > { %10739 = vmatmul.msk.f32.gmra.mxu2 %vm2320_vm2, %v5740_v34  ;;  %v15524_v54 = vpop.f32.mrf.mxu0 }
 0xa3f   : > { %v15517_v49 = vpop.eup %11499  ;;  %v5568_v31 = vmul.f32 1.442695, %v5524_v52 }
 0xa40   : > { %v5641_v35 = vsel %vm2320_vm2, %v15517_v49, 0.0 }
 0xa41   : > { %11503 = vpow2.f32 %v5568_v31  ;;  %5468 = vmax.xlane.f32.xlu0 %v5467_v21  ;;  %5642 = vadd.xlane.f32.xlu2 %v5641_v35 }
 0xa43   : > { %v11502_v50 = vpop.eup %11501 }
 0xa44   : > { %v5628_v40 = vpop.xlane.xlu0 %5627  ;;  %v5741_v16 = vmul.f32 %v11502_v50, %v15362_v57  ;;  %v15535_v57 = vpop.f32.mrf.mxu3 }
 0xa45   : > { %11505 = vrcp.f32 %v5628_v40  ;;  %v5457_v45 = vpop.xlane.xlu1 %5456  ;;  %v5473_v21 = vsel %vm2320_vm2, %v15535_v57, -inf }
 0xa46   : > { %10740 = vmatmul.msk.f32.gmra.mxu2 %vm2320_vm2, %v5741_v16  ;;  %v5024_v44 = vpop.f32.mrf.mxu0  ;;  %v5525_v31 = vsub.f32 %v15368_v11, %v5457_v45 }
 0xa47   : > { %v15527_v62 = vpop.eup %11503 }
 0xa48   : > { %v5644_v42 = vsel %vm2320_vm2, %v15527_v62, 0.0  ;;  %v5570_v40 = vmul.f32 1.442695, %v5525_v31 }
 0xa49   : > { %5645 = vadd.xlane.f32.xlu2 %v5644_v42 }
 0xa4b   : > { %v11506_v51 = vpop.eup %11505 }
 0xa4c   : > { %v5631_v6 = vpop.xlane.xlu0 %5630  ;;  %v5742_v15 = vmul.f32 %v11506_v51, %v15373_v59  ;;  %v15545_v35 = vpop.f32.mrf.mxu3 }
 0xa4d   : > { %11507 = vrcp.f32 %v5631_v6  ;;  %v5460_v50 = vpop.xlane.xlu1 %5459  ;;  %v5476_v11 = vsel %vm2320_vm2, %v15545_v35, -inf }
 0xa4e   : > { %10741 = vmatmul.msk.f32.gmra.mxu2 %vm2320_vm2, %v5742_v15  ;;  %v5027_v59 = vpop.f32.mrf.mxu0  ;;  %v5526_v6 = vsub.f32 %v15381_v43, %v5460_v50 }
 0xa50   : > { %v5572_v45 = vmul.f32 1.442695, %v5526_v6 }
 0xa51   : > { %5510 = vmax.xlane.f32.xlu2 %v5509_v63 }
 0xa53   : > { %v11508_v19 = vpop.eup %11507 }
 0xa54   : > { %v5490_v25 = vpop.xlane.xlu2 %5489  ;;  %v5743_v33 = vmul.f32 %v11508_v19, %v15383_v22  ;;  %v15555_v63 = vpop.f32.mrf.mxu3 }
 0xa55   : > { %v5536_v34 = vsub.f32 %v15398_v5, %v5490_v25  ;;  %v5463_v19 = vpop.xlane.xlu1 %5462  ;;  %v5479_v50 = vsel %vm2320_vm2, %v15555_v63, -inf }
 0xa56   : > { %10742 = vmatmul.msk.f32.gmra.mxu2 %vm2320_vm2, %v5743_v33  ;;  %v5030_v42 = vpop.f32.mrf.mxu0 }
 0xa57   : > { %v5592_v52 = vmul.f32 1.442695, %v5536_v34  ;;  %v5031_v43 = vadd.f32 %v15396_v4, %v5030_v42  ;;  %v5025_v42 = vadd.f32 %v15396_v4, %v5024_v44 }
 0xa59   : > { %5474 = vmax.xlane.f32.xlu2 %v5473_v21  ;;  %11509 = vpow2.f32 %v5592_v52 }
 0xa5a   : > { %11511 = vpow2.f32 %v5570_v40  ;;  %v5527_v40 = vsub.f32 %v15391_v48, %v5463_v19  ;;  %v5022_v48 = vadd.f32 %v15396_v4, %v15524_v54  ;;  %v5016_v19 = vadd.f32 %v15396_v4, %v15503_v37 }
 0xa5c   : > { %v5493_v16 = vpop.xlane.xlu2 %5492 }
 0xa5d   : > { %v5537_v22 = vsub.f32 %v15410_v17, %v5493_v16 }
 0xa5e   : > { %v5033_v33 = vpop.f32.mrf.mxu0 }
 0xa5f   : > { %v5594_v5 = vmul.f32 1.442695, %v5537_v22  ;;  %v15548_v51 = vpop.eup %11509  ;;  %v5034_v52 = vadd.f32 %v15396_v4, %v5033_v33 }
 0xa60   : > { %v5680_v15 = vsel %vm2320_vm2, %v15548_v51, 0.0  ;;  %v15558_v34 = vpop.eup %11511 }
 0xa61   : > { %11513 = vpow2.f32 %v5594_v5  ;;  %5477 = vmax.xlane.f32.xlu2 %v5476_v11  ;;  %5681 = vadd.xlane.f32.xlu0 %v5680_v15  ;;  %v5647_v22 = vsel %vm2320_vm2, %v15558_v34, 0.0  ;;  %v5574_v5 = vmul.f32 1.442695, %v5527_v40  ;;  %v15603_v40 = vpop.f32.mrf.mxu3 }
 0xa62   : > { %11515 = vpow2.f32 %v5572_v45  ;;  %5930 = vmatpush.msrb.mxu1 %v5034_v52  ;;  %v5019_v45 = vadd.f32 %v15396_v4, %v15514_v28  ;;  %v5013_v28 = vadd.f32 %v15396_v4, %v15488_v46 }
 0xa64   : > { %v5496_v17 = vpop.xlane.xlu2 %5495  ;;  %5931 = vmatpush.msrb.mxu1 %v5031_v43 }
 0xa65   : > { %v5538_v25 = vsub.f32 %v15425_v20, %v5496_v17  ;;  %v5028_v20 = vadd.f32 %v15396_v4, %v5027_v59 }
 0xa66   : > { %v15576_v59 = vpop.f32.mrf.mxu0 }
 0xa67   : > { %v15562_v31 = vpop.eup %11513  ;;  %v5596_v21 = vmul.f32 1.442695, %v5538_v25  ;;  %5932 = vmatpush.msrb.mxu1 %v5028_v20 }
 0xa68   : > { %v5683_v16 = vsel %vm2320_vm2, %v15562_v31, 0.0  ;;  %v15578_v15 = vpop.eup %11515 }
 0xa69   : > { %11517 = vpow2.f32 %v5596_v21  ;;  %5684 = vadd.xlane.f32.xlu1 %v5683_v16  ;;  %5480 = vmax.xlane.f32.xlu2 %v5479_v50 }
 0xa6a   : > { %5648 = vadd.xlane.f32.xlu0 %v5647_v22  ;;  %5933 = vmatpush.msrb.mxu1 %v5025_v42  ;;  %11519 = vpow2.f32 %v5574_v5 }
 0xa6c   : > { %v5499_v6 = vpop.xlane.xlu2 %5498  ;;  %5934 = vmatpush.msrb.mxu1 %v5022_v48  ;;  %v5482_v48 = vsel %vm2320_vm2, %v15603_v40, -inf }
 0xa6d   : > { %v5539_v11 = vsub.f32 %v15433_v8, %v5499_v6  ;;  %v5650_v8 = vsel %vm2320_vm2, %v15578_v15, 0.0 }
 0xa6e   : > { %5935 = vmatpush.msrb.mxu1 %v5019_v45  ;;  %v15593_v37 = vpop.f32.mrf.mxu0 }
 0xa6f   : > { %v15582_v17 = vpop.eup %11517  ;;  %v5598_v44 = vmul.f32 1.442695, %v5539_v11  ;;  %v15612_v11 = vpop.f32.mrf.mxu3 }
 0xa70   : > { %v5686_v54 = vsel %vm2320_vm2, %v15582_v17, 0.0  ;;  %5936 = vmatpush.msrb.mxu1 %v5016_v19  ;;  %v15595_v43 = vpop.eup %11519 }
 0xa71   : > { %11521 = vpow2.f32 %v5598_v44  ;;  %5687 = vadd.xlane.f32.xlu1 %v5686_v54  ;;  %v5653_v46 = vsel %vm2320_vm2, %v15595_v43, 0.0 }
 0xa72   : > { %5651 = vadd.xlane.f32.xlu0 %v5650_v8  ;;  %5937 = vmatpush.msrb.mxu1 %v5013_v28  ;;  %v5485_v8 = vsel %vm2320_vm2, %v15612_v11, -inf }
 0xa74   : > { %v5502_v25 = vpop.xlane.xlu1 %5501 }
 0xa75   : > { %v5540_v33 = vsub.f32 %v15441_v23, %v5502_v25 }
 0xa76   : > { %v5042_v20 = vpop.f32.mrf.mxu0 }
 0xa77   : > { %v15597_v52 = vpop.eup %11521  ;;  %v5600_v21 = vmul.f32 1.442695, %v5540_v33 }
 0xa78   : > { %v5689_v50 = vsel %vm2320_vm2, %v15597_v52, 0.0 }
 0xa79   : > { %11523 = vpow2.f32 %v5600_v21  ;;  %5690 = vadd.xlane.f32.xlu1 %v5689_v50 }
 0xa7a   : > { %5654 = vadd.xlane.f32.xlu0 %v5653_v46 }
 0xa7c   : > { %v5505_v23 = vpop.xlane.xlu1 %5504 }
 0xa7d   : > { %v5541_v16 = vsub.f32 %v15449_v27, %v5505_v23 }
 0xa7e   : > { %v5045_v44 = vpop.f32.mrf.mxu0 }
 0xa7f   : > { %v15606_v22 = vpop.eup %11523  ;;  %v5602_v42 = vmul.f32 1.442695, %v5541_v16 }
 0xa80   : > { %v5692_v5 = vsel %vm2320_vm2, %v15606_v22, 0.0 }
 0xa81   : > { %11525 = vpow2.f32 %v5602_v42  ;;  %5483 = vmax.xlane.f32.xlu1 %v5482_v48 }
 0xa82   : > { %5693 = vadd.xlane.f32.xlu0 %v5692_v5 }
 0xa84   : > { %v5508_v6 = vpop.xlane.xlu1 %5507 }
 0xa85   : > { %v5542_v45 = vsub.f32 %v15457_v18, %v5508_v6 }
 0xa86   : > { %v5048_v33 = vpop.f32.mrf.mxu0 }
 0xa87   : > { %v15615_v27 = vpop.eup %11525  ;;  %v5604_v19 = vmul.f32 1.442695, %v5542_v45 }
 0xa88   : > { %v5695_v54 = vsel %vm2320_vm2, %v15615_v27, 0.0 }
 0xa89   : > { %11527 = vpow2.f32 %v5604_v19  ;;  %5486 = vmax.xlane.f32.xlu1 %v5485_v8 }
 0xa8a   : > { %5696 = vadd.xlane.f32.xlu0 %v5695_v54 }
 0xa8c   : > { %v5472_v28 = vpop.xlane.xlu1 %5471 }
 0xa8d   : > { %v5530_v25 = vsub.f32 %v15463_v32, %v5472_v28  ;;  %v5049_v28 = vadd.f32 %v15396_v4, %v5048_v33  ;;  %v5040_v33 = vadd.f32 %v15396_v4, %v15593_v37 }
 0xa8e   : > { %v5051_v46 = vpop.f32.mrf.mxu0 }
 0xa8f   : > { %v15622_v21 = vpop.eup %11527  ;;  %v5580_v18 = vmul.f32 1.442695, %v5530_v25  ;;  %v5052_v8 = vadd.f32 %v15396_v4, %v5051_v46 }
 0xa90   : > { %v5698_v50 = vsel %vm2320_vm2, %v15622_v21, 0.0 }
 0xa91   : > { %11529 = vpow2.f32 %v5580_v18  ;;  %v5046_v18 = vadd.f32 %v15396_v4, %v5045_v44  ;;  %v5037_v44 = vadd.f32 %v15396_v4, %v15576_v59 }
 0xa92   : > { %5699 = vadd.xlane.f32.xlu0 %v5698_v50 }
 0xa96   : > { %v5054_v5 = vpop.f32.mrf.mxu0 }
 0xa97   : > { %v15626_v23 = vpop.eup %11529  ;;  %v5055_v19 = vadd.f32 %v15396_v4, %v5054_v5  ;;  %v5043_v5 = vadd.f32 %v15396_v4, %v5042_v20 }
 0xa98   : > { %v5662_v16 = vsel %vm2320_vm2, %v15626_v23, 0.0 }
 0xa99   : > { %5663 = vadd.xlane.f32.xlu1 %v5662_v16 }
 0xa9c   : > { %v5634_v42 = vpop.xlane.xlu0 %5633 }
 0xa9d   : > { %11531 = vrcp.f32 %v5634_v42 }
 0xa9e   : > { %v5057_v45 = vpop.f32.mrf.mxu0 }
 0xa9f   : > { %v5058_v54 = vadd.f32 %v15396_v4, %v5057_v45 }
 0xaa1   : > { %5995 = vmatpush.msrb.mxu2 %v5058_v54 }
 0xaa3   : > { %v11532_v32 = vpop.eup %11531  ;;  %5996 = vmatpush.msrb.mxu2 %v5055_v19 }
 0xaa4   : > { %v5744_v48 = vmul.f32 %v11532_v32, %v15479_v29  ;;  %v5637_v6 = vpop.xlane.xlu0 %5636 }
 0xaa5   : > { %11533 = vrcp.f32 %v5637_v6  ;;  %5997 = vmatpush.msrb.mxu2 %v5052_v8 }
 0xaa6   : > { %10743 = vmatmul.msk.f32.vlgmr.msrb.gmra.mxu3 %vm2320_vm2, %v5744_v48 }
 0xaa7   : > { %5998 = vmatpush.msrb.mxu2 %v5049_v28 }
 0xaa9   : > { %5999 = vmatpush.msrb.mxu2 %v5046_v18 }
 0xaab   : > { %v11534_v25 = vpop.eup %11533  ;;  %6000 = vmatpush.msrb.mxu2 %v5043_v5 }
 0xaac   : > { %v5466_v50 = vpop.xlane.xlu0 %5465  ;;  %v5640_v29 = vpop.xlane.xlu2 %5639  ;;  %v5745_v16 = vmul.f32 %v11534_v25, %v15493_v38 }
 0xaad   : > { %v5528_v42 = vsub.f32 %v15445_v41, %v5466_v50  ;;  %11535 = vrcp.f32 %v5640_v29  ;;  %6001 = vmatpush.msrb.mxu2 %v5040_v33 }
 0xaae   : > { %10744 = vmatmul.msk.f32.gmra.mxu3 %vm2320_vm2, %v5745_v16 }
 0xaaf   : > { %v5576_v46 = vmul.f32 1.442695, %v5528_v42  ;;  %6002 = vmatpush.msrb.mxu2 %v5037_v44 }
 0xab1   : > { %11537 = vpow2.f32 %v5576_v46 }
 0xab3   : > { %v11536_v38 = vpop.eup %11535 }
 0xab4   : > { %v5469_v32 = vpop.xlane.xlu0 %5468  ;;  %v5643_v48 = vpop.xlane.xlu2 %5642  ;;  %v5746_v41 = vmul.f32 %v11536_v38, %v15506_v30 }
 0xab5   : > { %v5529_v20 = vsub.f32 %v15455_v24, %v5469_v32  ;;  %11539 = vrcp.f32 %v5643_v48 }
 0xab6   : > { %10745 = vmatmul.msk.f32.gmra.mxu3 %vm2320_vm2, %v5746_v41 }
 0xab7   : > { %v15648_v6 = vpop.eup %11537  ;;  %v5578_v37 = vmul.f32 1.442695, %v5529_v20 }
 0xab8   : > { %v5656_v45 = vsel %vm2320_vm2, %v15648_v6, 0.0 }
 0xab9   : > { %11541 = vpow2.f32 %v5578_v37  ;;  %5657 = vadd.xlane.f32.xlu2 %v5656_v45 }
 0xabb   : > { %v11540_v4 = vpop.eup %11539 }
 0xabc   : > { %v5646_v59 = vpop.xlane.xlu2 %5645  ;;  %v5747_v19 = vmul.f32 %v11540_v4, %v15517_v49 }
 0xabd   : > { %11543 = vrcp.f32 %v5646_v59 }
 0xabe   : > { %10746 = vmatmul.msk.f32.gmra.mxu3 %vm2320_vm2, %v5747_v19 }
 0xabf   : > { %v15654_v24 = vpop.eup %11541 }
 0xac0   : > { %v5659_v30 = vsel %vm2320_vm2, %v15654_v24, 0.0 }
 0xac1   : > { %5660 = vadd.xlane.f32.xlu2 %v5659_v30 }
 0xac3   : > { %v11544_v54 = vpop.eup %11543 }
 0xac4   : > { %v5511_v8 = vpop.xlane.xlu2 %5510  ;;  %v5748_v28 = vmul.f32 %v11544_v54, %v15527_v62 }
 0xac5   : > { %v5543_v25 = vsub.f32 %v15532_v0, %v5511_v8 }
 0xac6   : > { %10747 = vmatmul.msk.f32.gmra.mxu3 %vm2320_vm2, %v5748_v28 }
 0xac7   : > { %v5606_v18 = vmul.f32 1.442695, %v5543_v25 }
 0xac9   : > { %11545 = vpow2.f32 %v5606_v18 }
 0xacc   : > { %v5475_v49 = vpop.xlane.xlu2 %5474 }
 0xacd   : > { %v5531_v50 = vsub.f32 %v15535_v57, %v5475_v49 }
 0xacf   : > { %v15662_v29 = vpop.eup %11545  ;;  %v5582_v16 = vmul.f32 1.442695, %v5531_v50 }
 0xad0   : > { %v5701_v42 = vsel %vm2320_vm2, %v15662_v29, 0.0 }
 0xad1   : > { %11547 = vpow2.f32 %v5582_v16  ;;  %5702 = vadd.xlane.f32.xlu2 %v5701_v42  ;;  %v5809_v16 = vpop.f32.mrf.mxu2 }
 0xad4   : > { %v5478_v5 = vpop.xlane.xlu2 %5477  ;;  %v5682_v46 = vpop.xlane.xlu0 %5681 }
 0xad5   : > { %v5532_v62 = vsub.f32 %v15545_v35, %v5478_v5  ;;  %11549 = vrcp.f32 %v5682_v46  ;;  %v10767_v35 = vld [vmem:[%s18980_s10 + $0x10] sm:$0xff] }
 0xad6   : > { %6141 = vmatpush.msra.mxu3 %v10767_v35 }
 0xad7   : > { %v15667_v0 = vpop.eup %11547  ;;  %v5584_v33 = vmul.f32 1.442695, %v5532_v62 }
 0xad8   : > { %v5665_v44 = vsel %vm2320_vm2, %v15667_v0, 0.0 }
 0xad9   : > { %11551 = vpow2.f32 %v5584_v33  ;;  %5666 = vadd.xlane.f32.xlu0 %v5665_v44 }
 0xadb   : > { %v11550_v57 = vpop.eup %11549 }
 0xadc   : > { %v5685_v38 = vpop.xlane.xlu1 %5684  ;;  %v5481_v32 = vpop.xlane.xlu2 %5480  ;;  %v5760_v48 = vmul.f32 %v11550_v57, %v15548_v51 }
 0xadd   : > { %v5649_v41 = vpop.xlane.xlu0 %5648  ;;  %11553 = vrcp.f32 %v5685_v38  ;;  %v5533_v20 = vsub.f32 %v15555_v63, %v5481_v32 }
 0xade   : > { %11555 = vrcp.f32 %v5649_v41  ;;  %10759 = vmatmul.msk.f32.vlgmr.msrb.gmra.mxu2 %vm2320_vm2, %v5760_v48 }
 0xadf   : > { %v15676_v37 = vpop.eup %11551  ;;  %v5586_v45 = vmul.f32 1.442695, %v5533_v20 }
 0xae0   : > { %v5668_v4 = vsel %vm2320_vm2, %v15676_v37, 0.0 }
 0xae1   : > { %11557 = vpow2.f32 %v5586_v45  ;;  %5669 = vadd.xlane.f32.xlu1 %v5668_v4 }
 0xae3   : > { %v11554_v51 = vpop.eup %11553 }
 0xae4   : > { %v11556_v59 = vpop.eup %11555  ;;  %v5688_v19 = vpop.xlane.xlu1 %5687  ;;  %v5761_v63 = vmul.f32 %v11554_v51, %v15562_v31 }
 0xae5   : > { %v5652_v30 = vpop.xlane.xlu0 %5651  ;;  %11559 = vrcp.f32 %v5688_v19  ;;  %v5749_v54 = vmul.f32 %v11556_v59, %v15558_v34 }
 0xae6   : > { %11561 = vrcp.f32 %v5652_v30  ;;  %10760 = vmatmul.msk.f32.gmra.mxu2 %vm2320_vm2, %v5761_v63 }
 0xae7   : > { %v15683_v8 = vpop.eup %11557  ;;  %10748 = vmatmul.msk.f32.gmra.mxu3 %vm2320_vm2, %v5749_v54 }
 0xae8   : > { %v5671_v28 = vsel %vm2320_vm2, %v15683_v8, 0.0 }
 0xae9   : > { %5672 = vadd.xlane.f32.xlu2 %v5671_v28 }
 0xaeb   : > { %v11560_v25 = vpop.eup %11559 }
 0xaec   : > { %v11562_v18 = vpop.eup %11561  ;;  %v5691_v49 = vpop.xlane.xlu1 %5690  ;;  %v5762_v31 = vmul.f32 %v11560_v25, %v15582_v17  ;;  %v10839_v25 = vld [vmem:[%s18976_s6 + $0x70] sm:$0xff] }
 0xaed   : > { %v5655_v50 = vpop.xlane.xlu0 %5654  ;;  %11563 = vrcp.f32 %v5691_v49  ;;  %v5750_v34 = vmul.f32 %v11562_v18, %v15578_v15  ;;  %v5812_v15 = vpop.f32.mrf.mxu2  ;;  %v10838_v18 = vld [vmem:[%s18976_s6 + $0x68] sm:$0xff] }
 0xaee   : > { %11565 = vrcp.f32 %v5655_v50  ;;  %10761 = vmatmul.msk.f32.gmra.mxu2 %vm2320_vm2, %v5762_v31 }
 0xaef   : > { %10749 = vmatmul.msk.f32.gmra.mxu3 %vm2320_vm2, %v5750_v34  ;;  %v10837_v34 = vld [vmem:[%s18976_s6 + $0x60] sm:$0xff] }
 0xaf3   : > { %v11564_v42 = vpop.eup %11563 }
 0xaf4   : > { %v11566_v5 = vpop.eup %11565  ;;  %v5484_v46 = vpop.xlane.xlu1 %5483  ;;  %v5763_v62 = vmul.f32 %v11564_v42, %v15597_v52 }
 0xaf5   : > { %v5694_v33 = vpop.xlane.xlu0 %5693  ;;  %v5534_v44 = vsub.f32 %v15603_v40, %v5484_v46  ;;  %v5751_v17 = vmul.f32 %v11566_v5, %v15595_v43  ;;  %v5815_v45 = vpop.f32.mrf.mxu2 }
 0xaf6   : > { %11567 = vrcp.f32 %v5694_v33  ;;  %10762 = vmatmul.msk.f32.gmra.mxu2 %vm2320_vm2, %v5763_v62 }
 0xaf7   : > { %v5588_v57 = vmul.f32 1.442695, %v5534_v44  ;;  %10750 = vmatmul.msk.f32.gmra.mxu3 %vm2320_vm2, %v5751_v17 }
 0xaf9   : > { %11569 = vpow2.f32 %v5588_v57 }
 0xafc   : > { %v11568_v38 = vpop.eup %11567  ;;  %v5487_v32 = vpop.xlane.xlu1 %5486 }
 0xafd   : > { %v5697_v48 = vpop.xlane.xlu0 %5696  ;;  %v5535_v41 = vsub.f32 %v15612_v11, %v5487_v32  ;;  %v5764_v52 = vmul.f32 %v11568_v38, %v15606_v22  ;;  %v5818_v63 = vpop.f32.mrf.mxu2 }
 0xafe   : > { %11571 = vrcp.f32 %v5697_v48 }
 0xaff   : > { %v15700_v20 = vpop.eup %11569  ;;  %v5590_v40 = vmul.f32 1.442695, %v5535_v41  ;;  %10763 = vmatmul.msk.f32.gmra.mxu2 %vm2320_vm2, %v5764_v52  ;;  %10768 = vmatmul.msk.f32.vlgmr.msra.gmra.mxu3 %vm1963_vm1, %v5809_v16 }
 0xb00   : > { %v5674_v43 = vsel %vm2320_vm2, %v15700_v20, 0.0 }
 0xb01   : > { %11573 = vpow2.f32 %v5590_v40  ;;  %5675 = vadd.xlane.f32.xlu0 %v5674_v43 }
 0xb04   : > { %v11572_v35 = vpop.eup %11571 }
 0xb05   : > { %v5700_v4 = vpop.xlane.xlu0 %5699  ;;  %v5765_v11 = vmul.f32 %v11572_v35, %v15615_v27  ;;  %v5821_v27 = vpop.f32.mrf.mxu2 }
 0xb06   : > { %11575 = vrcp.f32 %v5700_v4  ;;  %v10800_v4 = vld [vmem:[%s19058_s23 + $0x60] sm:$0xff] }
 0xb07   : > { %v15707_v22 = vpop.eup %11573  ;;  %10764 = vmatmul.msk.f32.gmra.mxu2 %vm2320_vm2, %v5765_v11  ;;  %10769 = vmatmul.msk.f32.gmra.mxu3 %vm1963_vm1, %v5812_v15 }
 0xb08   : > { %v5677_v51 = vsel %vm2320_vm2, %v15707_v22, 0.0 }
 0xb09   : > { %5678 = vadd.xlane.f32.xlu1 %v5677_v51 }
 0xb0c   : > { %v11576_v59 = vpop.eup %11575  ;;  %v5664_v5 = vpop.xlane.xlu1 %5663 }
 0xb0d   : > { %v5766_v19 = vmul.f32 %v11576_v59, %v15622_v21  ;;  %v5824_v30 = vpop.f32.mrf.mxu2  ;;  %v10840_v21 = vld [vmem:[%s18976_s6 + $0x78] sm:$0xff] }
 0xb0e   : > { %6416 = vmatpush.msra.mxu2 %v10840_v21  ;;  %v19239_v21 = vld [vmem:[#allocation8_spill] sm:$0xff] }
 0xb0f   : > { %10765 = vmatmul.msk.f32.gmra.mxu2 %vm2320_vm2, %v5766_v19  ;;  %10770 = vmatmul.msk.f32.gmra.mxu3 %vm1963_vm1, %v5815_v45  ;;  %v10803_v45 = vld [vmem:[%s19058_s23 + $0x78] sm:$0xff] }
 0xb10   : > { %6417 = vmatpush.msra.mxu2 %v10839_v25  ;;  %6293 = vmatpush.msra.mxu1 %v10803_v45  ;;  %v15826_v25 = vld [vmem:[%s12222_s0 + $0x20] sm:$0xff] }
 0xb12   : > { %6418 = vmatpush.msra.mxu2 %v10838_v18 }
 0xb14   : > { %6419 = vmatpush.msra.mxu2 %v10837_v34  ;;  %v15838_v34 = vld [vmem:[%s12222_s0 + $0x28] sm:$0xff] }
 0xb15   : > { %v5827_v54 = vpop.f32.mrf.mxu2 }
 0xb17   : > { %10771 = vmatmul.msk.f32.gmra.mxu3 %vm1963_vm1, %v5818_v63 }
 0xb1d   : > { %v5830_v16 = vpop.f32.mrf.mxu2 }
 0xb1f   : > { %10772 = vmatmul.msk.f32.gmra.mxu3 %vm1963_vm1, %v5821_v27 }
 0xb27   : > { %10773 = vmatmul.msk.f32.gmra.mxu3 %vm1963_vm1, %v5824_v30  ;;  %v19238_v30 = vld [vmem:[#allocation6_spill] sm:$0xff] }
 0xb29   : > { %v5874_v42 = vpop.f32.mrf.mxu3 }
 0xb2c   : > { %v5658_v28 = vpop.xlane.xlu2 %5657 }
 0xb2d   : > { %11577 = vrcp.f32 %v5658_v28 }
 0xb2f   : > { %10774 = vmatmul.msk.f32.gmra.mxu3 %vm1963_vm1, %v5827_v54 }
 0xb33   : > { %v11578_v49 = vpop.eup %11577 }
 0xb34   : > { %v5752_v31 = vmul.f32 %v11578_v49, %v15648_v6  ;;  %v5661_v50 = vpop.xlane.xlu2 %5660  ;;  %v5877_v6 = vpop.f32.mrf.mxu3 }
 0xb35   : > { %11579 = vrcp.f32 %v5661_v50  ;;  %v19240_v50 = vld [vmem:[#allocation10_spill] sm:$0xff] }
 0xb36   : > { %10751 = vmatmul.msk.f32.vlgmr.msrb.gmra.mxu1 %vm2320_vm2, %v5752_v31  ;;  %11581 = vrcp.f32 %v5664_v5  ;;  %v15846_v5 = vld [vmem:[%s12222_s0 + $0x30] sm:$0xff] }
 0xb37   : > { %10775 = vmatmul.msk.f32.gmra.mxu3 %vm1963_vm1, %v5830_v16 }
 0xb3b   : > { %v11580_v46 = vpop.eup %11579 }
 0xb3c   : > { %v5753_v62 = vmul.f32 %v11580_v46, %v15654_v24  ;;  %v11582_v33 = vpop.eup %11581  ;;  %v5880_v57 = vpop.f32.mrf.mxu3 }
 0xb3d   : > { %v5754_v17 = vmul.f32 %v11582_v33, %v15626_v23  ;;  %v19242_v33 = vld [vmem:[#allocation14_spill] sm:$0xff] }
 0xb3e   : > { %10752 = vmatmul.msk.f32.gmra.mxu1 %vm2320_vm2, %v5753_v62 }
 0xb3f   : > { %10776 = vmatmul.msk.f32.gmra.mxu3 %vm1963_vm1, %v5874_v42  ;;  %v19241_v42 = vld [vmem:[#allocation11_spill] sm:$0xff] }
 0xb44   : > { %v5703_v44 = vpop.xlane.xlu2 %5702  ;;  %v5883_v48 = vpop.f32.mrf.mxu3 }
 0xb45   : > { %11583 = vrcp.f32 %v5703_v44  ;;  %v15858_v44 = vld [vmem:[%s12222_s0 + $0x38] sm:$0xff] }
 0xb46   : > { %10753 = vmatmul.msk.f32.gmra.mxu1 %vm2320_vm2, %v5754_v17 }
 0xb47   : > { %10777 = vmatmul.msk.f32.gmra.mxu3 %vm1963_vm1, %v5877_v6 }
 0xb4b   : > { %v11584_v15 = vpop.eup %11583 }
 0xb4c   : > { %v5667_v38 = vpop.xlane.xlu0 %5666  ;;  %v5767_v32 = vmul.f32 %v11584_v15, %v15662_v29  ;;  %v5886_v43 = vpop.f32.mrf.mxu3  ;;  %v19243_v15 = vld [vmem:[#allocation16_spill] sm:$0xff] }
 0xb4d   : > { %11585 = vrcp.f32 %v5667_v38  ;;  %v15869_v38 = vld [vmem:[%s12222_s0 + $0x40] sm:$0xff] }
 0xb4e   : > { %10766 = vmatmul.msk.f32.gmra.mxu2 %vm2320_vm2, %v5767_v32 }
 0xb4f   : > { %10778 = vmatmul.msk.f32.gmra.mxu3 %vm1963_vm1, %v5880_v57 }
 0xb53   : > { %v11586_v24 = vpop.eup %11585 }
 0xb54   : > { %v5670_v41 = vpop.xlane.xlu1 %5669  ;;  %v5755_v23 = vmul.f32 %v11586_v24, %v15667_v0 }
 0xb55   : > { %11587 = vrcp.f32 %v5670_v41  ;;  %v19244_v41 = vld [vmem:[#allocation20_spill] sm:$0xff] }
 0xb56   : > { %10754 = vmatmul.msk.f32.gmra.mxu1 %vm2320_vm2, %v5755_v23  ;;  %10842 = vmatmul.msk.f32.vlgmr.msra.gmra.mxu2 %vm1415_vm0, %v12237_v55  ;;  %v15881_v23 = vld [vmem:[%s12222_s0 + $0x48] sm:$0xff] }
 0xb57   : > { %10779 = vmatmul.msk.f32.gmra.mxu3 %vm1963_vm1, %v5883_v48 }
 0xb5b   : > { %v11588_v52 = vpop.eup %11587 }
 0xb5c   : > { %v5673_v29 = vpop.xlane.xlu2 %5672  ;;  %v5756_v40 = vmul.f32 %v11588_v52, %v15676_v37 }
 0xb5d   : > { %11589 = vrcp.f32 %v5673_v29 }
 0xb5e   : > { %10755 = vmatmul.msk.f32.gmra.mxu1 %vm2320_vm2, %v5756_v40  ;;  %10843 = vmatmul.msk.f32.gmra.mxu2 %vm1415_vm0, %v12267_v9 }
 0xb5f   : > { %10780 = vmatmul.msk.f32.gmra.mxu3 %vm1963_vm1, %v5886_v43  ;;  %v19245_v43 = vld [vmem:[#allocation21_spill] sm:$0xff] }
 0xb61   : > { %v15785_v63 = vpop.f32.mrf.mxu2 }
 0xb63   : > { %v11590_v0 = vpop.eup %11589 }
 0xb64   : > { %v5757_v35 = vmul.f32 %v11590_v0, %v15683_v8  ;;  %v15893_v0 = vld [vmem:[%s12222_s0 + $0x50] sm:$0xff] }
 0xb66   : > { %10756 = vmatmul.msk.f32.gmra.mxu1 %vm2320_vm2, %v5757_v35  ;;  %10844 = vmatmul.msk.f32.gmra.mxu2 %vm1415_vm0, %v12298_v26  ;;  %v10802_v26 = vld [vmem:[%s19058_s23 + $0x70] sm:$0xff] }
 0xb67   : > { %6294 = vmatpush.msra.mxu1 %v10802_v26 }
 0xb6a   : > { %v5889_v55 = vpop.f32.mrf.mxu3 }
 0xb6b   : > { %10781 = vmatmul.msk.f32.gmra.mxu3 %vm1963_vm1, %v5889_v55 }
 0xb6e   : > { %10845 = vmatmul.msk.f32.gmra.mxu2 %vm1415_vm0, %v12319_v36  ;;  %v10801_v36 = vld [vmem:[%s19058_s23 + $0x68] sm:$0xff] }
 0xb6f   : > { %6295 = vmatpush.msra.mxu1 %v10801_v36  ;;  %v19247_v36 = vld [vmem:[#allocation23_spill] sm:$0xff] }
 0xb71   : > { %6296 = vmatpush.msra.mxu1 %v10800_v4 }
 0xb72   : > { %v5892_v37 = vpop.f32.mrf.mxu3 }
 0xb73   : > { %10782 = vmatmul.msk.f32.gmra.mxu3 %vm1963_vm1, %v5892_v37  ;;  %v19246_v37 = vld [vmem:[#allocation22_spill] sm:$0xff] }
 0xb74   : > { %v5676_v9 = vpop.xlane.xlu0 %5675 }
 0xb75   : > { %11591 = vrcp.f32 %v5676_v9  ;;  %v15903_v9 = vld [vmem:[%s12222_s0 + $0x58] sm:$0xff] }
 0xb76   : > { %10846 = vmatmul.msk.f32.gmra.mxu2 %vm1415_vm0, %v12354_v60 }
 0xb7a   : > { %v5895_v8 = vpop.f32.mrf.mxu3 }
 0xb7b   : > { %v11592_v11 = vpop.eup %11591  ;;  %10783 = vmatmul.msk.f32.gmra.mxu3 %vm1963_vm1, %v5895_v8  ;;  %v15912_v8 = vld [vmem:[%s12222_s0 + $0x60] sm:$0xff] }
 0xb7c   : > { %v5679_v60 = vpop.xlane.xlu1 %5678  ;;  %v5758_v51 = vmul.f32 %v11592_v11, %v15700_v20  ;;  %v15790_v20 = vld [vmem:[%s12222_s0] sm:$0xff] }
 0xb7d   : > { %11593 = vrcp.f32 %v5679_v60  ;;  %v19248_v60 = vld [vmem:[#allocation24_spill] sm:$0xff] }
 0xb7e   : > { %10757 = vmatmul.msk.f32.gmra.mxu1 %vm2320_vm2, %v5758_v51  ;;  %10847 = vmatmul.msk.f32.gmra.mxu2 %vm1415_vm0, %v12381_v14  ;;  %v15797_v14 = vld [vmem:[%s12222_s0 + $0x8] sm:$0xff] }
 0xb7f   : > { %v15921_v51 = vld [vmem:[%s12222_s0 + $0x68] sm:$0xff] }
 0xb82   : > { %v15821_v28 = vpop.f32.mrf.mxu3 }
 0xb83   : > { %v11594_v59 = vpop.eup %11593 }
 0xb84   : > { %v5759_v19 = vmul.f32 %v11594_v59, %v15707_v22  ;;  %v19237_v22 = vld [vmem:[#allocation5_spill] sm:$0xff] }
 0xb86   : > { %10758 = vmatmul.msk.f32.gmra.mxu1 %vm2320_vm2, %v5759_v19  ;;  %10848 = vmatmul.msk.f32.gmra.mxu2 %vm1415_vm0, %v19124_v58  ;;  %v15801_v58 = vpop.f32.mrf.mxu2 }
 0xb8a   : > { %v15833_v31 = vpop.f32.mrf.mxu3 }
 0xb8e   : > { %10849 = vmatmul.msk.f32.gmra.mxu2 %vm1415_vm0, %v19126_v53  ;;  %10805 = vmatmul.msk.f32.vlgmr.msra.gmra.mxu1 %vm1415_vm0, %v15790_v20  ;;  %v15806_v53 = vld [vmem:[%s12222_s0 + $0x10] sm:$0xff]  ;;  %v15810_v27 = vpop.f32.mrf.mxu2 }
 0xb92   : > { %v15852_v62 = vpop.f32.mrf.mxu3 }
 0xb96   : > { %10850 = vmatmul.msk.f32.gmra.mxu2 %vm1415_vm0, %v19128_v39  ;;  %10806 = vmatmul.msk.f32.gmra.mxu1 %vm1415_vm0, %v15797_v14  ;;  %v15815_v39 = vld [vmem:[%s12222_s0 + $0x18] sm:$0xff]  ;;  %v15819_v54 = vpop.f32.mrf.mxu2 }
 0xb9a   : > { %v15864_v57 = vpop.f32.mrf.mxu3 }
 0xb9e   : > { %10851 = vmatmul.msk.f32.gmra.mxu2 %vm1415_vm0, %v19237_v22  ;;  %10807 = vmatmul.msk.f32.gmra.mxu1 %vm1415_vm0, %v15806_v53  ;;  %v15831_v49 = vpop.f32.mrf.mxu2 }
 0xba2   : > { %v15875_v24 = vpop.f32.mrf.mxu3 }
 0xba6   : > { %10852 = vmatmul.msk.f32.gmra.mxu2 %vm1415_vm0, %v19238_v30  ;;  %10808 = vmatmul.msk.f32.gmra.mxu1 %vm1415_vm0, %v15815_v39  ;;  %v15850_v46 = vpop.f32.mrf.mxu2  ;;  %v19250_v30 = vld [vmem:[#allocation25_spill] sm:$0xff] }
 0xbaa   : > { %v15888_v40 = vpop.f32.mrf.mxu3 }
 0xbae   : > { %10853 = vmatmul.msk.f32.gmra.mxu2 %vm1415_vm0, %v19239_v21  ;;  %10809 = vmatmul.msk.f32.gmra.mxu1 %vm1415_vm0, %v15826_v25  ;;  %v15862_v17 = vpop.f32.mrf.mxu2  ;;  %v15931_v21 = vld [vmem:[%s12222_s0 + $0x70] sm:$0xff] }
 0xbb2   : > { %v15907_v45 = vpop.f32.mrf.mxu3 }
 0xbb3   : > { %v5939_v18 = vpop.f32.mrf.mxu1 }
 0xbb4   : > { %10784 = vmatmul.msk.f32.gmra.mxu3 %vm1963_vm1, %v5939_v18 }
 0xbb6   : > { %10854 = vmatmul.msk.f32.gmra.mxu2 %vm1415_vm0, %v19240_v50  ;;  %10810 = vmatmul.msk.f32.gmra.mxu1 %vm1415_vm0, %v15838_v34 }
 0xbba   : > { %v15916_v4 = vpop.f32.mrf.mxu3 }
 0xbbb   : > { %v5942_v16 = vpop.f32.mrf.mxu1 }
 0xbbc   : > { %10785 = vmatmul.msk.f32.gmra.mxu3 %vm1963_vm1, %v5942_v16 }
 0xbbe   : > { %10855 = vmatmul.msk.f32.gmra.mxu2 %vm1415_vm0, %v19241_v42  ;;  %10811 = vmatmul.msk.f32.gmra.mxu1 %vm1415_vm0, %v15846_v5  ;;  %v19252_v42 = vld [vmem:[#allocation26_spill] sm:$0xff] }
 0xbc2   : > { %v15925_v19 = vpop.f32.mrf.mxu3 }
 0xbc3   : > { %v5945_v6 = vpop.f32.mrf.mxu1  ;;  %19249 = vst [vmem:[#allocation5_spill] sm:$0xff] %v15925_v19 }
 0xbc4   : > { %10786 = vmatmul.msk.f32.gmra.mxu3 %vm1963_vm1, %v5945_v6  ;;  %v15941_v6 = vld [vmem:[%s12222_s0 + $0x78] sm:$0xff] }
 0xbc6   : > { %10856 = vmatmul.msk.f32.gmra.mxu2 %vm1415_vm0, %v19242_v33  ;;  %10812 = vmatmul.msk.f32.gmra.mxu1 %vm1415_vm0, %v15858_v44 }
 0xbca   : > { %v15936_v16 = vpop.f32.mrf.mxu3 }
 0xbcb   : > { %19251 = vst [vmem:[#allocation6_spill] sm:$0xff] %v15936_v16 }
 0xbce   : > { %10857 = vmatmul.msk.f32.gmra.mxu2 %vm1415_vm0, %v19243_v15  ;;  %10813 = vmatmul.msk.f32.gmra.mxu1 %vm1415_vm0, %v15869_v38 }
 0xbd1   : > { %v15873_v32 = vpop.f32.mrf.mxu2 }
 0xbd3   : > { %v5948_v48 = vpop.f32.mrf.mxu1 }
 0xbd4   : > { %10787 = vmatmul.msk.f32.gmra.mxu3 %vm1963_vm1, %v5948_v48  ;;  %v19253_v48 = vld [vmem:[#allocation27_spill] sm:$0xff] }
 0xbd6   : > { %10858 = vmatmul.msk.f32.gmra.mxu2 %vm1415_vm0, %v19244_v41  ;;  %10814 = vmatmul.msk.f32.gmra.mxu1 %vm1415_vm0, %v15881_v23  ;;  %v15952_v41 = vld [vmem:[%s12222_s0 + $0x80] sm:$0xff] }
 0xbd9   : > { %v15885_v52 = vpop.f32.mrf.mxu2 }
 0xbdb   : > { %v5951_v29 = vpop.f32.mrf.mxu1 }
 0xbdc   : > { %10788 = vmatmul.msk.f32.gmra.mxu3 %vm1963_vm1, %v5951_v29  ;;  %v15956_v29 = vpop.f32.mrf.mxu3 }
 0xbdd   : > { %19254 = vst [vmem:[#allocation8_spill] sm:$0xff] %v15956_v29 }
 0xbde   : > { %10859 = vmatmul.msk.f32.gmra.mxu2 %vm1415_vm0, %v19245_v43  ;;  %10815 = vmatmul.msk.f32.gmra.mxu1 %vm1415_vm0, %v15893_v0  ;;  %v15961_v43 = vld [vmem:[%s18977_s7 + $0x3] ss:$0 sm:$0xff] }
 0xbe1   : > { %v15897_v35 = vpop.f32.mrf.mxu2 }
 0xbe3   : > { %v5954_v55 = vpop.f32.mrf.mxu1 }
 0xbe4   : > { %10789 = vmatmul.msk.f32.gmra.mxu3 %vm1963_vm1, %v5954_v55 }
 0xbe6   : > { %10860 = vmatmul.msk.f32.gmra.mxu2 %vm1415_vm0, %v19246_v37  ;;  %10816 = vmatmul.msk.f32.gmra.mxu1 %vm1415_vm0, %v15903_v9 }
 0xbe9   : > { %v6427_v26 = vpop.f32.mrf.mxu2 }
 0xbee   : > { %10861 = vmatmul.msk.f32.gmra.mxu2 %vm1415_vm0, %v19247_v36  ;;  %10817 = vmatmul.msk.f32.gmra.mxu1 %vm1415_vm0, %v15912_v8  ;;  %v19255_v36 = vld [vmem:[#allocation7_spill] sm:$0xff] }
 0xbf1   : > { %v6430_v11 = vpop.f32.mrf.mxu2 }
 0xbf6   : > { %10862 = vmatmul.msk.f32.gmra.mxu2 %vm1415_vm0, %v19248_v60  ;;  %10818 = vmatmul.msk.f32.gmra.mxu1 %vm1415_vm0, %v15921_v51  ;;  %v15972_v60 = vld [vmem:[%s12222_s0 + $0x88] sm:$0xff] }
 0xbf9   : > { %v6433_v59 = vpop.f32.mrf.mxu2 }
 0xbfb   : > { %v5957_v22 = vpop.f32.mrf.mxu1 }
 0xbfc   : > { %10790 = vmatmul.msk.f32.gmra.mxu3 %vm1963_vm1, %v5957_v22 }
 0xbfe   : > { %10863 = vmatmul.msk.f32.gmra.mxu2 %vm1415_vm0, %v19250_v30  ;;  %10819 = vmatmul.msk.f32.gmra.mxu1 %vm1415_vm0, %v15931_v21  ;;  %v15977_v30 = vpop.f32.mrf.mxu3 }
 0xbff   : > { %19256 = vst [vmem:[#allocation10_spill] sm:$0xff] %v15977_v30 }
 0xc01   : > { %v6436_v18 = vpop.f32.mrf.mxu2 }
 0xc03   : > { %v5960_v50 = vpop.f32.mrf.mxu1 }
 0xc04   : > { %10791 = vmatmul.msk.f32.gmra.mxu3 %vm1963_vm1, %v5960_v50 }
 0xc06   : > { %10864 = vmatmul.msk.f32.gmra.mxu2 %vm1415_vm0, %v19252_v42  ;;  %10820 = vmatmul.msk.f32.gmra.mxu1 %vm1415_vm0, %v15941_v6 }
 0xc09   : > { %v6439_v33 = vpop.f32.mrf.mxu2 }
 0xc0a   : > { %v6440_v22 = vadd.f32 %v15961_v43, %v6439_v33  ;;  %v15991_v33 = vld [vmem:[%s12222_s0 + $0x90] sm:$0xff] }
 0xc0b   : > { %v15945_v15 = vpop.f32.mrf.mxu1 }
 0xc0c   : > { %10792 = vmatmul.msk.f32.gmra.mxu3 %vm1963_vm1, %v15785_v63 }
 0xc0e   : > { %10865 = vmatmul.msk.f32.gmra.mxu2 %vm1415_vm0, %v19253_v48  ;;  %10821 = vmatmul.msk.f32.gmra.mxu1 %vm1415_vm0, %v15952_v41  ;;  %v19257_v48 = vld [vmem:[#allocation9_spill] sm:$0xff] }
 0xc11   : > { %v6442_v55 = vpop.f32.mrf.mxu2 }
 0xc12   : > { %v6443_v37 = vadd.f32 %v15961_v43, %v6442_v55  ;;  %v6434_v55 = vadd.f32 %v15961_v43, %v6433_v59  ;;  %v16010_v59 = vld [vmem:[%s12222_s0 + $0x98] sm:$0xff] }
 0xc13   : > { %v15964_v63 = vpop.f32.mrf.mxu1 }
 0xc14   : > { %10793 = vmatmul.msk.f32.gmra.mxu3 %vm1963_vm1, %v15801_v58  ;;  %v6437_v58 = vadd.f32 %v15961_v43, %v6436_v18 }
 0xc15   : > { %10911 = vmatpush.xpose.msk.msrb.mxu3 %vm1963_vm1, %v6443_v37  ;;  %v15999_v37 = vpop.f32.mrf.mxu3 }
 0xc16   : > { %10866 = vmatmul.msk.f32.gmra.mxu2 %vm1415_vm0, %v19255_v36  ;;  %10822 = vmatmul.msk.f32.gmra.mxu1 %vm1415_vm0, %v15972_v60  ;;  %19258 = vst [vmem:[#allocation11_spill] sm:$0xff] %v15999_v37 }
 0xc19   : > { %10912 = vmatpush.xpose.msk.msrb.mxu3 %vm1963_vm1, %v6440_v22  ;;  %v15980_v50 = vpop.f32.mrf.mxu2  ;;  %v19259_v22 = vld [vmem:[#allocation12_spill] sm:$0xff] }
 0xc1b   : > { %v15983_v42 = vpop.f32.mrf.mxu1 }
 0xc1c   : > { %10794 = vmatmul.msk.f32.gmra.mxu3 %vm1963_vm1, %v15810_v27  ;;  %v6431_v27 = vadd.f32 %v15961_v43, %v6430_v11 }
 0xc1d   : > { %10913 = vmatpush.xpose.msk.msrb.mxu3 %vm1963_vm1, %v6437_v58  ;;  %v6428_v58 = vadd.f32 %v15961_v43, %v6427_v26  ;;  %v16030_v26 = vld [vmem:[%s12222_s0 + $0xa0] sm:$0xff] }
 0xc1e   : > { %10867 = vmatmul.msk.f32.gmra.mxu2 %vm1415_vm0, %v19257_v48  ;;  %10823 = vmatmul.msk.f32.gmra.mxu1 %vm1415_vm0, %v15991_v33  ;;  %v16020_v48 = vpop.f32.mrf.mxu3 }
 0xc1f   : > { %19260 = vst [vmem:[#allocation14_spill] sm:$0xff] %v16020_v48 }
 0xc21   : > { %10914 = vmatpush.xpose.msk.msrb.mxu3 %vm1963_vm1, %v6434_v55  ;;  %v15997_v18 = vpop.f32.mrf.mxu2 }
 0xc23   : > { %v16002_v36 = vpop.f32.mrf.mxu1 }
 0xc24   : > { %10795 = vmatmul.msk.f32.gmra.mxu3 %vm1963_vm1, %v15819_v54  ;;  %v6425_v54 = vadd.f32 %v15961_v43, %v15897_v35  ;;  %v6422_v35 = vadd.f32 %v15961_v43, %v15885_v52 }
 0xc25   : > { %10915 = vmatpush.xpose.msk.msrb.mxu3 %vm1963_vm1, %v6431_v27  ;;  %v19261_v27 = vld [vmem:[#allocation13_spill] sm:$0xff] }
 0xc26   : > { %10868 = vmatmul.msk.f32.gmra.mxu2 %vm1415_vm0, %v19259_v22  ;;  %10824 = vmatmul.msk.f32.gmra.mxu1 %vm1415_vm0, %v16010_v59 }
 0xc29   : > { %10916 = vmatpush.xpose.msk.msrb.mxu3 %vm1963_vm1, %v6428_v58  ;;  %v16016_v11 = vpop.f32.mrf.mxu2 }
 0xc2b   : > { %v16022_v55 = vpop.f32.mrf.mxu1 }
 0xc2c   : > { %10796 = vmatmul.msk.f32.gmra.mxu3 %vm1963_vm1, %v15831_v49  ;;  %v16041_v49 = vpop.f32.mrf.mxu3 }
 0xc2d   : > { %10917 = vmatpush.xpose.msk.msrb.mxu3 %vm1963_vm1, %v6425_v54  ;;  %19262 = vst [vmem:[#allocation16_spill] sm:$0xff] %v16041_v49  ;;  %v19263_v54 = vld [vmem:[#allocation15_spill] sm:$0xff] }
 0xc2e   : > { %10869 = vmatmul.msk.f32.gmra.mxu2 %vm1415_vm0, %v19261_v27  ;;  %10825 = vmatmul.msk.f32.gmra.mxu1 %vm1415_vm0, %v16030_v26  ;;  %v16046_v27 = vld [vmem:[%s12222_s0 + $0xa8] sm:$0xff] }
 0xc31   : > { %10918 = vmatpush.xpose.msk.msrb.mxu3 %vm1963_vm1, %v6422_v35  ;;  %v6454_v22 = vpop.f32.mrf.mxu2  ;;  %v19264_v35 = vld [vmem:[#allocation17_spill] sm:$0xff] }
 0xc33   : > { %v16037_v58 = vpop.f32.mrf.mxu1 }
 0xc34   : > { %10797 = vmatmul.msk.f32.gmra.mxu3 %vm1963_vm1, %v15850_v46  ;;  %v16057_v46 = vld [vmem:[%s12222_s0 + $0xb0] sm:$0xff] }
 0xc36   : > { %10870 = vmatmul.msk.f32.gmra.mxu2 %vm1415_vm0, %v19263_v54  ;;  %10826 = vmatmul.msk.f32.gmra.mxu1 %vm1415_vm0, %v16046_v27  ;;  %v16061_v54 = vpop.f32.mrf.mxu3 }
 0xc37   : > { %19265 = vst [vmem:[#allocation20_spill] sm:$0xff] %v16061_v54 }
 0xc39   : > { %v6457_v52 = vpop.f32.mrf.mxu2 }
 0xc3b   : > { %v16050_v10 = vpop.f32.mrf.mxu1 }
 0xc3c   : > { %10798 = vmatmul.msk.f32.gmra.mxu3 %vm1963_vm1, %v15862_v17  ;;  %v16070_v17 = vld [vmem:[%s18975_s5 + $0x3] ss:$0 sm:$0xff] }
 0xc3d   : > { %v6299_v56 = vadd.f32 %v16070_v17, %v15945_v15  ;;  %v6302_v12 = vadd.f32 %v16070_v17, %v15964_v63  ;;  %v6305_v63 = vadd.f32 %v16070_v17, %v15983_v42 }
 0xc3e   : > { %10871 = vmatmul.msk.f32.gmra.mxu2 %vm1415_vm0, %v19264_v35  ;;  %10827 = vmatmul.msk.f32.gmra.mxu1 %vm1415_vm0, %v16057_v46  ;;  %v19266_v35 = vld [vmem:[#allocation18_spill] sm:$0xff]  ;;  %v16079_v13 = vpop.f32.mrf.mxu3 }
 0xc3f   : > { %19267 = vst [vmem:[#allocation21_spill] sm:$0xff] %v16079_v13 }
 0xc41   : > { %v6460_v7 = vpop.f32.mrf.mxu2 }
 0xc43   : > { %v16063_v3 = vpop.f32.mrf.mxu1 }
 0xc44   : > { %10799 = vmatmul.msk.f32.gmra.mxu3 %vm1963_vm1, %v15873_v32 }
 0xc46   : > { %10872 = vmatmul.msk.f32.gmra.mxu2 %vm1415_vm0, %v19266_v35  ;;  %10828 = vmatmul.msk.f32.gmra.mxu1 %vm1415_vm0, %v16075_v47  ;;  %v16089_v35 = vld [vmem:[%s12222_s0 + $0xc0] sm:$0xff]  ;;  %v16095_v2 = vpop.f32.mrf.mxu3 }
 0xc47   : > { %19269 = vst [vmem:[#allocation22_spill] sm:$0xff] %v16095_v2  ;;  %v6461_v2 = vadd.f32 %v15961_v43, %v6460_v7  ;;  %v6308_v7 = vadd.f32 %v16070_v17, %v16002_v36  ;;  %v6311_v36 = vadd.f32 %v16070_v17, %v16022_v55 }
 0xc49   : > { %v6463_v32 = vpop.f32.mrf.mxu2 }
 0xc4b   : > { %v16083_v1 = vpop.f32.mrf.mxu1 }
 0xc4c   : > { %10919 = vmatmul.msk.f32.vlgmr.msrb.gmra.mxu3 %vm1963_vm1, %v6299_v56  ;;  %v16104_v56 = vld [vmem:[%s12222_s0 + $0xc8] sm:$0xff]  ;;  %v6323_v30 = vadd.f32 %v16070_v17, %v16083_v1 }
 0xc4e   : > { %10873 = vmatmul.msk.f32.gmra.mxu2 %vm1415_vm0, %v19268_v61  ;;  %10829 = vmatmul.msk.f32.gmra.mxu1 %vm1415_vm0, %v16089_v35  ;;  %v6464_v61 = vadd.f32 %v15961_v43, %v6463_v32  ;;  %v16114_v49 = vpop.f32.mrf.mxu3  ;;  %v6458_v32 = vadd.f32 %v15961_v43, %v6457_v52  ;;  %v6452_v52 = vadd.f32 %v15961_v43, %v16016_v11 }
 0xc4f   : > { %19270 = vst [vmem:[#allocation23_spill] sm:$0xff] %v16114_v49 }
 0xc51   : > { %v6466_v13 = vpop.f32.mrf.mxu2 }
 0xc52   : > { %v6467_v15 = vadd.f32 %v15961_v43, %v6466_v13 }
 0xc53   : > { %v16098_v54 = vpop.f32.mrf.mxu1 }
 0xc54   : > { %10920 = vmatmul.msk.f32.gmra.mxu3 %vm1963_vm1, %v6302_v12  ;;  %10927 = vmatpush.xpose.msk.msrb.mxu1 %vm1963_vm1, %v6467_v15  ;;  %v16122_v15 = vld [vmem:[%s12222_s0 + $0xd0] sm:$0xff]  ;;  %v6326_v29 = vadd.f32 %v16070_v17, %v16098_v54 }
 0xc56   : > { %10830 = vmatmul.msk.f32.gmra.mxu1 %vm1415_vm0, %v16104_v56 }
 0xc57   : > { %v16132_v49 = vpop.f32.mrf.mxu3 }
 0xc58   : > { %10928 = vmatpush.xpose.msk.msrb.mxu1 %vm1963_vm1, %v6464_v61  ;;  %v6455_v61 = vadd.f32 %v15961_v43, %v6454_v22  ;;  %19271 = vst [vmem:[#allocation24_spill] sm:$0xff] %v16132_v49  ;;  %v6317_v49 = vadd.f32 %v16070_v17, %v16050_v10 }
 0xc59   : > { %v16111_v13 = vpop.f32.mrf.mxu2 }
 0xc5b   : > { %v16116_v12 = vpop.f32.mrf.mxu1 }
 0xc5c   : > { %10921 = vmatmul.msk.f32.gmra.mxu3 %vm1963_vm1, %v6305_v63  ;;  %10929 = vmatpush.xpose.msk.msrb.mxu1 %vm1963_vm1, %v6461_v2  ;;  %v16141_v63 = vld [vmem:[%s12222_s0 + $0xd8] sm:$0xff] }
 0xc5e   : > { %10831 = vmatmul.msk.f32.gmra.mxu1 %vm1415_vm0, %v16122_v15 }
 0xc60   : > { %10930 = vmatpush.xpose.msk.msrb.mxu1 %vm1963_vm1, %v6458_v32  ;;  %v6449_v32 = vadd.f32 %v15961_v43, %v15997_v18  ;;  %v6314_v18 = vadd.f32 %v16070_v17, %v16037_v58  ;;  %v16180_v58 = vld [vmem:[%s12222_s0 + $0xf0] sm:$0xff] }
 0xc61   : > { %v16129_v42 = vpop.f32.mrf.mxu2 }
 0xc63   : > { %v16134_v2 = vpop.f32.mrf.mxu1 }
 0xc64   : > { %10922 = vmatmul.msk.f32.gmra.mxu3 %vm1963_vm1, %v6308_v7  ;;  %10931 = vmatpush.xpose.msk.msrb.mxu1 %vm1963_vm1, %v6455_v61  ;;  %v16154_v7 = vpop.f32.mrf.mxu3  ;;  %v6446_v61 = vadd.f32 %v15961_v43, %v15980_v50 }
 0xc65   : > { %19272 = vst [vmem:[#allocation25_spill] sm:$0xff] %v16154_v7  ;;  %v6320_v7 = vadd.f32 %v16070_v17, %v16063_v3 }
 0xc66   : > { %10832 = vmatmul.msk.f32.gmra.mxu1 %vm1415_vm0, %v16141_v63 }
 0xc68   : > { %10932 = vmatpush.xpose.msk.msrb.mxu1 %vm1963_vm1, %v6452_v52  ;;  %v16159_v52 = vld [vmem:[%s12222_s0 + $0xe0] sm:$0xff] }
 0xc69   : > { %v6475_v22 = vpop.f32.mrf.mxu2 }
 0xc6b   : > { %v16152_v11 = vpop.f32.mrf.mxu1 }
 0xc6c   : > { %10923 = vmatmul.msk.f32.gmra.mxu3 %vm1963_vm1, %v6311_v36  ;;  %10933 = vmatpush.xpose.msk.msrb.mxu1 %vm1963_vm1, %v6449_v32  ;;  %v16170_v32 = vld [vmem:[%s12222_s0 + $0xe8] sm:$0xff]  ;;  %v16174_v50 = vpop.f32.mrf.mxu3 }
 0xc6d   : > { %19273 = vst [vmem:[#allocation26_spill] sm:$0xff] %v16174_v50  ;;  %v16192_v50 = vld [vmem:[%s12222_s0 + $0xf8] sm:$0xff] }
 0xc6e   : > { %10833 = vmatmul.msk.f32.gmra.mxu1 %vm1415_vm0, %v16159_v52 }
 0xc70   : > { %10934 = vmatpush.xpose.msk.msrb.mxu1 %vm1963_vm1, %v6446_v61 }
 0xc71   : > { %v6478_v55 = vpop.f32.mrf.mxu2 }
 0xc73   : > { %v16167_v36 = vpop.f32.mrf.mxu1 }
 0xc74   : > { %10924 = vmatmul.msk.f32.gmra.mxu3 %vm1963_vm1, %v6314_v18 }
 0xc76   : > { %10834 = vmatmul.msk.f32.gmra.mxu1 %vm1415_vm0, %v16170_v32 }
 0xc79   : > { %v6481_v61 = vpop.f32.mrf.mxu2 }
 0xc7a   : > { %v6482_v54 = vadd.f32 %v15961_v43, %v6481_v61  ;;  %v10876_v61 = vld [vmem:[%s18978_s8 + $0x70] sm:$0xff] }
 0xc7b   : > { %v16188_v37 = vpop.f32.mrf.mxu1 }
 0xc7c   : > { %10925 = vmatmul.msk.f32.gmra.mxu3 %vm1963_vm1, %v6317_v49 }
 0xc7e   : > { %10835 = vmatmul.msk.f32.gmra.mxu1 %vm1415_vm0, %v16180_v58 }
 0xc7f   : > { %v16184_v18 = vpop.f32.mrf.mxu3 }
 0xc80   : > { %19274 = vst [vmem:[#allocation27_spill] sm:$0xff] %v16184_v18 }
 0xc81   : > { %v6484_v48 = vpop.f32.mrf.mxu2 }
 0xc83   : > { %v16200_v18 = vpop.f32.mrf.mxu1 }
 0xc84   : > { %10926 = vmatmul.msk.f32.gmra.mxu3 %vm1963_vm1, %v6320_v7 }
 0xc86   : > { %10836 = vmatmul.msk.f32.gmra.mxu1 %vm1415_vm0, %v16192_v50 }
 0xc87   : > { %v16196_v10 = vpop.f32.mrf.mxu3 }
 0xc88   : > { %19275 = vst [vmem:[#allocation7_spill] sm:$0xff] %v16196_v10 }
 0xc89   : > { %v6487_v49 = vpop.f32.mrf.mxu2 }
 0xc8a   : > { %v6488_v10 = vadd.f32 %v15961_v43, %v6487_v49 }
 0xc8b   : > { %v6346_v19 = vpop.f32.mrf.mxu1 }
 0xc8e   : > { %10935 = vmatmul.msk.f32.vlgmr.msrb.gmra.mxu1 %vm1963_vm1, %v6323_v30 }
 0xc8f   : > { %v16203_v3 = vpop.f32.mrf.mxu3 }
 0xc90   : > { %19276 = vst [vmem:[#allocation9_spill] sm:$0xff] %v16203_v3  ;;  %v6485_v3 = vadd.f32 %v15961_v43, %v6484_v48  ;;  %v6332_v48 = vadd.f32 %v16070_v17, %v16134_v2 }
 0xc91   : > { %v6490_v16 = vpop.f32.mrf.mxu2 }
 0xc92   : > { %v6491_v7 = vadd.f32 %v15961_v43, %v6490_v16  ;;  %v6329_v16 = vadd.f32 %v16070_v17, %v16116_v12  ;;  %v10877_v12 = vld [vmem:[%s18978_s8 + $0x78] sm:$0xff] }
 0xc93   : > { %6539 = vmatpush.msra.mxu0 %v10877_v12  ;;  %v6335_v12 = vadd.f32 %v16070_v17, %v16152_v11 }
 0xc94   : > { %10943 = vmatpush.xpose.msk.msrb.mxu2 %vm1963_vm1, %v6491_v7  ;;  %v6349_v7 = vpop.f32.mrf.mxu1 }
 0xc95   : > { %6540 = vmatpush.msra.mxu0 %v10876_v61 }
 0xc96   : > { %10936 = vmatmul.msk.f32.gmra.mxu1 %vm1963_vm1, %v6326_v29 }
 0xc97   : > { %v16211_v1 = vpop.f32.mrf.mxu3 }
 0xc98   : > { %10944 = vmatpush.xpose.msk.msrb.mxu2 %vm1963_vm1, %v6488_v10  ;;  %v6479_v10 = vadd.f32 %v15961_v43, %v6478_v55  ;;  %v10875_v55 = vld [vmem:[%s18978_s8 + $0x68] sm:$0xff] }
 0xc99   : > { %v16214_v30 = vpop.f32.mrf.mxu2  ;;  %6541 = vmatpush.msra.mxu0 %v10875_v55 }
 0xc9c   : > { %10945 = vmatpush.xpose.msk.msrb.mxu2 %vm1963_vm1, %v6485_v3  ;;  %v6476_v3 = vadd.f32 %v15961_v43, %v6475_v22  ;;  %v6473_v22 = vadd.f32 %v15961_v43, %v16129_v42  ;;  %v6338_v42 = vadd.f32 %v16070_v17, %v16167_v36  ;;  %v6350_v36 = vadd.f32 %v16070_v17, %v6349_v7 }
 0xc9e   : > { %10937 = vmatmul.msk.f32.gmra.mxu1 %vm1963_vm1, %v6329_v16  ;;  %v10874_v16 = vld [vmem:[%s18978_s8 + $0x60] sm:$0xff] }
 0xc9f   : > { %v16222_v49 = vpop.f32.mrf.mxu3  ;;  %6542 = vmatpush.msra.mxu0 %v10874_v16  ;;  %v6341_v16 = vadd.f32 %v16070_v17, %v16188_v37 }
 0xca0   : > { %10946 = vmatpush.xpose.msk.msrb.mxu2 %vm1963_vm1, %v6482_v54  ;;  %v6352_v54 = vpop.f32.mrf.mxu1  ;;  %10879 = vmatmul.msk.f32.vlgmr.msra.gmra.mxu0 %vm1415_vm0, %v15790_v20  ;;  %v6347_v20 = vadd.f32 %v16070_v17, %v6346_v19 }
 0xca1   : > { %v16225_v29 = vpop.f32.mrf.mxu2  ;;  %v6353_v37 = vadd.f32 %v16070_v17, %v6352_v54 }
 0xca4   : > { %10947 = vmatpush.xpose.msk.msrb.mxu2 %vm1963_vm1, %v6479_v10 }
 0xca6   : > { %10938 = vmatmul.msk.f32.gmra.mxu1 %vm1963_vm1, %v6332_v48  ;;  %v6470_v48 = vadd.f32 %v15961_v43, %v16111_v13 }
 0xca7   : > { %v16242_v2 = vpop.f32.mrf.mxu3 }
 0xca8   : > { %10948 = vmatpush.xpose.msk.msrb.mxu2 %vm1963_vm1, %v6476_v3  ;;  %10880 = vmatmul.msk.f32.gmra.mxu0 %vm1415_vm0, %v15797_v14  ;;  %v6355_v11 = vpop.f32.mrf.mxu1 }
 0xca9   : > { %v16248_v10 = vpop.f32.mrf.mxu2 }
 0xcac   : > { %10949 = vmatpush.xpose.msk.msrb.mxu2 %vm1963_vm1, %v6473_v22 }
 0xcae   : > { %10939 = vmatmul.msk.f32.gmra.mxu1 %vm1963_vm1, %v6335_v12  ;;  %v6344_v12 = vadd.f32 %v16070_v17, %v16200_v18 }
 0xcaf   : > { %v16260_v61 = vpop.f32.mrf.mxu3 }
 0xcb0   : > { %10950 = vmatpush.xpose.msk.msrb.mxu2 %vm1963_vm1, %v6470_v48  ;;  %10881 = vmatmul.msk.f32.gmra.mxu0 %vm1415_vm0, %v15806_v53  ;;  %v6358_v22 = vpop.f32.mrf.mxu1 }
 0xcb1   : > { %v6502_v3 = vpop.f32.mrf.mxu2 }
 0xcb3   : > { %10951 = vmatmul.msk.f32.vlgmr.msrb.gmra.mxu2 %vm1963_vm1, %v6347_v20 }
 0xcb6   : > { %10940 = vmatmul.msk.f32.gmra.mxu1 %vm1963_vm1, %v6338_v42  ;;  %v6356_v42 = vadd.f32 %v16070_v17, %v6355_v11 }
 0xcb7   : > { %v16270_v13 = vpop.f32.mrf.mxu3 }
 0xcb8   : > { %10882 = vmatmul.msk.f32.gmra.mxu0 %vm1415_vm0, %v15815_v39  ;;  %v6361_v48 = vpop.f32.mrf.mxu1 }
 0xcb9   : > { %v6505_v55 = vpop.f32.mrf.mxu2 }
 0xcbb   : > { %10952 = vmatmul.msk.f32.gmra.mxu2 %vm1963_vm1, %v6350_v36  ;;  %v6359_v36 = vadd.f32 %v16070_v17, %v6358_v22 }
 0xcbe   : > { %10941 = vmatmul.msk.f32.gmra.mxu1 %vm1963_vm1, %v6341_v16 }
 0xcbf   : > { %v16279_v14 = vpop.f32.mrf.mxu3 }
 0xcc0   : > { %10883 = vmatmul.msk.f32.gmra.mxu0 %vm1415_vm0, %v15826_v25  ;;  %v6364_v54 = vpop.f32.mrf.mxu1 }
 0xcc1   : > { %v6508_v19 = vpop.f32.mrf.mxu2 }
 0xcc3   : > { %10953 = vmatmul.msk.f32.gmra.mxu2 %vm1963_vm1, %v6353_v37  ;;  %v6509_v37 = vadd.f32 %v15961_v43, %v6508_v19  ;;  %v6503_v19 = vadd.f32 %v15961_v43, %v6502_v3 }
 0xcc6   : > { %10942 = vmatmul.msk.f32.gmra.mxu1 %vm1963_vm1, %v6344_v12 }
 0xcc7   : > { %v16288_v53 = vpop.f32.mrf.mxu3 }
 0xcc8   : > { %10884 = vmatmul.msk.f32.gmra.mxu0 %vm1415_vm0, %v15838_v34  ;;  %v6362_v34 = vadd.f32 %v16070_v17, %v6361_v48  ;;  %v6367_v22 = vpop.f32.mrf.mxu1  ;;  %v6500_v48 = vadd.f32 %v15961_v43, %v16248_v10  ;;  %v6494_v10 = vadd.f32 %v15961_v43, %v16214_v30 }
 0xcc9   : > { %v6511_v7 = vpop.f32.mrf.mxu2 }
 0xcca   : > { %v6512_v25 = vadd.f32 %v15961_v43, %v6511_v7  ;;  %v6506_v7 = vadd.f32 %v15961_v43, %v6505_v55 }
 0xccb   : > { %10954 = vmatmul.msk.f32.gmra.mxu2 %vm1963_vm1, %v6356_v42 }
 0xccf   : > { %v16294_v18 = vpop.f32.mrf.mxu3 }
 0xcd0   : > { %v6996_v39 = vsel %vm2320_vm2, %v16294_v18, -inf  ;;  %10885 = vmatmul.msk.f32.gmra.mxu0 %vm1415_vm0, %v15846_v5  ;;  %v6365_v5 = vadd.f32 %v16070_v17, %v6364_v54  ;;  %v6370_v55 = vpop.f32.mrf.mxu1  ;;  %v6368_v54 = vadd.f32 %v16070_v17, %v6367_v22 }
 0xcd1   : > { %v6514_v20 = vpop.f32.mrf.mxu2  ;;  %6997 = vmax.xlane.f32.xlu2 %v6996_v39 }
 0xcd2   : > { %v6515_v16 = vadd.f32 %v15961_v43, %v6514_v20 }
 0xcd3   : > { %10955 = vmatmul.msk.f32.gmra.mxu2 %vm1963_vm1, %v6359_v36 }
 0xcd4   : > { %10959 = vmatpush.xpose.msk.msra.mxu3 %vm1963_vm1, %v6515_v16 }
 0xcd7   : > { %v16305_v11 = vpop.f32.mrf.mxu3 }
 0xcd8   : > { %10960 = vmatpush.xpose.msk.msra.mxu3 %vm1963_vm1, %v6512_v25  ;;  %v6999_v12 = vsel %vm2320_vm2, %v16305_v11, -inf  ;;  %10886 = vmatmul.msk.f32.gmra.mxu0 %vm1415_vm0, %v15858_v44  ;;  %v6497_v44 = vadd.f32 %v15961_v43, %v16225_v29  ;;  %v6373_v16 = vpop.f32.mrf.mxu1  ;;  %v6371_v25 = vadd.f32 %v16070_v17, %v6370_v55 }
 0xcd9   : > { %7000 = vmax.xlane.f32.xlu0 %v6999_v12  ;;  %v6374_v43 = vadd.f32 %v16070_v17, %v6373_v16 }
 0xcdb   : > { %10956 = vmatmul.msk.f32.gmra.mxu2 %vm1963_vm1, %v6362_v34 }
 0xcdc   : > { %10961 = vmatpush.xpose.msk.msra.mxu3 %vm1963_vm1, %v6509_v37 }
 0xcdf   : > { %v16317_v42 = vpop.f32.mrf.mxu3 }
 0xce0   : > { %10962 = vmatpush.xpose.msk.msra.mxu3 %vm1963_vm1, %v6506_v7  ;;  %v7002_v39 = vsel %vm2320_vm2, %v16317_v42, -inf  ;;  %10887 = vmatmul.msk.f32.gmra.mxu0 %vm1415_vm0, %v15869_v38  ;;  %v6376_v12 = vpop.f32.mrf.mxu1 }
 0xce1   : > { %7003 = vmax.xlane.f32.xlu1 %v7002_v39 }
 0xce3   : > { %10957 = vmatmul.msk.f32.gmra.mxu2 %vm1963_vm1, %v6365_v5 }
 0xce4   : > { %10963 = vmatpush.xpose.msk.msra.mxu3 %vm1963_vm1, %v6503_v19 }
 0xce7   : > { %v16330_v20 = vpop.f32.mrf.mxu3 }
 0xce8   : > { %10964 = vmatpush.xpose.msk.msra.mxu3 %vm1963_vm1, %v6500_v48  ;;  %v7005_v3 = vsel %vm2320_vm2, %v16330_v20, -inf  ;;  %10888 = vmatmul.msk.f32.gmra.mxu0 %vm1415_vm0, %v15881_v23  ;;  %v6377_v23 = vadd.f32 %v16070_v17, %v6376_v12  ;;  %v6379_v22 = vpop.f32.mrf.mxu1 }
 0xce9   : > { %7006 = vmax.xlane.f32.xlu2 %v7005_v3 }
 0xceb   : > { %10958 = vmatmul.msk.f32.gmra.mxu2 %vm1963_vm1, %v6368_v54 }
 0xcec   : > { %10965 = vmatpush.xpose.msk.msra.mxu3 %vm1963_vm1, %v6497_v44 }
 0xcef   : > { %v16344_v36 = vpop.f32.mrf.mxu3 }
 0xcf0   : > { %10966 = vmatpush.xpose.msk.msra.mxu3 %vm1963_vm1, %v6494_v10  ;;  %v7008_v29 = vsel %vm2320_vm2, %v16344_v36, -inf  ;;  %10889 = vmatmul.msk.f32.gmra.mxu0 %vm1415_vm0, %v15893_v0  ;;  %v6380_v0 = vadd.f32 %v16070_v17, %v6379_v22  ;;  %v6382_v19 = vpop.f32.mrf.mxu1 }
 0xcf1   : > { %7009 = vmax.xlane.f32.xlu0 %v7008_v29  ;;  %v6383_v5 = vadd.f32 %v16070_v17, %v6382_v19 }
 0xcf3   : > { %10967 = vmatmul.msk.f32.vlgmr.msra.gmra.mxu3 %vm1963_vm1, %v6371_v25 }
 0xcf7   : > { %v16353_v38 = vpop.f32.mrf.mxu3 }
 0xcf8   : > { %v7011_v30 = vsel %vm2320_vm2, %v16353_v38, -inf  ;;  %10890 = vmatmul.msk.f32.gmra.mxu0 %vm1415_vm0, %v15903_v9  ;;  %v6385_v9 = vpop.f32.mrf.mxu1 }
 0xcf9   : > { %7012 = vmax.xlane.f32.xlu1 %v7011_v30  ;;  %v6386_v55 = vadd.f32 %v16070_v17, %v6385_v9 }
 0xcfb   : > { %10968 = vmatmul.msk.f32.gmra.mxu3 %vm1963_vm1, %v6374_v43 }
 0xcff   : > { %v16361_v37 = vpop.f32.mrf.mxu3 }
 0xd00   : > { %v7014_v34 = vsel %vm2320_vm2, %v16361_v37, -inf  ;;  %10891 = vmatmul.msk.f32.gmra.mxu0 %vm1415_vm0, %v15912_v8  ;;  %v6388_v8 = vpop.f32.mrf.mxu1 }
 0xd01   : > { %7015 = vmax.xlane.f32.xlu2 %v7014_v34  ;;  %v6389_v3 = vadd.f32 %v16070_v17, %v6388_v8 }
 0xd03   : > { %10969 = vmatmul.msk.f32.gmra.mxu3 %vm1963_vm1, %v6377_v23 }
 0xd07   : > { %v16369_v7 = vpop.f32.mrf.mxu3 }
 0xd08   : > { %v7017_v39 = vsel %vm2320_vm2, %v16369_v7, -inf  ;;  %10892 = vmatmul.msk.f32.gmra.mxu0 %vm1415_vm0, %v15921_v51  ;;  %v6391_v44 = vpop.f32.mrf.mxu1 }
 0xd09   : > { %7018 = vmax.xlane.f32.xlu1 %v7017_v39 }
 0xd0b   : > { %10970 = vmatmul.msk.f32.gmra.mxu3 %vm1963_vm1, %v6380_v0 }
 0xd10   : > { %10893 = vmatmul.msk.f32.gmra.mxu0 %vm1415_vm0, %v15931_v21  ;;  %v6392_v21 = vadd.f32 %v16070_v17, %v6391_v44  ;;  %v16406_v25 = vpop.f32.mrf.mxu1 }
 0xd11   : > { %v7020_v22 = vsel %vm2320_vm2, %v16406_v25, -inf }
 0xd13   : > { %10971 = vmatmul.msk.f32.gmra.mxu3 %vm1963_vm1, %v6383_v5 }
 0xd18   : > { %10894 = vmatmul.msk.f32.gmra.mxu0 %vm1415_vm0, %v15941_v6 }
 0xd1b   : > { %10972 = vmatmul.msk.f32.gmra.mxu3 %vm1963_vm1, %v6386_v55 }
 0xd1d   : > { %v16387_v48 = vpop.f32.mrf.mxu0 }
 0xd20   : > { %10895 = vmatmul.msk.f32.gmra.mxu0 %vm1415_vm0, %v15952_v41 }
 0xd23   : > { %10973 = vmatmul.msk.f32.gmra.mxu3 %vm1963_vm1, %v6389_v3 }
 0xd25   : > { %v16393_v51 = vpop.f32.mrf.mxu0 }
 0xd28   : > { %10896 = vmatmul.msk.f32.gmra.mxu0 %vm1415_vm0, %v15972_v60 }
 0xd2b   : > { %10974 = vmatmul.msk.f32.gmra.mxu3 %vm1963_vm1, %v6392_v21 }
 0xd2d   : > { %v16399_v6 = vpop.f32.mrf.mxu0 }
 0xd30   : > { %10897 = vmatmul.msk.f32.gmra.mxu0 %vm1415_vm0, %v15991_v33 }
 0xd35   : > { %v6553_v54 = vpop.f32.mrf.mxu0 }
 0xd38   : > { %10898 = vmatmul.msk.f32.gmra.mxu0 %vm1415_vm0, %v16010_v59 }
 0xd3d   : > { %v6556_v17 = vpop.f32.mrf.mxu0 }
 0xd40   : > { %10899 = vmatmul.msk.f32.gmra.mxu0 %vm1415_vm0, %v16030_v26 }
 0xd44   : > { %v6998_v41 = vpop.xlane.xlu2 %6997 }
 0xd45   : > { %v7092_v10 = vsub.f32 %v16294_v18, %v6998_v41  ;;  %v6559_v30 = vpop.f32.mrf.mxu0  ;;  %v16415_v18 = vpop.f32.mrf.mxu1 }
 0xd46   : > { %v7023_v8 = vsel %vm2320_vm2, %v16415_v18, -inf }
 0xd47   : > { %v7124_v16 = vmul.f32 1.442695, %v7092_v10 }
 0xd48   : > { %10900 = vmatmul.msk.f32.gmra.mxu0 %vm1415_vm0, %v16046_v27 }
 0xd49   : > { %11595 = vpow2.f32 %v7124_v16 }
 0xd4c   : > { %v7001_v60 = vpop.xlane.xlu0 %7000 }
 0xd4d   : > { %v7093_v29 = vsub.f32 %v16305_v11, %v7001_v60  ;;  %v6562_v34 = vpop.f32.mrf.mxu0  ;;  %v16428_v27 = vpop.f32.mrf.mxu1 }
 0xd4f   : > { %v16411_v43 = vpop.eup %11595  ;;  %v7126_v33 = vmul.f32 1.442695, %v7093_v29 }
 0xd50   : > { %v7188_v59 = vsel %vm2320_vm2, %v16411_v43, 0.0  ;;  %10901 = vmatmul.msk.f32.gmra.mxu0 %vm1415_vm0, %v16057_v46 }
 0xd51   : > { %11597 = vpow2.f32 %v7126_v33  ;;  %7189 = vadd.xlane.f32.xlu0 %v7188_v59 }
 0xd54   : > { %v7004_v12 = vpop.xlane.xlu1 %7003 }
 0xd55   : > { %v7094_v26 = vsub.f32 %v16317_v42, %v7004_v12  ;;  %v16433_v42 = vld [vmem:[%s18979_s9 + $0x3] ss:$0 sm:$0xff]  ;;  %v6565_v55 = vpop.f32.mrf.mxu0  ;;  %v16448_v10 = vpop.f32.mrf.mxu1 }
 0xd56   : > { %v6566_v3 = vadd.f32 %v16433_v42, %v6565_v55  ;;  %v6563_v44 = vadd.f32 %v16433_v42, %v6562_v34  ;;  %v6557_v29 = vadd.f32 %v16433_v42, %v6556_v17  ;;  %v6554_v59 = vadd.f32 %v16433_v42, %v6553_v54 }
 0xd57   : > { %v16420_v23 = vpop.eup %11597  ;;  %v7128_v11 = vmul.f32 1.442695, %v7094_v26 }
 0xd58   : > { %v7191_v0 = vsel %vm2320_vm2, %v16420_v23, 0.0  ;;  %10902 = vmatmul.msk.f32.gmra.mxu0 %vm1415_vm0, %v16075_v47 }
 0xd59   : > { %11599 = vpow2.f32 %v7128_v11  ;;  %7021 = vmax.xlane.f32.xlu0 %v7020_v22  ;;  %7192 = vadd.xlane.f32.xlu2 %v7191_v0  ;;  %v6548_v11 = vadd.f32 %v16433_v42, %v16393_v51 }
 0xd5a   : > { %7380 = vmatpush.msrb.mxu0 %v6566_v3 }
 0xd5c   : > { %v7007_v39 = vpop.xlane.xlu2 %7006  ;;  %7381 = vmatpush.msrb.mxu0 %v6563_v44 }
 0xd5d   : > { %v7095_v19 = vsub.f32 %v16330_v20, %v7007_v39  ;;  %v6560_v20 = vadd.f32 %v16433_v42, %v6559_v30  ;;  %v16453_v33 = vpop.f32.mrf.mxu0  ;;  %v7026_v30 = vsel %vm2320_vm2, %v16428_v27, -inf  ;;  %v16469_v34 = vpop.f32.mrf.mxu1 }
 0xd5e   : > { %v7032_v55 = vsel %vm2320_vm2, %v16469_v34, -inf }
 0xd5f   : > { %v16436_v5 = vpop.eup %11599  ;;  %v7130_v9 = vmul.f32 1.442695, %v7095_v19  ;;  %7382 = vmatpush.msrb.mxu0 %v6560_v20 }
 0xd60   : > { %v7194_v46 = vsel %vm2320_vm2, %v16436_v5, 0.0  ;;  %10903 = vmatmul.msk.f32.gmra.mxu0 %vm1415_vm0, %v16089_v35  ;;  %v7029_v35 = vsel %vm2320_vm2, %v16448_v10, -inf }
 0xd61   : > { %11601 = vpow2.f32 %v7130_v9  ;;  %7024 = vmax.xlane.f32.xlu2 %v7023_v8  ;;  %7195 = vadd.xlane.f32.xlu1 %v7194_v46 }
 0xd62   : > { %7383 = vmatpush.msrb.mxu0 %v6557_v29 }
 0xd64   : > { %v7010_v21 = vpop.xlane.xlu0 %7009  ;;  %7384 = vmatpush.msrb.mxu0 %v6554_v59 }
 0xd65   : > { %v7096_v41 = vsub.f32 %v16344_v36, %v7010_v21  ;;  %v6551_v36 = vadd.f32 %v16433_v42, %v16399_v6  ;;  %v16471_v22 = vpop.f32.mrf.mxu0  ;;  %v16488_v8 = vpop.f32.mrf.mxu1 }
 0xd66   : > { %v7035_v21 = vsel %vm2320_vm2, %v16488_v8, -inf }
 0xd67   : > { %v16450_v16 = vpop.eup %11601  ;;  %v7132_v60 = vmul.f32 1.442695, %v7096_v41  ;;  %7385 = vmatpush.msrb.mxu0 %v6551_v36 }
 0xd68   : > { %v7197_v47 = vsel %vm2320_vm2, %v16450_v16, 0.0  ;;  %10904 = vmatmul.msk.f32.gmra.mxu0 %vm1415_vm0, %v16104_v56 }
 0xd69   : > { %11603 = vpow2.f32 %v7132_v60  ;;  %7198 = vadd.xlane.f32.xlu0 %v7197_v47  ;;  %7027 = vmax.xlane.f32.xlu1 %v7026_v30  ;;  %v16511_v47 = vpop.f32.mrf.mxu2 }
 0xd6a   : > { %7386 = vmatpush.msrb.mxu0 %v6548_v11  ;;  %v7044_v59 = vsel %vm2320_vm2, %v16511_v47, -inf }
 0xd6c   : > { %v7013_v17 = vpop.xlane.xlu1 %7012 }
 0xd6d   : > { %v7097_v12 = vsub.f32 %v16353_v38, %v7013_v17  ;;  %v6545_v38 = vadd.f32 %v16433_v42, %v16387_v48  ;;  %v6574_v9 = vpop.f32.mrf.mxu0 }
 0xd6f   : > { %v16465_v26 = vpop.eup %11603  ;;  %v7134_v54 = vmul.f32 1.442695, %v7097_v12  ;;  %7387 = vmatpush.msrb.mxu0 %v6545_v38 }
 0xd70   : > { %v7200_v6 = vsel %vm2320_vm2, %v16465_v26, 0.0  ;;  %10905 = vmatmul.msk.f32.gmra.mxu0 %vm1415_vm0, %v16122_v15  ;;  %v16501_v15 = vpop.f32.mrf.mxu1 }
 0xd71   : > { %11605 = vpow2.f32 %v7134_v54  ;;  %7030 = vmax.xlane.f32.xlu0 %v7029_v35  ;;  %7201 = vadd.xlane.f32.xlu2 %v7200_v6  ;;  %v7038_v60 = vsel %vm2320_vm2, %v16501_v15, -inf  ;;  %v16521_v17 = vpop.f32.mrf.mxu2 }
 0xd74   : > { %v7016_v51 = vpop.xlane.xlu2 %7015 }
 0xd75   : > { %v7098_v0 = vsub.f32 %v16361_v37, %v7016_v51  ;;  %v6577_v44 = vpop.f32.mrf.mxu0 }
 0xd76   : > { %v6578_v38 = vadd.f32 %v16433_v42, %v6577_v44 }
 0xd77   : > { %v16482_v39 = vpop.eup %11605  ;;  %v7136_v19 = vmul.f32 1.442695, %v7098_v0  ;;  %v6572_v0 = vadd.f32 %v16433_v42, %v16471_v22 }
 0xd78   : > { %v7203_v48 = vsel %vm2320_vm2, %v16482_v39, 0.0  ;;  %10906 = vmatmul.msk.f32.gmra.mxu0 %vm1415_vm0, %v16141_v63  ;;  %v16513_v30 = vpop.f32.mrf.mxu1 }
 0xd79   : > { %11607 = vpow2.f32 %v7136_v19  ;;  %7033 = vmax.xlane.f32.xlu2 %v7032_v55  ;;  %7204 = vadd.xlane.f32.xlu1 %v7203_v48  ;;  %v7041_v36 = vsel %vm2320_vm2, %v16513_v30, -inf  ;;  %v6569_v19 = vadd.f32 %v16433_v42, %v16453_v33 }
 0xd7c   : > { %v7019_v56 = vpop.xlane.xlu1 %7018 }
 0xd7d   : > { %v7099_v37 = vsub.f32 %v16369_v7, %v7019_v56  ;;  %v6580_v7 = vpop.f32.mrf.mxu0 }
 0xd7f   : > { %v16493_v46 = vpop.eup %11607  ;;  %v7138_v3 = vmul.f32 1.442695, %v7099_v37 }
 0xd80   : > { %v7206_v20 = vsel %vm2320_vm2, %v16493_v46, 0.0  ;;  %10907 = vmatmul.msk.f32.gmra.mxu0 %vm1415_vm0, %v16159_v52  ;;  %v7047_v52 = vsel %vm2320_vm2, %v16521_v17, -inf }
 0xd81   : > { %11609 = vpow2.f32 %v7138_v3  ;;  %7207 = vadd.xlane.f32.xlu0 %v7206_v20  ;;  %7036 = vmax.xlane.f32.xlu1 %v7035_v21 }
 0xd85   : > { %v6583_v63 = vpop.f32.mrf.mxu0 }
 0xd86   : > { %v6584_v6 = vadd.f32 %v16433_v42, %v6583_v63 }
 0xd87   : > { %v16503_v41 = vpop.eup %11609 }
 0xd88   : > { %v7209_v29 = vsel %vm2320_vm2, %v16503_v41, 0.0  ;;  %10908 = vmatmul.msk.f32.gmra.mxu0 %vm1415_vm0, %v16170_v32  ;;  %v6581_v32 = vadd.f32 %v16433_v42, %v6580_v7 }
 0xd89   : > { %7039 = vmax.xlane.f32.xlu0 %v7038_v60  ;;  %7210 = vadd.xlane.f32.xlu2 %v7209_v29 }
 0xd8d   : > { %v6586_v12 = vpop.f32.mrf.mxu0 }
 0xd8e   : > { %v6587_v54 = vadd.f32 %v16433_v42, %v6586_v12 }
 0xd90   : > { %10909 = vmatmul.msk.f32.gmra.mxu0 %vm1415_vm0, %v16180_v58  ;;  %v6575_v58 = vadd.f32 %v16433_v42, %v6574_v9 }
 0xd91   : > { %7045 = vmax.xlane.f32.xlu0 %v7044_v59  ;;  %7042 = vmax.xlane.f32.xlu2 %v7041_v36 }
 0xd95   : > { %v6589_v11 = vpop.f32.mrf.mxu0 }
 0xd96   : > { %v6590_v35 = vadd.f32 %v16433_v42, %v6589_v11  ;;  %v16553_v11 = vpop.f32.mrf.mxu2 }
 0xd98   : > { %10910 = vmatmul.msk.f32.gmra.mxu0 %vm1415_vm0, %v16192_v50  ;;  %7445 = vmatpush.msra.mxu1 %v6590_v35 }
 0xd99   : > { %7048 = vmax.xlane.f32.xlu2 %v7047_v52 }
 0xd9a   : > { %7446 = vmatpush.msra.mxu1 %v6587_v54 }
 0xd9c   : > { %7447 = vmatpush.msra.mxu1 %v6584_v6 }
 0xd9d   : > { %v16534_v51 = vpop.f32.mrf.mxu0 }
 0xd9e   : > { %7448 = vmatpush.msra.mxu1 %v6581_v32 }
 0xda0   : > { %7449 = vmatpush.msra.mxu1 %v6578_v38 }
 0xda2   : > { %7450 = vmatpush.msra.mxu1 %v6575_v58 }
 0xda4   : > { %7451 = vmatpush.msra.mxu1 %v6572_v0 }
 0xda5   : > { %v16541_v50 = vpop.f32.mrf.mxu0 }
 0xda6   : > { %7452 = vmatpush.msra.mxu1 %v6569_v19 }
 0xdad   : > { %v6598_v55 = vpop.f32.mrf.mxu0 }
 0xdb5   : > { %v6601_v48 = vpop.f32.mrf.mxu0 }
 0xdbd   : > { %v6604_v37 = vpop.f32.mrf.mxu0 }
 0xdc4   : > { %v7190_v56 = vpop.xlane.xlu0 %7189 }
 0xdc5   : > { %11611 = vrcp.f32 %v7190_v56  ;;  %v6607_v21 = vpop.f32.mrf.mxu0 }
 0xdcb   : > { %v11612_v3 = vpop.eup %11611 }
 0xdcc   : > { %v7316_v9 = vmul.f32 %v11612_v3, %v16411_v43  ;;  %v7022_v44 = vpop.xlane.xlu0 %7021  ;;  %v7193_v20 = vpop.xlane.xlu2 %7192 }
 0xdcd   : > { %v7100_v22 = vsub.f32 %v16406_v25, %v7022_v44  ;;  %11613 = vrcp.f32 %v7193_v20  ;;  %v6610_v25 = vpop.f32.mrf.mxu0  ;;  %v6605_v44 = vadd.f32 %v16433_v42, %v6604_v37  ;;  %v7050_v37 = vsel %vm2320_vm2, %v16553_v11, -inf }
 0xdce   : > { %10975 = vmatmul.msk.f32.vlgmr.msrb.gmra.mxu0 %vm2320_vm2, %v7316_v9  ;;  %v6611_v0 = vadd.f32 %v16433_v42, %v6610_v25 }
 0xdcf   : > { %v7140_v33 = vmul.f32 1.442695, %v7100_v22  ;;  %v16568_v22 = vpop.f32.mrf.mxu2 }
 0xdd1   : > { %11615 = vpow2.f32 %v7140_v33  ;;  %v6602_v33 = vadd.f32 %v16433_v42, %v6601_v48  ;;  %v6596_v48 = vadd.f32 %v16433_v42, %v16541_v50 }
 0xdd3   : > { %v11614_v7 = vpop.eup %11613 }
 0xdd4   : > { %v7025_v60 = vpop.xlane.xlu2 %7024  ;;  %v7196_v29 = vpop.xlane.xlu1 %7195  ;;  %v7317_v63 = vmul.f32 %v11614_v7, %v16420_v23 }
 0xdd5   : > { %v7101_v59 = vsub.f32 %v16415_v18, %v7025_v60  ;;  %11617 = vrcp.f32 %v7196_v29  ;;  %v6613_v38 = vpop.f32.mrf.mxu0 }
 0xdd6   : > { %10976 = vmatmul.msk.f32.gmra.mxu0 %vm2320_vm2, %v7317_v63  ;;  %v6614_v19 = vadd.f32 %v16433_v42, %v6613_v38  ;;  %v6593_v63 = vadd.f32 %v16433_v42, %v16534_v51 }
 0xdd7   : > { %v16549_v43 = vpop.eup %11615  ;;  %v7142_v36 = vmul.f32 1.442695, %v7101_v59  ;;  %v16590_v50 = vpop.f32.mrf.mxu2 }
 0xdd8   : > { %v7212_v12 = vsel %vm2320_vm2, %v16549_v43, 0.0  ;;  %7510 = vmatpush.msra.mxu2 %v6614_v19 }
 0xdd9   : > { %11619 = vpow2.f32 %v7142_v36  ;;  %7213 = vadd.xlane.f32.xlu1 %v7212_v12 }
 0xdda   : > { %7511 = vmatpush.msra.mxu2 %v6611_v0 }
 0xddb   : > { %v11618_v52 = vpop.eup %11617 }
 0xddc   : > { %v7199_v54 = vpop.xlane.xlu0 %7198  ;;  %v7028_v35 = vpop.xlane.xlu1 %7027  ;;  %v7318_v23 = vmul.f32 %v11618_v52, %v16436_v5  ;;  %v6608_v5 = vadd.f32 %v16433_v42, %v6607_v21 }
 0xddd   : > { %11621 = vrcp.f32 %v7199_v54  ;;  %v7102_v18 = vsub.f32 %v16428_v27, %v7028_v35  ;;  %v16574_v60 = vpop.f32.mrf.mxu0 }
 0xdde   : > { %10977 = vmatmul.msk.f32.gmra.mxu0 %vm2320_vm2, %v7318_v23  ;;  %7512 = vmatpush.msra.mxu2 %v6608_v5  ;;  %v7056_v5 = vsel %vm2320_vm2, %v16590_v50, -inf }
 0xddf   : > { %v16558_v6 = vpop.eup %11619  ;;  %v7144_v32 = vmul.f32 1.442695, %v7102_v18 }
 0xde0   : > { %v7215_v58 = vsel %vm2320_vm2, %v16558_v6, 0.0  ;;  %7513 = vmatpush.msra.mxu2 %v6605_v44 }
 0xde1   : > { %11623 = vpow2.f32 %v7144_v32  ;;  %7216 = vadd.xlane.f32.xlu1 %v7215_v58 }
 0xde2   : > { %7514 = vmatpush.msra.mxu2 %v6602_v33 }
 0xde3   : > { %v11622_v56 = vpop.eup %11621 }
 0xde4   : > { %v7031_v27 = vpop.xlane.xlu0 %7030  ;;  %v7202_v3 = vpop.xlane.xlu2 %7201  ;;  %v7319_v9 = vmul.f32 %v11622_v56, %v16450_v16  ;;  %v6599_v16 = vadd.f32 %v16433_v42, %v6598_v55 }
 0xde5   : > { %v7103_v20 = vsub.f32 %v16448_v10, %v7031_v27  ;;  %11625 = vrcp.f32 %v7202_v3  ;;  %v16592_v54 = vpop.f32.mrf.mxu0 }
 0xde6   : > { %10978 = vmatmul.msk.f32.gmra.mxu0 %vm2320_vm2, %v7319_v9  ;;  %7515 = vmatpush.msra.mxu2 %v6599_v16 }
 0xde7   : > { %v16572_v21 = vpop.eup %11623  ;;  %v7146_v7 = vmul.f32 1.442695, %v7103_v20 }
 0xde8   : > { %v7218_v10 = vsel %vm2320_vm2, %v16572_v21, 0.0  ;;  %7516 = vmatpush.msra.mxu2 %v6596_v48 }
 0xde9   : > { %11627 = vpow2.f32 %v7146_v7  ;;  %7051 = vmax.xlane.f32.xlu1 %v7050_v37  ;;  %7219 = vadd.xlane.f32.xlu0 %v7218_v10 }
 0xdea   : > { %7517 = vmatpush.msra.mxu2 %v6593_v63 }
 0xdeb   : > { %v11626_v29 = vpop.eup %11625 }
 0xdec   : > { %v7034_v59 = vpop.xlane.xlu2 %7033  ;;  %v7205_v55 = vpop.xlane.xlu1 %7204  ;;  %v7320_v36 = vmul.f32 %v11626_v29, %v16465_v26  ;;  %v7053_v26 = vsel %vm2320_vm2, %v16568_v22, -inf }
 0xded   : > { %v7104_v25 = vsub.f32 %v16469_v34, %v7034_v59  ;;  %11629 = vrcp.f32 %v7205_v55  ;;  %v16603_v0 = vpop.f32.mrf.mxu0 }
 0xdee   : > { %10979 = vmatmul.msk.f32.gmra.mxu0 %vm2320_vm2, %v7320_v36 }
 0xdef   : > { %v16588_v12 = vpop.eup %11627  ;;  %v7148_v52 = vmul.f32 1.442695, %v7104_v25 }
 0xdf0   : > { %v7221_v51 = vsel %vm2320_vm2, %v16588_v12, 0.0 }
 0xdf1   : > { %11631 = vpow2.f32 %v7148_v52  ;;  %7222 = vadd.xlane.f32.xlu2 %v7221_v51  ;;  %7054 = vmax.xlane.f32.xlu0 %v7053_v26 }
 0xdf3   : > { %v11630_v34 = vpop.eup %11629 }
 0xdf4   : > { %v7208_v35 = vpop.xlane.xlu0 %7207  ;;  %v7037_v23 = vpop.xlane.xlu1 %7036  ;;  %v7321_v18 = vmul.f32 %v11630_v34, %v16482_v39 }
 0xdf5   : > { %11633 = vrcp.f32 %v7208_v35  ;;  %v7105_v32 = vsub.f32 %v16488_v8, %v7037_v23  ;;  %v16609_v39 = vpop.f32.mrf.mxu2  ;;  %v6625_v33 = vpop.f32.mrf.mxu0 }
 0xdf6   : > { %10980 = vmatmul.msk.f32.gmra.mxu0 %vm2320_vm2, %v7321_v18  ;;  %v7059_v7 = vsel %vm2320_vm2, %v16609_v39, -inf }
 0xdf7   : > { %v16601_v38 = vpop.eup %11631  ;;  %v7150_v58 = vmul.f32 1.442695, %v7105_v32 }
 0xdf8   : > { %v7224_v19 = vsel %vm2320_vm2, %v16601_v38, 0.0 }
 0xdf9   : > { %11635 = vpow2.f32 %v7150_v58  ;;  %7225 = vadd.xlane.f32.xlu1 %v7224_v19  ;;  %7057 = vmax.xlane.f32.xlu2 %v7056_v5 }
 0xdfb   : > { %v11634_v56 = vpop.eup %11633 }
 0xdfc   : > { %v7040_v8 = vpop.xlane.xlu0 %7039  ;;  %v7211_v27 = vpop.xlane.xlu2 %7210  ;;  %v7322_v3 = vmul.f32 %v11634_v56, %v16493_v46 }
 0xdfd   : > { %v7106_v9 = vsub.f32 %v16501_v15, %v7040_v8  ;;  %11637 = vrcp.f32 %v7211_v27  ;;  %v16620_v46 = vpop.f32.mrf.mxu2  ;;  %v6628_v25 = vpop.f32.mrf.mxu0 }
 0xdfe   : > { %10981 = vmatmul.msk.f32.gmra.mxu0 %vm2320_vm2, %v7322_v3  ;;  %v7062_v51 = vsel %vm2320_vm2, %v16620_v46, -inf }
 0xdff   : > { %v16614_v44 = vpop.eup %11635  ;;  %v7152_v20 = vmul.f32 1.442695, %v7106_v9 }
 0xe00   : > { %v7227_v16 = vsel %vm2320_vm2, %v16614_v44, 0.0 }
 0xe01   : > { %11639 = vpow2.f32 %v7152_v20  ;;  %7060 = vmax.xlane.f32.xlu1 %v7059_v7  ;;  %7228 = vadd.xlane.f32.xlu0 %v7227_v16 }
 0xe03   : > { %v11638_v37 = vpop.eup %11637 }
 0xe04   : > { %v7046_v15 = vpop.xlane.xlu0 %7045  ;;  %v7043_v10 = vpop.xlane.xlu2 %7042  ;;  %v7323_v48 = vmul.f32 %v11638_v37, %v16503_v41  ;;  %v6629_v37 = vadd.f32 %v16433_v42, %v6628_v25 }
 0xe05   : > { %v7108_v29 = vsub.f32 %v16511_v47, %v7046_v15  ;;  %v7107_v63 = vsub.f32 %v16513_v30, %v7043_v10  ;;  %v16633_v30 = vpop.f32.mrf.mxu2  ;;  %v6631_v35 = vpop.f32.mrf.mxu0  ;;  %v6626_v15 = vadd.f32 %v16433_v42, %v6625_v33  ;;  %v6623_v10 = vadd.f32 %v16433_v42, %v16603_v0 }
 0xe06   : > { %10982 = vmatmul.msk.f32.gmra.mxu0 %vm2320_vm2, %v7323_v48  ;;  %v7065_v32 = vsel %vm2320_vm2, %v16633_v30, -inf  ;;  %v6632_v16 = vadd.f32 %v16433_v42, %v6631_v35  ;;  %v6620_v48 = vadd.f32 %v16433_v42, %v16592_v54 }
 0xe07   : > { %v16626_v59 = vpop.eup %11639  ;;  %v7156_v55 = vmul.f32 1.442695, %v7108_v29  ;;  %v7154_v36 = vmul.f32 1.442695, %v7107_v63  ;;  %v11007_v29 = vld [vmem:[%s18980_s10 + $0x18] sm:$0xff]  ;;  %v6617_v63 = vadd.f32 %v16433_v42, %v16574_v60 }
 0xe08   : > { %v7230_v52 = vsel %vm2320_vm2, %v16626_v59, 0.0  ;;  %7721 = vmatpush.msra.mxu0 %v11007_v29 }
 0xe09   : > { %11641 = vpow2.f32 %v7156_v55  ;;  %7231 = vadd.xlane.f32.xlu2 %v7230_v52  ;;  %7063 = vmax.xlane.f32.xlu0 %v7062_v51 }
 0xe0a   : > { %11643 = vpow2.f32 %v7154_v36 }
 0xe0c   : > { %v7049_v41 = vpop.xlane.xlu2 %7048 }
 0xe0d   : > { %v7109_v47 = vsub.f32 %v16521_v17, %v7049_v41  ;;  %v16645_v17 = vpop.f32.mrf.mxu3  ;;  %v6634_v5 = vpop.f32.mrf.mxu0 }
 0xe0e   : > { %v7068_v8 = vsel %vm2320_vm2, %v16645_v17, -inf  ;;  %v6635_v9 = vadd.f32 %v16433_v42, %v6634_v5 }
 0xe0f   : > { %v16635_v26 = vpop.eup %11641  ;;  %v7158_v34 = vmul.f32 1.442695, %v7109_v47 }
 0xe10   : > { %v16637_v23 = vpop.eup %11643  ;;  %v7236_v18 = vsel %vm2320_vm2, %v16635_v26, 0.0 }
 0xe11   : > { %11645 = vpow2.f32 %v7158_v34  ;;  %7237 = vadd.xlane.f32.xlu2 %v7236_v18  ;;  %v7233_v58 = vsel %vm2320_vm2, %v16637_v23, 0.0  ;;  %7066 = vmax.xlane.f32.xlu0 %v7065_v32 }
 0xe12   : > { %7234 = vadd.xlane.f32.xlu1 %v7233_v58 }
 0xe15   : > { %v16653_v27 = vpop.f32.mrf.mxu3  ;;  %v6637_v3 = vpop.f32.mrf.mxu0 }
 0xe16   : > { %v6638_v20 = vadd.f32 %v16433_v42, %v6637_v3  ;;  %v7071_v7 = vsel %vm2320_vm2, %v16653_v27, -inf }
 0xe17   : > { %v16647_v19 = vpop.eup %11645 }
 0xe18   : > { %v7239_v56 = vsel %vm2320_vm2, %v16647_v19, 0.0  ;;  %7575 = vmatpush.msrb.mxu3 %v6638_v20 }
 0xe19   : > { %7069 = vmax.xlane.f32.xlu2 %v7068_v8 }
 0xe1a   : > { %7240 = vadd.xlane.f32.xlu1 %v7239_v56  ;;  %7576 = vmatpush.msrb.mxu3 %v6635_v9 }
 0xe1c   : > { %7577 = vmatpush.msrb.mxu3 %v6632_v16 }
 0xe1d   : > { %v16679_v18 = vpop.f32.mrf.mxu3 }
 0xe1e   : > { %7578 = vmatpush.msrb.mxu3 %v6629_v37 }
 0xe20   : > { %7579 = vmatpush.msrb.mxu3 %v6626_v15 }
 0xe22   : > { %7072 = vmax.xlane.f32.xlu1 %v7071_v7  ;;  %7580 = vmatpush.msrb.mxu3 %v6623_v10 }
 0xe24   : > { %7581 = vmatpush.msrb.mxu3 %v6620_v48  ;;  %v7074_v48 = vsel %vm2320_vm2, %v16679_v18, -inf }
 0xe25   : > { %v16692_v16 = vpop.f32.mrf.mxu3 }
 0xe26   : > { %7582 = vmatpush.msrb.mxu3 %v6617_v63 }
 0xe4b   : > { %v7389_v33 = vpop.f32.mrf.mxu0 }
 0xe4c   : > { %11008 = vmatmul.msk.f32.vlgmr.msra.gmra.mxu0 %vm1963_vm1, %v7389_v33  ;;  %v7214_v0 = vpop.xlane.xlu1 %7213 }
 0xe4d   : > { %11647 = vrcp.f32 %v7214_v0 }
 0xe53   : > { %v11648_v55 = vpop.eup %11647  ;;  %v7392_v36 = vpop.f32.mrf.mxu0 }
 0xe54   : > { %v7324_v54 = vmul.f32 %v11648_v55, %v16549_v43  ;;  %11009 = vmatmul.msk.f32.gmra.mxu0 %vm1963_vm1, %v7392_v36  ;;  %v7217_v25 = vpop.xlane.xlu1 %7216 }
 0xe55   : > { %11649 = vrcp.f32 %v7217_v25 }
 0xe56   : > { %10983 = vmatmul.msk.f32.vlgmr.msra.gmra.mxu1 %vm2320_vm2, %v7324_v54  ;;  %v16707_v54 = vpop.f32.mrf.mxu3 }
 0xe5b   : > { %v11650_v42 = vpop.eup %11649  ;;  %v7395_v60 = vpop.f32.mrf.mxu0 }
 0xe5c   : > { %v7220_v52 = vpop.xlane.xlu0 %7219  ;;  %11010 = vmatmul.msk.f32.gmra.mxu0 %vm1963_vm1, %v7395_v60  ;;  %v7052_v51 = vpop.xlane.xlu1 %7051  ;;  %v7325_v41 = vmul.f32 %v11650_v42, %v16558_v6  ;;  %v7077_v42 = vsel %vm2320_vm2, %v16692_v16, -inf }
 0xe5d   : > { %11651 = vrcp.f32 %v7220_v52  ;;  %v7110_v47 = vsub.f32 %v16553_v11, %v7052_v51 }
 0xe5e   : > { %10984 = vmatmul.msk.f32.gmra.mxu1 %vm2320_vm2, %v7325_v41 }
 0xe5f   : > { %v7160_v43 = vmul.f32 1.442695, %v7110_v47 }
 0xe61   : > { %11653 = vpow2.f32 %v7160_v43 }
 0xe63   : > { %v11652_v34 = vpop.eup %11651  ;;  %v7398_v35 = vpop.f32.mrf.mxu0 }
 0xe64   : > { %v7223_v32 = vpop.xlane.xlu2 %7222  ;;  %v7055_v58 = vpop.xlane.xlu0 %7054  ;;  %11011 = vmatmul.msk.f32.gmra.mxu0 %vm1963_vm1, %v7398_v35  ;;  %v7326_v5 = vmul.f32 %v11652_v34, %v16572_v21  ;;  %v7080_v35 = vsel %vm2320_vm2, %v16707_v54, -inf }
 0xe65   : > { %11655 = vrcp.f32 %v7223_v32  ;;  %v7111_v6 = vsub.f32 %v16568_v22, %v7055_v58  ;;  %v16723_v32 = vpop.f32.mrf.mxu3 }
 0xe66   : > { %10985 = vmatmul.msk.f32.gmra.mxu1 %vm2320_vm2, %v7326_v5 }
 0xe67   : > { %v16685_v11 = vpop.eup %11653  ;;  %v7162_v56 = vmul.f32 1.442695, %v7111_v6 }
 0xe68   : > { %v7242_v8 = vsel %vm2320_vm2, %v16685_v11, 0.0 }
 0xe69   : > { %11657 = vpow2.f32 %v7162_v56  ;;  %7243 = vadd.xlane.f32.xlu0 %v7242_v8 }
 0xe6b   : > { %v11656_v3 = vpop.eup %11655  ;;  %v7401_v9 = vpop.f32.mrf.mxu0 }
 0xe6c   : > { %v7058_v20 = vpop.xlane.xlu2 %7057  ;;  %11012 = vmatmul.msk.f32.gmra.mxu0 %vm1963_vm1, %v7401_v9  ;;  %v7226_v7 = vpop.xlane.xlu1 %7225  ;;  %v7327_v21 = vmul.f32 %v11656_v3, %v16588_v12 }
 0xe6d   : > { %v7112_v22 = vsub.f32 %v16590_v50, %v7058_v20  ;;  %11659 = vrcp.f32 %v7226_v7  ;;  %v7083_v7 = vsel %vm2320_vm2, %v16723_v32, -inf }
 0xe6e   : > { %10986 = vmatmul.msk.f32.gmra.mxu1 %vm2320_vm2, %v7327_v21  ;;  %v16735_v21 = vpop.f32.mrf.mxu3 }
 0xe6f   : > { %v16695_v37 = vpop.eup %11657  ;;  %v7164_v15 = vmul.f32 1.442695, %v7112_v22 }
 0xe70   : > { %v7245_v10 = vsel %vm2320_vm2, %v16695_v37, 0.0 }
 0xe71   : > { %11661 = vpow2.f32 %v7164_v15  ;;  %7246 = vadd.xlane.f32.xlu2 %v7245_v10  ;;  %7075 = vmax.xlane.f32.xlu0 %v7074_v48 }
 0xe73   : > { %v11660_v12 = vpop.eup %11659  ;;  %v7404_v29 = vpop.f32.mrf.mxu0 }
 0xe74   : > { %11013 = vmatmul.msk.f32.gmra.mxu0 %vm1963_vm1, %v7404_v29  ;;  %v7229_v50 = vpop.xlane.xlu0 %7228  ;;  %v7061_v63 = vpop.xlane.xlu1 %7060  ;;  %v7328_v33 = vmul.f32 %v11660_v12, %v16601_v38 }
 0xe75   : > { %11663 = vrcp.f32 %v7229_v50  ;;  %v7113_v0 = vsub.f32 %v16609_v39, %v7061_v63 }
 0xe76   : > { %10987 = vmatmul.msk.f32.gmra.mxu1 %vm2320_vm2, %v7328_v33 }
 0xe77   : > { %v16705_v55 = vpop.eup %11661  ;;  %v7166_v36 = vmul.f32 1.442695, %v7113_v0  ;;  %v16749_v0 = vpop.f32.mrf.mxu3 }
 0xe78   : > { %v7248_v25 = vsel %vm2320_vm2, %v16705_v55, 0.0 }
 0xe79   : > { %11665 = vpow2.f32 %v7166_v36  ;;  %7249 = vadd.xlane.f32.xlu1 %v7248_v25  ;;  %7078 = vmax.xlane.f32.xlu2 %v7077_v42 }
 0xe7b   : > { %v11664_v38 = vpop.eup %11663  ;;  %v7407_v60 = vpop.f32.mrf.mxu0 }
 0xe7c   : > { %v7232_v52 = vpop.xlane.xlu2 %7231  ;;  %11014 = vmatmul.msk.f32.gmra.mxu0 %vm1963_vm1, %v7407_v60  ;;  %v7064_v39 = vpop.xlane.xlu0 %7063  ;;  %v7329_v51 = vmul.f32 %v11664_v38, %v16614_v44  ;;  %v7089_v60 = vsel %vm2320_vm2, %v16749_v0, -inf }
 0xe7d   : > { %11667 = vrcp.f32 %v7232_v52  ;;  %v7114_v41 = vsub.f32 %v16620_v46, %v7064_v39 }
 0xe7e   : > { %10988 = vmatmul.msk.f32.gmra.mxu1 %vm2320_vm2, %v7329_v51 }
 0xe7f   : > { %v16717_v47 = vpop.eup %11665  ;;  %v7168_v43 = vmul.f32 1.442695, %v7114_v41 }
 0xe80   : > { %v7251_v34 = vsel %vm2320_vm2, %v16717_v47, 0.0 }
 0xe81   : > { %11669 = vpow2.f32 %v7168_v43  ;;  %7252 = vadd.xlane.f32.xlu0 %v7251_v34  ;;  %7081 = vmax.xlane.f32.xlu1 %v7080_v35 }
 0xe83   : > { %v11668_v44 = vpop.eup %11667  ;;  %v7410_v58 = vpop.f32.mrf.mxu0 }
 0xe84   : > { %v7238_v5 = vpop.xlane.xlu2 %7237  ;;  %11015 = vmatmul.msk.f32.gmra.mxu0 %vm1963_vm1, %v7410_v58  ;;  %v7067_v46 = vpop.xlane.xlu0 %7066  ;;  %v7330_v6 = vmul.f32 %v11668_v44, %v16626_v59 }
 0xe85   : > { %11671 = vrcp.f32 %v7238_v5  ;;  %v7115_v56 = vsub.f32 %v16633_v30, %v7067_v46  ;;  %v7235_v8 = vpop.xlane.xlu1 %7234 }
 0xe86   : > { %11673 = vrcp.f32 %v7235_v8  ;;  %10989 = vmatmul.msk.f32.gmra.mxu1 %vm2320_vm2, %v7330_v6 }
 0xe87   : > { %v16729_v3 = vpop.eup %11669  ;;  %v7170_v9 = vmul.f32 1.442695, %v7115_v56 }
 0xe88   : > { %v7254_v20 = vsel %vm2320_vm2, %v16729_v3, 0.0 }
 0xe89   : > { %11675 = vpow2.f32 %v7170_v9  ;;  %7255 = vadd.xlane.f32.xlu2 %v7254_v20  ;;  %7084 = vmax.xlane.f32.xlu0 %v7083_v7 }
 0xe8b   : > { %v11672_v59 = vpop.eup %11671 }
 0xe8c   : > { %v11674_v30 = vpop.eup %11673  ;;  %v7332_v22 = vmul.f32 %v11672_v59, %v16635_v26  ;;  %v7070_v15 = vpop.xlane.xlu2 %7069  ;;  %v7086_v26 = vsel %vm2320_vm2, %v16735_v21, -inf }
 0xe8d   : > { %v7241_v10 = vpop.xlane.xlu1 %7240  ;;  %v7116_v48 = vsub.f32 %v16645_v17, %v7070_v15  ;;  %v7331_v12 = vmul.f32 %v11674_v30, %v16637_v23 }
 0xe8e   : > { %11677 = vrcp.f32 %v7241_v10  ;;  %10991 = vmatmul.msk.f32.vlgmr.msra.gmra.mxu2 %vm2320_vm2, %v7332_v22 }
 0xe8f   : > { %v16741_v29 = vpop.eup %11675  ;;  %v7172_v50 = vmul.f32 1.442695, %v7116_v48  ;;  %10990 = vmatmul.msk.f32.gmra.mxu1 %vm2320_vm2, %v7331_v12 }
 0xe90   : > { %v7257_v63 = vsel %vm2320_vm2, %v16741_v29, 0.0 }
 0xe91   : > { %11679 = vpow2.f32 %v7172_v50  ;;  %7258 = vadd.xlane.f32.xlu1 %v7257_v63  ;;  %7087 = vmax.xlane.f32.xlu2 %v7086_v26 }
 0xe94   : > { %v11678_v17 = vpop.eup %11677 }
 0xe95   : > { %v7073_v33 = vpop.xlane.xlu1 %7072  ;;  %v7333_v23 = vmul.f32 %v11678_v17, %v16647_v19 }
 0xe96   : > { %v7117_v36 = vsub.f32 %v16653_v27, %v7073_v33 }
 0xe97   : > { %v16752_v25 = vpop.eup %11679  ;;  %10992 = vmatmul.msk.f32.gmra.mxu2 %vm2320_vm2, %v7333_v23 }
 0xe98   : > { %v7174_v42 = vmul.f32 1.442695, %v7117_v36  ;;  %v7260_v38 = vsel %vm2320_vm2, %v16752_v25, 0.0 }
 0xe99   : > { %7261 = vadd.xlane.f32.xlu0 %v7260_v38  ;;  %7090 = vmax.xlane.f32.xlu1 %v7089_v60  ;;  %v19277_v60 = vld [vmem:[#allocation35_spill] sm:$0xff] }
 0xe9a   : > { %11681 = vpow2.f32 %v7174_v42 }
 0xea0   : > { %v16759_v52 = vpop.eup %11681 }
 0xea1   : > { %v7263_v19 = vsel %vm2320_vm2, %v16759_v52, 0.0 }
 0xea2   : > { %7264 = vadd.xlane.f32.xlu2 %v7263_v19  ;;  %v19278_v19 = vld [vmem:[#allocation36_spill] sm:$0xff] }
 0xec9   : > { %v7723_v41 = vpop.f32.mrf.mxu0 }
 0xed1   : > { %v16769_v46 = vpop.f32.mrf.mxu0 }
 0xed3   : > { %v7454_v27 = vpop.f32.mrf.mxu1 }
 0xed4   : > { %11016 = vmatmul.msk.f32.gmra.mxu0 %vm1963_vm1, %v7454_v27  ;;  %v4596_v27 = vadd.f32 %v19278_v19, %v19277_v60  ;;  %v19285_v19 = vld [vmem:[#allocation50_spill] sm:$0xff] }
 0xed9   : > { %v16779_v22 = vpop.f32.mrf.mxu0 }
 0xedb   : > { %v7457_v39 = vpop.f32.mrf.mxu1 }
 0xedc   : > { %11017 = vmatmul.msk.f32.gmra.mxu0 %vm1963_vm1, %v7457_v39  ;;  %v7244_v51 = vpop.xlane.xlu0 %7243 }
 0xedd   : > { %11683 = vrcp.f32 %v7244_v51 }
 0xee1   : > { %v7732_v33 = vpop.f32.mrf.mxu0 }
 0xee3   : > { %v11684_v43 = vpop.eup %11683  ;;  %v7460_v34 = vpop.f32.mrf.mxu1 }
 0xee4   : > { %11018 = vmatmul.msk.f32.gmra.mxu0 %vm1963_vm1, %v7460_v34  ;;  %v7247_v35 = vpop.xlane.xlu2 %7246  ;;  %v7076_v44 = vpop.xlane.xlu0 %7075  ;;  %v7334_v58 = vmul.f32 %v11684_v43, %v16685_v11  ;;  %v6239_v43 = vadd.f32 %v15821_v28, %v4596_v27  ;;  %v19286_v27 = vld [vmem:[#allocation37_spill] sm:$0xff] }
 0xee5   : > { %11685 = vrcp.f32 %v7247_v35  ;;  %v7118_v5 = vsub.f32 %v16679_v18, %v7076_v44 }
 0xee6   : > { %10993 = vmatmul.msk.f32.gmra.mxu2 %vm2320_vm2, %v7334_v58 }
 0xee7   : > { %v7176_v6 = vmul.f32 1.442695, %v7118_v5 }
 0xee9   : > { %11687 = vpow2.f32 %v7176_v6  ;;  %v7735_v6 = vpop.f32.mrf.mxu0 }
 0xeeb   : > { %v11686_v56 = vpop.eup %11685  ;;  %v7463_v8 = vpop.f32.mrf.mxu1 }
 0xeec   : > { %11019 = vmatmul.msk.f32.gmra.mxu0 %vm1963_vm1, %v7463_v8  ;;  %v7250_v9 = vpop.xlane.xlu1 %7249  ;;  %v7079_v20 = vpop.xlane.xlu2 %7078  ;;  %v7335_v7 = vmul.f32 %v11686_v56, %v16695_v37 }
 0xeed   : > { %11689 = vrcp.f32 %v7250_v9  ;;  %v7119_v11 = vsub.f32 %v16692_v16, %v7079_v20  ;;  %v19279_v9 = vld [vmem:[#allocation48_spill] sm:$0xff]  ;;  %v19280_v20 = vld [vmem:[#allocation2_spill] sm:$0xff] }
 0xeee   : > { %10994 = vmatmul.msk.f32.gmra.mxu2 %vm2320_vm2, %v7335_v7  ;;  %v4599_v7 = vadd.f32 %v19280_v20, %v19279_v9 }
 0xeef   : > { %v16775_v18 = vpop.eup %11687  ;;  %v7178_v59 = vmul.f32 1.442695, %v7119_v11  ;;  %v19281_v11 = vld [vmem:[#allocation38_spill] sm:$0xff] }
 0xef0   : > { %v7266_v30 = vsel %vm2320_vm2, %v16775_v18, 0.0 }
 0xef1   : > { %11691 = vpow2.f32 %v7178_v59  ;;  %7267 = vadd.xlane.f32.xlu0 %v7266_v30  ;;  %v19282_v59 = vld [vmem:[#allocation3_spill] sm:$0xff] }
 0xef2   : > { %v4605_v30 = vadd.f32 %v19282_v59, %v19281_v11  ;;  %v19289_v11 = vld [vmem:[#allocation43_spill] sm:$0xff]  ;;  %v19290_v59 = vld [vmem:[#allocation4_spill] sm:$0xff] }
 0xef3   : > { %v11690_v15 = vpop.eup %11689  ;;  %v7466_v10 = vpop.f32.mrf.mxu1 }
 0xef4   : > { %11020 = vmatmul.msk.f32.gmra.mxu0 %vm1963_vm1, %v7466_v10  ;;  %v7253_v37 = vpop.xlane.xlu0 %7252  ;;  %v7082_v48 = vpop.xlane.xlu1 %7081  ;;  %v7336_v16 = vmul.f32 %v11690_v15, %v16705_v55  ;;  %v6242_v15 = vadd.f32 %v15864_v57, %v4605_v30  ;;  %v19283_v57 = vld [vmem:[#allocation40_spill] sm:$0xff]  ;;  %v4611_v30 = vadd.f32 %v19290_v59, %v19289_v11 }
 0xef5   : > { %11693 = vrcp.f32 %v7253_v37  ;;  %v7120_v12 = vsub.f32 %v16707_v54, %v7082_v48  ;;  %v11951_v37 = vld [vmem:[%s12222_s0] sm:$0xff] }
 0xef6   : > { %10995 = vmatmul.msk.f32.gmra.mxu2 %vm2320_vm2, %v7336_v16 }
 0xef7   : > { %v16785_v50 = vpop.eup %11691  ;;  %v7180_v63 = vmul.f32 1.442695, %v7120_v12  ;;  %v7822_v12 = vadd.f32 %v7732_v33, %v6242_v15 }
 0xef8   : > { %v7269_v26 = vsel %vm2320_vm2, %v16785_v50, 0.0 }
 0xef9   : > { %11695 = vpow2.f32 %v7180_v63  ;;  %7270 = vadd.xlane.f32.xlu1 %v7269_v26 }
 0xefb   : > { %v11694_v17 = vpop.eup %11693  ;;  %v7469_v23 = vpop.f32.mrf.mxu1 }
 0xefc   : > { %11021 = vmatmul.msk.f32.gmra.mxu0 %vm1963_vm1, %v7469_v23  ;;  %v7256_v36 = vpop.xlane.xlu2 %7255  ;;  %v7085_v55 = vpop.xlane.xlu0 %7084  ;;  %v7337_v42 = vmul.f32 %v11694_v17, %v16717_v47  ;;  %v7819_v47 = vadd.f32 %v7723_v41, %v6239_v43 }
 0xefd   : > { %11697 = vrcp.f32 %v7256_v36  ;;  %v7121_v54 = vsub.f32 %v16723_v32, %v7085_v55  ;;  %v16803_v32 = vld [vmem:[%s18981_s11] ss:$0 sm:$0xff]  ;;  %v19284_v55 = vld [vmem:[#allocation28_spill] sm:$0xff] }
 0xefe   : > { %10996 = vmatmul.msk.f32.gmra.mxu2 %vm2320_vm2, %v7337_v42  ;;  %v7855_v56 = vadd.f32 %v16803_v32, %v7819_v47  ;;  %v4608_v42 = vadd.f32 %v19284_v55, %v19283_v57  ;;  %v7858_v33 = vadd.f32 %v16803_v32, %v7822_v12  ;;  %v11955_v57 = vld [vmem:[%s12222_s0 + $0x10] sm:$0xff] }
 0xeff   : > { %v16793_v38 = vpop.eup %11695  ;;  %v7182_v39 = vmul.f32 1.442695, %v7121_v54  ;;  %v7738_v54 = vpop.f32.mrf.mxu0 }
 0xf00   : > { %v7272_v51 = vsel %vm2320_vm2, %v16793_v38, 0.0  ;;  %v16821_v48 = vadd.f32 %v11951_v37, %v7855_v56  ;;  %v6244_v37 = vadd.f32 %v15888_v40, %v4611_v30 }
 0xf01   : > { %11699 = vpow2.f32 %v7182_v39  ;;  %7273 = vadd.xlane.f32.xlu2 %v7272_v51  ;;  %v4602_v39 = vadd.f32 %v19286_v27, %v19285_v19  ;;  %v6243_v51 = vadd.f32 %v15875_v24, %v4608_v42 }
 0xf03   : > { %v11698_v34 = vpop.eup %11697  ;;  %v7472_v35 = vpop.f32.mrf.mxu1  ;;  %v6241_v47 = vadd.f32 %v15852_v62, %v4602_v39  ;;  %v19287_v62 = vld [vmem:[#allocation45_spill] sm:$0xff]  ;;  %v12003_v39 = vmov 32.0  }
 0xf04   : > { %11022 = vmatmul.msk.f32.gmra.mxu0 %vm1963_vm1, %v7472_v35  ;;  %v7259_v44 = vpop.xlane.xlu1 %7258  ;;  %v7088_v58 = vpop.xlane.xlu2 %7087  ;;  %v7338_v5 = vmul.f32 %v11698_v34, %v16729_v3  ;;  %v7823_v35 = vadd.f32 %v7735_v6, %v6243_v51  ;;  %v19288_v6 = vld [vmem:[#allocation29_spill] sm:$0xff] }
 0xf05   : > { %11701 = vrcp.f32 %v7259_v44  ;;  %v7122_v28 = vsub.f32 %v16735_v21, %v7088_v58  ;;  %v6240_v21 = vadd.f32 %v15833_v31, %v4599_v7  ;;  %v11952_v58 = vld [vmem:[%s12222_s0 + $0x18] sm:$0xff]  ;;  %v4614_v20 = vadd.f32 %v19288_v6, %v19287_v62 }
 0xf06   : > { %10997 = vmatmul.msk.f32.gmra.mxu2 %vm2320_vm2, %v7338_v5  ;;  %v16844_v5 = vadd.f32 %v11952_v58, %v7858_v33 }
 0xf07   : > { %v16809_v41 = vpop.eup %11699  ;;  %v7184_v8 = vmul.f32 1.442695, %v7122_v28  ;;  %v7820_v16 = vadd.f32 %v16769_v46, %v6240_v21  ;;  %v7919_v46 = vsel %vm1415_vm0, %v16821_v48, 0.0  ;;  %v11953_v28 = vld [vmem:[%s12222_s0 + $0x8] sm:$0xff]  ;;  %v7741_v21 = vpop.f32.mrf.mxu0 }
 0xf08   : > { %v7275_v3 = vsel %vm2320_vm2, %v16809_v41, 0.0  ;;  %v7928_v7 = vsel %vm1415_vm0, %v16844_v5, 0.0 }
 0xf09   : > { %11703 = vpow2.f32 %v7184_v8  ;;  %7276 = vadd.xlane.f32.xlu0 %v7275_v3  ;;  %v7821_v8 = vadd.f32 %v16779_v22, %v6241_v47 }
 0xf0b   : > { %v11702_v10 = vpop.eup %11701  ;;  %v7857_v3 = vadd.f32 %v16803_v32, %v7821_v8 }
 0xf0c   : > { %v7475_v63 = vpop.f32.mrf.mxu1  ;;  %v7262_v26 = vpop.xlane.xlu0 %7261  ;;  %v7339_v17 = vmul.f32 %v11702_v10, %v16741_v29  ;;  %v7856_v29 = vadd.f32 %v16803_v32, %v7820_v16  ;;  %v6245_v10 = vadd.f32 %v15907_v45, %v4614_v20 }
 0xf0d   : > { %11023 = vmatmul.msk.f32.gmra.mxu0 %vm1963_vm1, %v7475_v63  ;;  %11705 = vrcp.f32 %v7262_v26  ;;  %v7091_v23 = vpop.xlane.xlu1 %7090  ;;  %v11954_v26 = vld [vmem:[%s12222_s0 + $0x20] sm:$0xff]  ;;  %v16874_v55 = vadd.f32 %v11955_v57, %v7857_v3 }
 0xf0e   : > { %v7123_v36 = vsub.f32 %v16749_v0, %v7091_v23  ;;  %10998 = vmatmul.msk.f32.gmra.mxu2 %vm2320_vm2, %v7339_v17  ;;  %v16847_v56 = vadd.f32 %v11953_v28, %v7856_v29  ;;  %v7825_v12 = vadd.f32 %v7741_v21, %v6245_v10  ;;  %v7824_v23 = vadd.f32 %v7738_v54, %v6244_v37  ;;  %v19291_v21 = vld [vmem:[#allocation53_spill] sm:$0xff] }
 0xf0f   : > { %v16828_v31 = vpop.eup %11703  ;;  %v7925_v54 = vsel %vm1415_vm0, %v16874_v55, 0.0  ;;  %v7744_v51 = vpop.f32.mrf.mxu0 }
 0xf10   : > { %v7186_v60 = vmul.f32 1.442695, %v7123_v36  ;;  %v7278_v0 = vsel %vm2320_vm2, %v16828_v31, 0.0  ;;  %v7922_v22 = vsel %vm1415_vm0, %v16847_v56, 0.0  ;;  %v7861_v40 = vadd.f32 %v16803_v32, %v7825_v12 }
 0xf11   : > { %7920 = vadd.xlane.f32.xlu0 %v7919_v46  ;;  %7279 = vadd.xlane.f32.xlu1 %v7278_v0  ;;  %v7519_v43 = vpop.f32.mrf.mxu2  ;;  %v7860_v42 = vadd.f32 %v16803_v32, %v7824_v23  ;;  %v11956_v46 = vld [vmem:[%s12222_s0 + $0x30] sm:$0xff] }
 0xf12   : > { %11707 = vpow2.f32 %v7186_v60  ;;  %v16884_v29 = vadd.f32 %v11956_v46, %v7861_v40 }
 0xf13   : > { %v11706_v34 = vpop.eup %11705 }
 0xf14   : > { %v7340_v44 = vmul.f32 %v11706_v34, %v16752_v25  ;;  %v7859_v25 = vadd.f32 %v16803_v32, %v7823_v35  ;;  %v7937_v60 = vsel %vm1415_vm0, %v16884_v29, 0.0 }
 0xf15   : > { %11024 = vmatmul.msk.f32.gmra.mxu0 %vm1963_vm1, %v7519_v43  ;;  %v7265_v9 = vpop.xlane.xlu2 %7264 }
 0xf16   : > { %11709 = vrcp.f32 %v7265_v9  ;;  %10999 = vmatmul.msk.f32.vlgmr.msrb.gmra.mxu3 %vm2320_vm2, %v7340_v44  ;;  %v16869_v17 = vadd.f32 %v11954_v26, %v7859_v25 }
 0xf18   : > { %v16852_v24 = vpop.eup %11707  ;;  %v7931_v45 = vsel %vm1415_vm0, %v16869_v17, 0.0 }
 0xf19   : > { %7929 = vadd.xlane.f32.xlu0 %v7928_v7  ;;  %7923 = vadd.xlane.f32.xlu1 %v7922_v22  ;;  %v7281_v15 = vsel %vm2320_vm2, %v16852_v24, 0.0 }
 0xf1a   : > { %7282 = vadd.xlane.f32.xlu2 %v7281_v15  ;;  %v7522_v63 = vpop.f32.mrf.mxu2  ;;  %v19292_v15 = vld [vmem:[#allocation30_spill] sm:$0xff] }
 0xf1b   : > { %v4617_v10 = vadd.f32 %v19292_v15, %v19291_v21 }
 0xf1c   : > { %v11710_v16 = vpop.eup %11709 }
 0xf1d   : > { %11025 = vmatmul.msk.f32.gmra.mxu0 %vm1963_vm1, %v7522_v63  ;;  %v7341_v36 = vmul.f32 %v11710_v16, %v16759_v52  ;;  %v11957_v52 = vld [vmem:[%s12222_s0 + $0x28] sm:$0xff] }
 0xf1e   : > { %v16887_v33 = vadd.f32 %v11957_v52, %v7860_v42  ;;  %v19294_v42 = vld [vmem:[#allocation31_spill] sm:$0xff] }
 0xf1f   : > { %11000 = vmatmul.msk.f32.gmra.mxu3 %vm2320_vm2, %v7341_v36 }
 0xf20   : > { %v7934_v0 = vsel %vm1415_vm0, %v16887_v33, 0.0 }
 0xf21   : > { %7932 = vadd.xlane.f32.xlu1 %v7931_v45 }
 0xf22   : > { %7926 = vadd.xlane.f32.xlu2 %v7925_v54 }
 0xf29   : > { %7938 = vadd.xlane.f32.xlu1 %v7937_v60 }
 0xf2a   : > { %7935 = vadd.xlane.f32.xlu2 %v7934_v0  ;;  %v19295_v0 = vld [vmem:[#allocation5_spill] sm:$0xff] }
 0xf51   : > { %v7747_v58 = vpop.f32.mrf.mxu0 }
 0xf59   : > { %v16900_v7 = vpop.f32.mrf.mxu0 }
 0xf61   : > { %v7753_v26 = vpop.f32.mrf.mxu0 }
 0xf64   : > { %v7268_v19 = vpop.xlane.xlu0 %7267 }
 0xf65   : > { %11711 = vrcp.f32 %v7268_v19 }
 0xf66   : > { %11713 = vrcp.f32 %v12003_v39 }
 0xf69   : > { %v7525_v27 = vpop.f32.mrf.mxu2 }
 0xf6a   : > { %11026 = vmatmul.msk.f32.gmra.mxu0 %vm1963_vm1, %v7525_v27 }
 0xf6b   : > { %v11712_v43 = vpop.eup %11711 }
 0xf6c   : > { %v7271_v34 = vpop.xlane.xlu1 %7270  ;;  %v7342_v47 = vmul.f32 %v11712_v43, %v16775_v18  ;;  %v11714_v35 = vpop.eup %11713 }
 0xf6d   : > { %11715 = vrcp.f32 %v7271_v34  ;;  %v8016_v28 = vmul.f32 32.0, %v11714_v35  ;;  %vm8020_vm3 = vweird.f32 %v11714_v35 }
 0xf6e   : > { %11001 = vmatmul.msk.f32.gmra.mxu3 %vm2320_vm2, %v7342_v47  ;;  %v11958_v47 = vld [vmem:[%s12222_s0 + $0x38] sm:$0xff] }
 0xf6f   : > { %v8017_v6 = vsub.f32 1.0, %v8016_v28 }
 0xf71   : > { %v7528_v44 = vpop.f32.mrf.mxu2  ;;  %v8018_v18 = vmul.f32 %v11714_v35, %v8017_v6 }
 0xf72   : > { %11027 = vmatmul.msk.f32.gmra.mxu0 %vm1963_vm1, %v7528_v44  ;;  %v7756_v44 = vpop.f32.mrf.mxu0 }
 0xf73   : > { %v11716_v8 = vpop.eup %11715  ;;  %v8019_v59 = vadd.f32 %v11714_v35, %v8018_v18 }
 0xf74   : > { %v7274_v9 = vpop.xlane.xlu2 %7273  ;;  %v7343_v62 = vmul.f32 %v11716_v8, %v16785_v50  ;;  %v19296_v8 = vld [vmem:[#allocation59_spill] sm:$0xff] }
 0xf75   : > { %11717 = vrcp.f32 %v7274_v9  ;;  %v16905_v30 = vsel %vm8020_vm3, %v11714_v35, %v8019_v59  ;;  %v19297_v9 = vld [vmem:[#allocation33_spill] sm:$0xff] }
 0xf76   : > { %11002 = vmatmul.msk.f32.gmra.mxu3 %vm2320_vm2, %v7343_v62  ;;  %v4626_v62 = vadd.f32 %v19297_v9, %v19296_v8  ;;  %v19305_v9 = vld [vmem:[#allocation66_spill] sm:$0xff] }
 0xf79   : > { %v7531_v20 = vpop.f32.mrf.mxu2 }
 0xf7a   : > { %11028 = vmatmul.msk.f32.gmra.mxu0 %vm1963_vm1, %v7531_v20 }
 0xf7b   : > { %v11718_v25 = vpop.eup %11717 }
 0xf7c   : > { %v7277_v22 = vpop.xlane.xlu0 %7276  ;;  %v7344_v11 = vmul.f32 %v11718_v25, %v16793_v38  ;;  %v6246_v38 = vadd.f32 %v15916_v4, %v4617_v10  ;;  %v19298_v25 = vld [vmem:[#allocation57_spill] sm:$0xff] }
 0xf7d   : > { %11719 = vrcp.f32 %v7277_v22  ;;  %v19299_v22 = vld [vmem:[#allocation32_spill] sm:$0xff] }
 0xf7e   : > { %11003 = vmatmul.msk.f32.gmra.mxu3 %vm2320_vm2, %v7344_v11  ;;  %v7826_v23 = vadd.f32 %v7744_v51, %v6246_v38  ;;  %v4623_v11 = vadd.f32 %v19299_v22, %v19298_v25  ;;  %v19307_v22 = vld [vmem:[#allocation64_spill] sm:$0xff] }
 0xf80   : > { %v7862_v54 = vadd.f32 %v16803_v32, %v7826_v23 }
 0xf81   : > { %v7534_v50 = vpop.f32.mrf.mxu2 }
 0xf82   : > { %11029 = vmatmul.msk.f32.gmra.mxu0 %vm1963_vm1, %v7534_v50  ;;  %v16932_v35 = vadd.f32 %v11958_v47, %v7862_v54  ;;  %v19300_v50 = vld [vmem:[#allocation8_spill] sm:$0xff] }
 0xf83   : > { %v11720_v3 = vpop.eup %11719 }
 0xf84   : > { %v7921_v37 = vpop.xlane.xlu0 %7920  ;;  %v7280_v16 = vpop.xlane.xlu1 %7279  ;;  %v7345_v12 = vmul.f32 %v11720_v3, %v16809_v41  ;;  %v19293_v41 = vld [vmem:[#allocation55_spill] sm:$0xff]  ;;  %v6249_v3 = vadd.f32 %v19300_v50, %v4626_v62 }
 0xf85   : > { %v8022_v63 = vmul.f32 %v16905_v30, %v7921_v37  ;;  %11721 = vrcp.f32 %v7280_v16  ;;  %v4620_v4 = vadd.f32 %v19294_v42, %v19293_v41  ;;  %v19303_v41 = vld [vmem:[#allocation34_spill] sm:$0xff]  ;;  %v19306_v62 = vld [vmem:[#allocation47_spill] sm:$0xff] }
 0xf86   : > { %11004 = vmatmul.msk.f32.gmra.mxu3 %vm2320_vm2, %v7345_v12  ;;  %v7829_v16 = vadd.f32 %v7753_v26, %v6249_v3  ;;  %v7759_v26 = vpop.f32.mrf.mxu0 }
 0xf87   : > { %v16914_v36 = vsub.f32 %v16821_v48, %v8022_v63  ;;  %v6247_v19 = vadd.f32 %v19295_v0, %v4620_v4  ;;  %v11959_v63 = vld [vmem:[%s12222_s0 + $0x40] sm:$0xff] }
 0xf88   : > { %v7865_v54 = vadd.f32 %v16803_v32, %v7829_v16  ;;  %v19304_v0 = vld [vmem:[#allocation10_spill] sm:$0xff]  ;;  %v11962_v16 = vld [vmem:[%s12222_s0 + $0x58] sm:$0xff] }
 0xf89   : > { %v7537_v57 = vpop.f32.mrf.mxu2  ;;  %v8086_v40 = vmul.f32 %v16914_v36, %v16914_v36  ;;  %v7827_v51 = vadd.f32 %v7747_v58, %v6247_v19 }
 0xf8a   : > { %11030 = vmatmul.msk.f32.gmra.mxu0 %vm1963_vm1, %v7537_v57 }
 0xf8b   : > { %v11722_v45 = vpop.eup %11721  ;;  %v8118_v46 = vsel %vm1415_vm0, %v8086_v40, 0.0  ;;  %v7863_v58 = vadd.f32 %v16803_v32, %v7827_v51  ;;  %v11960_v51 = vld [vmem:[%s12222_s0 + $0x50] sm:$0xff] }
 0xf8c   : > { %8119 = vadd.xlane.f32.xlu0 %v8118_v46  ;;  %v7930_v52 = vpop.xlane.xlu0 %7929  ;;  %v7924_v60 = vpop.xlane.xlu1 %7923  ;;  %v7346_v48 = vmul.f32 %v11722_v45, %v16828_v31  ;;  %v19302_v45 = vld [vmem:[#allocation62_spill] sm:$0xff] }
 0xf8d   : > { %v7283_v27 = vpop.xlane.xlu2 %7282  ;;  %v8023_v39 = vmul.f32 %v16905_v30, %v7924_v60  ;;  %v8025_v43 = vmul.f32 %v16905_v30, %v7930_v52  ;;  %v16957_v23 = vadd.f32 %v11959_v63, %v7863_v58  ;;  %v4629_v42 = vadd.f32 %v19303_v41, %v19302_v45 }
 0xf8e   : > { %11723 = vrcp.f32 %v7283_v27  ;;  %11005 = vmatmul.msk.f32.gmra.mxu3 %vm2320_vm2, %v7346_v48  ;;  %v4635_v58 = vadd.f32 %v19306_v62, %v19305_v9  ;;  %v7762_v50 = vpop.f32.mrf.mxu0 }
 0xf8f   : > { %v16929_v34 = vsub.f32 %v16847_v56, %v8023_v39  ;;  %v16941_v6 = vsub.f32 %v16844_v5, %v8025_v43  ;;  %v7940_v56 = vsel %vm1415_vm0, %v16932_v35, 0.0  ;;  %v19301_v5 = vld [vmem:[#allocation6_spill] sm:$0xff]  ;;  %v6250_v19 = vadd.f32 %v19304_v0, %v4629_v42  ;;  %v8705_v0 = vld [vmem:[%s18984_s14 + $0x18] sm:$0xff] }
 0xf90   : > { %v6248_v10 = vadd.f32 %v19301_v5, %v4623_v11  ;;  %v16980_v43 = vadd.f32 %v11960_v51, %v7865_v54  ;;  %v19308_v11 = vld [vmem:[#allocation46_spill] sm:$0xff]  ;;  %v19310_v5 = vld [vmem:[#allocation11_spill] sm:$0xff]  ;;  %8818 = vmatpush.msrb.mxu1 %v8705_v0 }
 0xf91   : > { %v7540_v28 = vpop.f32.mrf.mxu2  ;;  %v8087_v31 = vmul.f32 %v16929_v34, %v16929_v34  ;;  %v8089_v38 = vmul.f32 %v16941_v6, %v16941_v6  ;;  %v7830_v39 = vadd.f32 %v7756_v44, %v6250_v19  ;;  %v8702_v51 = vld [vmem:[%s18984_s14] sm:$0xff] }
 0xf92   : > { %11031 = vmatmul.msk.f32.gmra.mxu0 %vm1963_vm1, %v7540_v28  ;;  %v7828_v57 = vadd.f32 %v16900_v7, %v6248_v10 }
 0xf93   : > { %v8121_v20 = vsel %vm1415_vm0, %v8087_v31, 0.0  ;;  %v8127_v7 = vsel %vm1415_vm0, %v8089_v38, 0.0  ;;  %v11961_v31 = vld [vmem:[%s12222_s0 + $0x48] sm:$0xff]  ;;  %v7866_v44 = vadd.f32 %v16803_v32, %v7830_v39 }
 0xf94   : > { %v11724_v18 = vpop.eup %11723  ;;  %7941 = vadd.xlane.f32.xlu0 %v7940_v56  ;;  %8122 = vadd.xlane.f32.xlu2 %v8121_v20  ;;  %v7933_v59 = vpop.xlane.xlu1 %7932  ;;  %v7864_v52 = vadd.f32 %v16803_v32, %v7828_v57 }
 0xf95   : > { %v7927_v21 = vpop.xlane.xlu2 %7926  ;;  %v7347_v15 = vmul.f32 %v11724_v18, %v16852_v24  ;;  %v8026_v12 = vmul.f32 %v16905_v30, %v7933_v59  ;;  %v7949_v18 = vsel %vm1415_vm0, %v16980_v43, 0.0  ;;  %v4632_v59 = vadd.f32 %v19308_v11, %v19307_v22 }
 0xf96   : > { %v8024_v37 = vmul.f32 %v16905_v30, %v7927_v21  ;;  %v16986_v8 = vadd.f32 %v11961_v31, %v7864_v52 }
 0xf97   : > { %11006 = vmatmul.msk.f32.gmra.mxu3 %vm2320_vm2, %v7347_v15  ;;  %v16970_v46 = vsub.f32 %v16869_v17, %v8026_v12  ;;  %v6251_v10 = vadd.f32 %v19310_v5, %v4632_v59  ;;  %v17008_v12 = vadd.f32 %v11962_v16, %v7866_v44 }
 0xf98   : > { %v16961_v40 = vsub.f32 %v16874_v55, %v8024_v37  ;;  %v7943_v55 = vsel %vm1415_vm0, %v16957_v23, 0.0  ;;  %v7946_v21 = vsel %vm1415_vm0, %v16986_v8, 0.0 }
 0xf99   : > { %v7584_v24 = vpop.f32.mrf.mxu3  ;;  %v8090_v47 = vmul.f32 %v16970_v46, %v16970_v46  ;;  %v7831_v38 = vadd.f32 %v7759_v26, %v6251_v10  ;;  %v11964_v26 = vld [vmem:[%s12222_s0 + $0x60] sm:$0xff] }
 0xf9a   : > { %11032 = vmatmul.msk.f32.gmra.mxu0 %vm1963_vm1, %v7584_v24  ;;  %v8088_v4 = vmul.f32 %v16961_v40, %v16961_v40  ;;  %v7952_v24 = vsel %vm1415_vm0, %v17008_v12, 0.0 }
 0xf9b   : > { %v8130_v25 = vsel %vm1415_vm0, %v8090_v47, 0.0  ;;  %v7867_v41 = vadd.f32 %v16803_v32, %v7831_v38  ;;  %v19315_v38 = vld [vmem:[#allocation51_spill] sm:$0xff] }
 0xf9c   : > { %8128 = vadd.xlane.f32.xlu0 %v8127_v7  ;;  %v8124_v60 = vsel %vm1415_vm0, %v8088_v4, 0.0  ;;  %7944 = vadd.xlane.f32.xlu2 %v7943_v55  ;;  %v7939_v48 = vpop.xlane.xlu1 %7938  ;;  %v11963_v4 = vld [vmem:[%s12222_s0 + $0x68] sm:$0xff] }
 0xf9d   : > { %8125 = vadd.xlane.f32.xlu1 %v8124_v60  ;;  %v7936_v27 = vpop.xlane.xlu2 %7935  ;;  %v8028_v17 = vmul.f32 %v16905_v30, %v7939_v48  ;;  %v17024_v7 = vadd.f32 %v11964_v26, %v7867_v41  ;;  %v7765_v60 = vpop.f32.mrf.mxu0 }
 0xf9e   : > { %v8027_v28 = vmul.f32 %v16905_v30, %v7936_v27  ;;  %v8704_v27 = vld [vmem:[%s18984_s14 + $0x10] sm:$0xff] }
 0xf9f   : > { %v16992_v20 = vsub.f32 %v16884_v29, %v8028_v17  ;;  %v19309_v29 = vld [vmem:[#allocation14_spill] sm:$0xff]  ;;  %v7955_v52 = vsel %vm1415_vm0, %v17024_v7, 0.0  ;;  %8819 = vmatpush.msrb.mxu1 %v8704_v27  ;;  %v8703_v17 = vld [vmem:[%s18984_s14 + $0x8] sm:$0xff] }
 0xfa0   : > { %v17001_v3 = vsub.f32 %v16887_v33, %v8027_v28  ;;  %v6252_v15 = vadd.f32 %v19309_v29, %v4635_v58  ;;  %v19311_v58 = vld [vmem:[#allocation68_spill] sm:$0xff] }
 0xfa1   : > { %v8092_v33 = vmul.f32 %v16992_v20, %v16992_v20  ;;  %8820 = vmatpush.msrb.mxu1 %v8703_v17 }
 0xfa2   : > { %v7587_v56 = vpop.f32.mrf.mxu3  ;;  %v7832_v37 = vadd.f32 %v7762_v50, %v6252_v15  ;;  %v8091_v63 = vmul.f32 %v17001_v3, %v17001_v3 }
 0xfa3   : > { %11033 = vmatmul.msk.f32.gmra.mxu0 %vm1963_vm1, %v7587_v56  ;;  %v8136_v45 = vsel %vm1415_vm0, %v8092_v33, 0.0  ;;  %8821 = vmatpush.msrb.mxu1 %v8702_v51  ;;  %v19312_v56 = vld [vmem:[#allocation49_spill] sm:$0xff]  ;;  %v19314_v33 = vld [vmem:[#allocation70_spill] sm:$0xff] }
 0xfa4   : > { %7950 = vadd.xlane.f32.xlu0 %v7949_v18  ;;  %8131 = vadd.xlane.f32.xlu2 %v8130_v25  ;;  %v7868_v57 = vadd.f32 %v16803_v32, %v7832_v37  ;;  %v8133_v42 = vsel %vm1415_vm0, %v8091_v63, 0.0  ;;  %v4638_v44 = vadd.f32 %v19312_v56, %v19311_v58  ;;  %v19313_v25 = vld [vmem:[#allocation16_spill] sm:$0xff]  ;;  %v4641_v63 = vadd.f32 %v19315_v38, %v19314_v33  ;;  %v19320_v58 = vld [vmem:[#allocation41_spill] sm:$0xff] }
 0xfa5   : > { %7947 = vadd.xlane.f32.xlu1 %v7946_v21  ;;  %v7768_v19 = vpop.f32.mrf.mxu0 }
 0xfa6   : > { %v17021_v54 = vadd.f32 %v11963_v4, %v7868_v57  ;;  %v6253_v22 = vadd.f32 %v19313_v25, %v4638_v44  ;;  %v19321_v44 = vld [vmem:[#allocation21_spill] sm:$0xff] }
 0xfa8   : > { %v7958_v55 = vsel %vm1415_vm0, %v17021_v54, 0.0  ;;  %v7833_v15 = vadd.f32 %v7765_v60, %v6253_v22 }
 0xfac   : > { %7953 = vadd.xlane.f32.xlu2 %v7952_v24  ;;  %8137 = vadd.xlane.f32.xlu0 %v8136_v45  ;;  %v19316_v45 = vld [vmem:[#allocation20_spill] sm:$0xff] }
 0xfad   : > { %8134 = vadd.xlane.f32.xlu1 %v8133_v42  ;;  %v7771_v31 = vpop.f32.mrf.mxu0  ;;  %v6254_v41 = vadd.f32 %v19316_v45, %v4641_v63  ;;  %v17093_v63 = vld [vmem:[%s18982_s12] ss:$0 sm:$0xff] }
 0xfae   : > { %v17105_v45 = vld [vmem:[%s18983_s13] ss:$0 sm:$0xff] }
 0xfb4   : > { %7959 = vadd.xlane.f32.xlu0 %v7958_v55  ;;  %v19317_v55 = vld [vmem:[#allocation71_spill] sm:$0xff] }
 0xfb5   : > { %7956 = vadd.xlane.f32.xlu1 %v7955_v52  ;;  %v7774_v10 = vpop.f32.mrf.mxu0  ;;  %v19318_v52 = vld [vmem:[#allocation39_spill] sm:$0xff] }
 0xfb6   : > { %v4644_v60 = vadd.f32 %v19318_v52, %v19317_v55  ;;  %v19324_v55 = vld [vmem:[#allocation42_spill] sm:$0xff] }
 0xff1   : > { %v7590_v48 = vpop.f32.mrf.mxu3 }
 0xff2   : > { %11034 = vmatmul.msk.f32.gmra.mxu0 %vm1963_vm1, %v7590_v48  ;;  %v7834_v48 = vadd.f32 %v7768_v19, %v6254_v41  ;;  %v11965_v19 = vld [vmem:[%s12222_s0 + $0x70] sm:$0xff] }
 0xff4   : > { %v7870_v38 = vadd.f32 %v16803_v32, %v7834_v48 }
 0xff9   : > { %v7593_v39 = vpop.f32.mrf.mxu3 }
 0xffa   : > { %11035 = vmatmul.msk.f32.gmra.mxu0 %vm1963_vm1, %v7593_v39 }
 0xfff   : > { %v8120_v47 = vpop.xlane.xlu0 %8119 }
0x1000   : > { %v8214_v28 = vmul.f32 %v8120_v47, %v16905_v30 }
0x1001   : > { %v7596_v9 = vpop.f32.mrf.mxu3 }
0x1002   : > { %v8246_v62 = vadd.f32 1e-05, %v8214_v28  ;;  %11036 = vmatmul.msk.f32.gmra.mxu0 %vm1963_vm1, %v7596_v9  ;;  %v19319_v9 = vld [vmem:[#allocation73_spill] sm:$0xff] }
0x1003   : > { %v4647_v56 = vadd.f32 %v19320_v58, %v19319_v9 }
0x1004   : > { %11725 = vrsqrt.f32 %v8246_v62  ;;  %vm8284_vm5 = vweird.f32 %v8246_v62 }
0x1007   : > { %v7942_v18 = vpop.xlane.xlu0 %7941  ;;  %v8123_v59 = vpop.xlane.xlu2 %8122 }
0x1008   : > { %v8029_v11 = vmul.f32 %v16905_v30, %v7942_v18  ;;  %v8215_v50 = vmul.f32 %v8123_v59, %v16905_v30  ;;  %v6255_v18 = vadd.f32 %v19321_v44, %v4644_v60  ;;  %v17081_v59 = vpop.f32.mrf.mxu0 }
0x1009   : > { %v7599_v21 = vpop.f32.mrf.mxu3 }
0x100a   : > { %v11726_v29 = vpop.eup %11725  ;;  %v17052_v5 = vsub.f32 %v16932_v35, %v8029_v11  ;;  %11037 = vmatmul.msk.f32.gmra.mxu0 %vm1963_vm1, %v7599_v21  ;;  %v17055_v16 = vadd.f32 1e-05, %v8215_v50  ;;  %v7869_v35 = vadd.f32 %v16803_v32, %v7833_v15 }
0x100b   : > { %v8279_v37 = vmul.f32 %v11726_v29, %v8246_v62  ;;  %vm8285_vm4 = vweird.f32 %v11726_v29 }
0x100c   : > { %v8093_v57 = vmul.f32 %v17052_v5, %v17052_v5  ;;  %11727 = vrsqrt.f32 %v17055_v16  ;;  %v17077_v22 = vadd.f32 %v11965_v19, %v7869_v35  ;;  %vm8286_vm6 = vmor %vm8284_vm5, %vm8285_vm4  ;;  %vm8294_vm8 = vweird.f32 %v17055_v16 }
0x100d   : > { %v8280_v24 = vmul.f32 %v11726_v29, %v8279_v37  ;;  %v19322_v37 = vld [vmem:[#allocation22_spill] sm:$0xff] }
0x100e   : > { %v8139_v42 = vsel %vm1415_vm0, %v8093_v57, 0.0  ;;  %v6256_v33 = vadd.f32 %v19322_v37, %v4647_v56 }
0x100f   : > { %v8281_v4 = vmul.f32 0.5, %v8280_v24  ;;  %v8129_v26 = vpop.xlane.xlu0 %8128  ;;  %8140 = vadd.xlane.f32.xlu2 %v8139_v42  ;;  %v7945_v27 = vpop.xlane.xlu2 %7944  ;;  %v7961_v42 = vsel %vm1415_vm0, %v17077_v22, 0.0 }
0x1010   : > { %v8217_v0 = vmul.f32 %v8129_v26, %v16905_v30  ;;  %v8126_v39 = vpop.xlane.xlu1 %8125  ;;  %v8030_v51 = vmul.f32 %v16905_v30, %v7945_v27  ;;  %v19323_v26 = vld [vmem:[#allocation75_spill] sm:$0xff] }
0x1011   : > { %v8282_v17 = vsub.f32 1.5, %v8281_v4  ;;  %v8216_v47 = vmul.f32 %v8126_v39, %v16905_v30  ;;  %v7602_v28 = vpop.f32.mrf.mxu3  ;;  %v4650_v52 = vadd.f32 %v19324_v55, %v19323_v26 }
0x1012   : > { %v17073_v25 = vadd.f32 1e-05, %v8217_v0  ;;  %11038 = vmatmul.msk.f32.gmra.mxu0 %vm1963_vm1, %v7602_v28  ;;  %v17079_v11 = vpop.eup %11727  ;;  %v17084_v21 = vsub.f32 %v16957_v23, %v8030_v51  ;;  %v7835_v23 = vadd.f32 %v7771_v31, %v6255_v18  ;;  %v7836_v31 = vadd.f32 %v7774_v10, %v6256_v33  ;;  %v11966_v51 = vld [vmem:[%s12222_s0 + $0x78] sm:$0xff] }
0x1013   : > { %v8283_v50 = vmul.f32 %v11726_v29, %v8282_v17  ;;  %v17086_v15 = vadd.f32 1e-05, %v8216_v47  ;;  %v8289_v57 = vmul.f32 %v17079_v11, %v17055_v16  ;;  %v17120_v47 = vadd.f32 %v11966_v51, %v7870_v38 }
0x1014   : > { %11729 = vrsqrt.f32 %v17073_v25  ;;  %v8094_v24 = vmul.f32 %v17084_v21, %v17084_v21  ;;  %v7871_v39 = vadd.f32 %v16803_v32, %v7835_v23  ;;  %vm8295_vm7 = vweird.f32 %v17079_v11  ;;  %v19325_v23 = vld [vmem:[#allocation76_spill] sm:$0xff] }
0x1015   : > { %v8287_v62 = vsel %vm8286_vm6, %v11726_v29, %v8283_v50  ;;  %11731 = vrsqrt.f32 %v17086_v15  ;;  %v8290_v35 = vmul.f32 %v17079_v11, %v8289_v57  ;;  %v7872_v19 = vadd.f32 %v16803_v32, %v7836_v31  ;;  %vm8296_vm9 = vmor %vm8294_vm8, %vm8295_vm7 }
0x1016   : > { %v8598_v41 = vmul.f32 %v8287_v62, %v16914_v36  ;;  %v8142_v4 = vsel %vm1415_vm0, %v8094_v24, 0.0  ;;  %v19326_v62 = vld [vmem:[#allocation44_spill] sm:$0xff]  ;;  %vm8304_vm12 = vweird.f32 %v17086_v15  ;;  %vm8314_vm14 = vweird.f32 %v17073_v25 }
0x1017   : > { %v7951_v29 = vpop.xlane.xlu0 %7950  ;;  %7962 = vadd.xlane.f32.xlu2 %v7961_v42  ;;  %v8291_v48 = vmul.f32 0.5, %v8290_v35  ;;  %8143 = vadd.xlane.f32.xlu1 %v8142_v4  ;;  %v8132_v36 = vpop.xlane.xlu2 %8131  ;;  %v17152_v24 = vadd.f32 %v19326_v62, %v19325_v23  ;;  %v19327_v35 = vld [vmem:[#allocation23_spill] sm:$0xff] }
0x1018   : > { %v8634_v60 = vmul.f32 %v17093_v63, %v8598_v41  ;;  %v8032_v0 = vmul.f32 %v16905_v30, %v7951_v29  ;;  %v7948_v27 = vpop.xlane.xlu1 %7947  ;;  %v8218_v17 = vmul.f32 %v8132_v36, %v16905_v30  ;;  %v6257_v42 = vadd.f32 %v19327_v35, %v4650_v52  ;;  %v19328_v35 = vld [vmem:[#allocation77_spill] sm:$0xff] }
0x1019   : > { %v8031_v10 = vmul.f32 %v16905_v30, %v7948_v27  ;;  %v8292_v58 = vsub.f32 1.5, %v8291_v48  ;;  %v11967_v27 = vld [vmem:[%s12222_s0 + $0x88] sm:$0xff] }
0x101a   : > { %v17122_v28 = vpop.eup %11729  ;;  %v17125_v9 = vadd.f32 %v17105_v45, %v8634_v60  ;;  %v17129_v56 = vsub.f32 %v16980_v43, %v8032_v0  ;;  %v7605_v44 = vpop.f32.mrf.mxu3  ;;  %v17136_v37 = vadd.f32 1e-05, %v8218_v17  ;;  %v7964_v60 = vsel %vm1415_vm0, %v17120_v47, 0.0 }
0x101b   : > { %v17131_v18 = vpop.eup %11731  ;;  %v8309_v50 = vmul.f32 %v17122_v28, %v17073_v25  ;;  %v17139_v33 = vsub.f32 %v16986_v8, %v8031_v10  ;;  %11039 = vmatmul.msk.f32.gmra.mxu0 %vm1963_vm1, %v7605_v44  ;;  %v8293_v38 = vmul.f32 %v17079_v11, %v8292_v58  ;;  %v17154_v8 = vpop.f32.mrf.mxu0  ;;  %v17172_v17 = vadd.f32 %v11967_v27, %v7872_v19  ;;  %v11968_v10 = vld [vmem:[%s12222_s0 + $0x80] sm:$0xff] }
0x101c   : > { %v8299_v43 = vmul.f32 %v17131_v18, %v17086_v15  ;;  %11040 = vmatmul.msk.f32.vlgmr.msrb.gmra.mxu1 %vm1415_vm0, %v17125_v9  ;;  %v8096_v57 = vmul.f32 %v17129_v56, %v17129_v56  ;;  %11733 = vrsqrt.f32 %v17136_v37  ;;  %v17175_v51 = vadd.f32 %v11968_v10, %v7871_v39 }
0x101d   : > { %v8310_v16 = vmul.f32 %v17122_v28, %v8309_v50  ;;  %v8095_v41 = vmul.f32 %v17139_v33, %v17139_v33  ;;  %v8297_v31 = vsel %vm8296_vm9, %v17079_v11, %v8293_v38  ;;  %vm8305_vm10 = vweird.f32 %v17131_v18 }
0x101e   : > { %v8300_v29 = vmul.f32 %v17131_v18, %v8299_v43  ;;  %v8148_v4 = vsel %vm1415_vm0, %v8096_v57, 0.0  ;;  %v8599_v26 = vmul.f32 %v8297_v31, %v16929_v34  ;;  %v7837_v34 = vadd.f32 %v17081_v59, %v6257_v42  ;;  %v19329_v42 = vld [vmem:[#allocation52_spill] sm:$0xff]  ;;  %vm8306_vm13 = vmor %vm8304_vm12, %vm8305_vm10 }
0x101f   : > { %v8311_v55 = vmul.f32 0.5, %v8310_v16  ;;  %8149 = vadd.xlane.f32.xlu2 %v8148_v4  ;;  %v8138_v48 = vpop.xlane.xlu0 %8137  ;;  %v8145_v0 = vsel %vm1415_vm0, %v8095_v41, 0.0  ;;  %7965 = vadd.xlane.f32.xlu1 %v7964_v60  ;;  %v7954_v52 = vpop.xlane.xlu2 %7953  ;;  %vm8315_vm11 = vweird.f32 %v17122_v28  ;;  %v4656_v31 = vadd.f32 %v19329_v42, %v19328_v35 }
0x1020   : > { %v8301_v36 = vmul.f32 0.5, %v8300_v29  ;;  %v8220_v11 = vmul.f32 %v8138_v48, %v16905_v30  ;;  %8146 = vadd.xlane.f32.xlu0 %v8145_v0  ;;  %v8033_v44 = vmul.f32 %v16905_v30, %v7954_v52  ;;  %v8135_v50 = vpop.xlane.xlu1 %8134  ;;  %v8635_v38 = vmul.f32 %v17093_v63, %v8599_v26  ;;  %vm17217_vm15 = vmor %vm8314_vm14, %vm8315_vm11  ;;  %v19332_v52 = vld [vmem:[#allocation25_spill] sm:$0xff] }
0x1021   : > { %v8312_v58 = vsub.f32 1.5, %v8311_v55  ;;  %v8219_v23 = vmul.f32 %v8135_v50, %v16905_v30  ;;  %v7967_v29 = vsel %vm1415_vm0, %v17175_v51, 0.0  ;;  %v7970_v55 = vsel %vm1415_vm0, %v17172_v17, 0.0 }
0x1022   : > { %v8302_v43 = vsub.f32 1.5, %v8301_v36  ;;  %v17181_v57 = vadd.f32 1e-05, %v8220_v11  ;;  %v17184_v19 = vpop.eup %11733  ;;  %v17189_v59 = vsub.f32 %v17008_v12, %v8033_v44  ;;  %v17192_v39 = vadd.f32 %v17105_v45, %v8635_v38 }
0x1023   : > { %v8313_v62 = vmul.f32 %v17122_v28, %v8312_v58  ;;  %v8319_v41 = vmul.f32 %v17184_v19, %v17136_v37  ;;  %v17201_v15 = vadd.f32 1e-05, %v8219_v23  ;;  %v7873_v60 = vadd.f32 %v16803_v32, %v7837_v34  ;;  %v7783_v48 = vpop.f32.mrf.mxu0 }
0x1024   : > { %v8303_v16 = vmul.f32 %v17131_v18, %v8302_v43  ;;  %11735 = vrsqrt.f32 %v17181_v57  ;;  %11041 = vmatmul.msk.f32.gmra.mxu1 %vm1415_vm0, %v17192_v39  ;;  %v8097_v12 = vmul.f32 %v17189_v59, %v17189_v59  ;;  %v6259_v11 = vadd.f32 %v19332_v52, %v4656_v31  ;;  %v11970_v52 = vld [vmem:[%s12222_s0 + $0xa0] sm:$0xff] }
0x1025   : > { %v8320_v26 = vmul.f32 %v17184_v19, %v8319_v41  ;;  %11737 = vrsqrt.f32 %v17201_v15  ;;  %v8317_v27 = vsel %vm17217_vm15, %v17122_v28, %v8313_v62  ;;  %vm8325_vm1 = vweird.f32 %v17184_v19 }
0x1026   : > { %v8307_v4 = vsel %vm8306_vm13, %v17131_v18, %v8303_v16  ;;  %v8151_v25 = vsel %vm1415_vm0, %v8097_v12, 0.0  ;;  %v7839_v43 = vadd.f32 %v7783_v48, %v6259_v11  ;;  %v8601_v62 = vmul.f32 %v8317_v27, %v16941_v6 }
0x1027   : > { %v8600_v36 = vmul.f32 %v8307_v4, %v16961_v40  ;;  %7971 = vadd.xlane.f32.xlu2 %v7970_v55  ;;  %v7960_v18 = vpop.xlane.xlu0 %7959  ;;  %v8321_v10 = vmul.f32 0.5, %v8320_v26  ;;  %8152 = vadd.xlane.f32.xlu1 %v8151_v25  ;;  %v19333_v40 = vld [vmem:[#allocation24_spill] sm:$0xff]  ;;  %vm8324_vm3 = vweird.f32 %v17136_v37  ;;  %vm8334_vm6 = vweird.f32 %v17201_v15 }
0x1028   : > { %v8035_v34 = vmul.f32 %v16905_v30, %v7960_v18  ;;  %7968 = vadd.xlane.f32.xlu0 %v7967_v29  ;;  %v6258_v58 = vadd.f32 %v19333_v40, %v17152_v24  ;;  %v7957_v44 = vpop.xlane.xlu1 %7956  ;;  %v11969_v24 = vld [vmem:[%s12222_s0 + $0x90] sm:$0xff]  ;;  %v7875_v4 = vadd.f32 %v16803_v32, %v7839_v43  ;;  %vm8326_vm4 = vmor %vm8324_vm3, %vm8325_vm1  ;;  %v11971_v40 = vld [vmem:[%s12222_s0 + $0x98] sm:$0xff]  ;;  %vm8344_vm9 = vweird.f32 %v17181_v57 }
0x1029   : > { %v8636_v50 = vmul.f32 %v17093_v63, %v8600_v36  ;;  %v8322_v23 = vsub.f32 1.5, %v8321_v10  ;;  %v8034_v28 = vmul.f32 %v16905_v30, %v7957_v44  ;;  %v17244_v35 = vadd.f32 %v11969_v24, %v7873_v60 }
0x102a   : > { %v17232_v38 = vpop.eup %11735  ;;  %v17235_v16 = vsub.f32 %v17021_v54, %v8035_v34  ;;  %v7838_v29 = vadd.f32 %v17154_v8, %v6258_v58  ;;  %v8637_v60 = vmul.f32 %v17093_v63, %v8601_v62  ;;  %v17273_v11 = vadd.f32 %v11970_v52, %v7875_v4  ;;  %v8955_v4 = vld [vmem:[%s18986_s16 + $0x20] sm:$0xff] }
0x102b   : > { %v17241_v41 = vadd.f32 %v17105_v45, %v8636_v50  ;;  %v8323_v42 = vmul.f32 %v17184_v19, %v8322_v23  ;;  %v8339_v31 = vmul.f32 %v17232_v38, %v17181_v57  ;;  %v17250_v54 = vsub.f32 %v17024_v7, %v8034_v28  ;;  %v11738_v6 = vpop.eup %11737  ;;  %v7786_v57 = vpop.f32.mrf.mxu0 }
0x102c   : > { %v8099_v12 = vmul.f32 %v17235_v16, %v17235_v16  ;;  %v8329_v26 = vmul.f32 %v11738_v6, %v17201_v15  ;;  %v7973_v7 = vsel %vm1415_vm0, %v17244_v35, 0.0  ;;  %v7874_v36 = vadd.f32 %v16803_v32, %v7838_v29  ;;  %v8956_v29 = vld [vmem:[%s18986_s16 + $0x28] sm:$0xff] }
0x102d   : > { %11042 = vmatmul.msk.f32.gmra.mxu1 %vm1415_vm0, %v17241_v41  ;;  %v8098_v8 = vmul.f32 %v17250_v54, %v17250_v54  ;;  %v8327_v48 = vsel %vm8326_vm4, %v17184_v19, %v8323_v42  ;;  %v8340_v37 = vmul.f32 %v17232_v38, %v8339_v31  ;;  %v17277_v10 = vadd.f32 %v17105_v45, %v8637_v60  ;;  %v8951_v60 = vld [vmem:[%s18986_s16] sm:$0xff] }
0x102e   : > { %v8157_v55 = vsel %vm1415_vm0, %v8099_v12, 0.0  ;;  %v8330_v0 = vmul.f32 %v11738_v6, %v8329_v26  ;;  %v8602_v27 = vmul.f32 %v8327_v48, %v16970_v46  ;;  %vm8335_vm5 = vweird.f32 %v11738_v6 }
0x102f   : > { %8158 = vadd.xlane.f32.xlu2 %v8157_v55  ;;  %7974 = vadd.xlane.f32.xlu1 %v7973_v7  ;;  %v8154_v25 = vsel %vm1415_vm0, %v8098_v8, 0.0  ;;  %v8341_v19 = vmul.f32 0.5, %v8340_v37  ;;  %v17282_v32 = vadd.f32 %v11971_v40, %v7874_v36  ;;  %v7979_v44 = vsel %vm1415_vm0, %v17273_v11, 0.0  ;;  %vm8336_vm7 = vmor %vm8334_vm6, %vm8335_vm5  ;;  %v8954_v55 = vld [vmem:[%s18986_s16 + $0x18] sm:$0xff]  ;;  %v8953_v7 = vld [vmem:[%s18986_s16 + $0x10] sm:$0xff] }
0x1030   : > { %v8331_v18 = vmul.f32 0.5, %v8330_v0  ;;  %8155 = vadd.xlane.f32.xlu0 %v8154_v25  ;;  %v8638_v46 = vmul.f32 %v17093_v63, %v8602_v27  ;;  %vm8345_vm8 = vweird.f32 %v17232_v38  ;;  %v8952_v8 = vld [vmem:[%s18986_s16 + $0x8] sm:$0xff]  ;;  %v19334_v25 = vld [vmem:[#allocation78_spill] sm:$0xff] }
0x1031   : > { %v8342_v50 = vsub.f32 1.5, %v8341_v19  ;;  %v7976_v23 = vsel %vm1415_vm0, %v17282_v32, 0.0  ;;  %vm8346_vm10 = vmor %vm8344_vm9, %vm8345_vm8  ;;  %v19336_v19 = vld [vmem:[#allocation26_spill] sm:$0xff] }
0x1032   : > { %v8332_v34 = vsub.f32 1.5, %v8331_v18  ;;  %v17292_v62 = vadd.f32 %v17105_v45, %v8638_v46  ;;  %v19335_v18 = vld [vmem:[#allocation54_spill] sm:$0xff] }
0x1033   : > { %v8343_v15 = vmul.f32 %v17232_v38, %v8342_v50  ;;  %v7789_v26 = vpop.f32.mrf.mxu0  ;;  %v4659_v52 = vadd.f32 %v19335_v18, %v19334_v25  ;;  %v19343_v25 = vld [vmem:[#allocation60_spill] sm:$0xff] }
0x1034   : > { %v8333_v58 = vmul.f32 %v11738_v6, %v8332_v34 }
0x1035   : > { %11043 = vmatmul.msk.f32.gmra.mxu1 %vm1415_vm0, %v17277_v10  ;;  %v8347_v42 = vsel %vm8346_vm10, %v17232_v38, %v8343_v15  ;;  %v8958_v38 = vld [vmem:[%s18986_s16 + $0x38] sm:$0xff]  ;;  %v6260_v34 = vadd.f32 %v19336_v19, %v4659_v52  ;;  %v19344_v52 = vld [vmem:[#allocation82_spill] sm:$0xff] }
0x1036   : > { %v8337_v43 = vsel %vm8336_vm7, %v11738_v6, %v8333_v58  ;;  %v8604_v31 = vmul.f32 %v8347_v42, %v16992_v20  ;;  %9067 = vmatpush.msrb.mxu2 %v8958_v38  ;;  %v8957_v20 = vld [vmem:[%s18986_s16 + $0x30] sm:$0xff] }
0x1037   : > { %7980 = vadd.xlane.f32.xlu2 %v7979_v44  ;;  %v8603_v28 = vmul.f32 %v8337_v43, %v17001_v3  ;;  %v7840_v50 = vadd.f32 %v7786_v57, %v6260_v34  ;;  %v19338_v42 = vld [vmem:[#allocation56_spill] sm:$0xff]  ;;  %v17357_v57 = vld [vmem:[%s18981_s11] ss:$0 sm:$0xff] }
0x1038   : > { %7977 = vadd.xlane.f32.xlu0 %v7976_v23  ;;  %v8640_v12 = vmul.f32 %v17093_v63, %v8604_v31  ;;  %9068 = vmatpush.msrb.mxu2 %v8957_v20  ;;  %v19339_v20 = vld [vmem:[#allocation27_spill] sm:$0xff] }
0x1039   : > { %v8639_v24 = vmul.f32 %v17093_v63, %v8603_v28 }
0x103a   : > { %v17309_v6 = vadd.f32 %v17105_v45, %v8640_v12  ;;  %9069 = vmatpush.msrb.mxu2 %v8956_v29 }
0x103b   : > { %v17303_v3 = vadd.f32 %v17105_v45, %v8639_v24  ;;  %v7792_v37 = vpop.f32.mrf.mxu0  ;;  %v19337_v24 = vld [vmem:[#allocation79_spill] sm:$0xff] }
0x103c   : > { %9070 = vmatpush.msrb.mxu2 %v8955_v4  ;;  %v4662_v31 = vadd.f32 %v19338_v42, %v19337_v24  ;;  %v19346_v42 = vld [vmem:[#allocation83_spill] sm:$0xff] }
0x103d   : > { %11044 = vmatmul.msk.f32.gmra.mxu1 %vm1415_vm0, %v17292_v62 }
0x103e   : > { %9071 = vmatpush.msrb.mxu2 %v8954_v55  ;;  %v6261_v29 = vadd.f32 %v19339_v20, %v4662_v31  ;;  %v19340_v55 = vld [vmem:[#allocation80_spill] sm:$0xff]  ;;  %v19347_v31 = vld [vmem:[#allocation63_spill] sm:$0xff] }
0x1040   : > { %9072 = vmatpush.msrb.mxu2 %v8953_v7  ;;  %v19341_v7 = vld [vmem:[#allocation58_spill] sm:$0xff]  ;;  %v7841_v34 = vadd.f32 %v7789_v26, %v6261_v29 }
0x1042   : > { %9073 = vmatpush.msrb.mxu2 %v8952_v8  ;;  %v4665_v8 = vadd.f32 %v19341_v7, %v19340_v55  ;;  %v11973_v55 = vld [vmem:[%s12222_s0 + $0xa8] sm:$0xff] }
0x1043   : > { %v7795_v43 = vpop.f32.mrf.mxu0 }
0x1044   : > { %9074 = vmatpush.msrb.mxu2 %v8951_v60 }
0x1045   : > { %11045 = vmatmul.msk.f32.gmra.mxu1 %vm1415_vm0, %v17303_v3 }
0x104d   : > { %11046 = vmatmul.msk.f32.gmra.mxu1 %vm1415_vm0, %v17309_v6 }
0x1082   : > { %v8141_v48 = vpop.xlane.xlu2 %8140 }
0x1083   : > { %v8221_v0 = vmul.f32 %v8141_v48, %v16905_v30 }
0x1085   : > { %v8253_v36 = vadd.f32 1e-05, %v8221_v0  ;;  %v19342_v0 = vld [vmem:[#allocation81_spill] sm:$0xff] }
0x1086   : > { %v4668_v18 = vadd.f32 %v19343_v25, %v19342_v0  ;;  %v17390_v0 = vld [vmem:[%s18985_s15] ss:$0 sm:$0xff] }
0x1087   : > { %11739 = vrsqrt.f32 %v8253_v36  ;;  %vm8354_vm12 = vweird.f32 %v8253_v36 }
0x108a   : > { %v7963_v27 = vpop.xlane.xlu2 %7962  ;;  %v8144_v58 = vpop.xlane.xlu1 %8143 }
0x108b   : > { %v8036_v40 = vmul.f32 %v16905_v30, %v7963_v27  ;;  %v8222_v44 = vmul.f32 %v8144_v58, %v16905_v30  ;;  %v19345_v27 = vld [vmem:[#allocation61_spill] sm:$0xff] }
0x108c   : > { %v4671_v19 = vadd.f32 %v19345_v27, %v19344_v52  ;;  %v7877_v52 = vadd.f32 %v17357_v57, %v7841_v34 }
0x108d   : > { %v11740_v46 = vpop.eup %11739  ;;  %v17344_v23 = vsub.f32 %v17077_v22, %v8036_v40  ;;  %v17346_v15 = vadd.f32 1e-05, %v8222_v44  ;;  %v7876_v22 = vadd.f32 %v17357_v57, %v7840_v50 }
0x108e   : > { %v8349_v28 = vmul.f32 %v11740_v46, %v8253_v36  ;;  %vm8355_vm11 = vweird.f32 %v11740_v46 }
0x108f   : > { %v8100_v12 = vmul.f32 %v17344_v23, %v17344_v23  ;;  %11741 = vrsqrt.f32 %v17346_v15  ;;  %v17378_v26 = vadd.f32 %v11973_v55, %v7876_v22  ;;  %v17394_v22 = vpop.f32.mrf.mxu0  ;;  %vm8356_vm13 = vmor %vm8354_vm12, %vm8355_vm11  ;;  %vm8364_vm15 = vweird.f32 %v17346_v15 }
0x1090   : > { %v8350_v38 = vmul.f32 %v11740_v46, %v8349_v28 }
0x1091   : > { %v8160_v4 = vsel %vm1415_vm0, %v8100_v12, 0.0  ;;  %v17372_v12 = vadd.f32 %v19347_v31, %v19346_v42 }
0x1092   : > { %v8351_v60 = vmul.f32 0.5, %v8350_v38  ;;  %8161 = vadd.xlane.f32.xlu1 %v8160_v4  ;;  %v8150_v48 = vpop.xlane.xlu2 %8149  ;;  %v7966_v44 = vpop.xlane.xlu1 %7965  ;;  %v19348_v38 = vld [vmem:[#allocation7_spill] sm:$0xff] }
0x1093   : > { %v8224_v40 = vmul.f32 %v8150_v48, %v16905_v30  ;;  %v8147_v58 = vpop.xlane.xlu0 %8146  ;;  %v8037_v24 = vmul.f32 %v16905_v30, %v7966_v44  ;;  %v6262_v20 = vadd.f32 %v19348_v38, %v4665_v8  ;;  %v19349_v8 = vld [vmem:[#allocation9_spill] sm:$0xff] }
0x1094   : > { %v8352_v50 = vsub.f32 1.5, %v8351_v60  ;;  %v8223_v28 = vmul.f32 %v8147_v58, %v16905_v30  ;;  %v6263_v25 = vadd.f32 %v19349_v8, %v4668_v18  ;;  %v19350_v58 = vld [vmem:[#allocation84_spill] sm:$0xff]  ;;  %v19351_v18 = vld [vmem:[#allocation65_spill] sm:$0xff] }
0x1095   : > { %v17375_v4 = vadd.f32 1e-05, %v8224_v40  ;;  %v17380_v29 = vpop.eup %11741  ;;  %v17385_v48 = vsub.f32 %v17120_v47, %v8037_v24  ;;  %v7842_v47 = vadd.f32 %v7792_v37, %v6262_v20  ;;  %v17405_v44 = vadd.f32 %v19351_v18, %v19350_v58 }
0x1096   : > { %v8353_v7 = vmul.f32 %v11740_v46, %v8352_v50  ;;  %v17382_v60 = vadd.f32 1e-05, %v8223_v28  ;;  %v8359_v36 = vmul.f32 %v17380_v29, %v17346_v15  ;;  %v7982_v24 = vsel %vm1415_vm0, %v17378_v26, 0.0 }
0x1097   : > { %11743 = vrsqrt.f32 %v17375_v4  ;;  %v8101_v40 = vmul.f32 %v17385_v48, %v17385_v48  ;;  %v6264_v37 = vadd.f32 %v16211_v1, %v4671_v19  ;;  %v7878_v1 = vadd.f32 %v17357_v57, %v7842_v47 }
0x1098   : > { %v8357_v27 = vsel %vm8356_vm13, %v11740_v46, %v8353_v7  ;;  %11745 = vrsqrt.f32 %v17382_v60  ;;  %v8360_v50 = vmul.f32 %v17380_v29, %v8359_v36  ;;  %v7843_v46 = vadd.f32 %v7795_v43, %v6263_v25  ;;  %v11974_v36 = vld [vmem:[%s12222_s0 + $0xb0] sm:$0xff] }
0x1099   : > { %v8605_v34 = vmul.f32 %v8357_v27, %v17052_v5  ;;  %v8823_v28 = vpop.f32.mrf.mxu1  ;;  %v8163_v38 = vsel %vm1415_vm0, %v8101_v40, 0.0  ;;  %v17417_v27 = vadd.f32 %v11974_v36, %v7877_v52  ;;  %vm8365_vm14 = vweird.f32 %v17380_v29 }
0x109a   : > { %v8824_v42 = vadd.f32 %v17390_v0, %v8823_v28  ;;  %7983 = vadd.xlane.f32.xlu1 %v7982_v24  ;;  %v7972_v31 = vpop.xlane.xlu2 %7971  ;;  %v8361_v20 = vmul.f32 0.5, %v8360_v50  ;;  %8164 = vadd.xlane.f32.xlu0 %v8163_v38  ;;  %v8153_v7 = vpop.xlane.xlu1 %8152  ;;  %v7879_v47 = vadd.f32 %v17357_v57, %v7843_v46  ;;  %vm8366_vm1 = vmor %vm8364_vm15, %vm8365_vm14  ;;  %vm8374_vm3 = vweird.f32 %v17382_v60 }
0x109b   : > { %v8039_v55 = vmul.f32 %v16905_v30, %v7972_v31  ;;  %v7969_v5 = vpop.xlane.xlu0 %7968  ;;  %v8641_v8 = vmul.f32 %v17093_v63, %v8605_v34  ;;  %v8225_v25 = vmul.f32 %v8153_v7, %v16905_v30  ;;  %v7985_v38 = vsel %vm1415_vm0, %v17417_v27, 0.0  ;;  %v11975_v7 = vld [vmem:[%s12222_s0 + $0xb8] sm:$0xff] }
0x109c   : > { %v8919_v43 = vmax.f32 %v8824_v42, 0.0  ;;  %v8038_v19 = vmul.f32 %v16905_v30, %v7969_v5  ;;  %v8362_v40 = vsub.f32 1.5, %v8361_v20  ;;  %vm8384_vm7 = vweird.f32 %v17375_v4 }
0x109d   : > { %v17422_v58 = vpop.eup %11743  ;;  %v17426_v18 = vsub.f32 %v17172_v17, %v8039_v55  ;;  %v17429_v34 = vadd.f32 %v17105_v45, %v8641_v8  ;;  %v17439_v24 = vadd.f32 1e-05, %v8225_v25  ;;  %v17442_v17 = vpop.f32.mrf.mxu0  ;;  %v17464_v8 = vadd.f32 %v11975_v7, %v7878_v1 }
0x109e   : > { %v17431_v52 = vpop.eup %11745  ;;  %v8379_v50 = vmul.f32 %v17422_v58, %v17375_v4  ;;  %v17437_v28 = vsub.f32 %v17175_v51, %v8038_v19  ;;  %11072 = vmatmul.msk.f32.vlgmr.msrb.gmra.mxu2 %vm2320_vm2, %v8919_v43  ;;  %v8363_v42 = vmul.f32 %v17380_v29, %v8362_v40  ;;  %vm8385_vm5 = vweird.f32 %v17422_v58 }
0x109f   : > { %19352 = vst [vmem:[#allocation12_spill] sm:$0xff] %v17429_v34  ;;  %v8369_v46 = vmul.f32 %v17431_v52, %v17382_v60  ;;  %11047 = vmatmul.msk.f32.gmra.mxu1 %vm1415_vm0, %v17429_v34  ;;  %v8103_v51 = vmul.f32 %v17426_v18, %v17426_v18  ;;  %11747 = vrsqrt.f32 %v17439_v24  ;;  %vm8375_vm4 = vweird.f32 %v17431_v52  ;;  %vm17518_vm8 = vmor %vm8384_vm7, %vm8385_vm5 }
0x10a0   : > { %v8380_v31 = vmul.f32 %v17422_v58, %v8379_v50  ;;  %v8102_v15 = vmul.f32 %v17437_v28, %v17437_v28  ;;  %v8367_v20 = vsel %vm8366_vm1, %v17380_v29, %v8363_v42  ;;  %v11976_v50 = vld [vmem:[%s12222_s0 + $0xc0] sm:$0xff]  ;;  %v7844_v29 = vadd.f32 %v17394_v22, %v6264_v37  ;;  %vm8376_vm6 = vmor %vm8374_vm3, %vm8375_vm4 }
0x10a1   : > { %v8370_v55 = vmul.f32 %v17431_v52, %v8369_v46  ;;  %v8169_v5 = vsel %vm1415_vm0, %v8103_v51, 0.0  ;;  %v8606_v36 = vmul.f32 %v8367_v20, %v17084_v21  ;;  %v8826_v19 = vpop.f32.mrf.mxu1  ;;  %v17469_v34 = vadd.f32 %v11976_v50, %v7879_v47 }
0x10a2   : > { %v8381_v43 = vmul.f32 0.5, %v8380_v31  ;;  %8170 = vadd.xlane.f32.xlu1 %v8169_v5  ;;  %v8159_v25 = vpop.xlane.xlu2 %8158  ;;  %v8166_v40 = vsel %vm1415_vm0, %v8102_v15, 0.0  ;;  %v8827_v46 = vadd.f32 %v17390_v0, %v8826_v19  ;;  %7986 = vadd.xlane.f32.xlu0 %v7985_v38  ;;  %v7975_v1 = vpop.xlane.xlu1 %7974  ;;  %vm8394_vm10 = vweird.f32 %v17439_v24 }
0x10a3   : > { %v8371_v42 = vmul.f32 0.5, %v8370_v55  ;;  %v8227_v51 = vmul.f32 %v8159_v25, %v16905_v30  ;;  %8167 = vadd.xlane.f32.xlu2 %v8166_v40  ;;  %v8040_v31 = vmul.f32 %v16905_v30, %v7975_v1  ;;  %v8642_v15 = vmul.f32 %v17093_v63, %v8606_v36  ;;  %v8156_v37 = vpop.xlane.xlu0 %8155 }
0x10a4   : > { %v8382_v21 = vsub.f32 1.5, %v8381_v43  ;;  %v8920_v47 = vmax.f32 %v8827_v46, 0.0  ;;  %v8226_v38 = vmul.f32 %v8156_v37, %v16905_v30  ;;  %v6266_v25 = vadd.f32 %v16242_v2, %v17405_v44 }
0x10a5   : > { %v8372_v20 = vsub.f32 1.5, %v8371_v42  ;;  %v17478_v22 = vadd.f32 1e-05, %v8227_v51  ;;  %v17480_v55 = vpop.eup %11747  ;;  %v17485_v5 = vsub.f32 %v17244_v35, %v8040_v31  ;;  %v17488_v7 = vadd.f32 %v17105_v45, %v8642_v15  ;;  %v7804_v42 = vpop.f32.mrf.mxu0 }
0x10a6   : > { %v8383_v36 = vmul.f32 %v17422_v58, %v8382_v21  ;;  %v8389_v19 = vmul.f32 %v17480_v55, %v17439_v24  ;;  %11073 = vmatmul.msk.f32.gmra.mxu2 %vm2320_vm2, %v8920_v47  ;;  %v17502_v35 = vadd.f32 1e-05, %v8226_v38  ;;  %v7988_v40 = vsel %vm1415_vm0, %v17464_v8, 0.0 }
0x10a7   : > { %v8373_v43 = vmul.f32 %v17431_v52, %v8372_v20  ;;  %11749 = vrsqrt.f32 %v17478_v22  ;;  %11048 = vmatmul.msk.f32.gmra.mxu1 %vm1415_vm0, %v17488_v7  ;;  %v8104_v50 = vmul.f32 %v17485_v5, %v17485_v5  ;;  %v7991_v60 = vsel %vm1415_vm0, %v17469_v34, 0.0 }
0x10a8   : > { %v8390_v44 = vmul.f32 %v17480_v55, %v8389_v19  ;;  %v7880_v46 = vadd.f32 %v17357_v57, %v7844_v29  ;;  %11751 = vrsqrt.f32 %v17502_v35  ;;  %v8387_v31 = vsel %vm17518_vm8, %v17422_v58, %v8383_v36 }
0x10a9   : > { %v8377_v2 = vsel %vm8376_vm6, %v17431_v52, %v8373_v43  ;;  %v8172_v21 = vsel %vm1415_vm0, %v8104_v50, 0.0  ;;  %v7846_v38 = vadd.f32 %v7804_v42, %v6266_v25  ;;  %v8608_v50 = vmul.f32 %v8387_v31, %v17129_v56 }
0x10aa   : > { %v8607_v1 = vmul.f32 %v8377_v2, %v17139_v33  ;;  %v8829_v4 = vpop.f32.mrf.mxu1  ;;  %7992 = vadd.xlane.f32.xlu1 %v7991_v60  ;;  %v7981_v52 = vpop.xlane.xlu2 %7980  ;;  %v8391_v29 = vmul.f32 0.5, %v8390_v44  ;;  %8173 = vadd.xlane.f32.xlu0 %v8172_v21  ;;  %v6265_v33 = vadd.f32 %v16222_v49, %v17372_v12  ;;  %v11977_v44 = vld [vmem:[%s12222_s0 + $0xc8] sm:$0xff]  ;;  %vm8395_vm9 = vweird.f32 %v17480_v55 }
0x10ab   : > { %v8830_v15 = vadd.f32 %v17390_v0, %v8829_v4  ;;  %v8042_v20 = vmul.f32 %v16905_v30, %v7981_v52  ;;  %7989 = vadd.xlane.f32.xlu2 %v7988_v40  ;;  %v7978_v36 = vpop.xlane.xlu0 %7977  ;;  %v17544_v49 = vadd.f32 %v11977_v44, %v7880_v46  ;;  %v7882_v46 = vadd.f32 %v17357_v57, %v7846_v38  ;;  %vm17563_vm11 = vmor %vm8394_vm10, %vm8395_vm9  ;;  %v11979_v44 = vld [vmem:[%s12222_s0 + $0xd0] sm:$0xff] }
0x10ac   : > { %v8643_v47 = vmul.f32 %v17093_v63, %v8607_v1  ;;  %v8392_v43 = vsub.f32 1.5, %v8391_v29  ;;  %v8041_v2 = vmul.f32 %v16905_v30, %v7978_v36  ;;  %v7845_v42 = vadd.f32 %v17442_v17, %v6265_v33 }
0x10ad   : > { %v17533_v37 = vpop.eup %11749  ;;  %v8921_v19 = vmax.f32 %v8830_v15, 0.0  ;;  %v17536_v58 = vsub.f32 %v17273_v11, %v8042_v20  ;;  %v7994_v52 = vsel %vm1415_vm0, %v17544_v49, 0.0  ;;  %v8644_v21 = vmul.f32 %v17093_v63, %v8608_v50 }
0x10ae   : > { %v17541_v40 = vadd.f32 %v17105_v45, %v8643_v47  ;;  %v8393_v12 = vmul.f32 %v17480_v55, %v8392_v43  ;;  %v8409_v25 = vmul.f32 %v17533_v37, %v17478_v22  ;;  %v11752_v11 = vpop.eup %11751  ;;  %v17555_v60 = vsub.f32 %v17282_v32, %v8041_v2  ;;  %v11978_v43 = vld [vmem:[%s12222_s0 + $0xd8] sm:$0xff] }
0x10af   : > { %11074 = vmatmul.msk.f32.gmra.mxu2 %vm2320_vm2, %v8921_v19  ;;  %v8106_v56 = vmul.f32 %v17536_v58, %v17536_v58  ;;  %v8399_v51 = vmul.f32 %v11752_v11, %v17502_v35  ;;  %v7881_v20 = vadd.f32 %v17357_v57, %v7845_v42  ;;  %v17580_v19 = vadd.f32 %v11978_v43, %v7882_v46 }
0x10b0   : > { %11049 = vmatmul.msk.f32.gmra.mxu1 %vm1415_vm0, %v17541_v40  ;;  %v8105_v32 = vmul.f32 %v17555_v60, %v17555_v60  ;;  %v8397_v24 = vsel %vm17563_vm11, %v17480_v55, %v8393_v12  ;;  %v8410_v31 = vmul.f32 %v17533_v37, %v8409_v25  ;;  %v17584_v55 = vadd.f32 %v17105_v45, %v8644_v21 }
0x10b1   : > { %v8178_v1 = vsel %vm1415_vm0, %v8106_v56, 0.0  ;;  %v8400_v29 = vmul.f32 %v11752_v11, %v8399_v51  ;;  %v8609_v36 = vmul.f32 %v8397_v24, %v17189_v59  ;;  %vm8405_vm12 = vweird.f32 %v11752_v11 }
0x10b2   : > { %v8832_v17 = vpop.f32.mrf.mxu1  ;;  %8179 = vadd.xlane.f32.xlu1 %v8178_v1  ;;  %7995 = vadd.xlane.f32.xlu0 %v7994_v52  ;;  %v8175_v33 = vsel %vm1415_vm0, %v8105_v32, 0.0  ;;  %v8411_v50 = vmul.f32 0.5, %v8410_v31  ;;  %v17590_v12 = vadd.f32 %v11979_v44, %v7881_v20  ;;  %vm8404_vm13 = vweird.f32 %v17502_v35 }
0x10b3   : > { %v8833_v15 = vadd.f32 %v17390_v0, %v8832_v17  ;;  %v8401_v47 = vmul.f32 0.5, %v8400_v29  ;;  %8176 = vadd.xlane.f32.xlu2 %v8175_v33  ;;  %v8000_v59 = vsel %vm1415_vm0, %v17580_v19, 0.0  ;;  %vm8406_vm14 = vmor %vm8404_vm13, %vm8405_vm12  ;;  %v8645_v42 = vmul.f32 %v17093_v63, %v8609_v36 }
0x10b4   : > { %v8412_v46 = vsub.f32 1.5, %v8411_v50  ;;  %v7997_v4 = vsel %vm1415_vm0, %v17590_v12, 0.0  ;;  %vm8415_vm15 = vweird.f32 %v17533_v37  ;;  %vm8414_vm1 = vweird.f32 %v17478_v22 }
0x10b5   : > { %v8922_v38 = vmax.f32 %v8833_v15, 0.0  ;;  %v8402_v2 = vsub.f32 1.5, %v8401_v47  ;;  %v17601_v35 = vadd.f32 %v17105_v45, %v8645_v42  ;;  %vm8416_vm3 = vmor %vm8414_vm1, %vm8415_vm15 }
0x10b6   : > { %v8413_v52 = vmul.f32 %v17533_v37, %v8412_v46 }
0x10b7   : > { %11075 = vmatmul.msk.f32.gmra.mxu2 %vm2320_vm2, %v8922_v38  ;;  %v8403_v25 = vmul.f32 %v11752_v11, %v8402_v2  ;;  %v19357_v2 = vld [vmem:[#allocation85_spill] sm:$0xff] }
0x10b8   : > { %11050 = vmatmul.msk.f32.gmra.mxu1 %vm1415_vm0, %v17584_v55 }
0x10b9   : > { %v8407_v51 = vsel %vm8406_vm14, %v11752_v11, %v8403_v25 }
0x10ba   : > { %v8835_v56 = vpop.f32.mrf.mxu1  ;;  %8001 = vadd.xlane.f32.xlu1 %v8000_v59  ;;  %v8610_v32 = vmul.f32 %v8407_v51, %v17250_v54  ;;  %v8417_v54 = vsel %vm8416_vm3, %v17533_v37, %v8413_v52  ;;  %v19359_v52 = vld [vmem:[#allocation86_spill] sm:$0xff] }
0x10bb   : > { %v8836_v1 = vadd.f32 %v17390_v0, %v8835_v56  ;;  %7998 = vadd.xlane.f32.xlu2 %v7997_v4  ;;  %v8611_v29 = vmul.f32 %v8417_v54, %v17235_v16  ;;  %v7807_v16 = vpop.f32.mrf.mxu0 }
0x10bc   : > { %v8646_v21 = vmul.f32 %v17093_v63, %v8610_v32 }
0x10bd   : > { %v8923_v17 = vmax.f32 %v8836_v1, 0.0  ;;  %v8647_v20 = vmul.f32 %v17093_v63, %v8611_v29  ;;  %v19358_v63 = vld [vmem:[#allocation67_spill] sm:$0xff] }
0x10be   : > { %v17614_v15 = vadd.f32 %v17105_v45, %v8646_v21  ;;  %v4680_v44 = vadd.f32 %v19358_v63, %v19357_v2 }
0x10bf   : > { %11076 = vmatmul.msk.f32.gmra.mxu2 %vm2320_vm2, %v8923_v17  ;;  %v17622_v37 = vadd.f32 %v17105_v45, %v8647_v20  ;;  %v19361_v20 = vld [vmem:[#allocation87_spill] sm:$0xff] }
0x10c0   : > { %11051 = vmatmul.msk.f32.gmra.mxu1 %vm1415_vm0, %v17601_v35  ;;  %v6267_v59 = vadd.f32 %v16260_v61, %v4680_v44 }
0x10c2   : > { %v8838_v11 = vpop.f32.mrf.mxu1  ;;  %v7847_v51 = vadd.f32 %v7807_v16, %v6267_v59  ;;  %v19364_v59 = vld [vmem:[#allocation74_spill] sm:$0xff] }
0x10c3   : > { %v8839_v24 = vadd.f32 %v17390_v0, %v8838_v11  ;;  %v7810_v43 = vpop.f32.mrf.mxu0  ;;  %v19360_v11 = vld [vmem:[#allocation69_spill] sm:$0xff] }
0x10c4   : > { %v4683_v21 = vadd.f32 %v19360_v11, %v19359_v52 }
0x10c5   : > { %v8924_v31 = vmax.f32 %v8839_v24, 0.0 }
0x10c6   : > { %v6268_v24 = vadd.f32 %v16270_v13, %v4683_v21 }
0x10c7   : > { %11077 = vmatmul.msk.f32.gmra.mxu2 %vm2320_vm2, %v8924_v31  ;;  %v7883_v31 = vadd.f32 %v17357_v57, %v7847_v51  ;;  %v11980_v51 = vld [vmem:[%s12222_s0 + $0xe0] sm:$0xff] }
0x10c8   : > { %11052 = vmatmul.msk.f32.gmra.mxu1 %vm1415_vm0, %v17614_v15  ;;  %v7848_v16 = vadd.f32 %v7810_v43, %v6268_v24 }
0x10ca   : > { %v8841_v22 = vpop.f32.mrf.mxu1 }
0x10cb   : > { %v8842_v33 = vadd.f32 %v17390_v0, %v8841_v22  ;;  %v7813_v1 = vpop.f32.mrf.mxu0 }
0x10cd   : > { %v8925_v47 = vmax.f32 %v8842_v33, 0.0  ;;  %v19362_v33 = vld [vmem:[#allocation72_spill] sm:$0xff] }
0x10cf   : > { %11078 = vmatmul.msk.f32.gmra.mxu2 %vm2320_vm2, %v8925_v47  ;;  %v4686_v47 = vadd.f32 %v19362_v33, %v19361_v20 }
0x10d0   : > { %11053 = vmatmul.msk.f32.gmra.mxu1 %vm1415_vm0, %v17622_v37 }
0x10d3   : > { %v7816_v24 = vpop.f32.mrf.mxu0 }
0x1105   : > { %v8162_v38 = vpop.xlane.xlu1 %8161 }
0x1106   : > { %v8228_v36 = vmul.f32 %v8162_v38, %v16905_v30 }
0x1108   : > { %v8260_v50 = vadd.f32 1e-05, %v8228_v36 }
0x110a   : > { %11753 = vrsqrt.f32 %v8260_v50  ;;  %vm8424_vm5 = vweird.f32 %v8260_v50 }
0x110d   : > { %v7984_v25 = vpop.xlane.xlu1 %7983  ;;  %v8165_v45 = vpop.xlane.xlu0 %8164 }
0x110e   : > { %v8043_v56 = vmul.f32 %v16905_v30, %v7984_v25  ;;  %v8229_v42 = vmul.f32 %v8165_v45, %v16905_v30  ;;  %v19363_v25 = vld [vmem:[#allocation88_spill] sm:$0xff] }
0x110f   : > { %v4689_v45 = vadd.f32 %v19364_v59, %v19363_v25 }
0x1110   : > { %v11754_v46 = vpop.eup %11753  ;;  %v17634_v4 = vsub.f32 %v17378_v26, %v8043_v56  ;;  %v17636_v32 = vadd.f32 1e-05, %v8229_v42  ;;  %v6269_v56 = vadd.f32 %v16279_v14, %v4686_v47 }
0x1111   : > { %v8419_v17 = vmul.f32 %v11754_v46, %v8260_v50  ;;  %vm8425_vm4 = vweird.f32 %v11754_v46 }
0x1112   : > { %v8107_v61 = vmul.f32 %v17634_v4, %v17634_v4  ;;  %11755 = vrsqrt.f32 %v17636_v32  ;;  %vm8426_vm6 = vmor %vm8424_vm5, %vm8425_vm4  ;;  %vm8434_vm8 = vweird.f32 %v17636_v32 }
0x1113   : > { %v8420_v54 = vmul.f32 %v11754_v46, %v8419_v17  ;;  %v17657_v17 = vadd.f32 %v11980_v51, %v7883_v31  ;;  %v7849_v31 = vadd.f32 %v7813_v1, %v6269_v56 }
0x1114   : > { %v8181_v29 = vsel %vm1415_vm0, %v8107_v61, 0.0  ;;  %v6270_v61 = vadd.f32 %v16288_v53, %v4689_v45 }
0x1115   : > { %v8421_v26 = vmul.f32 0.5, %v8420_v54  ;;  %8182 = vadd.xlane.f32.xlu0 %v8181_v29  ;;  %v8171_v22 = vpop.xlane.xlu1 %8170  ;;  %v7987_v36 = vpop.xlane.xlu0 %7986  ;;  %v7884_v54 = vadd.f32 %v17357_v57, %v7848_v16 }
0x1116   : > { %v8168_v38 = vpop.xlane.xlu2 %8167  ;;  %v8231_v2 = vmul.f32 %v8171_v22, %v16905_v30  ;;  %v8044_v44 = vmul.f32 %v16905_v30, %v7987_v36  ;;  %v8003_v22 = vsel %vm1415_vm0, %v17657_v17, 0.0  ;;  %v7850_v20 = vadd.f32 %v7816_v24, %v6270_v61  ;;  %v17685_v36 = vld [vmem:[%s18982_s12] ss:$0 sm:$0xff] }
0x1117   : > { %v8422_v63 = vsub.f32 1.5, %v8421_v26  ;;  %v8230_v13 = vmul.f32 %v8168_v38, %v16905_v30  ;;  %v17703_v61 = vld [vmem:[%s18983_s13] ss:$0 sm:$0xff] }
0x1118   : > { %v17654_v42 = vadd.f32 1e-05, %v8231_v2  ;;  %v17659_v43 = vpop.eup %11755  ;;  %v17664_v21 = vsub.f32 %v17417_v27, %v8044_v44  ;;  %v7885_v44 = vadd.f32 %v17357_v57, %v7849_v31 }
0x1119   : > { %v8423_v52 = vmul.f32 %v11754_v46, %v8422_v63  ;;  %v17661_v11 = vadd.f32 1e-05, %v8230_v13  ;;  %v8429_v14 = vmul.f32 %v17659_v43, %v17636_v32  ;;  %v11982_v63 = vld [vmem:[%s12222_s0 + $0xe8] sm:$0xff]  ;;  %vm8435_vm7 = vweird.f32 %v17659_v43 }
0x111a   : > { %11757 = vrsqrt.f32 %v17654_v42  ;;  %v8108_v27 = vmul.f32 %v17664_v21, %v17664_v21  ;;  %v17689_v13 = vadd.f32 %v11982_v63, %v7884_v54  ;;  %vm8436_vm9 = vmor %vm8434_vm8, %vm8435_vm7  ;;  %vm8454_vm14 = vweird.f32 %v17654_v42 }
0x111b   : > { %v8427_v29 = vsel %vm8426_vm6, %v11754_v46, %v8423_v52  ;;  %11759 = vrsqrt.f32 %v17661_v11  ;;  %v8430_v53 = vmul.f32 %v17659_v43, %v8429_v14  ;;  %v7886_v14 = vadd.f32 %v17357_v57, %v7850_v20  ;;  %v11984_v20 = vld [vmem:[%s12222_s0 + $0xf0] sm:$0xff] }
0x111c   : > { %v8612_v50 = vmul.f32 %v8427_v29, %v17344_v23  ;;  %v8844_v26 = vpop.f32.mrf.mxu1  ;;  %v8184_v1 = vsel %vm1415_vm0, %v8108_v27, 0.0  ;;  %vm8444_vm12 = vweird.f32 %v17661_v11 }
0x111d   : > { %v8845_v33 = vadd.f32 %v17390_v0, %v8844_v26  ;;  %8004 = vadd.xlane.f32.xlu0 %v8003_v22  ;;  %v7993_v46 = vpop.xlane.xlu1 %7992  ;;  %v8431_v47 = vmul.f32 0.5, %v8430_v53  ;;  %8185 = vadd.xlane.f32.xlu2 %v8184_v1  ;;  %v8174_v38 = vpop.xlane.xlu0 %8173  ;;  %v8006_v53 = vsel %vm1415_vm0, %v17689_v13, 0.0 }
0x111e   : > { %v7990_v16 = vpop.xlane.xlu2 %7989  ;;  %v8046_v23 = vmul.f32 %v16905_v30, %v7993_v46  ;;  %v8648_v2 = vmul.f32 %v17685_v36, %v8612_v50  ;;  %v8232_v45 = vmul.f32 %v8174_v38, %v16905_v30 }
0x111f   : > { %v8926_v25 = vmax.f32 %v8845_v33, 0.0  ;;  %v8045_v59 = vmul.f32 %v16905_v30, %v7990_v16  ;;  %v8432_v51 = vsub.f32 1.5, %v8431_v47  ;;  %v17736_v33 = vadd.f32 %v11984_v20, %v7885_v44 }
0x1120   : > { %v17694_v56 = vpop.eup %11757  ;;  %v17698_v52 = vsub.f32 %v17469_v34, %v8046_v23  ;;  %v17706_v54 = vadd.f32 %v17703_v61, %v8648_v2  ;;  %v17716_v34 = vadd.f32 1e-05, %v8232_v45  ;;  %v11985_v23 = vld [vmem:[%s12222_s0 + $0xf8] sm:$0xff] }
0x1121   : > { %v17708_v24 = vpop.eup %11759  ;;  %v8449_v31 = vmul.f32 %v17694_v56, %v17654_v42  ;;  %v17714_v29 = vsub.f32 %v17464_v8, %v8045_v59  ;;  %11079 = vmatmul.msk.f32.gmra.mxu2 %vm2320_vm2, %v8926_v25  ;;  %v8433_v27 = vmul.f32 %v17659_v43, %v8432_v51  ;;  %v17741_v2 = vadd.f32 %v11985_v23, %v7886_v14 }
0x1122   : > { %v8439_v50 = vmul.f32 %v17708_v24, %v17661_v11  ;;  %11054 = vmatmul.msk.f32.gmra.mxu1 %vm1415_vm0, %v17706_v54  ;;  %11761 = vrsqrt.f32 %v17716_v34  ;;  %v8110_v22 = vmul.f32 %v17698_v52, %v17698_v52  ;;  %vm8455_vm10 = vweird.f32 %v17694_v56 }
0x1123   : > { %v8450_v57 = vmul.f32 %v17694_v56, %v8449_v31  ;;  %v8109_v8 = vmul.f32 %v17714_v29, %v17714_v29  ;;  %v8437_v32 = vsel %vm8436_vm9, %v17659_v43, %v8433_v27  ;;  %vm8445_vm11 = vweird.f32 %v17708_v24  ;;  %vm17774_vm15 = vmor %vm8454_vm14, %vm8455_vm10 }
0x1124   : > { %v8440_v26 = vmul.f32 %v17708_v24, %v8439_v50  ;;  %v8613_v1 = vmul.f32 %v8437_v32, %v17385_v48  ;;  %v8847_v47 = vpop.f32.mrf.mxu1  ;;  %v8190_v59 = vsel %vm1415_vm0, %v8110_v22, 0.0  ;;  %vm8446_vm13 = vmor %vm8444_vm12, %vm8445_vm11  ;;  %vm8464_vm3 = vweird.f32 %v17716_v34 }
0x1125   : > { %v8451_v46 = vmul.f32 0.5, %v8450_v57  ;;  %v8187_v16 = vsel %vm1415_vm0, %v8109_v8, 0.0  ;;  %v8180_v38 = vpop.xlane.xlu1 %8179  ;;  %v8848_v43 = vadd.f32 %v17390_v0, %v8847_v47  ;;  %8007 = vadd.xlane.f32.xlu2 %v8006_v53  ;;  %v7996_v25 = vpop.xlane.xlu0 %7995  ;;  %8191 = vadd.xlane.f32.xlu0 %v8190_v59  ;;  %v8009_v47 = vsel %vm1415_vm0, %v17736_v33, 0.0 }
0x1126   : > { %v8441_v63 = vmul.f32 0.5, %v8440_v26  ;;  %8188 = vadd.xlane.f32.xlu1 %v8187_v16  ;;  %v8234_v44 = vmul.f32 %v8180_v38, %v16905_v30  ;;  %v8047_v48 = vmul.f32 %v16905_v30, %v7996_v25  ;;  %v8649_v51 = vmul.f32 %v17685_v36, %v8613_v1  ;;  %v8177_v27 = vpop.xlane.xlu2 %8176 }
0x1127   : > { %v8452_v45 = vsub.f32 1.5, %v8451_v46  ;;  %v8927_v31 = vmax.f32 %v8848_v43, 0.0  ;;  %v8233_v53 = vmul.f32 %v8177_v27, %v16905_v30 }
0x1128   : > { %v8442_v14 = vsub.f32 1.5, %v8441_v63  ;;  %v17750_v50 = vadd.f32 1e-05, %v8234_v44  ;;  %v17752_v57 = vpop.eup %11761  ;;  %v17757_v32 = vsub.f32 %v17544_v49, %v8047_v48  ;;  %v17760_v26 = vadd.f32 %v17703_v61, %v8649_v51 }
0x1129   : > { %v8453_v8 = vmul.f32 %v17694_v56, %v8452_v45  ;;  %v8459_v20 = vmul.f32 %v17752_v57, %v17716_v34  ;;  %11080 = vmatmul.msk.f32.gmra.mxu2 %vm2320_vm2, %v8927_v31  ;;  %v8265_v1 = vadd.f32 1e-05, %v8233_v53  ;;  %v8012_v63 = vsel %vm1415_vm0, %v17741_v2, 0.0 }
0x112a   : > { %v8443_v22 = vmul.f32 %v17708_v24, %v8442_v14  ;;  %11763 = vrsqrt.f32 %v17750_v50  ;;  %11055 = vmatmul.msk.f32.gmra.mxu1 %vm1415_vm0, %v17760_v26  ;;  %v8111_v42 = vmul.f32 %v17757_v32, %v17757_v32  ;;  %vm8465_vm1 = vweird.f32 %v17752_v57 }
0x112b   : > { %v8460_v46 = vmul.f32 %v17752_v57, %v8459_v20  ;;  %11765 = vrsqrt.f32 %v8265_v1  ;;  %vm8466_vm4 = vmor %vm8464_vm3, %vm8465_vm1  ;;  %vm8474_vm6 = vweird.f32 %v8265_v1  ;;  %vm8484_vm9 = vweird.f32 %v17750_v50 }
0x112c   : > { %v8447_v49 = vsel %vm8446_vm13, %v17708_v24, %v8443_v22  ;;  %v8457_v24 = vsel %vm17774_vm15, %v17694_v56, %v8453_v8  ;;  %v8193_v59 = vsel %vm1415_vm0, %v8111_v42, 0.0 }
0x112d   : > { %v8614_v16 = vmul.f32 %v8447_v49, %v17437_v28  ;;  %v8850_v38 = vpop.f32.mrf.mxu1  ;;  %v8002_v23 = vpop.xlane.xlu1 %8001  ;;  %v8461_v43 = vmul.f32 0.5, %v8460_v46  ;;  %8194 = vadd.xlane.f32.xlu2 %v8193_v59  ;;  %8013 = vadd.xlane.f32.xlu0 %v8012_v63  ;;  %v8615_v31 = vmul.f32 %v8457_v24, %v17426_v18 }
0x112e   : > { %v8851_v25 = vadd.f32 %v17390_v0, %v8850_v38  ;;  %8010 = vadd.xlane.f32.xlu1 %v8009_v47  ;;  %v8049_v44 = vmul.f32 %v16905_v30, %v8002_v23  ;;  %v7999_v51 = vpop.xlane.xlu2 %7998 }
0x112f   : > { %v8650_v28 = vmul.f32 %v17685_v36, %v8614_v16  ;;  %v8462_v56 = vsub.f32 1.5, %v8461_v43  ;;  %v8048_v27 = vmul.f32 %v16905_v30, %v7999_v51  ;;  %v8651_v42 = vmul.f32 %v17685_v36, %v8615_v31 }
0x1130   : > { %v11764_v45 = vpop.eup %11763  ;;  %v8928_v48 = vmax.f32 %v8851_v25, 0.0  ;;  %v17794_v14 = vsub.f32 %v17580_v19, %v8049_v44 }
0x1131   : > { %v17799_v8 = vadd.f32 %v17703_v61, %v8650_v28  ;;  %v8463_v53 = vmul.f32 %v17752_v57, %v8462_v56  ;;  %v8479_v22 = vmul.f32 %v11764_v45, %v17750_v50  ;;  %v11766_v19 = vpop.eup %11765  ;;  %v17808_v49 = vsub.f32 %v17590_v12, %v8048_v27 }
0x1132   : > { %11081 = vmatmul.msk.f32.gmra.mxu2 %vm2320_vm2, %v8928_v48  ;;  %v8113_v20 = vmul.f32 %v17794_v14, %v17794_v14  ;;  %v8469_v18 = vmul.f32 %v11766_v19, %v8265_v1  ;;  %v17822_v25 = vadd.f32 %v17703_v61, %v8651_v42  ;;  %vm8475_vm5 = vweird.f32 %v11766_v19 }
0x1133   : > { %11056 = vmatmul.msk.f32.gmra.mxu1 %vm1415_vm0, %v17799_v8  ;;  %v8112_v47 = vmul.f32 %v17808_v49, %v17808_v49  ;;  %v8467_v16 = vsel %vm8466_vm4, %v17752_v57, %v8463_v53  ;;  %v8480_v12 = vmul.f32 %v11764_v45, %v8479_v22  ;;  %vm8476_vm7 = vmor %vm8474_vm6, %vm8475_vm5  ;;  %vm8485_vm8 = vweird.f32 %v11764_v45 }
0x1134   : > { %v8199_v11 = vsel %vm1415_vm0, %v8113_v20, 0.0  ;;  %v8470_v24 = vmul.f32 %v11766_v19, %v8469_v18  ;;  %v8616_v43 = vmul.f32 %v8467_v16, %v17485_v5  ;;  %vm8486_vm10 = vmor %vm8484_vm9, %vm8485_vm8 }
0x1135   : > { %v8853_v46 = vpop.f32.mrf.mxu1  ;;  %v8196_v23 = vsel %vm1415_vm0, %v8112_v47, 0.0  ;;  %8200 = vadd.xlane.f32.xlu2 %v8199_v11  ;;  %v8481_v44 = vmul.f32 0.5, %v8480_v12 }
0x1136   : > { %v8854_v38 = vadd.f32 %v17390_v0, %v8853_v46  ;;  %v8471_v34 = vmul.f32 0.5, %v8470_v24  ;;  %8197 = vadd.xlane.f32.xlu1 %v8196_v23  ;;  %v8652_v56 = vmul.f32 %v17685_v36, %v8616_v43 }
0x1137   : > { %v8482_v51 = vsub.f32 1.5, %v8481_v44 }
0x1138   : > { %v8929_v63 = vmax.f32 %v8854_v38, 0.0  ;;  %v8472_v59 = vsub.f32 1.5, %v8471_v34  ;;  %v17831_v53 = vadd.f32 %v17703_v61, %v8652_v56 }
0x1139   : > { %v8483_v22 = vmul.f32 %v11764_v45, %v8482_v51 }
0x113a   : > { %11082 = vmatmul.msk.f32.gmra.mxu2 %vm2320_vm2, %v8929_v63  ;;  %v8473_v57 = vmul.f32 %v11766_v19, %v8472_v59 }
0x113b   : > { %11057 = vmatmul.msk.f32.gmra.mxu1 %vm1415_vm0, %v17822_v25 }
0x113c   : > { %v8477_v48 = vsel %vm8476_vm7, %v11766_v19, %v8473_v57  ;;  %v8487_v19 = vsel %vm8486_vm10, %v11764_v45, %v8483_v22 }
0x113d   : > { %v8856_v28 = vpop.f32.mrf.mxu1  ;;  %v8617_v27 = vmul.f32 %v8477_v48, %v17555_v60  ;;  %v8618_v11 = vmul.f32 %v8487_v19, %v17536_v58  ;;  %v9076_v58 = vpop.f32.mrf.mxu2 }
0x113e   : > { %v8857_v5 = vadd.f32 %v17390_v0, %v8856_v28 }
0x113f   : > { %v8653_v20 = vmul.f32 %v17685_v36, %v8617_v27  ;;  %v8654_v50 = vmul.f32 %v17685_v36, %v8618_v11 }
0x1140   : > { %v8930_v31 = vmax.f32 %v8857_v5, 0.0 }
0x1141   : > { %v17841_v46 = vadd.f32 %v17703_v61, %v8653_v20  ;;  %v17849_v45 = vadd.f32 %v17703_v61, %v8654_v50 }
0x1142   : > { %11083 = vmatmul.msk.f32.gmra.mxu2 %vm2320_vm2, %v8930_v31 }
0x1143   : > { %11058 = vmatmul.msk.f32.gmra.mxu1 %vm1415_vm0, %v17831_v53 }
0x1145   : > { %v8859_v1 = vpop.f32.mrf.mxu1  ;;  %v17854_v24 = vpop.f32.mrf.mxu2 }
0x1146   : > { %v8860_v18 = vadd.f32 %v17390_v0, %v8859_v1 }
0x1148   : > { %v8931_v60 = vmax.f32 %v8860_v18, 0.0 }
0x114a   : > { %11084 = vmatmul.msk.f32.gmra.mxu2 %vm2320_vm2, %v8931_v60  ;;  %v17876_v60 = vld [vmem:[%s18987_s17] ss:$0 sm:$0xff] }
0x114b   : > { %11059 = vmatmul.msk.f32.gmra.mxu1 %vm1415_vm0, %v17841_v46 }
0x114d   : > { %v8862_v47 = vpop.f32.mrf.mxu1  ;;  %v17856_v12 = vpop.f32.mrf.mxu2 }
0x114e   : > { %v8863_v42 = vadd.f32 %v17390_v0, %v8862_v47 }
0x1150   : > { %v8932_v16 = vmax.f32 %v8863_v42, 0.0 }
0x1152   : > { %11085 = vmatmul.msk.f32.gmra.mxu2 %vm2320_vm2, %v8932_v16 }
0x1153   : > { %11060 = vmatmul.msk.f32.gmra.mxu1 %vm1415_vm0, %v17849_v45 }
0x1155   : > { %v17858_v38 = vpop.f32.mrf.mxu2 }
0x115d   : > { %v17860_v23 = vpop.f32.mrf.mxu2 }
0x1165   : > { %v17864_v28 = vpop.f32.mrf.mxu2 }
0x1188   : > { %v8183_v34 = vpop.xlane.xlu0 %8182 }
0x1189   : > { %v8235_v63 = vmul.f32 %v8183_v34, %v16905_v30  ;;  %v17881_v34 = vpop.f32.mrf.mxu2 }
0x118b   : > { %v8267_v43 = vadd.f32 1e-05, %v8235_v63 }
0x118d   : > { %11767 = vrsqrt.f32 %v8267_v43  ;;  %vm8494_vm12 = vweird.f32 %v8267_v43 }
0x1190   : > { %v8005_v59 = vpop.xlane.xlu0 %8004  ;;  %v8186_v44 = vpop.xlane.xlu2 %8185 }
0x1191   : > { %v8050_v57 = vmul.f32 %v16905_v30, %v8005_v59  ;;  %v8236_v56 = vmul.f32 %v8186_v44, %v16905_v30 }
0x1193   : > { %v11768_v48 = vpop.eup %11767  ;;  %v17868_v51 = vsub.f32 %v17657_v17, %v8050_v57  ;;  %v8268_v31 = vadd.f32 1e-05, %v8236_v56 }
0x1194   : > { %v8489_v5 = vmul.f32 %v11768_v48, %v8267_v43  ;;  %vm8495_vm11 = vweird.f32 %v11768_v48 }
0x1195   : > { %v8114_v27 = vmul.f32 %v17868_v51, %v17868_v51  ;;  %11769 = vrsqrt.f32 %v8268_v31  ;;  %vm8496_vm13 = vmor %vm8494_vm12, %vm8495_vm11  ;;  %vm8504_vm15 = vweird.f32 %v8268_v31 }
0x1196   : > { %v8490_v22 = vmul.f32 %v11768_v48, %v8489_v5  ;;  %v9077_v5 = vadd.f32 %v17876_v60, %v9076_v58 }
0x1197   : > { %v8202_v1 = vsel %vm1415_vm0, %v8114_v27, 0.0 }
0x1198   : > { %v8491_v20 = vmul.f32 0.5, %v8490_v22  ;;  %8203 = vadd.xlane.f32.xlu0 %v8202_v1  ;;  %v8008_v19 = vpop.xlane.xlu2 %8007  ;;  %v8192_v47 = vpop.xlane.xlu0 %8191 }
0x1199   : > { %v8189_v18 = vpop.xlane.xlu1 %8188  ;;  %v8051_v11 = vmul.f32 %v16905_v30, %v8008_v19  ;;  %v8238_v42 = vmul.f32 %v8192_v47, %v16905_v30 }
0x119a   : > { %v8492_v17 = vsub.f32 1.5, %v8491_v20  ;;  %v8237_v50 = vmul.f32 %v8189_v18, %v16905_v30 }
0x119b   : > { %v11770_v16 = vpop.eup %11769  ;;  %v17884_v59 = vsub.f32 %v17689_v13, %v8051_v11  ;;  %v17888_v56 = vadd.f32 1e-05, %v8238_v42 }
0x119c   : > { %v8493_v63 = vmul.f32 %v11768_v48, %v8492_v17  ;;  %v17886_v44 = vadd.f32 1e-05, %v8237_v50  ;;  %v8499_v57 = vmul.f32 %v11770_v16, %v8268_v31  ;;  %vm8505_vm14 = vweird.f32 %v11770_v16 }
0x119d   : > { %v8115_v22 = vmul.f32 %v17884_v59, %v17884_v59  ;;  %vm8506_vm1 = vmor %vm8504_vm15, %vm8505_vm14  ;;  %v9083_v31 = vadd.f32 %v17876_v60, %v17856_v12  ;;  %v17949_v12 = vld [vmem:[%s18985_s15] ss:$0 sm:$0xff]  ;;  %vm8524_vm7 = vweird.f32 %v17888_v56 }
0x119e   : > { %v8497_v27 = vsel %vm8496_vm13, %v11768_v48, %v8493_v63  ;;  %11771 = vrsqrt.f32 %v17886_v44  ;;  %v8500_v43 = vmul.f32 %v11770_v16, %v8499_v57  ;;  %vm8514_vm5 = vweird.f32 %v17886_v44 }
0x119f   : > { %v8619_v1 = vmul.f32 %v8497_v27, %v17634_v4  ;;  %11773 = vrsqrt.f32 %v17888_v56  ;;  %v8865_v13 = vpop.f32.mrf.mxu1  ;;  %v8205_v19 = vsel %vm1415_vm0, %v8115_v22, 0.0  ;;  %v17901_v4 = vadd.f32 %v9077_v5, %v17125_v9 }
0x11a0   : > { %v8866_v20 = vadd.f32 %v17390_v0, %v8865_v13  ;;  %v8501_v18 = vmul.f32 0.5, %v8500_v43  ;;  %8206 = vadd.xlane.f32.xlu1 %v8205_v19  ;;  %v8195_v11 = vpop.xlane.xlu2 %8194  ;;  %v8014_v50 = vpop.xlane.xlu0 %8013  ;;  %v9080_v22 = vadd.f32 %v17876_v60, %v17854_v24 }
0x11a1   : > { %v8011_v17 = vpop.xlane.xlu1 %8010  ;;  %v8655_v58 = vmul.f32 %v17685_v36, %v8619_v1  ;;  %v8239_v63 = vmul.f32 %v8195_v11, %v16905_v30  ;;  %v8053_v0 = vmul.f32 %v16905_v30, %v8014_v50  ;;  %v9086_v1 = vadd.f32 %v17876_v60, %v17858_v38 }
0x11a2   : > { %v8933_v48 = vmax.f32 %v8866_v20, 0.0  ;;  %v8052_v47 = vmul.f32 %v16905_v30, %v8011_v17  ;;  %v8502_v42 = vsub.f32 1.5, %v8501_v18  ;;  %v9204_v38 = vsel %vm1415_vm0, %v17901_v4, 0.0 }
0x11a3   : > { %v17906_v57 = vadd.f32 %v17703_v61, %v8655_v58  ;;  %v17924_v19 = vadd.f32 1e-05, %v8239_v63  ;;  %v17932_v24 = vsub.f32 %v17741_v2, %v8053_v0 }
0x11a4   : > { %v17908_v27 = vpop.eup %11771  ;;  %v17915_v43 = vsub.f32 %v17736_v33, %v8052_v47  ;;  %v17917_v9 = vpop.f32.mrf.mxu2  ;;  %11086 = vmatmul.msk.f32.gmra.mxu2 %vm2320_vm2, %v8933_v48  ;;  %v8503_v13 = vmul.f32 %v11770_v16, %v8502_v42  ;;  %v17956_v42 = vadd.f32 %v9080_v22, %v17192_v39 }
0x11a5   : > { %v17920_v5 = vpop.eup %11773  ;;  %v8509_v20 = vmul.f32 %v17908_v27, %v17886_v44  ;;  %11061 = vmatmul.msk.f32.gmra.mxu1 %vm1415_vm0, %v17906_v57  ;;  %11775 = vrsqrt.f32 %v17924_v19  ;;  %v8117_v47 = vmul.f32 %v17932_v24, %v17932_v24  ;;  %vm8515_vm3 = vweird.f32 %v17908_v27 }
0x11a6   : > { %v8519_v33 = vmul.f32 %v17920_v5, %v17888_v56  ;;  %v8507_v18 = vsel %vm8506_vm1, %v11770_v16, %v8503_v13  ;;  %v8116_v2 = vmul.f32 %v17915_v43, %v17915_v43  ;;  %vm8525_vm4 = vweird.f32 %v17920_v5  ;;  %vm8516_vm6 = vmor %vm8514_vm5, %vm8515_vm3 }
0x11a7   : > { %v8510_v17 = vmul.f32 %v17908_v27, %v8509_v20  ;;  %v8620_v58 = vmul.f32 %v8507_v18, %v17664_v21  ;;  %v8868_v11 = vpop.f32.mrf.mxu1  ;;  %v17953_v21 = vadd.f32 %v9086_v1, %v17277_v10  ;;  %v8211_v20 = vsel %vm1415_vm0, %v8117_v47, 0.0  ;;  %vm17996_vm8 = vmor %vm8524_vm7, %vm8525_vm4 }
0x11a8   : > { %v8520_v48 = vmul.f32 %v17920_v5, %v8519_v33  ;;  %v8869_v16 = vadd.f32 %v17949_v12, %v8868_v11  ;;  %9205 = vadd.xlane.f32.xlu1 %v9204_v38  ;;  %v8201_v0 = vpop.xlane.xlu2 %8200  ;;  %v8208_v13 = vsel %vm1415_vm0, %v8116_v2, 0.0  ;;  %8212 = vadd.xlane.f32.xlu0 %v8211_v20  ;;  %vm8534_vm10 = vweird.f32 %v17924_v19 }
0x11a9   : > { %v8511_v50 = vmul.f32 0.5, %v8510_v17  ;;  %v8656_v33 = vmul.f32 %v17685_v36, %v8620_v58  ;;  %v8241_v38 = vmul.f32 %v8201_v0, %v16905_v30  ;;  %8209 = vadd.xlane.f32.xlu2 %v8208_v13  ;;  %v8198_v10 = vpop.xlane.xlu1 %8197 }
0x11aa   : > { %v8521_v63 = vmul.f32 0.5, %v8520_v48  ;;  %v8934_v17 = vmax.f32 %v8869_v16, 0.0  ;;  %v8240_v39 = vmul.f32 %v8198_v10, %v16905_v30  ;;  %v17968_v48 = vadd.f32 %v9083_v31, %v17241_v41 }
0x11ab   : > { %v8512_v18 = vsub.f32 1.5, %v8511_v50  ;;  %v17965_v22 = vadd.f32 %v17703_v61, %v8656_v33  ;;  %v17970_v11 = vpop.eup %11775  ;;  %v17975_v2 = vadd.f32 1e-05, %v8241_v38  ;;  %v9213_v16 = vsel %vm1415_vm0, %v17953_v21, 0.0 }
0x11ac   : > { %v8522_v1 = vsub.f32 1.5, %v8521_v63  ;;  %v9100_v47 = vpop.f32.mrf.mxu2  ;;  %11087 = vmatmul.msk.f32.gmra.mxu2 %vm2320_vm2, %v8934_v17  ;;  %v8529_v41 = vmul.f32 %v17970_v11, %v17924_v19  ;;  %v17983_v31 = vadd.f32 1e-05, %v8240_v39  ;;  %v9095_v63 = vadd.f32 %v17876_v60, %v17881_v34 }
0x11ad   : > { %v8513_v58 = vmul.f32 %v17908_v27, %v8512_v18  ;;  %11062 = vmatmul.msk.f32.gmra.mxu1 %vm1415_vm0, %v17965_v22  ;;  %11777 = vrsqrt.f32 %v17975_v2  ;;  %v9207_v34 = vsel %vm1415_vm0, %v17956_v42, 0.0  ;;  %v9210_v18 = vsel %vm1415_vm0, %v17968_v48, 0.0 }
0x11ae   : > { %v8523_v50 = vmul.f32 %v17920_v5, %v8522_v1  ;;  %v8530_v56 = vmul.f32 %v17970_v11, %v8529_v41  ;;  %11779 = vrsqrt.f32 %v17983_v31  ;;  %v9092_v17 = vadd.f32 %v17876_v60, %v17864_v28 }
0x11af   : > { %v8517_v44 = vsel %vm8516_vm6, %v17908_v27, %v8513_v58  ;;  %vm8535_vm9 = vweird.f32 %v17970_v11  ;;  %vm8544_vm13 = vweird.f32 %v17983_v31  ;;  %vm8554_vm1 = vweird.f32 %v17975_v2 }
0x11b0   : > { %v8621_v13 = vmul.f32 %v8517_v44, %v17714_v29  ;;  %v8871_v27 = vpop.f32.mrf.mxu1  ;;  %v8527_v20 = vsel %vm17996_vm8, %v17920_v5, %v8523_v50  ;;  %9214 = vadd.xlane.f32.xlu1 %v9213_v16  ;;  %v9089_v29 = vadd.f32 %v17876_v60, %v17860_v23  ;;  %v8531_v38 = vmul.f32 0.5, %v8530_v56  ;;  %9211 = vadd.xlane.f32.xlu0 %v9210_v18  ;;  %vm18040_vm11 = vmor %vm8534_vm10, %vm8535_vm9 }
0x11b1   : > { %v8872_v33 = vadd.f32 %v17949_v12, %v8871_v27  ;;  %9208 = vadd.xlane.f32.xlu2 %v9207_v34  ;;  %v8622_v5 = vmul.f32 %v8527_v20, %v17698_v52  ;;  %v18021_v50 = vadd.f32 %v9095_v63, %v17309_v6  ;;  %v18036_v6 = vadd.f32 %v9092_v17, %v17303_v3 }
0x11b2   : > { %v8657_v10 = vmul.f32 %v17685_v36, %v8621_v13  ;;  %v8532_v39 = vsub.f32 1.5, %v8531_v38  ;;  %v18033_v16 = vadd.f32 %v9089_v29, %v17292_v62  ;;  %v9098_v34 = vadd.f32 %v17876_v60, %v17917_v9 }
0x11b3   : > { %v8935_v1 = vmax.f32 %v8872_v33, 0.0  ;;  %v18023_v41 = vpop.eup %11777  ;;  %v9222_v27 = vsel %vm1415_vm0, %v18021_v50, 0.0  ;;  %v8658_v62 = vmul.f32 %v17685_v36, %v8622_v5  ;;  %v9101_v18 = vadd.f32 %v17876_v60, %v9100_v47 }
0x11b4   : > { %v18018_v58 = vadd.f32 %v17703_v61, %v8657_v10  ;;  %v11780_v28 = vpop.eup %11779  ;;  %v8533_v44 = vmul.f32 %v17970_v11, %v8532_v39  ;;  %v8549_v52 = vmul.f32 %v18023_v41, %v17975_v2  ;;  %v9216_v29 = vsel %vm1415_vm0, %v18033_v16, 0.0 }
0x11b5   : > { %v9103_v23 = vpop.f32.mrf.mxu2  ;;  %11088 = vmatmul.msk.f32.gmra.mxu2 %vm2320_vm2, %v8935_v1  ;;  %v8539_v63 = vmul.f32 %v11780_v28, %v17983_v31  ;;  %v9219_v17 = vsel %vm1415_vm0, %v18036_v6, 0.0  ;;  %v18065_v5 = vadd.f32 %v17703_v61, %v8658_v62  ;;  %vm8545_vm12 = vweird.f32 %v11780_v28 }
0x11b6   : > { %11063 = vmatmul.msk.f32.gmra.mxu1 %vm1415_vm0, %v18018_v58  ;;  %v9104_v13 = vadd.f32 %v17876_v60, %v9103_v23  ;;  %v8537_v3 = vsel %vm18040_vm11, %v17970_v11, %v8533_v44  ;;  %v8550_v19 = vmul.f32 %v18023_v41, %v8549_v52  ;;  %v18069_v23 = vadd.f32 %v9101_v18, %v17488_v7  ;;  %v19371_v44 = vld [vmem:[#allocation12_spill] sm:$0xff]  ;;  %vm8546_vm14 = vmor %vm8544_vm13, %vm8545_vm12 }
0x11b7   : > { %v8540_v20 = vmul.f32 %v11780_v28, %v8539_v63  ;;  %v8623_v11 = vmul.f32 %v8537_v3, %v17757_v32  ;;  %v18074_v32 = vadd.f32 %v9098_v34, %v19371_v44  ;;  %vm8555_vm15 = vweird.f32 %v18023_v41 }
0x11b8   : > { %v8874_v56 = vpop.f32.mrf.mxu1  ;;  %9223 = vadd.xlane.f32.xlu1 %v9222_v27  ;;  %9220 = vadd.xlane.f32.xlu0 %v9219_v17  ;;  %v18062_v1 = vadd.f32 %v9104_v13, %v17541_v40  ;;  %v8551_v9 = vmul.f32 0.5, %v8550_v19  ;;  %v9228_v31 = vsel %vm1415_vm0, %v18069_v23, 0.0  ;;  %vm8556_vm3 = vmor %vm8554_vm1, %vm8555_vm15 }
0x11b9   : > { %v8875_v33 = vadd.f32 %v17949_v12, %v8874_v56  ;;  %v8541_v38 = vmul.f32 0.5, %v8540_v20  ;;  %9217 = vadd.xlane.f32.xlu2 %v9216_v29  ;;  %v8659_v0 = vmul.f32 %v17685_v36, %v8623_v11  ;;  %v9225_v62 = vsel %vm1415_vm0, %v18074_v32, 0.0 }
0x11ba   : > { %v9231_v63 = vsel %vm1415_vm0, %v18062_v1, 0.0  ;;  %v8552_v13 = vsub.f32 1.5, %v8551_v9 }
0x11bb   : > { %v8936_v10 = vmax.f32 %v8875_v33, 0.0  ;;  %v8542_v47 = vsub.f32 1.5, %v8541_v38  ;;  %v18088_v20 = vadd.f32 %v17703_v61, %v8659_v0 }
0x11bd   : > { %v9106_v39 = vpop.f32.mrf.mxu2  ;;  %11089 = vmatmul.msk.f32.gmra.mxu2 %vm2320_vm2, %v8936_v10  ;;  %v8543_v40 = vmul.f32 %v11780_v28, %v8542_v47 }
0x11be   : > { %11064 = vmatmul.msk.f32.gmra.mxu1 %vm1415_vm0, %v18065_v5  ;;  %v9107_v27 = vadd.f32 %v17876_v60, %v9106_v39 }
0x11bf   : > { %v8547_v56 = vsel %vm8546_vm14, %v11780_v28, %v8543_v40  ;;  %v8553_v28 = vmul.f32 %v18023_v41, %v8552_v13 }
0x11c0   : > { %v8877_v52 = vpop.f32.mrf.mxu1  ;;  %9232 = vadd.xlane.f32.xlu1 %v9231_v63  ;;  %9229 = vadd.xlane.f32.xlu0 %v9228_v31  ;;  %v8624_v19 = vmul.f32 %v8547_v56, %v17808_v49  ;;  %v18094_v34 = vadd.f32 %v9107_v27, %v17584_v55 }
0x11c1   : > { %v8878_v7 = vadd.f32 %v17949_v12, %v8877_v52  ;;  %9226 = vadd.xlane.f32.xlu2 %v9225_v62  ;;  %v8557_v38 = vsel %vm8556_vm3, %v18023_v41, %v8553_v28 }
0x11c2   : > { %v8660_v17 = vmul.f32 %v17685_v36, %v8624_v19  ;;  %v9234_v55 = vsel %vm1415_vm0, %v18094_v34, 0.0  ;;  %v8625_v2 = vmul.f32 %v8557_v38, %v17794_v14 }
0x11c3   : > { %v8937_v3 = vmax.f32 %v8878_v7, 0.0 }
0x11c4   : > { %v8661_v40 = vmul.f32 %v17685_v36, %v8625_v2 }
0x11c5   : > { %v9109_v33 = vpop.f32.mrf.mxu2  ;;  %11090 = vmatmul.msk.f32.gmra.mxu2 %vm2320_vm2, %v8937_v3 }
0x11c6   : > { %v9110_v18 = vadd.f32 %v17876_v60, %v9109_v33  ;;  %11065 = vmatmul.msk.f32.gmra.mxu1 %vm1415_vm0, %v18088_v20  ;;  %v18126_v0 = vadd.f32 %v17703_v61, %v8661_v40 }
0x11c8   : > { %v18101_v49 = vadd.f32 %v9110_v18, %v17601_v35  ;;  %v8880_v29 = vpop.f32.mrf.mxu1  ;;  %v18112_v35 = vadd.f32 %v17703_v61, %v8660_v17 }
0x11c9   : > { %v8881_v10 = vadd.f32 %v17949_v12, %v8880_v29  ;;  %9235 = vadd.xlane.f32.xlu2 %v9234_v55 }
0x11ca   : > { %v9237_v11 = vsel %vm1415_vm0, %v18101_v49, 0.0 }
0x11cb   : > { %v8938_v9 = vmax.f32 %v8881_v10, 0.0  ;;  %9238 = vadd.xlane.f32.xlu0 %v9237_v11 }
0x11cd   : > { %v9112_v47 = vpop.f32.mrf.mxu2  ;;  %11091 = vmatmul.msk.f32.gmra.mxu2 %vm2320_vm2, %v8938_v9 }
0x11ce   : > { %v9113_v41 = vadd.f32 %v17876_v60, %v9112_v47  ;;  %11066 = vmatmul.msk.f32.gmra.mxu1 %vm1415_vm0, %v18112_v35 }
0x11d0   : > { %v18119_v39 = vadd.f32 %v9113_v41, %v17614_v15  ;;  %v8883_v44 = vpop.f32.mrf.mxu1 }
0x11d1   : > { %v8884_v52 = vadd.f32 %v17949_v12, %v8883_v44 }
0x11d2   : > { %v9240_v14 = vsel %vm1415_vm0, %v18119_v39, 0.0 }
0x11d3   : > { %v8939_v63 = vmax.f32 %v8884_v52, 0.0  ;;  %9241 = vadd.xlane.f32.xlu1 %v9240_v14 }
0x11d5   : > { %v9115_v13 = vpop.f32.mrf.mxu2  ;;  %11092 = vmatmul.msk.f32.gmra.mxu2 %vm2320_vm2, %v8939_v63 }
0x11d6   : > { %v9116_v56 = vadd.f32 %v17876_v60, %v9115_v13  ;;  %11067 = vmatmul.msk.f32.gmra.mxu1 %vm1415_vm0, %v18126_v0 }
0x11d8   : > { %v18133_v15 = vadd.f32 %v9116_v56, %v17622_v37 }
0x11da   : > { %v9243_v7 = vsel %vm1415_vm0, %v18133_v15, 0.0 }
0x11db   : > { %9244 = vadd.xlane.f32.xlu2 %v9243_v7 }
0x120b   : > { %v8204_v27 = vpop.xlane.xlu0 %8203 }
0x120c   : > { %v8242_v62 = vmul.f32 %v8204_v27, %v16905_v30 }
0x120e   : > { %v8274_v31 = vadd.f32 1e-05, %v8242_v62 }
0x1210   : > { %11781 = vrsqrt.f32 %v8274_v31  ;;  %vm8564_vm5 = vweird.f32 %v8274_v31 }
0x1213   : > { %v8207_v3 = vpop.xlane.xlu1 %8206 }
0x1214   : > { %v8243_v19 = vmul.f32 %v8207_v3, %v16905_v30 }
0x1216   : > { %v11782_v28 = vpop.eup %11781  ;;  %v8275_v18 = vadd.f32 1e-05, %v8243_v19 }
0x1217   : > { %v8559_v33 = vmul.f32 %v11782_v28, %v8274_v31  ;;  %vm8565_vm4 = vweird.f32 %v11782_v28 }
0x1218   : > { %11783 = vrsqrt.f32 %v8275_v18  ;;  %vm8566_vm6 = vmor %vm8564_vm5, %vm8565_vm4  ;;  %vm8574_vm8 = vweird.f32 %v8275_v18 }
0x1219   : > { %v8560_v29 = vmul.f32 %v11782_v28, %v8559_v33 }
0x121b   : > { %v8561_v17 = vmul.f32 0.5, %v8560_v29  ;;  %v8213_v10 = vpop.xlane.xlu0 %8212  ;;  %v9206_v27 = vpop.xlane.xlu1 %9205 }
0x121c   : > { %v8210_v38 = vpop.xlane.xlu2 %8209  ;;  %v8245_v2 = vmul.f32 %v8213_v10, %v16905_v30 }
0x121d   : > { %v8562_v37 = vsub.f32 1.5, %v8561_v17  ;;  %v8244_v9 = vmul.f32 %v8210_v38, %v16905_v30 }
0x121e   : > { %v11784_v55 = vpop.eup %11783  ;;  %v18141_v40 = vadd.f32 1e-05, %v8245_v2 }
0x121f   : > { %v8563_v11 = vmul.f32 %v11782_v28, %v8562_v37  ;;  %v8569_v47 = vmul.f32 %v11784_v55, %v8275_v18  ;;  %v8276_v44 = vadd.f32 1e-05, %v8244_v9  ;;  %vm8575_vm7 = vweird.f32 %v11784_v55 }
0x1220   : > { %vm8576_vm9 = vmor %vm8574_vm8, %vm8575_vm7  ;;  %vm8594_vm14 = vweird.f32 %v18141_v40 }
0x1221   : > { %v8567_v41 = vsel %vm8566_vm6, %v11782_v28, %v8563_v11  ;;  %v8570_v14 = vmul.f32 %v11784_v55, %v8569_v47  ;;  %11785 = vrsqrt.f32 %v8276_v44  ;;  %v9300_v28 = vmul.f32 %v9206_v27, %v16905_v30 }
0x1222   : > { %v8626_v52 = vmul.f32 %v8567_v41, %v17868_v51  ;;  %v8886_v63 = vpop.f32.mrf.mxu1  ;;  %11787 = vrsqrt.f32 %v18141_v40  ;;  %vm8584_vm11 = vweird.f32 %v8276_v44 }
0x1223   : > { %v8887_v13 = vadd.f32 %v17949_v12, %v8886_v63  ;;  %v8571_v56 = vmul.f32 0.5, %v8570_v14  ;;  %v18161_v47 = vsub.f32 %v17901_v4, %v9300_v28 }
0x1224   : > { %v8662_v7 = vmul.f32 %v17685_v36, %v8626_v52  ;;  %v9209_v63 = vpop.xlane.xlu2 %9208 }
0x1225   : > { %v8940_v62 = vmax.f32 %v8887_v13, 0.0  ;;  %v8572_v31 = vsub.f32 1.5, %v8571_v56  ;;  %v9364_v27 = vmul.f32 %v18161_v47, %v18161_v47 }
0x1226   : > { %v18148_v3 = vadd.f32 %v17703_v61, %v8662_v7 }
0x1227   : > { %v9118_v19 = vpop.f32.mrf.mxu2  ;;  %11093 = vmatmul.msk.f32.gmra.mxu2 %vm2320_vm2, %v8940_v62  ;;  %v8573_v51 = vmul.f32 %v11784_v55, %v8572_v31  ;;  %v11786_v29 = vpop.eup %11785  ;;  %v9301_v31 = vmul.f32 %v9209_v63, %v16905_v30 }
0x1228   : > { %v9119_v33 = vadd.f32 %v17876_v60, %v9118_v19  ;;  %11068 = vmatmul.msk.f32.gmra.mxu1 %vm1415_vm0, %v18148_v3  ;;  %v11788_v17 = vpop.eup %11787  ;;  %v8579_v38 = vmul.f32 %v11786_v29, %v8276_v44  ;;  %vm8585_vm10 = vweird.f32 %v11786_v29 }
0x1229   : > { %v8577_v37 = vsel %vm8576_vm9, %v11784_v55, %v8573_v51  ;;  %v8589_v9 = vmul.f32 %v11788_v17, %v18141_v40  ;;  %vm8595_vm12 = vweird.f32 %v11788_v17  ;;  %vm8586_vm13 = vmor %vm8584_vm11, %vm8585_vm10  ;;  %v18185_v44 = vsub.f32 %v17956_v42, %v9301_v31  ;;  %v11988_v31 = vld [vmem:[%s18983_s13] ss:$0 sm:$0xff] }
0x122a   : > { %v18156_v10 = vadd.f32 %v9119_v33, %v17706_v54  ;;  %v8627_v11 = vmul.f32 %v8577_v37, %v17884_v59  ;;  %v8889_v18 = vpop.f32.mrf.mxu1  ;;  %v8580_v2 = vmul.f32 %v11786_v29, %v8579_v38  ;;  %vm8596_vm15 = vmor %vm8594_vm14, %vm8595_vm12 }
0x122b   : > { %v8890_v41 = vadd.f32 %v17949_v12, %v8889_v18  ;;  %v8590_v14 = vmul.f32 %v11788_v17, %v8589_v9  ;;  %v9396_v9 = vsel %vm1415_vm0, %v9364_v27, 0.0 }
0x122c   : > { %v9246_v52 = vsel %vm1415_vm0, %v18156_v10, 0.0  ;;  %v8663_v55 = vmul.f32 %v17685_v36, %v8627_v11  ;;  %v8581_v54 = vmul.f32 0.5, %v8580_v2  ;;  %v9212_v2 = vpop.xlane.xlu0 %9211 }
0x122d   : > { %9247 = vadd.xlane.f32.xlu0 %v9246_v52  ;;  %v8941_v13 = vmax.f32 %v8890_v41, 0.0  ;;  %v8591_v59 = vmul.f32 0.5, %v8590_v14 }
0x122e   : > { %v8582_v56 = vsub.f32 1.5, %v8581_v54  ;;  %v18169_v4 = vadd.f32 %v17703_v61, %v8663_v55  ;;  %v9365_v54 = vmul.f32 %v18185_v44, %v18185_v44 }
0x122f   : > { %v9121_v7 = vpop.f32.mrf.mxu2  ;;  %11094 = vmatmul.msk.f32.gmra.mxu2 %vm2320_vm2, %v8941_v13  ;;  %v8592_v62 = vsub.f32 1.5, %v8591_v59  ;;  %v11987_v59 = vld [vmem:[%s18982_s12] ss:$0 sm:$0xff] }
0x1230   : > { %v9122_v19 = vadd.f32 %v17876_v60, %v9121_v7  ;;  %v8583_v51 = vmul.f32 %v11786_v29, %v8582_v56  ;;  %11069 = vmatmul.msk.f32.gmra.mxu1 %vm1415_vm0, %v18169_v4  ;;  %v9215_v56 = vpop.xlane.xlu1 %9214 }
0x1231   : > { %v8593_v28 = vmul.f32 %v11788_v17, %v8592_v62 }
0x1232   : > { %v18178_v33 = vadd.f32 %v9122_v19, %v17760_v26  ;;  %v8587_v38 = vsel %vm8586_vm13, %v11786_v29, %v8583_v51  ;;  %v9302_v29 = vmul.f32 %v9212_v2, %v16905_v30  ;;  %v9218_v2 = vpop.xlane.xlu2 %9217 }
0x1233   : > { %v8892_v37 = vpop.f32.mrf.mxu1  ;;  %v8628_v18 = vmul.f32 %v8587_v38, %v17915_v43  ;;  %v8597_v26 = vsel %vm8596_vm15, %v11788_v17, %v8593_v28 }
0x1234   : > { %v8893_v11 = vadd.f32 %v17949_v12, %v8892_v37  ;;  %v9249_v41 = vsel %vm1415_vm0, %v18178_v33, 0.0  ;;  %v8629_v43 = vmul.f32 %v8597_v26, %v17932_v24  ;;  %v18206_v13 = vsub.f32 %v17968_v48, %v9302_v29 }
0x1235   : > { %9397 = vadd.xlane.f32.xlu0 %v9396_v9  ;;  %9250 = vadd.xlane.f32.xlu1 %v9249_v41  ;;  %v8664_v40 = vmul.f32 %v17685_v36, %v8628_v18  ;;  %v9303_v48 = vmul.f32 %v9215_v56, %v16905_v30  ;;  %v9304_v26 = vmul.f32 %v9218_v2, %v16905_v30 }
0x1236   : > { %v8942_v52 = vmax.f32 %v8893_v11, 0.0  ;;  %v9366_v51 = vmul.f32 %v18206_v13, %v18206_v13 }
0x1237   : > { %v18195_v55 = vadd.f32 %v17703_v61, %v8664_v40  ;;  %v9399_v61 = vsel %vm1415_vm0, %v9365_v54, 0.0  ;;  %v18231_v11 = vsub.f32 %v17953_v21, %v9303_v48 }
0x1238   : > { %v9124_v14 = vpop.f32.mrf.mxu2  ;;  %11095 = vmatmul.msk.f32.gmra.mxu2 %vm2320_vm2, %v8942_v52  ;;  %v9402_v18 = vsel %vm1415_vm0, %v9366_v51, 0.0 }
0x1239   : > { %v9125_v42 = vadd.f32 %v17876_v60, %v9124_v14  ;;  %11070 = vmatmul.msk.f32.gmra.mxu1 %vm1415_vm0, %v18195_v55  ;;  %v9367_v21 = vmul.f32 %v18231_v11, %v18231_v11 }
0x123b   : > { %v18200_v17 = vadd.f32 %v9125_v42, %v17799_v8  ;;  %v8895_v36 = vpop.f32.mrf.mxu1  ;;  %v8665_v8 = vmul.f32 %v11987_v59, %v8629_v43  ;;  %v18246_v43 = vsub.f32 %v18033_v16, %v9304_v26  ;;  %v9405_v54 = vsel %vm1415_vm0, %v9367_v21, 0.0 }
0x123c   : > { %v8896_v63 = vadd.f32 %v17949_v12, %v8895_v36  ;;  %v9221_v36 = vpop.xlane.xlu0 %9220 }
0x123d   : > { %v9252_v24 = vsel %vm1415_vm0, %v18200_v17, 0.0  ;;  %9400 = vadd.xlane.f32.xlu1 %v9399_v61  ;;  %v18220_v19 = vadd.f32 %v11988_v31, %v8665_v8  ;;  %v9368_v16 = vmul.f32 %v18246_v43, %v18246_v43 }
0x123e   : > { %v8943_v7 = vmax.f32 %v8896_v63, 0.0  ;;  %9253 = vadd.xlane.f32.xlu2 %v9252_v24 }
0x1240   : > { %v9127_v27 = vpop.f32.mrf.mxu2  ;;  %11096 = vmatmul.msk.f32.gmra.mxu2 %vm2320_vm2, %v8943_v7 }
0x1241   : > { %v9128_v62 = vadd.f32 %v17876_v60, %v9127_v27  ;;  %11071 = vmatmul.msk.f32.gmra.mxu1 %vm1415_vm0, %v18220_v19  ;;  %v9408_v27 = vsel %vm1415_vm0, %v9368_v16, 0.0 }
0x1243   : > { %v18225_v28 = vadd.f32 %v9128_v62, %v17822_v25  ;;  %v8898_v37 = vpop.f32.mrf.mxu1  ;;  %v9224_v62 = vpop.xlane.xlu1 %9223 }
0x1244   : > { %v8899_v38 = vadd.f32 %v17949_v12, %v8898_v37  ;;  %v9230_v26 = vpop.xlane.xlu0 %9229 }
0x1245   : > { %v9255_v9 = vsel %vm1415_vm0, %v18225_v28, 0.0 }
0x1246   : > { %v8944_v41 = vmax.f32 %v8899_v38, 0.0  ;;  %9256 = vadd.xlane.f32.xlu0 %v9255_v9  ;;  %9403 = vadd.xlane.f32.xlu2 %v9402_v18 }
0x1248   : > { %v9130_v25 = vpop.f32.mrf.mxu2  ;;  %11097 = vmatmul.msk.f32.gmra.mxu2 %vm2320_vm2, %v8944_v41 }
0x1249   : > { %v9131_v52 = vadd.f32 %v17876_v60, %v9130_v25 }
0x124b   : > { %v18242_v40 = vadd.f32 %v9131_v52, %v17831_v53  ;;  %v8901_v29 = vpop.f32.mrf.mxu1  ;;  %v9305_v53 = vmul.f32 %v9221_v36, %v16905_v30  ;;  %v9227_v52 = vpop.xlane.xlu2 %9226 }
0x124c   : > { %v8902_v14 = vadd.f32 %v17949_v12, %v8901_v29  ;;  %v9233_v21 = vpop.xlane.xlu1 %9232 }
0x124d   : > { %v9258_v42 = vsel %vm1415_vm0, %v18242_v40, 0.0  ;;  %v18261_v7 = vsub.f32 %v18036_v6, %v9305_v53 }
0x124e   : > { %v8945_v63 = vmax.f32 %v8902_v14, 0.0  ;;  %9259 = vadd.xlane.f32.xlu1 %v9258_v42  ;;  %9406 = vadd.xlane.f32.xlu0 %v9405_v54 }
0x124f   : > { %v9369_v6 = vmul.f32 %v18261_v7, %v18261_v7 }
0x1250   : > { %v9133_v24 = vpop.f32.mrf.mxu2  ;;  %11098 = vmatmul.msk.f32.gmra.mxu2 %vm2320_vm2, %v8945_v63 }
0x1251   : > { %v9134_v61 = vadd.f32 %v17876_v60, %v9133_v24  ;;  %v9411_v2 = vsel %vm1415_vm0, %v9369_v6, 0.0 }
0x1253   : > { %v18257_v59 = vadd.f32 %v9134_v61, %v17841_v46  ;;  %v8904_v8 = vpop.f32.mrf.mxu1  ;;  %v9306_v46 = vmul.f32 %v9224_v62, %v16905_v30  ;;  %v18287_v29 = vpop.xlane.xlu2 %9235 }
0x1254   : > { %v8905_v56 = vadd.f32 %v17949_v12, %v8904_v8  ;;  %v18289_v14 = vpop.xlane.xlu1 %9241  ;;  %v9307_v8 = vmul.f32 %v9227_v52, %v16905_v30 }
0x1255   : > { %v9261_v48 = vsel %vm1415_vm0, %v18257_v59, 0.0  ;;  %v18275_v9 = vsub.f32 %v18021_v50, %v9306_v46 }
0x1256   : > { %v8946_v31 = vmax.f32 %v8905_v56, 0.0  ;;  %9409 = vadd.xlane.f32.xlu1 %v9408_v27  ;;  %9262 = vadd.xlane.f32.xlu2 %v9261_v48  ;;  %v18304_v62 = vsub.f32 %v18074_v32, %v9307_v8 }
0x1257   : > { %v9370_v41 = vmul.f32 %v18275_v9, %v18275_v9 }
0x1258   : > { %v9136_v51 = vpop.f32.mrf.mxu2  ;;  %11099 = vmatmul.msk.f32.gmra.mxu2 %vm2320_vm2, %v8946_v31 }
0x1259   : > { %v9137_v37 = vadd.f32 %v17876_v60, %v9136_v51  ;;  %v9414_v25 = vsel %vm1415_vm0, %v9370_v41, 0.0 }
0x125b   : > { %v18272_v38 = vadd.f32 %v9137_v37, %v17849_v45  ;;  %v18283_v45 = vpop.xlane.xlu0 %9238  ;;  %v18292_v24 = vpop.xlane.xlu2 %9244 }
0x125d   : > { %v9264_v18 = vsel %vm1415_vm0, %v18272_v38, 0.0 }
0x125e   : > { %9265 = vadd.xlane.f32.xlu0 %v9264_v18  ;;  %9412 = vadd.xlane.f32.xlu2 %v9411_v2 }
0x1266   : > { %9415 = vadd.xlane.f32.xlu0 %v9414_v25 }
0x12a0   : > { %v18285_v50 = vpop.xlane.xlu0 %9247 }
0x12a5   : > { %v8907_v42 = vpop.f32.mrf.mxu1 }
0x12a6   : > { %v8908_v54 = vadd.f32 %v17949_v12, %v8907_v42  ;;  %v9308_v42 = vmul.f32 %v9230_v26, %v16905_v30 }
0x12a8   : > { %v8947_v36 = vmax.f32 %v8908_v54, 0.0  ;;  %v9398_v63 = vpop.xlane.xlu0 %9397  ;;  %v18294_v53 = vpop.xlane.xlu1 %9250 }
0x12a9   : > { %v9492_v61 = vmul.f32 %v9398_v63, %v16905_v30 }
0x12aa   : > { %v9139_v16 = vpop.f32.mrf.mxu2  ;;  %11100 = vmatmul.msk.f32.gmra.mxu2 %vm2320_vm2, %v8947_v36 }
0x12ab   : > { %v9524_v56 = vadd.f32 1e-05, %v9492_v61  ;;  %v9140_v27 = vadd.f32 %v17876_v60, %v9139_v16 }
0x12ad   : > { %11789 = vrsqrt.f32 %v9524_v56  ;;  %v18301_v48 = vadd.f32 %v9140_v27, %v17906_v57  ;;  %v8910_v31 = vpop.f32.mrf.mxu1  ;;  %v9371_v57 = vmul.f32 %v18304_v62, %v18304_v62  ;;  %v18325_v27 = vsub.f32 %v18069_v23, %v9308_v42 }
0x12ae   : > { %v8911_v46 = vadd.f32 %v17949_v12, %v8910_v31  ;;  %vm9562_vm3 = vweird.f32 %v9524_v56 }
0x12af   : > { %v9267_v51 = vsel %vm1415_vm0, %v18301_v48, 0.0  ;;  %v9417_v61 = vsel %vm1415_vm0, %v9371_v57, 0.0 }
0x12b0   : > { %9268 = vadd.xlane.f32.xlu1 %v9267_v51  ;;  %v9401_v6 = vpop.xlane.xlu1 %9400  ;;  %v8948_v18 = vmax.f32 %v8911_v46, 0.0 }
0x12b1   : > { %v18309_v37 = vpop.xlane.xlu2 %9253  ;;  %v9493_v2 = vmul.f32 %v9401_v6, %v16905_v30 }
0x12b2   : > { %v9142_v25 = vpop.f32.mrf.mxu2  ;;  %11101 = vmatmul.msk.f32.gmra.mxu2 %vm2320_vm2, %v8948_v18  ;;  %v9309_v18 = vmul.f32 %v9233_v21, %v16905_v30  ;;  %v9372_v21 = vmul.f32 %v18325_v27, %v18325_v27 }
0x12b3   : > { %v11790_v41 = vpop.eup %11789  ;;  %v18314_v52 = vadd.f32 1e-05, %v9493_v2  ;;  %v9143_v54 = vadd.f32 %v17876_v60, %v9142_v25 }
0x12b4   : > { %v9557_v32 = vmul.f32 %v11790_v41, %v9524_v56  ;;  %vm9563_vm1 = vweird.f32 %v11790_v41 }
0x12b5   : > { %11791 = vrsqrt.f32 %v18314_v52  ;;  %v18321_v63 = vadd.f32 %v9143_v54, %v17965_v22  ;;  %v18340_v54 = vld [vmem:[%s18988_s18] ss:$0 sm:$0xff]  ;;  %vm9564_vm4 = vmor %vm9562_vm3, %vm9563_vm1  ;;  %vm9572_vm6 = vweird.f32 %v18314_v52 }
0x12b6   : > { %v9558_v36 = vmul.f32 %v11790_v41, %v9557_v32  ;;  %v8913_v8 = vpop.f32.mrf.mxu1 }
0x12b7   : > { %v8914_v31 = vadd.f32 %v17949_v12, %v8913_v8  ;;  %v9270_v26 = vsel %vm1415_vm0, %v18321_v63, 0.0 }
0x12b8   : > { %v9559_v16 = vmul.f32 0.5, %v9558_v36  ;;  %9418 = vadd.xlane.f32.xlu1 %v9417_v61  ;;  %9271 = vadd.xlane.f32.xlu2 %v9270_v26 }
0x12b9   : > { %v9404_v51 = vpop.xlane.xlu2 %9403  ;;  %v18330_v46 = vpop.xlane.xlu0 %9256  ;;  %v8949_v2 = vmax.f32 %v8914_v31, 0.0 }
0x12ba   : > { %v9560_v6 = vsub.f32 1.5, %v9559_v16  ;;  %v9494_v22 = vmul.f32 %v9404_v51, %v16905_v30  ;;  %v18353_v16 = vld [vmem:[%s18989_s19] ss:$0 sm:$0xff]  ;;  %v18357_v51 = vsub.f32 %v18062_v1, %v9309_v18 }
0x12bb   : > { %v9145_v25 = vpop.f32.mrf.mxu2  ;;  %v11792_v57 = vpop.eup %11791  ;;  %11102 = vmatmul.msk.f32.gmra.mxu2 %vm2320_vm2, %v8949_v2 }
0x12bc   : > { %v9561_v23 = vmul.f32 %v11790_v41, %v9560_v6  ;;  %v18334_v32 = vadd.f32 1e-05, %v9494_v22  ;;  %v9146_v42 = vadd.f32 %v17876_v60, %v9145_v25  ;;  %v9567_v36 = vmul.f32 %v11792_v57, %v18314_v52 }
0x12bd   : > { %v9420_v25 = vsel %vm1415_vm0, %v9372_v21, 0.0  ;;  %vm9573_vm5 = vweird.f32 %v11792_v57  ;;  %v9310_v21 = vmul.f32 %v18287_v29, %v16905_v30 }
0x12be   : > { %v9565_v61 = vsel %vm9564_vm4, %v11790_v41, %v9561_v23  ;;  %11793 = vrsqrt.f32 %v18334_v32  ;;  %v18348_v56 = vadd.f32 %v9146_v42, %v18018_v58  ;;  %v9568_v31 = vmul.f32 %v11792_v57, %v9567_v36  ;;  %v8916_v26 = vpop.f32.mrf.mxu1  ;;  %vm9574_vm7 = vmor %vm9572_vm6, %vm9573_vm5 }
0x12bf   : > { %v9876_v8 = vmul.f32 %v9565_v61, %v18161_v47  ;;  %v8917_v58 = vadd.f32 %v17949_v12, %v8916_v26  ;;  %vm9582_vm8 = vweird.f32 %v18334_v32 }
0x12c0   : > { %v9273_v41 = vsel %vm1415_vm0, %v18348_v56, 0.0  ;;  %v9569_v22 = vmul.f32 0.5, %v9568_v31  ;;  %9421 = vadd.xlane.f32.xlu2 %v9420_v25  ;;  %v9373_v31 = vmul.f32 %v18357_v51, %v18357_v51 }
0x12c1   : > { %v9912_v6 = vmul.f32 %v18340_v54, %v9876_v8  ;;  %v18363_v2 = vpop.xlane.xlu1 %9259  ;;  %9274 = vadd.xlane.f32.xlu0 %v9273_v41  ;;  %v9407_v23 = vpop.xlane.xlu0 %9406  ;;  %v8950_v12 = vmax.f32 %v8917_v58, 0.0 }
0x12c2   : > { %v9495_v1 = vmul.f32 %v9407_v23, %v16905_v30  ;;  %v9570_v18 = vsub.f32 1.5, %v9569_v22  ;;  %v18391_v22 = vsub.f32 %v18094_v34, %v9310_v21  ;;  %v9423_v25 = vsel %vm1415_vm0, %v9373_v31, 0.0 }
0x12c3   : > { %v9948_v47 = vadd.f32 %v18353_v16, %v9912_v6  ;;  %v9148_v42 = vpop.f32.mrf.mxu2  ;;  %11103 = vmatmul.msk.f32.gmra.mxu2 %vm2320_vm2, %v8950_v12  ;;  %v9311_v34 = vmul.f32 %v18283_v45, %v16905_v30 }
0x12c4   : > { %v11794_v36 = vpop.eup %11793  ;;  %v18376_v61 = vadd.f32 1e-05, %v9495_v1  ;;  %v9149_v8 = vadd.f32 %v17876_v60, %v9148_v42  ;;  %v9571_v26 = vmul.f32 %v11792_v57, %v9570_v18 }
0x12c5   : > { %9980 = vst.msk [vmem:[%s18370_s27] sm:$0xff] %vm1415_vm0, %v9948_v47  ;;  %v9577_v41 = vmul.f32 %v11794_v36, %v18334_v32  ;;  %vm9583_vm2 = vweird.f32 %v11794_v36 }
0x12c6   : > { %11795 = vrsqrt.f32 %v18376_v61  ;;  %v18388_v29 = vadd.f32 %v9149_v8, %v18065_v5  ;;  %v9575_v6 = vsel %vm9574_vm7, %v11792_v57, %v9571_v26  ;;  %v18409_v8 = vld [vmem:[%s18987_s17] ss:$0 sm:$0xff]  ;;  %v9374_v26 = vmul.f32 %v18391_v22, %v18391_v22  ;;  %vm9584_vm9 = vmor %vm9582_vm8, %vm9583_vm2 }
0x12c7   : > { %v9578_v60 = vmul.f32 %v11794_v36, %v9577_v41  ;;  %v9877_v58 = vmul.f32 %v9575_v6, %v18185_v44  ;;  %vm9592_vm11 = vweird.f32 %v18376_v61 }
0x12c8   : > { %v9276_v52 = vsel %vm1415_vm0, %v18388_v29, 0.0 }
0x12c9   : > { %v9579_v23 = vmul.f32 0.5, %v9578_v60  ;;  %9277 = vadd.xlane.f32.xlu1 %v9276_v52  ;;  %v9410_v1 = vpop.xlane.xlu1 %9409  ;;  %9424 = vadd.xlane.f32.xlu0 %v9423_v25  ;;  %v18397_v47 = vpop.xlane.xlu2 %9262  ;;  %v9913_v5 = vmul.f32 %v18340_v54, %v9877_v58  ;;  %v18423_v52 = vsub.f32 %v18101_v49, %v9311_v34  ;;  %v9312_v49 = vmul.f32 %v18289_v14, %v16905_v30 }
0x12ca   : > { %v9496_v57 = vmul.f32 %v9410_v1, %v16905_v30 }
0x12cb   : > { %v9580_v44 = vsub.f32 1.5, %v9579_v23  ;;  %v9151_v18 = vpop.f32.mrf.mxu2  ;;  %v9949_v42 = vadd.f32 %v18353_v16, %v9913_v5  ;;  %v9426_v23 = vsel %vm1415_vm0, %v9374_v26, 0.0  ;;  %v9375_v26 = vmul.f32 %v18423_v52, %v18423_v52 }
0x12cc   : > { %v11796_v12 = vpop.eup %11795  ;;  %v18404_v21 = vadd.f32 1e-05, %v9496_v57  ;;  %v9152_v31 = vadd.f32 %v18409_v8, %v9151_v18 }
0x12cd   : > { %v9581_v41 = vmul.f32 %v11794_v36, %v9580_v44  ;;  %v9587_v45 = vmul.f32 %v11796_v12, %v18376_v61  ;;  %9981 = vst.msk [vmem:[%s18370_s27 + $0x8] sm:$0xff] %vm1415_vm0, %v9949_v42  ;;  %vm9593_vm10 = vweird.f32 %v11796_v12  ;;  %v9429_v61 = vsel %vm1415_vm0, %v9375_v26, 0.0 }
0x12ce   : > { %11797 = vrsqrt.f32 %v18404_v21  ;;  %v18420_v6 = vadd.f32 %v9152_v31, %v18088_v20  ;;  %vm9594_vm12 = vmor %vm9592_vm11, %vm9593_vm10  ;;  %vm9602_vm14 = vweird.f32 %v18404_v21 }
0x12cf   : > { %v9585_v60 = vsel %vm9584_vm9, %v11794_v36, %v9581_v41  ;;  %v9588_v58 = vmul.f32 %v11796_v12, %v9587_v45 }
0x12d0   : > { %v9878_v25 = vmul.f32 %v9585_v60, %v18206_v13  ;;  %v9279_v32 = vsel %vm1415_vm0, %v18420_v6, 0.0  ;;  %v18447_v60 = vsub.f32 %v18119_v39, %v9312_v49  ;;  %v9313_v49 = vmul.f32 %v18292_v24, %v16905_v30 }
0x12d1   : > { %v9589_v1 = vmul.f32 0.5, %v9588_v58  ;;  %9427 = vadd.xlane.f32.xlu1 %v9426_v23  ;;  %v9413_v5 = vpop.xlane.xlu2 %9412  ;;  %9280 = vadd.xlane.f32.xlu2 %v9279_v32  ;;  %v18429_v57 = vpop.xlane.xlu0 %9265 }
0x12d2   : > { %v9914_v20 = vmul.f32 %v18340_v54, %v9878_v25  ;;  %v9497_v36 = vmul.f32 %v9413_v5, %v16905_v30  ;;  %v18468_v24 = vsub.f32 %v18133_v15, %v9313_v49 }
0x12d3   : > { %v9590_v13 = vsub.f32 1.5, %v9589_v1  ;;  %v9154_v34 = vpop.f32.mrf.mxu2 }
0x12d4   : > { %v11798_v44 = vpop.eup %11797  ;;  %v9950_v18 = vadd.f32 %v18353_v16, %v9914_v20  ;;  %v9529_v42 = vadd.f32 1e-05, %v9497_v36  ;;  %v9155_v31 = vadd.f32 %v18409_v8, %v9154_v34  ;;  %v9377_v15 = vmul.f32 %v18468_v24, %v18468_v24 }
0x12d5   : > { %v9591_v41 = vmul.f32 %v11796_v12, %v9590_v13  ;;  %v9597_v45 = vmul.f32 %v11798_v44, %v18404_v21  ;;  %vm9603_vm13 = vweird.f32 %v11798_v44 }
0x12d6   : > { %9982 = vst.msk [vmem:[%s18370_s27 + $0x10] sm:$0xff] %vm1415_vm0, %v9950_v18  ;;  %11799 = vrsqrt.f32 %v9529_v42  ;;  %v18444_v14 = vadd.f32 %v9155_v31, %v18112_v35  ;;  %vm9604_vm15 = vmor %vm9602_vm14, %vm9603_vm13  ;;  %vm9612_vm3 = vweird.f32 %v9529_v42 }
0x12d7   : > { %v9595_v58 = vsel %vm9594_vm12, %v11796_v12, %v9591_v41  ;;  %v9598_v25 = vmul.f32 %v11798_v44, %v9597_v45 }
0x12d8   : > { %v9879_v23 = vmul.f32 %v9595_v58, %v18231_v11  ;;  %v9282_v32 = vsel %vm1415_vm0, %v18444_v14, 0.0  ;;  %v9376_v11 = vmul.f32 %v18447_v60, %v18447_v60 }
0x12d9   : > { %v9599_v1 = vmul.f32 0.5, %v9598_v25  ;;  %9283 = vadd.xlane.f32.xlu0 %v9282_v32  ;;  %9430 = vadd.xlane.f32.xlu2 %v9429_v61  ;;  %v9416_v5 = vpop.xlane.xlu0 %9415 }
0x12da   : > { %v9915_v35 = vmul.f32 %v18340_v54, %v9879_v23  ;;  %v9498_v20 = vmul.f32 %v9416_v5, %v16905_v30  ;;  %v9432_v21 = vsel %vm1415_vm0, %v9376_v11, 0.0 }
0x12db   : > { %v9600_v39 = vsub.f32 1.5, %v9599_v1  ;;  %v9157_v12 = vpop.f32.mrf.mxu2 }
0x12dc   : > { %v11800_v36 = vpop.eup %11799  ;;  %v9951_v13 = vadd.f32 %v18353_v16, %v9915_v35  ;;  %v9530_v34 = vadd.f32 1e-05, %v9498_v20  ;;  %v9158_v18 = vadd.f32 %v18409_v8, %v9157_v12  ;;  %v9435_v12 = vsel %vm1415_vm0, %v9377_v15, 0.0 }
0x12dd   : > { %v9601_v31 = vmul.f32 %v11798_v44, %v9600_v39  ;;  %v9607_v26 = vmul.f32 %v11800_v36, %v9529_v42  ;;  %vm9613_vm1 = vweird.f32 %v11800_v36 }
0x12de   : > { %9983 = vst.msk [vmem:[%s18370_s27 + $0x18] sm:$0xff] %vm1415_vm0, %v9951_v13  ;;  %11801 = vrsqrt.f32 %v9530_v34  ;;  %v18465_v41 = vadd.f32 %v9158_v18, %v18126_v0  ;;  %vm9614_vm4 = vmor %vm9612_vm3, %vm9613_vm1  ;;  %vm9622_vm6 = vweird.f32 %v9530_v34 }
0x12df   : > { %v9605_v45 = vsel %vm9604_vm15, %v11798_v44, %v9601_v31  ;;  %v9608_v58 = vmul.f32 %v11800_v36, %v9607_v26 }
0x12e0   : > { %v9880_v25 = vmul.f32 %v9605_v45, %v18246_v43  ;;  %v9285_v23 = vsel %vm1415_vm0, %v18465_v41, 0.0 }
0x12e1   : > { %v9609_v32 = vmul.f32 0.5, %v9608_v58  ;;  %9286 = vadd.xlane.f32.xlu1 %v9285_v23  ;;  %9433 = vadd.xlane.f32.xlu0 %v9432_v21 }
0x12e2   : > { %v9916_v61 = vmul.f32 %v18340_v54, %v9880_v25 }
0x12e3   : > { %v9610_v0 = vsub.f32 1.5, %v9609_v32 }
0x12e4   : > { %v11802_v44 = vpop.eup %11801  ;;  %v9952_v1 = vadd.f32 %v18353_v16, %v9916_v61 }
0x12e5   : > { %v9611_v5 = vmul.f32 %v11800_v36, %v9610_v0  ;;  %v9617_v43 = vmul.f32 %v11802_v44, %v9530_v34  ;;  %vm9623_vm5 = vweird.f32 %v11802_v44 }
0x12e6   : > { %9984 = vst.msk [vmem:[%s18370_s27 + $0x20] sm:$0xff] %vm1415_vm0, %v9952_v1  ;;  %vm9624_vm7 = vmor %vm9622_vm6, %vm9623_vm5 }
0x12e7   : > { %v9615_v35 = vsel %vm9614_vm4, %v11800_v36, %v9611_v5  ;;  %v9618_v20 = vmul.f32 %v11802_v44, %v9617_v43  ;;  %v9315_v5 = vmul.f32 %v18294_v53, %v16905_v30 }
0x12e8   : > { %v9881_v39 = vmul.f32 %v9615_v35, %v18261_v7 }
0x12e9   : > { %v9619_v11 = vmul.f32 0.5, %v9618_v20  ;;  %9436 = vadd.xlane.f32.xlu1 %v9435_v12 }
0x12ea   : > { %v9917_v49 = vmul.f32 %v18340_v54, %v9881_v39 }
0x12eb   : > { %v9620_v13 = vsub.f32 1.5, %v9619_v11  ;;  %v18510_v11 = vsub.f32 %v18178_v33, %v9315_v5 }
0x12ec   : > { %v9953_v42 = vadd.f32 %v18353_v16, %v9917_v49 }
0x12ed   : > { %v9621_v18 = vmul.f32 %v11802_v44, %v9620_v13 }
0x12ee   : > { %9985 = vst.msk [vmem:[%s18370_s27 + $0x28] sm:$0xff] %vm1415_vm0, %v9953_v42 }
0x12ef   : > { %v9625_v36 = vsel %vm9624_vm7, %v11802_v44, %v9621_v18 }
0x12f0   : > { %v9882_v31 = vmul.f32 %v9625_v36, %v18275_v9 }
0x12f2   : > { %v9918_v7 = vmul.f32 %v18340_v54, %v9882_v31 }
0x12f4   : > { %v9954_v26 = vadd.f32 %v18353_v16, %v9918_v7 }
0x12f6   : > { %9986 = vst.msk [vmem:[%s18370_s27 + $0x30] sm:$0xff] %vm1415_vm0, %v9954_v26  ;;  %v9316_v26 = vmul.f32 %v18309_v37, %v16905_v30 }
0x12f8   : > { %v18530_v5 = vsub.f32 %v18200_v17, %v9316_v26 }
0x1323   : > { %v9269_v45 = vpop.xlane.xlu1 %9268 }
0x132b   : > { %v9419_v58 = vpop.xlane.xlu1 %9418  ;;  %v18492_v23 = vpop.xlane.xlu2 %9271 }
0x132c   : > { %v9499_v25 = vmul.f32 %v9419_v58, %v16905_v30  ;;  %v9318_v58 = vmul.f32 %v18363_v2, %v16905_v30 }
0x132d   : > { %v9160_v21 = vpop.f32.mrf.mxu2 }
0x132e   : > { %v9531_v34 = vadd.f32 1e-05, %v9499_v25  ;;  %v9161_v32 = vadd.f32 %v18409_v8, %v9160_v21  ;;  %v18533_v37 = vsub.f32 %v18242_v40, %v9318_v58 }
0x1330   : > { %11803 = vrsqrt.f32 %v9531_v34  ;;  %v18496_v61 = vadd.f32 %v9161_v32, %v18148_v3  ;;  %vm9632_vm8 = vweird.f32 %v9531_v34 }
0x1332   : > { %v9288_v9 = vsel %vm1415_vm0, %v18496_v61, 0.0 }
0x1333   : > { %9289 = vadd.xlane.f32.xlu2 %v9288_v9  ;;  %v9422_v44 = vpop.xlane.xlu2 %9421 }
0x1334   : > { %v18500_v0 = vpop.xlane.xlu0 %9274  ;;  %v9500_v15 = vmul.f32 %v9422_v44, %v16905_v30 }
0x1335   : > { %v9163_v35 = vpop.f32.mrf.mxu2 }
0x1336   : > { %v11804_v1 = vpop.eup %11803  ;;  %v9532_v20 = vadd.f32 1e-05, %v9500_v15  ;;  %v9164_v39 = vadd.f32 %v18409_v8, %v9163_v35 }
0x1337   : > { %v9627_v43 = vmul.f32 %v11804_v1, %v9531_v34  ;;  %vm9633_vm2 = vweird.f32 %v11804_v1 }
0x1338   : > { %11805 = vrsqrt.f32 %v9532_v20  ;;  %v18507_v12 = vadd.f32 %v9164_v39, %v18169_v4  ;;  %v9379_v4 = vmul.f32 %v18510_v11, %v18510_v11  ;;  %vm9634_vm9 = vmor %vm9632_vm8, %vm9633_vm2  ;;  %vm9642_vm11 = vweird.f32 %v9532_v20 }
0x1339   : > { %v9628_v3 = vmul.f32 %v11804_v1, %v9627_v43 }
0x133a   : > { %v9291_v42 = vsel %vm1415_vm0, %v18507_v12, 0.0  ;;  %v9441_v15 = vsel %vm1415_vm0, %v9379_v4, 0.0  ;;  %v9382_v4 = vmul.f32 %v18533_v37, %v18533_v37 }
0x133b   : > { %v9629_v49 = vmul.f32 0.5, %v9628_v3  ;;  %9292 = vadd.xlane.f32.xlu0 %v9291_v42 }
0x133c   : > { %v18512_v13 = vpop.xlane.xlu1 %9277  ;;  %v9425_v53 = vpop.xlane.xlu0 %9424 }
0x133d   : > { %v9630_v18 = vsub.f32 1.5, %v9629_v49  ;;  %v9501_v36 = vmul.f32 %v9425_v53, %v16905_v30  ;;  %v9321_v49 = vmul.f32 %v9269_v45, %v16905_v30 }
0x133e   : > { %v11806_v33 = vpop.eup %11805  ;;  %v9166_v25 = vpop.f32.mrf.mxu2 }
0x133f   : > { %v9631_v31 = vmul.f32 %v11804_v1, %v9630_v18  ;;  %v18517_v7 = vadd.f32 1e-05, %v9501_v36  ;;  %v9637_v32 = vmul.f32 %v11806_v33, %v9532_v20  ;;  %v9167_v9 = vadd.f32 %v18409_v8, %v9166_v25 }
0x1340   : > { %vm9643_vm10 = vweird.f32 %v11806_v33  ;;  %v18562_v25 = vsub.f32 %v18301_v48, %v9321_v49  ;;  %v9450_v20 = vsel %vm1415_vm0, %v9382_v4, 0.0  ;;  %v9317_v49 = vmul.f32 %v18330_v46, %v16905_v30 }
0x1341   : > { %v9635_v21 = vsel %vm9634_vm9, %v11804_v1, %v9631_v31  ;;  %11807 = vrsqrt.f32 %v18517_v7  ;;  %v9638_v44 = vmul.f32 %v11806_v33, %v9637_v32  ;;  %v18537_v1 = vadd.f32 %v9167_v9, %v18195_v55  ;;  %vm9644_vm12 = vmor %vm9642_vm11, %vm9643_vm10 }
0x1342   : > { %v9883_v34 = vmul.f32 %v9635_v21, %v18304_v62  ;;  %v9314_v55 = vmul.f32 %v18285_v50, %v16905_v30  ;;  %v9380_v31 = vmul.f32 %v18530_v5, %v18530_v5  ;;  %v9319_v50 = vmul.f32 %v18397_v47, %v16905_v30 }
0x1343   : > { %v9639_v62 = vmul.f32 0.5, %v9638_v44  ;;  %9442 = vadd.xlane.f32.xlu0 %v9441_v15  ;;  %v9294_v17 = vsel %vm1415_vm0, %v18537_v1, 0.0  ;;  %vm9652_vm14 = vweird.f32 %v18517_v7 }
0x1344   : > { %v9919_v2 = vmul.f32 %v18340_v54, %v9883_v34  ;;  %v9428_v43 = vpop.xlane.xlu1 %9427  ;;  %v18539_v35 = vpop.xlane.xlu2 %9280  ;;  %9295 = vadd.xlane.f32.xlu1 %v9294_v17  ;;  %v9444_v47 = vsel %vm1415_vm0, %v9380_v31, 0.0 }
0x1345   : > { %v9502_v39 = vmul.f32 %v9428_v43, %v16905_v30  ;;  %v9640_v42 = vsub.f32 1.5, %v9639_v62 }
0x1346   : > { %v9955_v3 = vadd.f32 %v18353_v16, %v9919_v2  ;;  %v9169_v36 = vpop.f32.mrf.mxu2 }
0x1347   : > { %v11808_v40 = vpop.eup %11807  ;;  %v18546_v53 = vadd.f32 1e-05, %v9502_v39  ;;  %v9641_v45 = vmul.f32 %v11806_v33, %v9640_v42  ;;  %v9170_v26 = vadd.f32 %v18409_v8, %v9169_v36  ;;  %v18572_v8 = vsub.f32 %v18156_v10, %v9314_v55 }
0x1348   : > { %9987 = vst.msk [vmem:[%s18370_s27 + $0x38] sm:$0xff] %vm1415_vm0, %v9955_v3  ;;  %v9647_v18 = vmul.f32 %v11808_v40, %v18517_v7  ;;  %vm9653_vm13 = vweird.f32 %v11808_v40  ;;  %v9324_v10 = vmul.f32 %v18512_v13, %v16905_v30  ;;  %v9385_v39 = vmul.f32 %v18562_v25, %v18562_v25 }
0x1349   : > { %11809 = vrsqrt.f32 %v18546_v53  ;;  %v9645_v21 = vsel %vm9644_vm12, %v11806_v33, %v9641_v45  ;;  %v18565_v32 = vadd.f32 %v9170_v26, %v18220_v19  ;;  %v18579_v33 = vsub.f32 %v18257_v59, %v9319_v50  ;;  %vm9654_vm15 = vmor %vm9652_vm14, %vm9653_vm13 }
0x134a   : > { %v9648_v58 = vmul.f32 %v11808_v40, %v9647_v18  ;;  %v9884_v34 = vmul.f32 %v9645_v21, %v18325_v27  ;;  %v9378_v13 = vmul.f32 %v18572_v8, %v18572_v8  ;;  %v9322_v42 = vmul.f32 %v18492_v23, %v16905_v30 }
0x134b   : > { %9451 = vadd.xlane.f32.xlu0 %v9450_v20  ;;  %v9297_v48 = vsel %vm1415_vm0, %v18565_v32, 0.0  ;;  %v9383_v7 = vmul.f32 %v18579_v33, %v18579_v33  ;;  %v18603_v36 = vsub.f32 %v18388_v29, %v9324_v10  ;;  %v9459_v45 = vsel %vm1415_vm0, %v9385_v39, 0.0 }
0x134c   : > { %v9649_v9 = vmul.f32 0.5, %v9648_v58  ;;  %v9431_v44 = vpop.xlane.xlu2 %9430  ;;  %v18569_v15 = vpop.xlane.xlu0 %9283  ;;  %v9920_v27 = vmul.f32 %v18340_v54, %v9884_v34  ;;  %9298 = vadd.xlane.f32.xlu2 %v9297_v48  ;;  %9445 = vadd.xlane.f32.xlu1 %v9444_v47  ;;  %v18608_v50 = vsub.f32 %v18225_v28, %v9317_v49  ;;  %v18614_v29 = vsub.f32 %v18321_v63, %v9322_v42 }
0x134d   : > { %v9503_v19 = vmul.f32 %v9431_v44, %v16905_v30  ;;  %v9453_v21 = vsel %vm1415_vm0, %v9383_v7, 0.0  ;;  %v9388_v20 = vmul.f32 %v18603_v36, %v18603_v36  ;;  %vm9662_vm3 = vweird.f32 %v18546_v53 }
0x134e   : > { %v9650_v2 = vsub.f32 1.5, %v9649_v9  ;;  %v9956_v3 = vadd.f32 %v18353_v16, %v9920_v27  ;;  %v9320_v48 = vmul.f32 %v18429_v57, %v16905_v30  ;;  %v9386_v10 = vmul.f32 %v18614_v29, %v18614_v29 }
0x134f   : > { %v11810_v43 = vpop.eup %11809  ;;  %v18584_v62 = vadd.f32 1e-05, %v9503_v19  ;;  %v9381_v19 = vmul.f32 %v18608_v50, %v18608_v50 }
0x1350   : > { %v9651_v59 = vmul.f32 %v11808_v40, %v9650_v2  ;;  %v9657_v17 = vmul.f32 %v11810_v43, %v18546_v53  ;;  %9988 = vst.msk [vmem:[%s18370_s27 + $0x40] sm:$0xff] %vm1415_vm0, %v9956_v3  ;;  %vm9663_vm1 = vweird.f32 %v11810_v43  ;;  %v9325_v2 = vmul.f32 %v18539_v35, %v16905_v30 }
0x1351   : > { %11811 = vrsqrt.f32 %v18584_v62  ;;  %vm9664_vm4 = vmor %vm9662_vm3, %vm9663_vm1  ;;  %v18642_v49 = vsub.f32 %v18272_v38, %v9320_v48  ;;  %vm9672_vm6 = vweird.f32 %v18584_v62 }
0x1352   : > { %v9655_v55 = vsel %vm9654_vm15, %v11808_v40, %v9651_v59  ;;  %v9658_v18 = vmul.f32 %v11810_v43, %v9657_v17  ;;  %v9438_v40 = vsel %vm1415_vm0, %v9378_v13, 0.0  ;;  %v9468_v17 = vsel %vm1415_vm0, %v9388_v20, 0.0 }
0x1353   : > { %v9885_v46 = vmul.f32 %v9655_v55, %v18357_v51  ;;  %9460 = vadd.xlane.f32.xlu0 %v9459_v45  ;;  %v9447_v13 = vsel %vm1415_vm0, %v9381_v19, 0.0 }
0x1354   : > { %v9659_v31 = vmul.f32 0.5, %v9658_v18  ;;  %v9287_v4 = vpop.xlane.xlu1 %9286  ;;  %v9434_v26 = vpop.xlane.xlu0 %9433  ;;  %9439 = vadd.xlane.f32.xlu2 %v9438_v40  ;;  %9454 = vadd.xlane.f32.xlu1 %v9453_v21 }
0x1355   : > { %v9921_v23 = vmul.f32 %v18340_v54, %v9885_v46  ;;  %v9504_v58 = vmul.f32 %v9434_v26, %v16905_v30  ;;  %v9327_v47 = vmul.f32 %v9287_v4, %v16905_v30  ;;  %v9384_v4 = vmul.f32 %v18642_v49, %v18642_v49 }
0x1356   : > { %v9660_v51 = vsub.f32 1.5, %v9659_v31 }
0x1357   : > { %v11812_v34 = vpop.eup %11811  ;;  %v9957_v28 = vadd.f32 %v18353_v16, %v9921_v23  ;;  %v18618_v9 = vadd.f32 1e-05, %v9504_v58  ;;  %v18638_v57 = vsub.f32 %v18465_v41, %v9327_v47  ;;  %v9462_v41 = vsel %vm1415_vm0, %v9386_v10, 0.0 }
0x1358   : > { %v9661_v44 = vmul.f32 %v11810_v43, %v9660_v51  ;;  %v9667_v63 = vmul.f32 %v11812_v34, %v18584_v62  ;;  %vm9673_vm5 = vweird.f32 %v11812_v34  ;;  %v9456_v21 = vsel %vm1415_vm0, %v9384_v4, 0.0 }
0x1359   : > { %9989 = vst.msk [vmem:[%s18370_s27 + $0x48] sm:$0xff] %vm1415_vm0, %v9957_v28  ;;  %11813 = vrsqrt.f32 %v18618_v9  ;;  %v9391_v31 = vmul.f32 %v18638_v57, %v18638_v57  ;;  %vm9674_vm7 = vmor %vm9672_vm6, %vm9673_vm5  ;;  %vm9682_vm8 = vweird.f32 %v18618_v9 }
0x135a   : > { %v9665_v27 = vsel %vm9664_vm4, %v11810_v43, %v9661_v44  ;;  %v9668_v53 = vmul.f32 %v11812_v34, %v9667_v63 }
0x135b   : > { %v9886_v39 = vmul.f32 %v9665_v27, %v18391_v22  ;;  %9469 = vadd.xlane.f32.xlu0 %v9468_v17  ;;  %v18648_v22 = vsub.f32 %v18420_v6, %v9325_v2  ;;  %v9323_v6 = vmul.f32 %v18500_v0, %v16905_v30  ;;  %v9477_v58 = vsel %vm1415_vm0, %v9391_v31, 0.0 }
0x135c   : > { %v9669_v3 = vmul.f32 0.5, %v9668_v53  ;;  %v9437_v59 = vpop.xlane.xlu1 %9436  ;;  %9448 = vadd.xlane.f32.xlu2 %v9447_v13  ;;  %9463 = vadd.xlane.f32.xlu1 %v9462_v41 }
0x135d   : > { %v9922_v43 = vmul.f32 %v18340_v54, %v9886_v39  ;;  %v9505_v35 = vmul.f32 %v9437_v59, %v16905_v30  ;;  %v9389_v62 = vmul.f32 %v18648_v22, %v18648_v22  ;;  %v18667_v0 = vsub.f32 %v18348_v56, %v9323_v6 }
0x135e   : > { %v9670_v42 = vsub.f32 1.5, %v9669_v3  ;;  %v9326_v56 = vmul.f32 %v18569_v15, %v16905_v30 }
0x135f   : > { %v11814_v55 = vpop.eup %11813  ;;  %v9958_v38 = vadd.f32 %v18353_v16, %v9922_v43  ;;  %v9537_v18 = vadd.f32 1e-05, %v9505_v35  ;;  %v9387_v47 = vmul.f32 %v18667_v0, %v18667_v0 }
0x1360   : > { %v9671_v7 = vmul.f32 %v11812_v34, %v9670_v42  ;;  %v9677_v46 = vmul.f32 %v11814_v55, %v18618_v9  ;;  %vm9683_vm2 = vweird.f32 %v11814_v55  ;;  %v18682_v53 = vsub.f32 %v18444_v14, %v9326_v56 }
0x1361   : > { %9990 = vst.msk [vmem:[%s18370_s27 + $0x50] sm:$0xff] %vm1415_vm0, %v9958_v38  ;;  %11815 = vrsqrt.f32 %v9537_v18  ;;  %vm9684_vm9 = vmor %vm9682_vm8, %vm9683_vm2  ;;  %v9465_v10 = vsel %vm1415_vm0, %v9387_v47, 0.0  ;;  %vm9692_vm11 = vweird.f32 %v9537_v18 }
0x1362   : > { %v9675_v45 = vsel %vm9674_vm7, %v11812_v34, %v9671_v7  ;;  %v9678_v26 = vmul.f32 %v11814_v55, %v9677_v46  ;;  %v9471_v34 = vsel %vm1415_vm0, %v9389_v62, 0.0 }
0x1363   : > { %v9887_v23 = vmul.f32 %v9675_v45, %v18423_v52  ;;  %9478 = vadd.xlane.f32.xlu0 %v9477_v58 }
0x1364   : > { %v9679_v40 = vmul.f32 0.5, %v9678_v26  ;;  %9457 = vadd.xlane.f32.xlu2 %v9456_v21  ;;  %9472 = vadd.xlane.f32.xlu1 %v9471_v34 }
0x1365   : > { %v9923_v51 = vmul.f32 %v18340_v54, %v9887_v23 }
0x1366   : > { %v9680_v28 = vsub.f32 1.5, %v9679_v40 }
0x1367   : > { %v11816_v20 = vpop.eup %11815  ;;  %v9959_v52 = vadd.f32 %v18353_v16, %v9923_v51 }
0x1368   : > { %v9681_v44 = vmul.f32 %v11814_v55, %v9680_v28  ;;  %v9687_v63 = vmul.f32 %v11816_v20, %v9537_v18  ;;  %vm9693_vm10 = vweird.f32 %v11816_v20 }
0x1369   : > { %9991 = vst.msk [vmem:[%s18370_s27 + $0x58] sm:$0xff] %vm1415_vm0, %v9959_v52  ;;  %vm9694_vm12 = vmor %vm9692_vm11, %vm9693_vm10 }
0x136a   : > { %v9685_v48 = vsel %vm9684_vm9, %v11814_v55, %v9681_v44  ;;  %v9688_v19 = vmul.f32 %v11816_v20, %v9687_v63 }
0x136b   : > { %v9888_v27 = vmul.f32 %v9685_v48, %v18447_v60  ;;  %v9390_v60 = vmul.f32 %v18682_v53, %v18682_v53 }
0x136c   : > { %v9689_v2 = vmul.f32 0.5, %v9688_v19  ;;  %9466 = vadd.xlane.f32.xlu2 %v9465_v10 }
0x136d   : > { %v9924_v9 = vmul.f32 %v18340_v54, %v9888_v27  ;;  %v9474_v43 = vsel %vm1415_vm0, %v9390_v60, 0.0 }
0x136e   : > { %v9690_v39 = vsub.f32 1.5, %v9689_v2 }
0x136f   : > { %v9960_v15 = vadd.f32 %v18353_v16, %v9924_v9 }
0x1370   : > { %v9691_v3 = vmul.f32 %v11816_v20, %v9690_v39 }
0x1371   : > { %9992 = vst.msk [vmem:[%s18370_s27 + $0x60] sm:$0xff] %vm1415_vm0, %v9960_v15 }
0x1372   : > { %v9695_v14 = vsel %vm9694_vm12, %v11816_v20, %v9691_v3 }
0x1373   : > { %v9889_v59 = vmul.f32 %v9695_v14, %v18468_v24 }
0x1374   : > { %9475 = vadd.xlane.f32.xlu2 %v9474_v43 }
0x1375   : > { %v9925_v17 = vmul.f32 %v18340_v54, %v9889_v59 }
0x1377   : > { %v9961_v35 = vadd.f32 %v18353_v16, %v9925_v17 }
0x1379   : > { %9993 = vst.msk [vmem:[%s18370_s27 + $0x68] sm:$0xff] %vm1415_vm0, %v9961_v35 }
0x13a6   : > { %v9290_v13 = vpop.xlane.xlu2 %9289 }
0x13a7   : > { %v9328_v42 = vmul.f32 %v9290_v13, %v16905_v30 }
0x13a9   : > { %v18699_v41 = vsub.f32 %v18496_v61, %v9328_v42 }
0x13ab   : > { %v9392_v55 = vmul.f32 %v18699_v41, %v18699_v41 }
0x13ad   : > { %v9480_v24 = vsel %vm1415_vm0, %v9392_v55, 0.0 }
0x13ae   : > { %9481 = vadd.xlane.f32.xlu1 %v9480_v24  ;;  %v9293_v38 = vpop.xlane.xlu0 %9292 }
0x13af   : > { %v9329_v18 = vmul.f32 %v9293_v38, %v16905_v30 }
0x13b1   : > { %v18706_v7 = vsub.f32 %v18507_v12, %v9329_v18 }
0x13b3   : > { %v9393_v46 = vmul.f32 %v18706_v7, %v18706_v7 }
0x13b5   : > { %v9483_v31 = vsel %vm1415_vm0, %v9393_v46, 0.0 }
0x13b6   : > { %9484 = vadd.xlane.f32.xlu2 %v9483_v31  ;;  %v9443_v61 = vpop.xlane.xlu0 %9442 }
0x13b7   : > { %v9507_v6 = vmul.f32 %v9443_v61, %v16905_v30  ;;  %v9296_v4 = vpop.xlane.xlu1 %9295 }
0x13b8   : > { %v9330_v45 = vmul.f32 %v9296_v4, %v16905_v30 }
0x13b9   : > { %v9539_v26 = vadd.f32 1e-05, %v9507_v6 }
0x13ba   : > { %v18714_v62 = vsub.f32 %v18537_v1, %v9330_v45 }
0x13bb   : > { %11817 = vrsqrt.f32 %v9539_v26  ;;  %vm9712_vm14 = vweird.f32 %v9539_v26 }
0x13bc   : > { %v9394_v12 = vmul.f32 %v18714_v62, %v18714_v62 }
0x13be   : > { %v9452_v23 = vpop.xlane.xlu0 %9451  ;;  %v9486_v40 = vsel %vm1415_vm0, %v9394_v12, 0.0 }
0x13bf   : > { %v9299_v58 = vpop.xlane.xlu2 %9298  ;;  %v9510_v51 = vmul.f32 %v9452_v23, %v16905_v30  ;;  %v9446_v21 = vpop.xlane.xlu1 %9445  ;;  %9487 = vadd.xlane.f32.xlu0 %v9486_v40 }
0x13c0   : > { %v9331_v28 = vmul.f32 %v9299_v58, %v16905_v30  ;;  %v9508_v20 = vmul.f32 %v9446_v21, %v16905_v30 }
0x13c1   : > { %v11818_v34 = vpop.eup %11817  ;;  %v9542_v52 = vadd.f32 1e-05, %v9510_v51 }
0x13c2   : > { %v9707_v1 = vmul.f32 %v11818_v34, %v9539_v26  ;;  %v18723_v44 = vsub.f32 %v18565_v32, %v9331_v28  ;;  %v18725_v63 = vadd.f32 1e-05, %v9508_v20  ;;  %vm9713_vm13 = vweird.f32 %v11818_v34 }
0x13c3   : > { %11819 = vrsqrt.f32 %v9542_v52  ;;  %vm9714_vm15 = vmor %vm9712_vm14, %vm9713_vm13  ;;  %vm9742_vm3 = vweird.f32 %v9542_v52 }
0x13c4   : > { %v9708_v56 = vmul.f32 %v11818_v34, %v9707_v1  ;;  %v9395_v47 = vmul.f32 %v18723_v44, %v18723_v44  ;;  %11821 = vrsqrt.f32 %v18725_v63  ;;  %vm9722_vm5 = vweird.f32 %v18725_v63 }
0x13c6   : > { %v9709_v48 = vmul.f32 0.5, %v9708_v56  ;;  %v9489_v19 = vsel %vm1415_vm0, %v9395_v47, 0.0  ;;  %v9461_v27 = vpop.xlane.xlu0 %9460 }
0x13c7   : > { %9490 = vadd.xlane.f32.xlu1 %v9489_v19  ;;  %v9440_v2 = vpop.xlane.xlu2 %9439  ;;  %v9513_v9 = vmul.f32 %v9461_v27, %v16905_v30  ;;  %v9455_v32 = vpop.xlane.xlu1 %9454 }
0x13c8   : > { %v9710_v10 = vsub.f32 1.5, %v9709_v48  ;;  %v9506_v39 = vmul.f32 %v9440_v2, %v16905_v30  ;;  %v9511_v3 = vmul.f32 %v9455_v32, %v16905_v30 }
0x13c9   : > { %v11820_v15 = vpop.eup %11819  ;;  %v18734_v60 = vadd.f32 1e-05, %v9513_v9 }
0x13ca   : > { %v9711_v14 = vmul.f32 %v11818_v34, %v9710_v10  ;;  %v9737_v59 = vmul.f32 %v11820_v15, %v9542_v52  ;;  %v18736_v17 = vadd.f32 1e-05, %v9506_v39  ;;  %v11822_v43 = vpop.eup %11821  ;;  %v18738_v35 = vadd.f32 1e-05, %v9511_v3 }
0x13cb   : > { %11823 = vrsqrt.f32 %v18734_v60  ;;  %v9717_v42 = vmul.f32 %v11822_v43, %v18725_v63  ;;  %vm9743_vm1 = vweird.f32 %v11820_v15  ;;  %vm9723_vm4 = vweird.f32 %v11822_v43 }
0x13cc   : > { %v9715_v13 = vsel %vm9714_vm15, %v11818_v34, %v9711_v14  ;;  %v9738_v55 = vmul.f32 %v11820_v15, %v9737_v59  ;;  %11825 = vrsqrt.f32 %v18738_v35  ;;  %vm9744_vm6 = vmor %vm9742_vm3, %vm9743_vm1  ;;  %vm9772_vm7 = vweird.f32 %v18734_v60 }
0x13cd   : > { %v9891_v24 = vmul.f32 %v9715_v13, %v18510_v11  ;;  %v9718_v38 = vmul.f32 %v11822_v43, %v9717_v42  ;;  %11827 = vrsqrt.f32 %v18736_v17  ;;  %vm9724_vm2 = vmor %vm9722_vm5, %vm9723_vm4  ;;  %vm9752_vm8 = vweird.f32 %v18738_v35 }
0x13ce   : > { %v9739_v18 = vmul.f32 0.5, %v9738_v55  ;;  %v9470_v46 = vpop.xlane.xlu0 %9469  ;;  %vm9702_vm9 = vweird.f32 %v18736_v17 }
0x13cf   : > { %v9927_v31 = vmul.f32 %v18340_v54, %v9891_v24  ;;  %v9449_v61 = vpop.xlane.xlu2 %9448  ;;  %v9516_v6 = vmul.f32 %v9470_v46, %v16905_v30  ;;  %v9719_v4 = vmul.f32 0.5, %v9718_v38  ;;  %v9464_v26 = vpop.xlane.xlu1 %9463 }
0x13d0   : > { %v9740_v45 = vsub.f32 1.5, %v9739_v18  ;;  %v9509_v12 = vmul.f32 %v9449_v61, %v16905_v30  ;;  %v9514_v40 = vmul.f32 %v9464_v26, %v16905_v30 }
0x13d1   : > { %v18748_v11 = vpop.eup %11823  ;;  %v9963_v23 = vadd.f32 %v18353_v16, %v9927_v31  ;;  %v18752_v58 = vadd.f32 1e-05, %v9516_v6  ;;  %v9720_v51 = vsub.f32 1.5, %v9719_v4 }
0x13d2   : > { %v9741_v21 = vmul.f32 %v11820_v15, %v9740_v45  ;;  %v9767_v28 = vmul.f32 %v18748_v11, %v18734_v60  ;;  %v18756_v34 = vpop.eup %11825  ;;  %v18763_v20 = vadd.f32 1e-05, %v9514_v40  ;;  %v18770_v48 = vadd.f32 1e-05, %v9509_v12 }
0x13d3   : > { %9995 = vst.msk [vmem:[%s18370_s27 + $0x78] sm:$0xff] %vm1415_vm0, %v9963_v23  ;;  %11829 = vrsqrt.f32 %v18752_v58  ;;  %v18766_v52 = vpop.eup %11827  ;;  %v9721_v1 = vmul.f32 %v11822_v43, %v9720_v51  ;;  %v9747_v47 = vmul.f32 %v18756_v34, %v18738_v35  ;;  %vm9773_vm10 = vweird.f32 %v18748_v11 }
0x13d4   : > { %v9745_v56 = vsel %vm9744_vm6, %v11820_v15, %v9741_v21  ;;  %v9697_v19 = vmul.f32 %v18766_v52, %v18736_v17  ;;  %v9768_v27 = vmul.f32 %v18748_v11, %v9767_v28  ;;  %11831 = vrsqrt.f32 %v18763_v20  ;;  %vm18808_vm14 = vmor %vm9772_vm7, %vm9773_vm10  ;;  %v18846_v17 = vld [vmem:[%s18988_s18] ss:$0 sm:$0xff] }
0x13d5   : > { %v9894_v63 = vmul.f32 %v9745_v56, %v18533_v37  ;;  %v9725_v2 = vsel %vm9724_vm2, %v11822_v43, %v9721_v1  ;;  %v9748_v9 = vmul.f32 %v18756_v34, %v9747_v47  ;;  %11833 = vrsqrt.f32 %v18770_v48 }
0x13d6   : > { %v9892_v10 = vmul.f32 %v9725_v2, %v18530_v5  ;;  %v9698_v37 = vmul.f32 %v18766_v52, %v9697_v19  ;;  %v9769_v39 = vmul.f32 0.5, %v9768_v27  ;;  %vm9753_vm11 = vweird.f32 %v18756_v34  ;;  %v9479_v40 = vpop.xlane.xlu0 %9478 }
0x13d7   : > { %v9930_v32 = vmul.f32 %v18340_v54, %v9894_v63  ;;  %v9458_v15 = vpop.xlane.xlu2 %9457  ;;  %v9749_v3 = vmul.f32 0.5, %v9748_v9  ;;  %v9473_v14 = vpop.xlane.xlu1 %9472  ;;  %vm9802_vm12 = vweird.f32 %v18752_v58  ;;  %vm9703_vm13 = vweird.f32 %v18766_v52  ;;  %vm9754_vm1 = vmor %vm9752_vm8, %vm9753_vm11 }
0x13d8   : > { %v9512_v59 = vmul.f32 %v9458_v15, %v16905_v30  ;;  %v9928_v13 = vmul.f32 %v18340_v54, %v9892_v10  ;;  %v9699_v42 = vmul.f32 0.5, %v9698_v37  ;;  %v9770_v55 = vsub.f32 1.5, %v9769_v39  ;;  %vm9704_vm4 = vmor %vm9702_vm9, %vm9703_vm13 }
0x13d9   : > { %v18787_v43 = vpop.eup %11829  ;;  %v9966_v5 = vadd.f32 %v18353_v16, %v9930_v32  ;;  %v9750_v24 = vsub.f32 1.5, %v9749_v3  ;;  %v9517_v18 = vmul.f32 %v9473_v14, %v16905_v30  ;;  %vm9782_vm3 = vweird.f32 %v18763_v20 }
0x13da   : > { %v9797_v38 = vmul.f32 %v18787_v43, %v18752_v58  ;;  %v9964_v46 = vadd.f32 %v18353_v16, %v9928_v13  ;;  %v9700_v54 = vsub.f32 1.5, %v9699_v42  ;;  %v9771_v31 = vmul.f32 %v18748_v11, %v9770_v55  ;;  %v18801_v61 = vpop.eup %11831 }
0x13db   : > { %9998 = vst.msk [vmem:[%s18370_s27 + $0x90] sm:$0xff] %vm1415_vm0, %v9966_v5  ;;  %v9751_v6 = vmul.f32 %v18756_v34, %v9750_v24  ;;  %vm9803_vm15 = vweird.f32 %v18787_v43  ;;  %v18814_v45 = vadd.f32 1e-05, %v9517_v18  ;;  %v9777_v12 = vmul.f32 %v18801_v61, %v18763_v20  ;;  %v11834_v51 = vpop.eup %11833 }
0x13dc   : > { %v9798_v16 = vmul.f32 %v18787_v43, %v9797_v38  ;;  %9996 = vst.msk [vmem:[%s18370_s27 + $0x80] sm:$0xff] %vm1415_vm0, %v9964_v46  ;;  %v9701_v26 = vmul.f32 %v18766_v52, %v9700_v54  ;;  %v9775_v60 = vsel %vm18808_vm14, %v18748_v11, %v9771_v31  ;;  %v18829_v23 = vadd.f32 1e-05, %v9512_v59  ;;  %vm9804_vm7 = vmor %vm9802_vm12, %vm9803_vm15 }
0x13dd   : > { %v9755_v21 = vsel %vm9754_vm1, %v18756_v34, %v9751_v6  ;;  %v9897_v35 = vmul.f32 %v9775_v60, %v18562_v25  ;;  %11835 = vrsqrt.f32 %v18814_v45  ;;  %v9778_v56 = vmul.f32 %v18801_v61, %v9777_v12 }
0x13de   : > { %v9799_v28 = vmul.f32 0.5, %v9798_v16  ;;  %v9895_v11 = vmul.f32 %v9755_v21, %v18579_v33  ;;  %v9705_v1 = vsel %vm9704_vm4, %v18766_v52, %v9701_v26  ;;  %v9727_v47 = vmul.f32 %v11834_v51, %v18770_v48 }
0x13df   : > { %v9467_v63 = vpop.xlane.xlu2 %9466  ;;  %v9890_v34 = vmul.f32 %v9705_v1, %v18572_v8  ;;  %v9933_v25 = vmul.f32 %v18846_v17, %v9897_v35  ;;  %v9519_v27 = vmul.f32 %v9479_v40, %v16905_v30  ;;  %v9779_v52 = vmul.f32 0.5, %v9778_v56  ;;  %v18856_v8 = vld [vmem:[%s18989_s19] ss:$0 sm:$0xff] }
0x13e0   : > { %v9800_v19 = vsub.f32 1.5, %v9799_v28  ;;  %v9931_v33 = vmul.f32 %v18846_v17, %v9895_v11  ;;  %vm9783_vm5 = vweird.f32 %v18801_v61  ;;  %v9728_v2 = vmul.f32 %v11834_v51, %v9727_v47 }
0x13e1   : > { %v9926_v9 = vmul.f32 %v18846_v17, %v9890_v34  ;;  %v9969_v10 = vadd.f32 %v18856_v8, %v9933_v25  ;;  %11837 = vrsqrt.f32 %v18829_v23  ;;  %v9780_v39 = vsub.f32 1.5, %v9779_v52  ;;  %vm9784_vm2 = vmor %vm9782_vm3, %vm9783_vm5 }
0x13e2   : > { %v9801_v32 = vmul.f32 %v18787_v43, %v9800_v19  ;;  %v9967_v37 = vadd.f32 %v18856_v8, %v9931_v33  ;;  %v9729_v15 = vmul.f32 0.5, %v9728_v2  ;;  %vm9733_vm6 = vweird.f32 %v11834_v51 }
0x13e3   : > { %v11836_v3 = vpop.eup %11835  ;;  %v9962_v14 = vadd.f32 %v18856_v8, %v9926_v9  ;;  %10001 = vst.msk [vmem:[%s18370_s27 + $0xa8] sm:$0xff] %vm1415_vm0, %v9969_v10  ;;  %v18870_v13 = vadd.f32 1e-05, %v9519_v27  ;;  %v9515_v5 = vmul.f32 %v9467_v63, %v16905_v30  ;;  %v9781_v42 = vmul.f32 %v18801_v61, %v9780_v39 }
0x13e4   : > { %v9805_v59 = vsel %vm9804_vm7, %v18787_v43, %v9801_v32  ;;  %9999 = vst.msk [vmem:[%s18370_s27 + $0x98] sm:$0xff] %vm1415_vm0, %v9967_v37  ;;  %v9730_v55 = vsub.f32 1.5, %v9729_v15  ;;  %v9807_v58 = vmul.f32 %v11836_v3, %v18814_v45  ;;  %vm9732_vm8 = vweird.f32 %v18770_v48 }
0x13e5   : > { %v9900_v24 = vmul.f32 %v9805_v59, %v18603_v36  ;;  %9994 = vst.msk [vmem:[%s18370_s27 + $0x70] sm:$0xff] %vm1415_vm0, %v9962_v14  ;;  %11839 = vrsqrt.f32 %v18870_v13  ;;  %v18886_v43 = vadd.f32 1e-05, %v9515_v5  ;;  %v9785_v38 = vsel %vm9784_vm2, %v18801_v61, %v9781_v42  ;;  %vm9734_vm9 = vmor %vm9732_vm8, %vm9733_vm6 }
0x13e6   : > { %v9731_v18 = vmul.f32 %v11834_v51, %v9730_v55  ;;  %v9808_v46 = vmul.f32 %v11836_v3, %v9807_v58  ;;  %v9898_v6 = vmul.f32 %v9785_v38, %v18614_v29  ;;  %vm9813_vm10 = vweird.f32 %v11836_v3 }
0x13e7   : > { %v9936_v36 = vmul.f32 %v18846_v17, %v9900_v24  ;;  %v9476_v54 = vpop.xlane.xlu2 %9475  ;;  %v11838_v31 = vpop.eup %11837  ;;  %11841 = vrsqrt.f32 %v18886_v43  ;;  %vm9812_vm11 = vweird.f32 %v18814_v45  ;;  %vm9762_vm14 = vweird.f32 %v18829_v23 }
0x13e8   : > { %v9518_v20 = vmul.f32 %v9476_v54, %v16905_v30  ;;  %v9735_v48 = vsel %vm9734_vm9, %v11834_v51, %v9731_v18  ;;  %v9809_v16 = vmul.f32 0.5, %v9808_v46  ;;  %v9757_v61 = vmul.f32 %v11838_v31, %v18829_v23  ;;  %vm9814_vm12 = vmor %vm9812_vm11, %vm9813_vm10 }
0x13e9   : > { %v9972_v4 = vadd.f32 %v18856_v8, %v9936_v36  ;;  %v9934_v26 = vmul.f32 %v18846_v17, %v9898_v6  ;;  %v9893_v60 = vmul.f32 %v9735_v48, %v18608_v50  ;;  %vm9763_vm13 = vweird.f32 %v11838_v31 }
0x13ea   : > { %v18898_v12 = vadd.f32 1e-05, %v9518_v20  ;;  %v9810_v29 = vsub.f32 1.5, %v9809_v16  ;;  %v9758_v40 = vmul.f32 %v11838_v31, %v9757_v61  ;;  %vm9764_vm15 = vmor %vm9762_vm14, %vm9763_vm13  ;;  %vm9832_vm3 = vweird.f32 %v18870_v13 }
0x13eb   : > { %10004 = vst.msk [vmem:[%s18370_s27 + $0xc0] sm:$0xff] %vm1415_vm0, %v9972_v4  ;;  %v11840_v21 = vpop.eup %11839  ;;  %v9970_v51 = vadd.f32 %v18856_v8, %v9934_v26  ;;  %v9929_v35 = vmul.f32 %v18846_v17, %v9893_v60  ;;  %vm9792_vm6 = vweird.f32 %v18886_v43 }
0x13ec   : > { %11843 = vrsqrt.f32 %v18898_v12  ;;  %v9811_v28 = vmul.f32 %v11836_v3, %v9810_v29  ;;  %v9759_v11 = vmul.f32 0.5, %v9758_v40  ;;  %v9827_v50 = vmul.f32 %v11840_v21, %v18870_v13 }
0x13ed   : > { %v11842_v1 = vpop.eup %11841  ;;  %10002 = vst.msk [vmem:[%s18370_s27 + $0xb0] sm:$0xff] %vm1415_vm0, %v9970_v51  ;;  %v9965_v56 = vadd.f32 %v18856_v8, %v9929_v35  ;;  %vm9833_vm1 = vweird.f32 %v11840_v21  ;;  %vm9822_vm8 = vweird.f32 %v18898_v12 }
0x13ee   : > { %v9815_v47 = vsel %vm9814_vm12, %v11836_v3, %v9811_v28  ;;  %v9760_v63 = vsub.f32 1.5, %v9759_v11  ;;  %v9828_v34 = vmul.f32 %v11840_v21, %v9827_v50  ;;  %v9787_v25 = vmul.f32 %v11842_v1, %v18886_v43  ;;  %vm9834_vm5 = vmor %vm9832_vm3, %vm9833_vm1 }
0x13ef   : > { %9997 = vst.msk [vmem:[%s18370_s27 + $0x88] sm:$0xff] %vm1415_vm0, %v9965_v56  ;;  %v9901_v19 = vmul.f32 %v9815_v47, %v18648_v22  ;;  %vm9793_vm4 = vweird.f32 %v11842_v1 }
0x13f0   : > { %v9761_v45 = vmul.f32 %v11838_v31, %v9760_v63  ;;  %v9829_v27 = vmul.f32 0.5, %v9828_v34  ;;  %v9788_v33 = vmul.f32 %v11842_v1, %v9787_v25  ;;  %vm9794_vm7 = vmor %vm9792_vm6, %vm9793_vm4 }
0x13f1   : > { %v9937_v2 = vmul.f32 %v18846_v17, %v9901_v19 }
0x13f2   : > { %v11844_v52 = vpop.eup %11843  ;;  %v9765_v9 = vsel %vm9764_vm15, %v11838_v31, %v9761_v45  ;;  %v9830_v10 = vsub.f32 1.5, %v9829_v27  ;;  %v9789_v32 = vmul.f32 0.5, %v9788_v33 }
0x13f3   : > { %v9817_v37 = vmul.f32 %v11844_v52, %v18898_v12  ;;  %v9973_v39 = vadd.f32 %v18856_v8, %v9937_v2  ;;  %v9896_v22 = vmul.f32 %v9765_v9, %v18642_v49  ;;  %vm9823_vm2 = vweird.f32 %v11844_v52 }
0x13f4   : > { %v9831_v23 = vmul.f32 %v11840_v21, %v9830_v10  ;;  %v9790_v15 = vsub.f32 1.5, %v9789_v32  ;;  %vm9824_vm9 = vmor %vm9822_vm8, %vm9823_vm2 }
0x13f5   : > { %v9818_v3 = vmul.f32 %v11844_v52, %v9817_v37  ;;  %10005 = vst.msk [vmem:[%s18370_s27 + $0xc8] sm:$0xff] %vm1415_vm0, %v9973_v39  ;;  %v9932_v14 = vmul.f32 %v18846_v17, %v9896_v22 }
0x13f6   : > { %v9835_v59 = vsel %vm9834_vm5, %v11840_v21, %v9831_v23  ;;  %v9791_v5 = vmul.f32 %v11842_v1, %v9790_v15 }
0x13f7   : > { %v9819_v42 = vmul.f32 0.5, %v9818_v3  ;;  %v9968_v49 = vadd.f32 %v18856_v8, %v9932_v14  ;;  %v9903_v13 = vmul.f32 %v9835_v59, %v18638_v57 }
0x13f8   : > { %v9795_v55 = vsel %vm9794_vm7, %v11842_v1, %v9791_v5 }
0x13f9   : > { %v9820_v24 = vsub.f32 1.5, %v9819_v42  ;;  %10000 = vst.msk [vmem:[%s18370_s27 + $0xa0] sm:$0xff] %vm1415_vm0, %v9968_v49  ;;  %v9939_v58 = vmul.f32 %v18846_v17, %v9903_v13  ;;  %v9899_v38 = vmul.f32 %v9795_v55, %v18667_v0 }
0x13fb   : > { %v9821_v18 = vmul.f32 %v11844_v52, %v9820_v24  ;;  %v9975_v43 = vadd.f32 %v18856_v8, %v9939_v58  ;;  %v9935_v36 = vmul.f32 %v18846_v17, %v9899_v38 }
0x13fd   : > { %v9825_v57 = vsel %vm9824_vm9, %v11844_v52, %v9821_v18  ;;  %10007 = vst.msk [vmem:[%s18370_s27 + $0xd8] sm:$0xff] %vm1415_vm0, %v9975_v43  ;;  %v9971_v46 = vadd.f32 %v18856_v8, %v9935_v36 }
0x13fe   : > { %v9902_v54 = vmul.f32 %v9825_v57, %v18682_v53 }
0x13ff   : > { %10003 = vst.msk [vmem:[%s18370_s27 + $0xb8] sm:$0xff] %vm1415_vm0, %v9971_v46 }
0x1400   : > { %v9938_v31 = vmul.f32 %v18846_v17, %v9902_v54 }
0x1402   : > { %v9974_v0 = vadd.f32 %v18856_v8, %v9938_v31 }
0x1404   : > { %10006 = vst.msk [vmem:[%s18370_s27 + $0xd0] sm:$0xff] %vm1415_vm0, %v9974_v0 }
0x1421   : > { %v9482_v6 = vpop.xlane.xlu1 %9481 }
0x1422   : > { %v9520_v20 = vmul.f32 %v9482_v6, %v16905_v30 }
0x1424   : > { %v9552_v48 = vadd.f32 1e-05, %v9520_v20 }
0x1426   : > { %11845 = vrsqrt.f32 %v9552_v48  ;;  %vm9842_vm11 = vweird.f32 %v9552_v48 }
0x1429   : > { %v9485_v4 = vpop.xlane.xlu2 %9484 }
0x142a   : > { %v9521_v61 = vmul.f32 %v9485_v4, %v16905_v30 }
0x142c   : > { %v11846_v16 = vpop.eup %11845  ;;  %v9553_v60 = vadd.f32 1e-05, %v9521_v61 }
0x142d   : > { %v9837_v26 = vmul.f32 %v11846_v16, %v9552_v48  ;;  %vm9843_vm10 = vweird.f32 %v11846_v16 }
0x142e   : > { %11847 = vrsqrt.f32 %v9553_v60  ;;  %vm9844_vm12 = vmor %vm9842_vm11, %vm9843_vm10  ;;  %vm9852_vm14 = vweird.f32 %v9553_v60 }
0x142f   : > { %v9838_v53 = vmul.f32 %v11846_v16, %v9837_v26 }
0x1431   : > { %v9839_v12 = vmul.f32 0.5, %v9838_v53 }
0x1432   : > { %v9488_v21 = vpop.xlane.xlu0 %9487 }
0x1433   : > { %v9840_v29 = vsub.f32 1.5, %v9839_v12  ;;  %v9522_v35 = vmul.f32 %v9488_v21, %v16905_v30 }
0x1434   : > { %v11848_v51 = vpop.eup %11847 }
0x1435   : > { %v9841_v40 = vmul.f32 %v11846_v16, %v9840_v29  ;;  %v9847_v11 = vmul.f32 %v11848_v51, %v9553_v60  ;;  %v9554_v1 = vadd.f32 1e-05, %v9522_v35  ;;  %vm9853_vm13 = vweird.f32 %v11848_v51 }
0x1436   : > { %vm9854_vm15 = vmor %vm9852_vm14, %vm9853_vm13 }
0x1437   : > { %v9845_v28 = vsel %vm9844_vm12, %v11846_v16, %v9841_v40  ;;  %v9848_v56 = vmul.f32 %v11848_v51, %v9847_v11  ;;  %11849 = vrsqrt.f32 %v9554_v1  ;;  %vm9862_vm3 = vweird.f32 %v9554_v1 }
0x1438   : > { %v9904_v50 = vmul.f32 %v9845_v28, %v18699_v41 }
0x1439   : > { %v9849_v63 = vmul.f32 0.5, %v9848_v56 }
0x143a   : > { %v9940_v47 = vmul.f32 %v18846_v17, %v9904_v50  ;;  %v9491_v25 = vpop.xlane.xlu1 %9490 }
0x143b   : > { %v9850_v19 = vsub.f32 1.5, %v9849_v63  ;;  %v9523_v45 = vmul.f32 %v9491_v25, %v16905_v30 }
0x143c   : > { %v9976_v34 = vadd.f32 %v18856_v8, %v9940_v47 }
0x143d   : > { %v9851_v27 = vmul.f32 %v11848_v51, %v9850_v19  ;;  %v9555_v33 = vadd.f32 1e-05, %v9523_v45  ;;  %v11850_v41 = vpop.eup %11849 }
0x143e   : > { %10008 = vst.msk [vmem:[%s18370_s27 + $0xe0] sm:$0xff] %vm1415_vm0, %v9976_v34  ;;  %v9857_v2 = vmul.f32 %v11850_v41, %v9554_v1  ;;  %vm9863_vm1 = vweird.f32 %v11850_v41 }
0x143f   : > { %v9855_v52 = vsel %vm9854_vm15, %v11848_v51, %v9851_v27  ;;  %11851 = vrsqrt.f32 %v9555_v33  ;;  %vm9864_vm4 = vmor %vm9862_vm3, %vm9863_vm1  ;;  %vm9872_vm6 = vweird.f32 %v9555_v33 }
0x1440   : > { %v9905_v9 = vmul.f32 %v9855_v52, %v18706_v7  ;;  %v9858_v10 = vmul.f32 %v11850_v41, %v9857_v2 }
0x1442   : > { %v9941_v32 = vmul.f32 %v18846_v17, %v9905_v9  ;;  %v9859_v37 = vmul.f32 0.5, %v9858_v10 }
0x1444   : > { %v9977_v39 = vadd.f32 %v18856_v8, %v9941_v32  ;;  %v9860_v22 = vsub.f32 1.5, %v9859_v37 }
0x1445   : > { %v11852_v30 = vpop.eup %11851 }
0x1446   : > { %10009 = vst.msk [vmem:[%s18370_s27 + $0xe8] sm:$0xff] %vm1415_vm0, %v9977_v39  ;;  %v9867_v23 = vmul.f32 %v11852_v30, %v9555_v33  ;;  %v9861_v15 = vmul.f32 %v11850_v41, %v9860_v22  ;;  %vm9873_vm5 = vweird.f32 %v11852_v30 }
0x1447   : > { %vm9874_vm7 = vmor %vm9872_vm6, %vm9873_vm5 }
0x1448   : > { %v9868_v3 = vmul.f32 %v11852_v30, %v9867_v23  ;;  %v9865_v14 = vsel %vm9864_vm4, %v11850_v41, %v9861_v15 }
0x1449   : > { %v9906_v7 = vmul.f32 %v9865_v14, %v18714_v62 }
0x144a   : > { %v9869_v59 = vmul.f32 0.5, %v9868_v3 }
0x144b   : > { %v9942_v5 = vmul.f32 %v18846_v17, %v9906_v7 }
0x144c   : > { %v9870_v42 = vsub.f32 1.5, %v9869_v59 }
0x144d   : > { %v9978_v49 = vadd.f32 %v18856_v8, %v9942_v5 }
0x144e   : > { %v9871_v13 = vmul.f32 %v11852_v30, %v9870_v42 }
0x144f   : > { %10010 = vst.msk [vmem:[%s18370_s27 + $0xf0] sm:$0xff] %vm1415_vm0, %v9978_v49 }
0x1450   : > { %v9875_v55 = vsel %vm9874_vm7, %v11852_v30, %v9871_v13 }
0x1451   : > { %v9907_v24 = vmul.f32 %v9875_v55, %v18723_v44 }
0x1453   : > { %v9943_v58 = vmul.f32 %v18846_v17, %v9907_v24 }
0x1455   : > { %v9979_v38 = vadd.f32 %v18856_v8, %v9943_v58 }
0x1457   : > { %10011 = vst.msk [vmem:[%s18370_s27 + $0xf8] sm:$0xff] %vm1415_vm0, %v9979_v38 }
0x1458 PF: > { %s30_s1 = sadd.s32 1, %s11998_s1  }
0x1459   : > { %p27_p4 = scmp.ge.s32.totalorder %s30_s1, 6  }
0x145b   :  { %29 = sbr.rel (!%p27_p4) target bundleno = 6 (0x6), region = 154 }

</bundles_post_ra>
